<compile_context>
chip_gen: v7x
topology: tpu7x:2x2x1
jax: 0.10.0
libtpu: 0.0.40
codegen_flags: <defaults>
</compile_context>

<pallas_src>
import jax
import jax.numpy as jnp
from jax import lax
from jax.experimental import pallas as pl
from jax.experimental.pallas import tpu as pltpu

# ----- EEGNet hyperparameters (module defaults) -----------------------------
NB_CLASSES = 2
CHANS = 2
SAMPLES = 128
KERN_LENGTH = 64
F1 = 8
D = 2
F2 = 16
EPS = 1e-5

FD = F1 * D                                  # depthwise output channels (16)
T1 = SAMPLES - KERN_LENGTH + 1               # width after conv1        (65)
W2 = (T1 - 4) // 4 + 1                       # width after avgpool(1,4) (16)
KSEP = 16                                    # separable conv kernel width
PAD = 8                                      # separable conv padding
W3 = W2 + 2 * PAD - KSEP + 1                 # width after sep conv     (17)
W4 = (W3 - 8) // 8 + 1                       # width after avgpool(1,8) (2)
FLAT = F2 * W4                               # dense in_features        (32)

IN_DIM = CHANS * SAMPLES                     # 256  (GEMM-A K)
H1_DIM = FD * T1                             # 1040 (GEMM-A N / GEMM-B K)
H2_DIM = F2 * W3                             # 272  (GEMM-B N / GEMM-C K)
CLS_PAD = 128                                # lane-dense padded class dim
B_TILE = 128                                 # samples per grid step (128-512 ok)


# ------------------------------- kernel --------------------------------------
def eegnet_kernel(x_ref, a_ref, ab_ref, b_ref, bb_ref, c_ref, cb_ref, out_ref):
    f32 = jnp.float32

    def elu2(v):
        # ELU(alpha=2); exp(v)-1 (not expm1) kept for known-good Mosaic lowering
        return jnp.where(v > 0.0, v, 2.0 * (jnp.exp(v) - 1.0))

    x = x_ref[...]                                                # (B_TILE, 256)
    h1 = jnp.dot(x, a_ref[...], preferred_element_type=f32) + ab_ref[...]
    h1 = elu2(h1)                                                 # (B_TILE, 1040)
    h2 = jnp.dot(h1, b_ref[...], preferred_element_type=f32) + bb_ref[...]
    h2 = elu2(h2)                                                 # (B_TILE, 272)
    logits = jnp.dot(h2, c_ref[...], preferred_element_type=f32) + cb_ref[...]
    out_ref[...] = logits.astype(out_ref.dtype)                   # (B_TILE, 128)


def eegnet_forward(x, kparams):
    a_m, a_b, b_m, b_b, c_m, c_b = kparams
    n = x.shape[0]
    n_pad = ((n + B_TILE - 1) // B_TILE) * B_TILE
    xf = x.reshape(n, IN_DIM).astype(jnp.float32)
    if n_pad != n:
        xf = jnp.pad(xf, ((0, n_pad - n), (0, 0)))

    def full2(arr):                            # whole (2-D) array per grid step
        return pl.BlockSpec(arr.shape, lambda i: (0, 0))

    grid_spec = pltpu.PrefetchScalarGridSpec(
        num_scalar_prefetch=0,
        grid=(n_pad // B_TILE,),
        in_specs=[pl.BlockSpec((B_TILE, IN_DIM), lambda i: (i, 0)),
                  full2(a_m), full2(a_b),
                  full2(b_m), full2(b_b),
                  full2(c_m), full2(c_b)],
        out_specs=pl.BlockSpec((B_TILE, CLS_PAD), lambda i: (i, 0)),
    )
    out = pl.pallas_call(
        eegnet_kernel,
        out_shape=jax.ShapeDtypeStruct((n_pad, CLS_PAD), jnp.float32),
        grid_spec=grid_spec,
        compiler_params=pltpu.CompilerParams(
            dimension_semantics=("parallel",)),
    )(xf, a_m, a_b, b_m, b_b, c_m, c_b)
    return out[:n, :NB_CLASSES]


# ---------------------------- parameter setup --------------------------------
def init_params(key):
    ks = jax.random.split(key, 8)
    w1_full = jax.random.normal(ks[0], (F1, 1, 1, KERN_LENGTH), jnp.float32) * 0.1
    wd_full = jax.random.normal(ks[1], (FD, 1, CHANS, 1), jnp.float32) * 0.3
    ws_full = jax.random.normal(ks[2], (F2, FD, 1, KSEP), jnp.float32) * 0.1
    dense_w = jax.random.normal(ks[3], (NB_CLASSES, FLAT), jnp.float32) * 0.1
    dense_b = jax.random.normal(ks[4], (NB_CLASSES,), jnp.float32) * 0.1

    def bn(k, c):
        k1, k2, k3, k4 = jax.random.split(k, 4)
        gamma = 1.0 + 0.1 * jax.random.normal(k1, (c,), jnp.float32)
        beta = 0.1 * jax.random.normal(k2, (c,), jnp.float32)
        mean = 0.1 * jax.random.normal(k3, (c,), jnp.float32)
        var = 0.5 + jax.random.uniform(k4, (c,), jnp.float32)
        scale = gamma / jnp.sqrt(var + EPS)
        shift = beta - mean * scale
        return scale, shift

    s1, b1 = bn(ks[5], F1)
    s2, b2 = bn(ks[6], FD)
    s3, b3 = bn(ks[7], F2)
    return (w1_full, wd_full, ws_full, dense_w, dense_b, s1, b1, s2, b2, s3, b3)


def _build_affine(fn, in_dim):
    """Extract (matrix, bias) such that fn(x) == x @ matrix + bias."""
    bias = fn(jnp.zeros((in_dim,), jnp.float32))
    mat = jax.vmap(fn)(jnp.eye(in_dim, dtype=jnp.float32)) - bias[None, :]
    return mat, bias


def pack_kernel_params(raw):
    """Fold the three affine segments of EEGNet into dense matrices (offline)."""
    (w1_full, wd_full, ws_full, dense_w, dense_b, s1, b1, s2, b2, s3, b3) = raw
    dn = ('NCHW', 'OIHW', 'NCHW')
    hp = jax.lax.Precision.HIGHEST

    def seg1(xf):                                    # (256,) -> (1040,)
        x = xf.reshape(1, 1, CHANS, SAMPLES)
        z = lax.conv_general_dilated(x, w1_full, (1, 1), 'VALID',
                                     dimension_numbers=dn, precision=hp)
        z = z * s1.reshape(1, -1, 1, 1) + b1.reshape(1, -1, 1, 1)
        y = lax.conv_general_dilated(z, wd_full, (1, 1), 'VALID',
                                     dimension_numbers=dn,
                                     feature_group_count=F1, precision=hp)
        y = y * s2.reshape(1, -1, 1, 1) + b2.reshape(1, -1, 1, 1)
        return y.reshape(H1_DIM)

    def seg2(hf):                                    # (1040,) -> (272,)
        y = hf.reshape(1, FD, 1, T1)
        y = y[..., :W2 * 4].reshape(1, FD, 1, W2, 4).mean(-1)
        q = lax.conv_general_dilated(y, ws_full, (1, 1), ((0, 0), (PAD, PAD)),
                                     dimension_numbers=dn, precision=hp)
        q = q * s3.reshape(1, -1, 1, 1) + b3.reshape(1, -1, 1, 1)
        return q.reshape(H2_DIM)

    def seg3(hf):                                    # (272,) -> (NB_CLASSES,)
        q = hf.reshape(1, F2, 1, W3)
        q = q[..., :W4 * 8].reshape(1, F2, 1, W4, 8).mean(-1)
        flat = q.reshape(1, FLAT)
        return (flat @ dense_w.T + dense_b).reshape(NB_CLASSES)

    a_m, a_b = _build_affine(seg1, IN_DIM)           # (256, 1040), (1040,)
    b_m, b_b = _build_affine(seg2, H1_DIM)           # (1040, 272), (272,)
    c_m, c_b = _build_affine(seg3, H2_DIM)           # (272, 2),    (2,)
    # zero-pad the class dim so the output store is lane-dense (128 lanes)
    c_m = jnp.pad(c_m, ((0, 0), (0, CLS_PAD - NB_CLASSES)))
    c_b = jnp.pad(c_b, ((0, CLS_PAD - NB_CLASSES),))
    return (a_m, a_b.reshape(1, H1_DIM),
            b_m, b_b.reshape(1, H2_DIM),
            c_m, c_b.reshape(1, CLS_PAD))


# --------------------------- pure-JAX reference -------------------------------
def eegnet_reference(x, raw):
    (w1_full, wd_full, ws_full, dense_w, dense_b, s1, b1, s2, b2, s3, b3) = raw
    dn = ('NCHW', 'OIHW', 'NCHW')
    hp = jax.lax.Precision.HIGHEST
    n = x.shape[0]
    z = lax.conv_general_dilated(x, w1_full, (1, 1), 'VALID',
                                 dimension_numbers=dn, precision=hp)
    z = z * s1.reshape(1, -1, 1, 1) + b1.reshape(1, -1, 1, 1)
    y = lax.conv_general_dilated(z, wd_full, (1, 1), 'VALID',
                                 dimension_numbers=dn,
                                 feature_group_count=F1, precision=hp)
    y = y * s2.reshape(1, -1, 1, 1) + b2.reshape(1, -1, 1, 1)
    y = jnp.where(y > 0, y, 2.0 * (jnp.exp(y) - 1.0))
    y = y[..., :W2 * 4].reshape(n, FD, 1, W2, 4).mean(-1)
    q = lax.conv_general_dilated(y, ws_full, (1, 1), ((0, 0), (PAD, PAD)),
                                 dimension_numbers=dn, precision=hp)
    q = q * s3.reshape(1, -1, 1, 1) + b3.reshape(1, -1, 1, 1)
    q = jnp.where(q > 0, q, 2.0 * (jnp.exp(q) - 1.0))
    q = q[..., :W4 * 8].reshape(n, F2, 1, W4, 8).mean(-1)
    flat = q.reshape(n, -1)
    return flat @ dense_w.T + dense_b


if __name__ == "__main__":
    key = jax.random.PRNGKey(0)
    kx, kp = jax.random.split(key)
    N = 2
    x = jax.random.normal(kx, (N, 1, CHANS, SAMPLES), jnp.float32)

    raw = init_params(kp)
    kparams = pack_kernel_params(raw)

    out = eegnet_forward(x, kparams)
    out = jax.block_until_ready(out)

    ref = eegnet_reference(x, raw)
    assert out.shape == (N, NB_CLASSES)
    assert bool(jnp.all(jnp.isfinite(out)))
    if not jnp.allclose(out, ref, rtol=2e-2, atol=2e-2):
        raise AssertionError(f"kernel/reference mismatch:\n{out}\nvs\n{ref}")
    print("KERNEL_OK")
</pallas_src>

<mosaic_0001>
module attributes {stable_mosaic.version = 11 : i64} {
  func.func @eegnet_kernel(%arg0: i32, %arg1: memref<128x256xf32, #tpu.memory_space<vmem>>, %arg2: memref<256x1040xf32, #tpu.memory_space<vmem>>, %arg3: memref<1x1040xf32, #tpu.memory_space<vmem>>, %arg4: memref<1040x272xf32, #tpu.memory_space<vmem>>, %arg5: memref<1x272xf32, #tpu.memory_space<vmem>>, %arg6: memref<272x128xf32, #tpu.memory_space<vmem>>, %arg7: memref<1x128xf32, #tpu.memory_space<vmem>>, %arg8: memref<128x128xf32, #tpu.memory_space<vmem>>) attributes {dimension_semantics = [#tpu.dimension_semantics<parallel>], iteration_bounds = array<i64: 1>, scalar_prefetch = 0 : i64, scratch_operands = 0 : i64, tpu.core_type = #tpu.core_type<tc>, window_params = [{transform_indices = @transform_0, window_bounds = array<i64: 128, 256>}, {pipeline_mode = #tpu.pipeline_mode<synchronous>, transform_indices = @transform_1, window_bounds = array<i64: 256, 1040>}, {pipeline_mode = #tpu.pipeline_mode<synchronous>, transform_indices = @transform_2, window_bounds = array<i64: 1, 1040>}, {pipeline_mode = #tpu.pipeline_mode<synchronous>, transform_indices = @transform_3, window_bounds = array<i64: 1040, 272>}, {pipeline_mode = #tpu.pipeline_mode<synchronous>, transform_indices = @transform_4, window_bounds = array<i64: 1, 272>}, {pipeline_mode = #tpu.pipeline_mode<synchronous>, transform_indices = @transform_5, window_bounds = array<i64: 272, 128>}, {pipeline_mode = #tpu.pipeline_mode<synchronous>, transform_indices = @transform_6, window_bounds = array<i64: 1, 128>}, {transform_indices = @transform_7, window_bounds = array<i64: 128, 128>}]} {
    %c0 = arith.constant 0 : index
    %c0_0 = arith.constant 0 : index
    %0 = vector.load %arg1[%c0, %c0_0] : memref<128x256xf32, #tpu.memory_space<vmem>>, vector<128x256xf32>
    %c0_1 = arith.constant 0 : index
    %c0_2 = arith.constant 0 : index
    %1 = vector.load %arg2[%c0_1, %c0_2] : memref<256x1040xf32, #tpu.memory_space<vmem>>, vector<256x1040xf32>
    %cst = arith.constant dense<0.000000e+00> : vector<128x1040xf32>
    %2 = tpu.matmul %0, %1, %cst {dimension_numbers = #tpu.dot_dimension_numbers<[1], [0], [0], [1], [0, 0, 1, 1], [], []>} : vector<128x256xf32>, vector<256x1040xf32>, vector<128x1040xf32> -> vector<128x1040xf32>
    %c0_3 = arith.constant 0 : index
    %c0_4 = arith.constant 0 : index
    %3 = vector.load %arg3[%c0_3, %c0_4] : memref<1x1040xf32, #tpu.memory_space<vmem>>, vector<1x1040xf32>
    %4 = vector.broadcast %3 : vector<1x1040xf32> to vector<128x1040xf32>
    %5 = arith.addf %2, %4 : vector<128x1040xf32>
    %cst_5 = arith.constant 0.000000e+00 : f32
    %6 = vector.broadcast %cst_5 : f32 to vector<128x1040xf32>
    %7 = arith.cmpf ogt, %5, %6 : vector<128x1040xf32>
    %8 = math.exp %5 : vector<128x1040xf32>
    %cst_6 = arith.constant 1.000000e+00 : f32
    %9 = vector.broadcast %cst_6 : f32 to vector<128x1040xf32>
    %10 = arith.subf %8, %9 : vector<128x1040xf32>
    %cst_7 = arith.constant 2.000000e+00 : f32
    %11 = vector.broadcast %cst_7 : f32 to vector<128x1040xf32>
    %12 = arith.mulf %11, %10 : vector<128x1040xf32>
    %13 = arith.select %7, %5, %12 : vector<128x1040xi1>, vector<128x1040xf32>
    %c0_8 = arith.constant 0 : index
    %c0_9 = arith.constant 0 : index
    %14 = vector.load %arg4[%c0_8, %c0_9] : memref<1040x272xf32, #tpu.memory_space<vmem>>, vector<1040x272xf32>
    %cst_10 = arith.constant dense<0.000000e+00> : vector<128x272xf32>
    %15 = tpu.matmul %13, %14, %cst_10 {dimension_numbers = #tpu.dot_dimension_numbers<[1], [0], [0], [1], [0, 0, 1, 1], [], []>} : vector<128x1040xf32>, vector<1040x272xf32>, vector<128x272xf32> -> vector<128x272xf32>
    %c0_11 = arith.constant 0 : index
    %c0_12 = arith.constant 0 : index
    %16 = vector.load %arg5[%c0_11, %c0_12] : memref<1x272xf32, #tpu.memory_space<vmem>>, vector<1x272xf32>
    %17 = vector.broadcast %16 : vector<1x272xf32> to vector<128x272xf32>
    %18 = arith.addf %15, %17 : vector<128x272xf32>
    %cst_13 = arith.constant 0.000000e+00 : f32
    %19 = vector.broadcast %cst_13 : f32 to vector<128x272xf32>
    %20 = arith.cmpf ogt, %18, %19 : vector<128x272xf32>
    %21 = math.exp %18 : vector<128x272xf32>
    %cst_14 = arith.constant 1.000000e+00 : f32
    %22 = vector.broadcast %cst_14 : f32 to vector<128x272xf32>
    %23 = arith.subf %21, %22 : vector<128x272xf32>
    %cst_15 = arith.constant 2.000000e+00 : f32
    %24 = vector.broadcast %cst_15 : f32 to vector<128x272xf32>
    %25 = arith.mulf %24, %23 : vector<128x272xf32>
    %26 = arith.select %20, %18, %25 : vector<128x272xi1>, vector<128x272xf32>
    %c0_16 = arith.constant 0 : index
    %c0_17 = arith.constant 0 : index
    %27 = vector.load %arg6[%c0_16, %c0_17] : memref<272x128xf32, #tpu.memory_space<vmem>>, vector<272x128xf32>
    %cst_18 = arith.constant dense<0.000000e+00> : vector<128x128xf32>
    %28 = tpu.matmul %26, %27, %cst_18 {dimension_numbers = #tpu.dot_dimension_numbers<[1], [0], [0], [1], [0, 0, 1, 1], [], []>} : vector<128x272xf32>, vector<272x128xf32>, vector<128x128xf32> -> vector<128x128xf32>
    %c0_19 = arith.constant 0 : index
    %c0_20 = arith.constant 0 : index
    %29 = vector.load %arg7[%c0_19, %c0_20] : memref<1x128xf32, #tpu.memory_space<vmem>>, vector<1x128xf32>
    %30 = vector.broadcast %29 : vector<1x128xf32> to vector<128x128xf32>
    %31 = arith.addf %28, %30 : vector<128x128xf32>
    %c0_21 = arith.constant 0 : index
    %c0_22 = arith.constant 0 : index
    %32 = vector.load %arg8[%c0_21, %c0_22] : memref<128x128xf32, #tpu.memory_space<vmem>>, vector<128x128xf32>
    tpu.vector_store %arg8[%c0_21, %c0_22], %31 {strides = array<i32>} : memref<128x128xf32, #tpu.memory_space<vmem>>, vector<128x128xf32>,
    return
  }
  func.func @transform_0(%arg0: i32) -> (i32, i32) {
    %c0_i32 = arith.constant 0 : i32
    %c0_i32_0 = arith.constant 0 : i32
    return %arg0, %c0_i32 : i32, i32
  }
  func.func @transform_1(%arg0: i32) -> (i32, i32) {
    %c0_i32 = arith.constant 0 : i32
    %c0_i32_0 = arith.constant 0 : i32
    %c0_i32_1 = arith.constant 0 : i32
    return %c0_i32, %c0_i32_0 : i32, i32
  }
  func.func @transform_2(%arg0: i32) -> (i32, i32) {
    %c0_i32 = arith.constant 0 : i32
    %c0_i32_0 = arith.constant 0 : i32
    %c0_i32_1 = arith.constant 0 : i32
    return %c0_i32, %c0_i32_0 : i32, i32
  }
  func.func @transform_3(%arg0: i32) -> (i32, i32) {
    %c0_i32 = arith.constant 0 : i32
    %c0_i32_0 = arith.constant 0 : i32
    %c0_i32_1 = arith.constant 0 : i32
    return %c0_i32, %c0_i32_0 : i32, i32
  }
  func.func @transform_4(%arg0: i32) -> (i32, i32) {
    %c0_i32 = arith.constant 0 : i32
    %c0_i32_0 = arith.constant 0 : i32
    %c0_i32_1 = arith.constant 0 : i32
    return %c0_i32, %c0_i32_0 : i32, i32
  }
  func.func @transform_5(%arg0: i32) -> (i32, i32) {
    %c0_i32 = arith.constant 0 : i32
    %c0_i32_0 = arith.constant 0 : i32
    %c0_i32_1 = arith.constant 0 : i32
    return %c0_i32, %c0_i32_0 : i32, i32
  }
  func.func @transform_6(%arg0: i32) -> (i32, i32) {
    %c0_i32 = arith.constant 0 : i32
    %c0_i32_0 = arith.constant 0 : i32
    %c0_i32_1 = arith.constant 0 : i32
    return %c0_i32, %c0_i32_0 : i32, i32
  }
  func.func @transform_7(%arg0: i32) -> (i32, i32) {
    %c0_i32 = arith.constant 0 : i32
    %c0_i32_0 = arith.constant 0 : i32
    return %arg0, %c0_i32 : i32, i32
  }
}

</mosaic_0001>

<bundles_post_ra>
// kernel: tpu_custom_call.1
= control target key start
LH: loop header
LB: loop body
LE: loop exit
PB: predicated region body
PF: predicated region fallthrough
CT: control target
= control target key end

     0   :  { %s12514_s0 = inlined_call_operand.vmem [shape: f32[128,256], index: 0, kind: input, shape index: {}]   ;;  %s12515_s1 = inlined_call_operand.vmem [shape: f32[256,1040], index: 1, kind: input, shape index: {}]   ;;  %s12516_s2 = inlined_call_operand.vmem [shape: f32[1,1040], index: 2, kind: input, shape index: {}]   ;;  %s12517_s3 = inlined_call_operand.vmem [shape: f32[1040,272], index: 3, kind: input, shape index: {}]   ;;  %s12518_s4 = inlined_call_operand.vmem [shape: f32[1,272], index: 4, kind: input, shape index: {}]   ;;  %s12519_s5 = inlined_call_operand.vmem [shape: f32[272,128], index: 5, kind: input, shape index: {}]   ;;  %s12520_s6 = inlined_call_operand.vmem [shape: f32[1,128], index: 6, kind: input, shape index: {}]   ;;  %s12521_s7 = inlined_call_operand.hbm [shape: f32[128,128], index: 7, kind: output, shape index: {}]  }
   0x1   :  { %v60_v0 = vld [vmem:[%s12515_s1 + $0x8] sm:$0xff]  ;;  %v69_v1 = vld [vmem:[%s12515_s1 + $0x50] sm:$0xff]  ;;  %v59_v2 = vld [vmem:[%s12515_s1] sm:$0xff] }
   0x2   :  { %v5548_v3 = vpack.c.bf16 %v69_v1, %v60_v0  ;;  %v68_v4 = vld [vmem:[%s12515_s1 + $0x48] sm:$0xff]  ;;  %v78_v5 = vld [vmem:[%s12515_s1 + $0x98] sm:$0xff]  ;;  %v87_v6 = vld [vmem:[%s12515_s1 + $0xe0] sm:$0xff] }
   0x3   :  { %v5550_v7 = vpack.c.bf16 %v68_v4, %v59_v2  ;;  %v5552_v8 = vpack.c.bf16 %v87_v6, %v78_v5  ;;  %v77_v9 = vld [vmem:[%s12515_s1 + $0x90] sm:$0xff]  ;;  %v86_v10 = vld [vmem:[%s12515_s1 + $0xd8] sm:$0xff]  ;;  %v96_v11 = vld [vmem:[%s12515_s1 + $0x128] sm:$0xff] }
   0x4   :  { %5549 = vmatprep.subr.bf16.mxu0 %v5548_v3  ;;  %v105_v12 = vld [vmem:[%s12515_s1 + $0x170] sm:$0xff]  ;;  %v5554_v13 = vpack.c.bf16 %v86_v10, %v77_v9  ;;  %v95_v15 = vld [vmem:[%s12515_s1 + $0x120] sm:$0xff]  ;;  %v104_v16 = vld [vmem:[%s12515_s1 + $0x168] sm:$0xff] }
   0x5   :  { %5551 = vmatpush1.bf16.msra.mxu0 %v5550_v7  ;;  %v5556_v14 = vpack.c.bf16 %v105_v12, %v96_v11  ;;  %v114_v17 = vld [vmem:[%s12515_s1 + $0x1b8] sm:$0xff]  ;;  %v123_v18 = vld [vmem:[%s12515_s1 + $0x200] sm:$0xff]  ;;  %v5558_v19 = vpack.c.bf16 %v104_v16, %v95_v15  ;;  %v113_v21 = vld [vmem:[%s12515_s1 + $0x1b0] sm:$0xff] }
   0x6   :  { %5553 = vmatprep.subr.bf16.mxu0 %v5552_v8  ;;  %v5560_v20 = vpack.c.bf16 %v123_v18, %v114_v17  ;;  %v122_v22 = vld [vmem:[%s12515_s1 + $0x1f8] sm:$0xff]  ;;  %v132_v23 = vld [vmem:[%s12515_s1 + $0x248] sm:$0xff]  ;;  %v141_v24 = vld [vmem:[%s12515_s1 + $0x290] sm:$0xff] }
   0x7   :  { %v5562_v25 = vpack.c.bf16 %v122_v22, %v113_v21  ;;  %v5564_v26 = vpack.c.bf16 %v141_v24, %v132_v23  ;;  %v131_v27 = vld [vmem:[%s12515_s1 + $0x240] sm:$0xff]  ;;  %v140_v28 = vld [vmem:[%s12515_s1 + $0x288] sm:$0xff]  ;;  %v150_v29 = vld [vmem:[%s12515_s1 + $0x2d8] sm:$0xff] }
   0x8   :  { %v159_v30 = vld [vmem:[%s12515_s1 + $0x320] sm:$0xff]  ;;  %v5566_v31 = vpack.c.bf16 %v140_v28, %v131_v27  ;;  %v62_v32 = vld [vmem:[%s12515_s1 + $0x18] sm:$0xff]  ;;  %v61_v34 = vld [vmem:[%s12515_s1 + $0x10] sm:$0xff] }
   0x9   :  { %5555 = vmatpush1.bf16.msra.mxu0 %v5554_v13  ;;  %v71_v33 = vld [vmem:[%s12515_s1 + $0x60] sm:$0xff]  ;;  %v5568_v35 = vpack.c.bf16 %v159_v30, %v150_v29  ;;  %v149_v36 = vld [vmem:[%s12515_s1 + $0x2d0] sm:$0xff]  ;;  %v158_v37 = vld [vmem:[%s12515_s1 + $0x318] sm:$0xff] }
   0xa   :  { %5557 = vmatprep.subr.bf16.mxu0 %v5556_v14  ;;  %v5612_v38 = vpack.c.bf16 %v71_v33, %v62_v32  ;;  %v70_v39 = vld [vmem:[%s12515_s1 + $0x58] sm:$0xff]  ;;  %v168_v40 = vld [vmem:[%s12515_s1 + $0x368] sm:$0xff]  ;;  %v177_v41 = vld [vmem:[%s12515_s1 + $0x3b0] sm:$0xff]  ;;  %v5570_v47 = vpack.c.bf16 %v158_v37, %v149_v36 }
   0xb   :  { %v5614_v42 = vpack.c.bf16 %v70_v39, %v61_v34  ;;  %v80_v43 = vld [vmem:[%s12515_s1 + $0xa8] sm:$0xff]  ;;  %v89_v44 = vld [vmem:[%s12515_s1 + $0xf0] sm:$0xff]  ;;  %v79_v45 = vld [vmem:[%s12515_s1 + $0xa0] sm:$0xff]  ;;  %v5572_v52 = vpack.c.bf16 %v177_v41, %v168_v40 }
   0xc   :  { %5613 = vmatprep.subr.bf16.mxu1 %v5612_v38  ;;  %v88_v46 = vld [vmem:[%s12515_s1 + $0xe8] sm:$0xff]  ;;  %v167_v48 = vld [vmem:[%s12515_s1 + $0x360] sm:$0xff]  ;;  %v5616_v50 = vpack.c.bf16 %v89_v44, %v80_v43  ;;  %v186_v53 = vld [vmem:[%s12515_s1 + $0x3f8] sm:$0xff] }
   0xd   :  { %5559 = vmatpush1.bf16.msra.mxu0 %v5558_v19  ;;  %v176_v49 = vld [vmem:[%s12515_s1 + $0x3a8] sm:$0xff]  ;;  %5615 = vmatpush1.bf16.msra.mxu1 %v5614_v42  ;;  %v5618_v51 = vpack.c.bf16 %v88_v46, %v79_v45  ;;  %v98_v54 = vld [vmem:[%s12515_s1 + $0x138] sm:$0xff]  ;;  %v107_v55 = vld [vmem:[%s12515_s1 + $0x180] sm:$0xff] }
   0xe   :  { %5561 = vmatprep.subr.bf16.mxu0 %v5560_v20  ;;  %v195_v56 = vld [vmem:[%s12515_s1 + $0x440] sm:$0xff]  ;;  %5617 = vmatprep.subr.bf16.mxu1 %v5616_v50  ;;  %v5620_v57 = vpack.c.bf16 %v107_v55, %v98_v54  ;;  %v97_v58 = vld [vmem:[%s12515_s1 + $0x130] sm:$0xff]  ;;  %v106_v59 = vld [vmem:[%s12515_s1 + $0x178] sm:$0xff]  ;;  %v5574_v60 = vpack.c.bf16 %v176_v49, %v167_v48 }
   0xf   :  { %v185_v61 = vld [vmem:[%s12515_s1 + $0x3f0] sm:$0xff]  ;;  %v5622_v62 = vpack.c.bf16 %v106_v59, %v97_v58  ;;  %v116_v63 = vld [vmem:[%s12515_s1 + $0x1c8] sm:$0xff]  ;;  %v5576_v1 = vpack.c.bf16 %v195_v56, %v186_v53  ;;  %v194_v2 = vld [vmem:[%s12515_s1 + $0x438] sm:$0xff] }
  0x10   :  { %v125_v0 = vld [vmem:[%s12515_s1 + $0x210] sm:$0xff]  ;;  %v115_v4 = vld [vmem:[%s12515_s1 + $0x1c0] sm:$0xff]  ;;  %v124_v5 = vld [vmem:[%s12515_s1 + $0x208] sm:$0xff]  ;;  %v5578_v11 = vpack.c.bf16 %v194_v2, %v185_v61 }
  0x11   :  { %5563 = vmatpush1.bf16.msra.mxu0 %v5562_v25  ;;  %5619 = vmatpush1.bf16.msra.mxu1 %v5618_v51  ;;  %v5624_v3 = vpack.c.bf16 %v125_v0, %v116_v63  ;;  %v204_v6 = vld [vmem:[%s12515_s1 + $0x488] sm:$0xff]  ;;  %v213_v7 = vld [vmem:[%s12515_s1 + $0x4d0] sm:$0xff]  ;;  %v134_v8 = vld [vmem:[%s12515_s1 + $0x258] sm:$0xff]  ;;  %v5626_v14 = vpack.c.bf16 %v124_v5, %v115_v4 }
  0x12   :  { %5565 = vmatprep.subr.bf16.mxu0 %v5564_v26  ;;  %5621 = vmatprep.subr.bf16.mxu1 %v5620_v57  ;;  %v143_v9 = vld [vmem:[%s12515_s1 + $0x2a0] sm:$0xff]  ;;  %v7062_v10 = vld [vmem:[%s12514_s0 + $0x8] sm:$0xff]  ;;  %v5580_v15 = vpack.c.bf16 %v213_v7, %v204_v6  ;;  %v222_v16 = vld [vmem:[%s12515_s1 + $0x518] sm:$0xff] }
  0x13   :  { %v203_v12 = vld [vmem:[%s12515_s1 + $0x480] sm:$0xff]  ;;  %v212_v13 = vld [vmem:[%s12515_s1 + $0x4c8] sm:$0xff]  ;;  %v5628_v17 = vpack.c.bf16 %v143_v9, %v134_v8  ;;  %v133_v18 = vld [vmem:[%s12515_s1 + $0x250] sm:$0xff]  ;;  %460 = vmatprep.mubr.f32.mxu0 %v7062_v10  ;;  %621 = vmatprep.mubr.f32.mxu1 %v7062_v10 }
  0x14   :  { %v142_v19 = vld [vmem:[%s12515_s1 + $0x298] sm:$0xff]  ;;  %v231_v20 = vld [vmem:[%s12515_s1 + $0x560] sm:$0xff]  ;;  %v152_v21 = vld [vmem:[%s12515_s1 + $0x2e8] sm:$0xff]  ;;  %v5582_v23 = vpack.c.bf16 %v212_v13, %v203_v12 }
  0x15   :  { %5567 = vmatpush1.bf16.msra.mxu0 %v5566_v31  ;;  %5623 = vmatpush1.bf16.msra.mxu1 %v5622_v62  ;;  %v161_v22 = vld [vmem:[%s12515_s1 + $0x330] sm:$0xff]  ;;  %v230_v25 = vld [vmem:[%s12515_s1 + $0x558] sm:$0xff]  ;;  %v5630_v26 = vpack.c.bf16 %v142_v19, %v133_v18  ;;  %v5584_v27 = vpack.c.bf16 %v231_v20, %v222_v16  ;;  %v240_v28 = vld [vmem:[%s12515_s1 + $0x5a8] sm:$0xff] }
  0x16   :  { %5569 = vmatprep.subr.bf16.mxu0 %v5568_v35  ;;  %5625 = vmatprep.subr.bf16.mxu1 %v5624_v3  ;;  %v221_v24 = vld [vmem:[%s12515_s1 + $0x510] sm:$0xff]  ;;  %v5632_v29 = vpack.c.bf16 %v161_v22, %v152_v21  ;;  %v151_v30 = vld [vmem:[%s12515_s1 + $0x2e0] sm:$0xff]  ;;  %v160_v31 = vld [vmem:[%s12515_s1 + $0x328] sm:$0xff] }
  0x17   :  { %v249_v32 = vld [vmem:[%s12515_s1 + $0x5f0] sm:$0xff]  ;;  %v170_v33 = vld [vmem:[%s12515_s1 + $0x378] sm:$0xff]  ;;  %v179_v34 = vld [vmem:[%s12515_s1 + $0x3c0] sm:$0xff]  ;;  %v5586_v35 = vpack.c.bf16 %v230_v25, %v221_v24  ;;  %v5634_v38 = vpack.c.bf16 %v160_v31, %v151_v30 }
  0x18   :  { %v239_v36 = vld [vmem:[%s12515_s1 + $0x5a0] sm:$0xff]  ;;  %v248_v37 = vld [vmem:[%s12515_s1 + $0x5e8] sm:$0xff]  ;;  %v5588_v39 = vpack.c.bf16 %v249_v32, %v240_v28  ;;  %v258_v40 = vld [vmem:[%s12515_s1 + $0x638] sm:$0xff]  ;;  %v5636_v41 = vpack.c.bf16 %v179_v34, %v170_v33 }
  0x19   :  { %5571 = vmatpush1.bf16.msra.mxu0 %v5570_v47  ;;  %5627 = vmatpush1.bf16.msra.mxu1 %v5626_v14  ;;  %v169_v42 = vld [vmem:[%s12515_s1 + $0x370] sm:$0xff]  ;;  %v178_v43 = vld [vmem:[%s12515_s1 + $0x3b8] sm:$0xff]  ;;  %v267_v44 = vld [vmem:[%s12515_s1 + $0x680] sm:$0xff]  ;;  %v5590_v47 = vpack.c.bf16 %v248_v37, %v239_v36 }
  0x1a   :  { %5573 = vmatprep.subr.bf16.mxu0 %v5572_v52  ;;  %5629 = vmatprep.subr.bf16.mxu1 %v5628_v17  ;;  %v188_v45 = vld [vmem:[%s12515_s1 + $0x408] sm:$0xff]  ;;  %v197_v46 = vld [vmem:[%s12515_s1 + $0x450] sm:$0xff]  ;;  %v266_v49 = vld [vmem:[%s12515_s1 + $0x678] sm:$0xff]  ;;  %v5638_v50 = vpack.c.bf16 %v178_v43, %v169_v42  ;;  %v5592_v51 = vpack.c.bf16 %v267_v44, %v258_v40 }
  0x1b   :  { %v257_v48 = vld [vmem:[%s12515_s1 + $0x630] sm:$0xff]  ;;  %v276_v52 = vld [vmem:[%s12515_s1 + $0x6c8] sm:$0xff]  ;;  %v5640_v53 = vpack.c.bf16 %v197_v46, %v188_v45  ;;  %v187_v54 = vld [vmem:[%s12515_s1 + $0x400] sm:$0xff] }
  0x1c   :  { %v196_v55 = vld [vmem:[%s12515_s1 + $0x448] sm:$0xff]  ;;  %v285_v56 = vld [vmem:[%s12515_s1 + $0x710] sm:$0xff]  ;;  %v206_v57 = vld [vmem:[%s12515_s1 + $0x498] sm:$0xff]  ;;  %v5594_v59 = vpack.c.bf16 %v266_v49, %v257_v48 }
  0x1d   :  { %5575 = vmatpush1.bf16.msra.mxu0 %v5574_v60  ;;  %5631 = vmatpush1.bf16.msra.mxu1 %v5630_v26  ;;  %v215_v58 = vld [vmem:[%s12515_s1 + $0x4e0] sm:$0xff]  ;;  %v284_v61 = vld [vmem:[%s12515_s1 + $0x708] sm:$0xff]  ;;  %v5642_v62 = vpack.c.bf16 %v196_v55, %v187_v54  ;;  %v5596_v63 = vpack.c.bf16 %v285_v56, %v276_v52  ;;  %v294_v0 = vld [vmem:[%s12515_s1 + $0x758] sm:$0xff] }
  0x1e   :  { %5577 = vmatprep.subr.bf16.mxu0 %v5576_v1  ;;  %5633 = vmatprep.subr.bf16.mxu1 %v5632_v29  ;;  %v275_v60 = vld [vmem:[%s12515_s1 + $0x6c0] sm:$0xff]  ;;  %v5644_v1 = vpack.c.bf16 %v215_v58, %v206_v57  ;;  %v205_v2 = vld [vmem:[%s12515_s1 + $0x490] sm:$0xff]  ;;  %v214_v3 = vld [vmem:[%s12515_s1 + $0x4d8] sm:$0xff] }
  0x1f   :  { %v303_v4 = vld [vmem:[%s12515_s1 + $0x7a0] sm:$0xff]  ;;  %v224_v5 = vld [vmem:[%s12515_s1 + $0x528] sm:$0xff]  ;;  %v233_v6 = vld [vmem:[%s12515_s1 + $0x570] sm:$0xff]  ;;  %v5598_v7 = vpack.c.bf16 %v284_v61, %v275_v60 }
  0x20   :  { %v293_v8 = vld [vmem:[%s12515_s1 + $0x750] sm:$0xff]  ;;  %v302_v9 = vld [vmem:[%s12515_s1 + $0x798] sm:$0xff]  ;;  %v5600_v12 = vpack.c.bf16 %v303_v4, %v294_v0  ;;  %v312_v13 = vld [vmem:[%s12515_s1 + $0x7e8] sm:$0xff]  ;;  %v5648_v14 = vpack.c.bf16 %v233_v6, %v224_v5 }
  0x21   :  { %5579 = vmatpush1.bf16.msra.mxu0 %v5578_v11  ;;  %5635 = vmatpush1.bf16.msra.mxu1 %v5634_v38  ;;  %v5646_v11 = vpack.c.bf16 %v214_v3, %v205_v2  ;;  %v232_v16 = vld [vmem:[%s12515_s1 + $0x568] sm:$0xff]  ;;  %v321_v17 = vld [vmem:[%s12515_s1 + $0x830] sm:$0xff]  ;;  %v242_v18 = vld [vmem:[%s12515_s1 + $0x5b8] sm:$0xff]  ;;  %v5602_v20 = vpack.c.bf16 %v302_v9, %v293_v8 }
  0x22   :  { %5581 = vmatprep.subr.bf16.mxu0 %v5580_v15  ;;  %5637 = vmatprep.subr.bf16.mxu1 %v5636_v41  ;;  %v223_v15 = vld [vmem:[%s12515_s1 + $0x520] sm:$0xff]  ;;  %v320_v22 = vld [vmem:[%s12515_s1 + $0x828] sm:$0xff]  ;;  %v5604_v24 = vpack.c.bf16 %v321_v17, %v312_v13  ;;  %v330_v25 = vld [vmem:[%s12515_s1 + $0x878] sm:$0xff] }
  0x23   :  { %v251_v19 = vld [vmem:[%s12515_s1 + $0x600] sm:$0xff]  ;;  %v250_v28 = vld [vmem:[%s12515_s1 + $0x5f8] sm:$0xff]  ;;  %v260_v30 = vld [vmem:[%s12515_s1 + $0x648] sm:$0xff] }
  0x24   :  { %v311_v21 = vld [vmem:[%s12515_s1 + $0x7e0] sm:$0xff]  ;;  %v5652_v26 = vpack.c.bf16 %v251_v19, %v242_v18  ;;  %v269_v31 = vld [vmem:[%s12515_s1 + $0x690] sm:$0xff]  ;;  %v338_v34 = vld [vmem:[%s12515_s1 + $0x8b8] sm:$0xff] }
  0x25   :  { %5583 = vmatpush1.bf16.msra.mxu0 %v5582_v23  ;;  %5639 = vmatpush1.bf16.msra.mxu1 %v5638_v50  ;;  %v5650_v23 = vpack.c.bf16 %v232_v16, %v223_v15  ;;  %v339_v29 = vld [vmem:[%s12515_s1 + $0x8c0] sm:$0xff]  ;;  %v5606_v32 = vpack.c.bf16 %v320_v22, %v311_v21  ;;  %v329_v33 = vld [vmem:[%s12515_s1 + $0x870] sm:$0xff]  ;;  %v5656_v37 = vpack.c.bf16 %v269_v31, %v260_v30  ;;  %v278_v40 = vld [vmem:[%s12515_s1 + $0x6d8] sm:$0xff] }
  0x26   :  { %5585 = vmatprep.subr.bf16.mxu0 %v5584_v27  ;;  %5641 = vmatprep.subr.bf16.mxu1 %v5640_v53  ;;  %v241_v27 = vld [vmem:[%s12515_s1 + $0x5b0] sm:$0xff]  ;;  %v5608_v36 = vpack.c.bf16 %v339_v29, %v330_v25  ;;  %v259_v38 = vld [vmem:[%s12515_s1 + $0x640] sm:$0xff]  ;;  %v64_v42 = vld [vmem:[%s12515_s1 + $0x28] sm:$0xff]  ;;  %v5610_v44 = vpack.c.bf16 %v338_v34, %v329_v33 }
  0x27   :  { %v287_v41 = vld [vmem:[%s12515_s1 + $0x720] sm:$0xff]  ;;  %v73_v43 = vld [vmem:[%s12515_s1 + $0x70] sm:$0xff]  ;;  %v286_v48 = vld [vmem:[%s12515_s1 + $0x718] sm:$0xff] }
  0x28   :  { %v5660_v46 = vpack.c.bf16 %v287_v41, %v278_v40  ;;  %v296_v49 = vld [vmem:[%s12515_s1 + $0x768] sm:$0xff]  ;;  %v5676_v50 = vpack.c.bf16 %v73_v43, %v64_v42  ;;  %v63_v52 = vld [vmem:[%s12515_s1 + $0x20] sm:$0xff]  ;;  %v82_v54 = vld [vmem:[%s12515_s1 + $0xb8] sm:$0xff] }
  0x29   :  { %5587 = vmatpush1.bf16.msra.mxu0 %v5586_v35  ;;  %5643 = vmatpush1.bf16.msra.mxu1 %v5642_v62  ;;  %v5654_v35 = vpack.c.bf16 %v250_v28, %v241_v27  ;;  %v72_v53 = vld [vmem:[%s12515_s1 + $0x68] sm:$0xff]  ;;  %v91_v55 = vld [vmem:[%s12515_s1 + $0x100] sm:$0xff]  ;;  %v7290_v57 = vld [vmem:[%s12514_s0 + $0x18] sm:$0xff] }
  0x2a   :  { %5589 = vmatprep.subr.bf16.mxu0 %v5588_v39  ;;  %5645 = vmatprep.subr.bf16.mxu1 %v5644_v1  ;;  %v268_v39 = vld [vmem:[%s12515_s1 + $0x688] sm:$0xff]  ;;  %v7285_v56 = vld [vmem:[%s12514_s0] sm:$0xff]  ;;  %v314_v62 = vld [vmem:[%s12515_s1 + $0x7f8] sm:$0xff]  ;;  %v5680_v1 = vpack.c.bf16 %v91_v55, %v82_v54 }
  0x2b   :  { %v5658_v45 = vpack.c.bf16 %v268_v39, %v259_v38  ;;  %v295_v60 = vld [vmem:[%s12515_s1 + $0x760] sm:$0xff]  ;;  %v304_v61 = vld [vmem:[%s12515_s1 + $0x7a8] sm:$0xff]  ;;  %v81_v2 = vld [vmem:[%s12515_s1 + $0xb0] sm:$0xff] }
  0x2c   :  { %v323_v0 = vld [vmem:[%s12515_s1 + $0x840] sm:$0xff]  ;;  %v90_v3 = vld [vmem:[%s12515_s1 + $0xf8] sm:$0xff]  ;;  %v100_v4 = vld [vmem:[%s12515_s1 + $0x148] sm:$0xff]  ;;  %v5666_v8 = vpack.c.bf16 %v304_v61, %v295_v60 }
  0x2d   :  { %5591 = vmatpush1.bf16.msra.mxu0 %v5590_v47  ;;  %5647 = vmatpush1.bf16.msra.mxu1 %v5646_v11  ;;  %v277_v47 = vld [vmem:[%s12515_s1 + $0x6d0] sm:$0xff]  ;;  %v5668_v9 = vpack.c.bf16 %v323_v0, %v314_v62  ;;  %v332_v13 = vld [vmem:[%s12515_s1 + $0x888] sm:$0xff]  ;;  %v99_v17 = vld [vmem:[%s12515_s1 + $0x140] sm:$0xff] }
  0x2e   :  { %5593 = vmatprep.subr.bf16.mxu0 %v5592_v51  ;;  %5649 = vmatprep.subr.bf16.mxu1 %v5648_v14  ;;  %v305_v51 = vld [vmem:[%s12515_s1 + $0x7b0] sm:$0xff]  ;;  %v5662_v58 = vpack.c.bf16 %v286_v48, %v277_v47  ;;  %v5682_v14 = vpack.c.bf16 %v90_v3, %v81_v2  ;;  %v108_v18 = vld [vmem:[%s12515_s1 + $0x188] sm:$0xff]  ;;  %v118_v19 = vld [vmem:[%s12515_s1 + $0x1d8] sm:$0xff] }
  0x2f   :  { %v109_v5 = vld [vmem:[%s12515_s1 + $0x190] sm:$0xff]  ;;  %v7357_v21 = vld [vmem:[%s12514_s0 + $0x20] sm:$0xff]  ;;  %v7362_v22 = vld [vmem:[%s12514_s0 + $0x38] sm:$0xff]  ;;  %v5686_v27 = vpack.c.bf16 %v108_v18, %v99_v17 }
  0x30   :  { %v7321_v6 = vld [vmem:[%s12514_s0 + $0x10] sm:$0xff]  ;;  %v5684_v16 = vpack.c.bf16 %v109_v5, %v100_v4  ;;  %v331_v25 = vld [vmem:[%s12515_s1 + $0x880] sm:$0xff]  ;;  %v126_v30 = vld [vmem:[%s12515_s1 + $0x218] sm:$0xff] }
  0x31   :  { %5595 = vmatpush1.bf16.msra.mxu0 %v5594_v59  ;;  %5651 = vmatpush1.bf16.msra.mxu1 %v5650_v23  ;;  %v5664_v59 = vpack.c.bf16 %v305_v51, %v296_v49  ;;  %v313_v11 = vld [vmem:[%s12515_s1 + $0x7f0] sm:$0xff]  ;;  %v66_v31 = vld [vmem:[%s12515_s1 + $0x38] sm:$0xff]  ;;  %v136_v33 = vld [vmem:[%s12515_s1 + $0x268] sm:$0xff] }
  0x32   :  { %5597 = vmatprep.subr.bf16.mxu0 %v5596_v63  ;;  %5653 = vmatprep.subr.bf16.mxu1 %v5652_v26  ;;  %v5678_v63 = vpack.c.bf16 %v72_v53, %v63_v52  ;;  %v341_v15 = vld [vmem:[%s12515_s1 + $0x8d0] sm:$0xff]  ;;  %v340_v26 = vld [vmem:[%s12515_s1 + $0x8c8] sm:$0xff]  ;;  %v135_v39 = vld [vmem:[%s12515_s1 + $0x260] sm:$0xff] }
  0x33   :  { %v117_v28 = vld [vmem:[%s12515_s1 + $0x1d0] sm:$0xff]  ;;  %v144_v40 = vld [vmem:[%s12515_s1 + $0x2a8] sm:$0xff]  ;;  %v154_v43 = vld [vmem:[%s12515_s1 + $0x2f8] sm:$0xff] }
  0x34   :  { %v145_v34 = vld [vmem:[%s12515_s1 + $0x2b0] sm:$0xff]  ;;  %v5690_v38 = vpack.c.bf16 %v126_v30, %v117_v28  ;;  %v84_v47 = vld [vmem:[%s12515_s1 + $0xc8] sm:$0xff]  ;;  %v7429_v49 = vld [vmem:[%s12514_s0 + $0x40] sm:$0xff]  ;;  %v5694_v51 = vpack.c.bf16 %v144_v40, %v135_v39 }
  0x35   :  { %5599 = vmatpush1.bf16.msra.mxu0 %v5598_v7  ;;  %5655 = vmatpush1.bf16.msra.mxu1 %v5654_v35  ;;  %v7326_v7 = vld [vmem:[%s12514_s0 + $0x28] sm:$0xff]  ;;  %v7393_v35 = vld [vmem:[%s12514_s0 + $0x30] sm:$0xff]  ;;  %v5692_v42 = vpack.c.bf16 %v145_v34, %v136_v33  ;;  %v162_v53 = vld [vmem:[%s12515_s1 + $0x338] sm:$0xff] }
  0x36   :  { %5601 = vmatprep.subr.bf16.mxu0 %v5600_v12  ;;  %5657 = vmatprep.subr.bf16.mxu1 %v5656_v37  ;;  %v322_v12 = vld [vmem:[%s12515_s1 + $0x838] sm:$0xff]  ;;  %v7398_v37 = vld [vmem:[%s12514_s0 + $0x48] sm:$0xff]  ;;  %v93_v48 = vld [vmem:[%s12515_s1 + $0x110] sm:$0xff] }
  0x37   :  { %v5670_v23 = vpack.c.bf16 %v322_v12, %v313_v11  ;;  %v153_v52 = vld [vmem:[%s12515_s1 + $0x2f0] sm:$0xff]  ;;  %v83_v60 = vld [vmem:[%s12515_s1 + $0xc0] sm:$0xff]  ;;  %v92_v61 = vld [vmem:[%s12515_s1 + $0x108] sm:$0xff] }
  0x38   :  { %v181_v62 = vld [vmem:[%s12515_s1 + $0x3d0] sm:$0xff]  ;;  %v111_v0 = vld [vmem:[%s12515_s1 + $0x1a0] sm:$0xff]  ;;  %v7472_v2 = vld [vmem:[%s12514_s0 + $0x68] sm:$0xff]  ;;  %v5698_v3 = vpack.c.bf16 %v162_v53, %v153_v52 }
  0x39   :  { %5603 = vmatpush1.bf16.msra.mxu0 %v5602_v20  ;;  %5659 = vmatpush1.bf16.msra.mxu1 %v5658_v45  ;;  %v127_v20 = vld [vmem:[%s12515_s1 + $0x220] sm:$0xff]  ;;  %v74_v45 = vld [vmem:[%s12515_s1 + $0x78] sm:$0xff]  ;;  %v180_v5 = vld [vmem:[%s12515_s1 + $0x3c8] sm:$0xff] }
  0x3a   :  { %5605 = vmatprep.subr.bf16.mxu0 %v5604_v24  ;;  %5661 = vmatprep.subr.bf16.mxu1 %v5660_v46  ;;  %v5672_v24 = vpack.c.bf16 %v341_v15, %v332_v13  ;;  %v5688_v29 = vpack.c.bf16 %v127_v20, %v118_v19  ;;  %v163_v46 = vld [vmem:[%s12515_s1 + $0x340] sm:$0xff]  ;;  %v190_v11 = vld [vmem:[%s12515_s1 + $0x418] sm:$0xff]  ;;  %v101_v13 = vld [vmem:[%s12515_s1 + $0x150] sm:$0xff] }
  0x3b   :  { %v5696_v55 = vpack.c.bf16 %v163_v46, %v154_v43  ;;  %v171_v4 = vld [vmem:[%s12515_s1 + $0x380] sm:$0xff]  ;;  %v129_v17 = vld [vmem:[%s12515_s1 + $0x230] sm:$0xff]  ;;  %v7510_v19 = vld [vmem:[%s12514_s0 + $0x78] sm:$0xff] }
  0x3c   :  { %v199_v15 = vld [vmem:[%s12515_s1 + $0x460] sm:$0xff]  ;;  %v5702_v20 = vpack.c.bf16 %v180_v5, %v171_v4  ;;  %v128_v30 = vld [vmem:[%s12515_s1 + $0x228] sm:$0xff]  ;;  %v7542_v34 = vld [vmem:[%s12514_s0 + $0x70] sm:$0xff] }
  0x3d   :  { %5607 = vmatpush1.bf16.msra.mxu0 %v5606_v32  ;;  %5663 = vmatpush1.bf16.msra.mxu1 %v5662_v58  ;;  %v75_v32 = vld [vmem:[%s12515_s1 + $0x80] sm:$0xff]  ;;  %v172_v58 = vld [vmem:[%s12515_s1 + $0x388] sm:$0xff]  ;;  %v226_v43 = vld [vmem:[%s12515_s1 + $0x538] sm:$0xff] }
  0x3e   :  { %5609 = vmatprep.subr.bf16.mxu0 %v5608_v36  ;;  %5665 = vmatprep.subr.bf16.mxu1 %v5664_v59  ;;  %v5674_v36 = vpack.c.bf16 %v340_v26, %v331_v25  ;;  %v5740_v41 = vpack.c.bf16 %v75_v32, %v66_v31  ;;  %v5744_v59 = vpack.c.bf16 %v93_v48, %v84_v47  ;;  %v7504_v18 = vld [vmem:[%s12514_s0 + $0x60] sm:$0xff]  ;;  %v217_v31 = vld [vmem:[%s12515_s1 + $0x4f0] sm:$0xff]  ;;  %v138_v32 = vld [vmem:[%s12515_s1 + $0x278] sm:$0xff] }
  0x3f   :  { %v5704_v26 = vpack.c.bf16 %v199_v15, %v190_v11  ;;  %v147_v33 = vld [vmem:[%s12515_s1 + $0x2c0] sm:$0xff]  ;;  %v216_v40 = vld [vmem:[%s12515_s1 + $0x4e8] sm:$0xff]  ;;  %v146_v46 = vld [vmem:[%s12515_s1 + $0x2b8] sm:$0xff] }
  0x40   :  { %v207_v39 = vld [vmem:[%s12515_s1 + $0x4a0] sm:$0xff]  ;;  %v156_v48 = vld [vmem:[%s12515_s1 + $0x308] sm:$0xff]  ;;  %v7586_v53 = vld [vmem:[%s12514_s0 + $0x98] sm:$0xff] }
  0x41   :  { %5611 = vmatpush1.bf16.msra.mxu0 %v5610_v44  ;;  %5667 = vmatpush1.bf16.msra.mxu1 %v5666_v8  ;;  %v65_v44 = vld [vmem:[%s12515_s1 + $0x30] sm:$0xff]  ;;  %v5746_v8 = vpack.c.bf16 %v92_v61, %v83_v60  ;;  %v235_v47 = vld [vmem:[%s12515_s1 + $0x580] sm:$0xff]  ;;  %v244_v61 = vld [vmem:[%s12515_s1 + $0x5c8] sm:$0xff] }
  0x42   :  { %5677 = vmatprep.subr.bf16.mxu0 %v5676_v50  ;;  %5669 = vmatprep.subr.bf16.mxu1 %v5668_v9  ;;  %v7434_v50 = vld [vmem:[%s12514_s0 + $0x58] sm:$0xff]  ;;  %v5742_v54 = vpack.c.bf16 %v74_v45, %v65_v44  ;;  %v5700_v9 = vpack.c.bf16 %v181_v62, %v172_v58  ;;  %v5756_v44 = vpack.c.bf16 %v147_v33, %v138_v32  ;;  %v137_v45 = vld [vmem:[%s12515_s1 + $0x270] sm:$0xff]  ;;  %v7580_v52 = vld [vmem:[%s12514_s0 + $0x80] sm:$0xff] }
  0x43   :  { %v234_v58 = vld [vmem:[%s12515_s1 + $0x578] sm:$0xff]  ;;  %v5712_v60 = vpack.c.bf16 %v235_v47, %v226_v43  ;;  %v183_v5 = vld [vmem:[%s12515_s1 + $0x3e0] sm:$0xff] }
  0x44   :  { %461 = vmatmul.mubr.f32.vlgmr.msra.gmra.mrb[0].mxu0 %v7285_v56  ;;  %v174_v4 = vld [vmem:[%s12515_s1 + $0x398] sm:$0xff] }
  0x45   :  { %466 = vmatprep.mubr.f32.mxu0 %v7290_v57  ;;  %5679 = vmatpush1.bf16.msra.mxu0 %v5678_v63  ;;  %v102_v63 = vld [vmem:[%s12515_s1 + $0x158] sm:$0xff] }
  0x46   :  { %5681 = vmatprep.subr.bf16.mxu0 %v5680_v1  ;;  %5671 = vmatpush1.bf16.msra.mxu1 %v5670_v23  ;;  %v7466_v1 = vld [vmem:[%s12514_s0 + $0x50] sm:$0xff]  ;;  %v5748_v12 = vpack.c.bf16 %v111_v0, %v102_v63  ;;  %v155_v63 = vld [vmem:[%s12515_s1 + $0x300] sm:$0xff]  ;;  %v164_v0 = vld [vmem:[%s12515_s1 + $0x348] sm:$0xff] }
  0x47   :  { %5673 = vmatprep.subr.bf16.mxu1 %v5672_v24  ;;  %v189_v23 = vld [vmem:[%s12515_s1 + $0x410] sm:$0xff]  ;;  %v198_v24 = vld [vmem:[%s12515_s1 + $0x458] sm:$0xff] }
  0x48   :  { %467 = vmatmul.mubr.f32.gmra.mrb[2].mxu0 %v7321_v6  ;;  %v210_v43 = vld [vmem:[%s12515_s1 + $0x4b8] sm:$0xff] }
  0x49   :  { %472 = vmatprep.mubr.f32.mxu0 %v7326_v7  ;;  %5683 = vmatpush1.bf16.msra.mxu0 %v5682_v14  ;;  %v110_v14 = vld [vmem:[%s12515_s1 + $0x198] sm:$0xff] }
  0x4a   :  { %5685 = vmatprep.subr.bf16.mxu0 %v5684_v16  ;;  %5675 = vmatpush1.bf16.msra.mxu1 %v5674_v36  ;;  %v120_v16 = vld [vmem:[%s12515_s1 + $0x1e8] sm:$0xff]  ;;  %v5750_v25 = vpack.c.bf16 %v110_v14, %v101_v13  ;;  %v5762_v14 = vpack.c.bf16 %v164_v0, %v155_v63  ;;  %v237_v0 = vld [vmem:[%s12515_s1 + $0x590] sm:$0xff] }
  0x4b   :  { %5741 = vmatprep.subr.bf16.mxu1 %v5740_v41  ;;  %v5752_v28 = vpack.c.bf16 %v129_v17, %v120_v16  ;;  %v7548_v36 = vld [vmem:[%s12514_s0 + $0x88] sm:$0xff]  ;;  %v262_v16 = vld [vmem:[%s12515_s1 + $0x658] sm:$0xff]  ;;  %v5764_v17 = vpack.c.bf16 %v183_v5, %v174_v4 }
  0x4c   :  { %473 = vmatmul.mubr.f32.gmra.mrb[4].mxu0 %v7357_v21  ;;  %v252_v13 = vld [vmem:[%s12515_s1 + $0x608] sm:$0xff]  ;;  %v7738_v4 = vld [vmem:[%s12514_s0 + $0xd8] sm:$0xff] }
  0x4d   :  { %478 = vmatprep.mubr.f32.mxu0 %v7362_v22  ;;  %5687 = vmatpush1.bf16.msra.mxu0 %v5686_v27  ;;  %v208_v27 = vld [vmem:[%s12515_s1 + $0x4a8] sm:$0xff] }
  0x4e   :  { %5689 = vmatprep.subr.bf16.mxu0 %v5688_v29  ;;  %622 = vmatmul.mubr.f32.vlgmr.msra.gmra.mrb[0].mxu1 %v7285_v56  ;;  %v119_v29 = vld [vmem:[%s12515_s1 + $0x1e0] sm:$0xff]  ;;  %v228_v63 = vld [vmem:[%s12515_s1 + $0x548] sm:$0xff] }
  0x4f   :  { %627 = vmatprep.mubr.f32.mxu1 %v7290_v57  ;;  %5743 = vmatpush1.bf16.msra.mxu1 %v5742_v54  ;;  %v5754_v41 = vpack.c.bf16 %v128_v30, %v119_v29  ;;  %v5710_v54 = vpack.c.bf16 %v216_v40, %v207_v39  ;;  %v261_v30 = vld [vmem:[%s12515_s1 + $0x650] sm:$0xff]  ;;  %v191_v40 = vld [vmem:[%s12515_s1 + $0x420] sm:$0xff] }
  0x50   :  { %479 = vmatmul.mubr.f32.gmra.mrb[6].mxu0 %v7393_v35  ;;  %5745 = vmatprep.subr.bf16.mxu1 %v5744_v59  ;;  %v5758_v59 = vpack.c.bf16 %v146_v46, %v137_v45  ;;  %v7694_v45 = vld [vmem:[%s12514_s0 + $0xb0] sm:$0xff]  ;;  %v7700_v46 = vld [vmem:[%s12514_s0 + $0xc8] sm:$0xff] }
  0x51   :  { %484 = vmatprep.mubr.f32.mxu0 %v7398_v37  ;;  %5691 = vmatpush1.bf16.msra.mxu0 %v5690_v38  ;;  %v5706_v38 = vpack.c.bf16 %v198_v24, %v189_v23  ;;  %v182_v23 = vld [vmem:[%s12515_s1 + $0x3d8] sm:$0xff]  ;;  %v271_v24 = vld [vmem:[%s12515_s1 + $0x6a0] sm:$0xff] }
  0x52   :  { %5693 = vmatprep.subr.bf16.mxu0 %v5692_v42  ;;  %628 = vmatmul.mubr.f32.gmra.mrb[2].mxu1 %v7321_v6  ;;  %v5708_v42 = vpack.c.bf16 %v217_v31, %v208_v27  ;;  %v7656_v27 = vld [vmem:[%s12514_s0 + $0xa0] sm:$0xff]  ;;  %v270_v31 = vld [vmem:[%s12515_s1 + $0x698] sm:$0xff]  ;;  %v5720_v33 = vpack.c.bf16 %v271_v24, %v262_v16  ;;  %v5776_v16 = vpack.c.bf16 %v237_v0, %v228_v63  ;;  %v272_v63 = vld [vmem:[%s12515_s1 + $0x6a8] sm:$0xff] }
  0x53   :  { %633 = vmatprep.mubr.f32.mxu1 %v7326_v7  ;;  %5747 = vmatpush1.bf16.msra.mxu1 %v5746_v8  ;;  %v7618_v8 = vld [vmem:[%s12514_s0 + $0x90] sm:$0xff]  ;;  %v5722_v47 = vpack.c.bf16 %v270_v31, %v261_v30  ;;  %v246_v24 = vld [vmem:[%s12515_s1 + $0x5d8] sm:$0xff]  ;;  %v315_v31 = vld [vmem:[%s12515_s1 + $0x800] sm:$0xff] }
  0x54   :  { %485 = vmatmul.mubr.f32.gmra.mrb[8].mxu0 %v7429_v49  ;;  %5749 = vmatprep.subr.bf16.mxu1 %v5748_v12  ;;  %v243_v12 = vld [vmem:[%s12515_s1 + $0x5c0] sm:$0xff]  ;;  %v282_v0 = vld [vmem:[%s12515_s1 + $0x6f8] sm:$0xff] }
  0x55   :  { %490 = vmatprep.mubr.f32.mxu0 %v7434_v50  ;;  %5695 = vmatpush1.bf16.msra.mxu0 %v5694_v51  ;;  %v165_v51 = vld [vmem:[%s12515_s1 + $0x350] sm:$0xff]  ;;  %v5718_v29 = vpack.c.bf16 %v252_v13, %v243_v12  ;;  %v306_v12 = vld [vmem:[%s12515_s1 + $0x7b8] sm:$0xff] }
  0x56   :  { %5697 = vmatprep.subr.bf16.mxu0 %v5696_v55  ;;  %634 = vmatmul.mubr.f32.gmra.mrb[4].mxu1 %v7357_v21  ;;  %v225_v55 = vld [vmem:[%s12515_s1 + $0x530] sm:$0xff]  ;;  %v5760_v62 = vpack.c.bf16 %v165_v51, %v156_v48  ;;  %v279_v48 = vld [vmem:[%s12515_s1 + $0x6e0] sm:$0xff]  ;;  %v288_v51 = vld [vmem:[%s12515_s1 + $0x728] sm:$0xff] }
  0x57   :  { %639 = vmatprep.mubr.f32.mxu1 %v7362_v22  ;;  %5751 = vmatpush1.bf16.msra.mxu1 %v5750_v25  ;;  %v5714_v11 = vpack.c.bf16 %v234_v58, %v225_v55  ;;  %v192_v25 = vld [vmem:[%s12515_s1 + $0x428] sm:$0xff]  ;;  %v298_v58 = vld [vmem:[%s12515_s1 + $0x778] sm:$0xff]  ;;  %v5726_v5 = vpack.c.bf16 %v288_v51, %v279_v48  ;;  %v7808_v48 = vld [vmem:[%s12514_s0 + $0xe0] sm:$0xff] }
  0x58   :  { %491 = vmatmul.mubr.f32.gmra.mrb[10].mxu0 %v7466_v1  ;;  %5753 = vmatprep.subr.bf16.mxu1 %v5752_v28  ;;  %v7662_v28 = vld [vmem:[%s12514_s0 + $0xb8] sm:$0xff] }
  0x59   :  { %496 = vmatprep.mubr.f32.mxu0 %v7472_v2  ;;  %5699 = vmatpush1.bf16.msra.mxu0 %v5698_v3  ;;  %v253_v3 = vld [vmem:[%s12515_s1 + $0x610] sm:$0xff]  ;;  %v7814_v51 = vld [vmem:[%s12514_s0 + $0xf8] sm:$0xff] }
  0x5a   :  { %5701 = vmatprep.subr.bf16.mxu0 %v5700_v9  ;;  %640 = vmatmul.mubr.f32.gmra.mrb[6].mxu1 %v7393_v35  ;;  %v7624_v9 = vld [vmem:[%s12514_s0 + $0xa8] sm:$0xff]  ;;  %v5716_v15 = vpack.c.bf16 %v253_v3, %v244_v61  ;;  %v218_v61 = vld [vmem:[%s12515_s1 + $0x4f8] sm:$0xff]  ;;  %v7732_v3 = vld [vmem:[%s12514_s0 + $0xc0] sm:$0xff] }
  0x5b   :  { %645 = vmatprep.mubr.f32.mxu1 %v7398_v37  ;;  %5755 = vmatpush1.bf16.msra.mxu1 %v5754_v41  ;;  %v200_v41 = vld [vmem:[%s12515_s1 + $0x468] sm:$0xff] }
  0x5c   :  { %497 = vmatmul.mubr.f32.gmra.mrb[12].mxu0 %v7504_v18  ;;  %5757 = vmatprep.subr.bf16.mxu1 %v5756_v44  ;;  %v219_v44 = vld [vmem:[%s12515_s1 + $0x500] sm:$0xff] }
  0x5d   :  { %502 = vmatprep.mubr.f32.mxu0 %v7510_v19  ;;  %5703 = vmatpush1.bf16.msra.mxu0 %v5702_v20  ;;  %v173_v20 = vld [vmem:[%s12515_s1 + $0x390] sm:$0xff] }
  0x5e   :  { %5705 = vmatprep.subr.bf16.mxu0 %v5704_v26  ;;  %646 = vmatmul.mubr.f32.gmra.mrb[8].mxu1 %v7429_v49  ;;  %v201_v26 = vld [vmem:[%s12515_s1 + $0x470] sm:$0xff]  ;;  %v5766_v32 = vpack.c.bf16 %v182_v23, %v173_v20  ;;  %v236_v20 = vld [vmem:[%s12515_s1 + $0x588] sm:$0xff] }
  0x5f   :  { %651 = vmatprep.mubr.f32.mxu1 %v7434_v50  ;;  %5759 = vmatpush1.bf16.msra.mxu1 %v5758_v59  ;;  %v5768_v39 = vpack.c.bf16 %v201_v26, %v192_v25  ;;  %v5772_v59 = vpack.c.bf16 %v219_v44, %v210_v43  ;;  %v325_v23 = vld [vmem:[%s12515_s1 + $0x850] sm:$0xff]  ;;  %v255_v25 = vld [vmem:[%s12515_s1 + $0x620] sm:$0xff]  ;;  %v264_v44 = vld [vmem:[%s12515_s1 + $0x668] sm:$0xff] }
  0x60   :  { %503 = vmatmul.mubr.f32.gmra.mrb[14].mxu0 %v7542_v34  ;;  %5761 = vmatprep.subr.bf16.mxu1 %v5760_v62  ;;  %v307_v62 = vld [vmem:[%s12515_s1 + $0x7c0] sm:$0xff]  ;;  %v7770_v26 = vld [vmem:[%s12514_s0 + $0xd0] sm:$0xff] }
  0x61   :  { %508 = vmatprep.mubr.f32.mxu0 %v7548_v36  ;;  %5707 = vmatpush1.bf16.msra.mxu0 %v5706_v38  ;;  %v280_v38 = vld [vmem:[%s12515_s1 + $0x6e8] sm:$0xff]  ;;  %v343_v43 = vld [vmem:[%s12515_s1 + $0x8e0] sm:$0xff] }
  0x62   :  { %5709 = vmatprep.subr.bf16.mxu0 %v5708_v42  ;;  %652 = vmatmul.mubr.f32.gmra.mrb[10].mxu1 %v7466_v1  ;;  %v289_v42 = vld [vmem:[%s12515_s1 + $0x730] sm:$0xff] }
  0x63   :  { %657 = vmatprep.mubr.f32.mxu1 %v7472_v2  ;;  %5763 = vmatpush1.bf16.msra.mxu1 %v5762_v14  ;;  %v5724_v55 = vpack.c.bf16 %v289_v42, %v280_v38  ;;  %v5728_v14 = vpack.c.bf16 %v307_v62, %v298_v58  ;;  %v254_v42 = vld [vmem:[%s12515_s1 + $0x618] sm:$0xff]  ;;  %v263_v62 = vld [vmem:[%s12515_s1 + $0x660] sm:$0xff] }
  0x64   :  { %509 = vmatmul.mubr.f32.gmra.mrb[16].mxu0 %v7580_v52  ;;  %5765 = vmatprep.subr.bf16.mxu1 %v5764_v17  ;;  %v227_v17 = vld [vmem:[%s12515_s1 + $0x540] sm:$0xff]  ;;  %v342_v58 = vld [vmem:[%s12515_s1 + $0x8d8] sm:$0xff] }
  0x65   :  { %514 = vmatprep.mubr.f32.mxu0 %v7586_v53  ;;  %5711 = vmatpush1.bf16.msra.mxu0 %v5710_v54  ;;  %v5770_v54 = vpack.c.bf16 %v200_v41, %v191_v40  ;;  %v5780_v40 = vpack.c.bf16 %v255_v25, %v246_v24  ;;  %v245_v41 = vld [vmem:[%s12515_s1 + $0x5d0] sm:$0xff] }
  0x66   :  { %5713 = vmatprep.subr.bf16.mxu0 %v5712_v60  ;;  %658 = vmatmul.mubr.f32.gmra.mrb[12].mxu1 %v7504_v18  ;;  %v209_v60 = vld [vmem:[%s12515_s1 + $0x4b0] sm:$0xff] }
  0x67   :  { %663 = vmatprep.mubr.f32.mxu1 %v7510_v19  ;;  %5767 = vmatpush1.bf16.msra.mxu1 %v5766_v32  ;;  %v5774_v13 = vpack.c.bf16 %v218_v61, %v209_v60  ;;  %v324_v32 = vld [vmem:[%s12515_s1 + $0x848] sm:$0xff] }
  0x68   :  { %515 = vmatmul.mubr.f32.gmra.mrb[18].mxu0 %v7618_v8  ;;  %5769 = vmatprep.subr.bf16.mxu1 %v5768_v39  ;;  %v334_v39 = vld [vmem:[%s12515_s1 + $0x898] sm:$0xff] }
  0x69   :  { %520 = vmatprep.mubr.f32.mxu0 %v7624_v9  ;;  %5715 = vmatpush1.bf16.msra.mxu0 %v5714_v11  ;;  %v297_v11 = vld [vmem:[%s12515_s1 + $0x770] sm:$0xff]  ;;  %v5736_v60 = vpack.c.bf16 %v343_v43, %v334_v39 }
  0x6a   :  { %5717 = vmatprep.subr.bf16.mxu0 %v5716_v15  ;;  %664 = vmatmul.mubr.f32.gmra.mrb[14].mxu1 %v7542_v34  ;;  %v316_v15 = vld [vmem:[%s12515_s1 + $0x808] sm:$0xff]  ;;  %v5730_v30 = vpack.c.bf16 %v306_v12, %v297_v11  ;;  %v211_v11 = vld [vmem:[%s12515_s1 + $0x4c0] sm:$0xff] }
  0x6b   :  { %669 = vmatprep.mubr.f32.mxu1 %v7548_v36  ;;  %5771 = vmatpush1.bf16.msra.mxu1 %v5770_v54  ;;  %v5732_v38 = vpack.c.bf16 %v325_v23, %v316_v15  ;;  %v5734_v54 = vpack.c.bf16 %v324_v32, %v315_v31  ;;  %v220_v12 = vld [vmem:[%s12515_s1 + $0x508] sm:$0xff]  ;;  %v5786_v15 = vpack.c.bf16 %v272_v63, %v263_v62 }
  0x6c   :  { %521 = vmatmul.mubr.f32.gmra.mrb[20].mxu0 %v7656_v27  ;;  %5773 = vmatprep.subr.bf16.mxu1 %v5772_v59  ;;  %v5782_v59 = vpack.c.bf16 %v254_v42, %v245_v41 }
  0x6d   :  { %526 = vmatprep.mubr.f32.mxu0 %v7662_v28  ;;  %5719 = vmatpush1.bf16.msra.mxu0 %v5718_v29  ;;  %v7776_v29 = vld [vmem:[%s12514_s0 + $0xe8] sm:$0xff] }
  0x6e   :  { %5721 = vmatprep.subr.bf16.mxu0 %v5720_v33  ;;  %670 = vmatmul.mubr.f32.gmra.mrb[16].mxu1 %v7580_v52  ;;  %v5778_v33 = vpack.c.bf16 %v236_v20, %v227_v17 }
  0x6f   :  { %675 = vmatprep.mubr.f32.mxu1 %v7586_v53  ;;  %5775 = vmatpush1.bf16.msra.mxu1 %v5774_v13  ;;  %v7846_v13 = vld [vmem:[%s12514_s0 + $0xf0] sm:$0xff] }
  0x70   :  { %527 = vmatmul.mubr.f32.gmra.mrb[22].mxu0 %v7694_v45  ;;  %5777 = vmatprep.subr.bf16.mxu1 %v5776_v16 }
  0x71   :  { %532 = vmatprep.mubr.f32.mxu0 %v7700_v46  ;;  %5723 = vmatpush1.bf16.msra.mxu0 %v5722_v47  ;;  %v273_v47 = vld [vmem:[%s12515_s1 + $0x6b0] sm:$0xff] }
  0x72   :  { %5725 = vmatprep.subr.bf16.mxu0 %v5724_v55  ;;  %676 = vmatmul.mubr.f32.gmra.mrb[18].mxu1 %v7618_v8  ;;  %v333_v55 = vld [vmem:[%s12515_s1 + $0x890] sm:$0xff]  ;;  %v5784_v61 = vpack.c.bf16 %v273_v47, %v264_v44 }
  0x73   :  { %681 = vmatprep.mubr.f32.mxu1 %v7624_v9  ;;  %5779 = vmatpush1.bf16.msra.mxu1 %v5778_v33 }
  0x74   :  { %533 = vmatmul.mubr.f32.gmra.mrb[24].mxu0 %v7732_v3  ;;  %5781 = vmatprep.subr.bf16.mxu1 %v5780_v40 }
  0x75   :  { %538 = vmatprep.mubr.f32.mxu0 %v7738_v4  ;;  %5727 = vmatpush1.bf16.msra.mxu0 %v5726_v5  ;;  %v291_v5 = vld [vmem:[%s12515_s1 + $0x740] sm:$0xff] }
  0x76   :  { %5729 = vmatprep.subr.bf16.mxu0 %v5728_v14  ;;  %682 = vmatmul.mubr.f32.gmra.mrb[20].mxu1 %v7656_v27  ;;  %v5738_v14 = vpack.c.bf16 %v342_v58, %v333_v55 }
  0x77   :  { %687 = vmatprep.mubr.f32.mxu1 %v7662_v28  ;;  %5783 = vmatpush1.bf16.msra.mxu1 %v5782_v59 }
  0x78   :  { %539 = vmatmul.mubr.f32.gmra.mrb[26].mxu0 %v7770_v26 }
  0x79   :  { %544 = vmatprep.mubr.f32.mxu0 %v7776_v29  ;;  %5731 = vmatpush1.bf16.msra.mxu0 %v5730_v30 }
  0x7a   :  { %5733 = vmatprep.subr.bf16.mxu0 %v5732_v38 }
  0x7c   :  { %545 = vmatmul.mubr.f32.gmra.mrb[28].mxu0 %v7808_v48 }
  0x7d   :  { %550 = vmatprep.mubr.f32.mxu0 %v7814_v51  ;;  %5735 = vmatpush1.bf16.msra.mxu0 %v5734_v54 }
  0x7e   :  { %12 = vsyncpa [#allocation3], 0  ;;  %5737 = vmatprep.subr.bf16.mxu0 %v5736_v60  ;;  %5785 = vmatprep.subr.bf16.mxu1 %v5784_v61  ;;  %v5788_v16 = vpack.c.bf16 %v291_v5, %v282_v0  ;;  %v281_v17 = vld [vmem:[%s12515_s1 + $0x6f0] sm:$0xff]  ;;  %v290_v20 = vld [vmem:[%s12515_s1 + $0x738] sm:$0xff]  ;;  %v5804_v23 = vpack.c.bf16 %v220_v12, %v211_v11 }
  0x7f   :  { %v67_v24 = vld [vmem:[%s12515_s1 + $0x40] sm:$0xff]  ;;  %688 = vmatmul.mubr.f32.gmra.mrb[22].mxu1 %v7694_v45  ;;  %v76_v25 = vld [vmem:[%s12515_s1 + $0x88] sm:$0xff]  ;;  %v309_v31 = vld [vmem:[%s12515_s1 + $0x7d0] sm:$0xff]  ;;  %v5790_v38 = vpack.c.bf16 %v290_v20, %v281_v17 }
  0x80   :  { %551 = vmatmul.mubr.f32.gmra.mrb[30].mxu0 %v7846_v13  ;;  %v300_v30 = vld [vmem:[%s12515_s1 + $0x788] sm:$0xff]  ;;  %693 = vmatprep.mubr.f32.mxu1 %v7700_v46  ;;  %v229_v32 = vld [vmem:[%s12515_s1 + $0x550] sm:$0xff]  ;;  %v238_v33 = vld [vmem:[%s12515_s1 + $0x598] sm:$0xff]  ;;  %v5806_v39 = vpack.c.bf16 %v76_v25, %v67_v24 }
  0x81   :  { %782 = vmatprep.mubr.f32.mxu0 %v7062_v10  ;;  %5739 = vmatpush1.bf16.msra.mxu0 %v5738_v14  ;;  %v5792_v40 = vpack.c.bf16 %v309_v31, %v300_v30  ;;  %v299_v41 = vld [vmem:[%s12515_s1 + $0x780] sm:$0xff]  ;;  %v308_v10 = vld [vmem:[%s12515_s1 + $0x7c8] sm:$0xff]  ;;  %v85_v42 = vld [vmem:[%s12515_s1 + $0xd0] sm:$0xff]  ;;  %v5808_v43 = vpack.c.bf16 %v238_v33, %v229_v32 }
  0x82   :  { %5787 = vmatpush1.bf16.msra.mxu1 %v5786_v15  ;;  %5805 = vmatprep.subr.bf16.mxu0 %v5804_v23  ;;  %v94_v44 = vld [vmem:[%s12515_s1 + $0x118] sm:$0xff]  ;;  %v327_v54 = vld [vmem:[%s12515_s1 + $0x860] sm:$0xff]  ;;  %v256_v58 = vld [vmem:[%s12515_s1 + $0x628] sm:$0xff]  ;;  %v5794_v59 = vpack.c.bf16 %v308_v10, %v299_v41 }
  0x83   :  { %5789 = vmatprep.subr.bf16.mxu1 %v5788_v16  ;;  %694 = vmatmul.mubr.f32.gmra.mrb[24].mxu1 %v7732_v3  ;;  %v318_v47 = vld [vmem:[%s12515_s1 + $0x818] sm:$0xff]  ;;  %v247_v55 = vld [vmem:[%s12515_s1 + $0x5e0] sm:$0xff]  ;;  %v5810_v60 = vpack.c.bf16 %v94_v44, %v85_v42  ;;  %v317_v62 = vld [vmem:[%s12515_s1 + $0x810] sm:$0xff] }
  0x84   :  { %699 = vmatprep.mubr.f32.mxu1 %v7738_v4  ;;  %783 = vmatmul.mubr.f32.vlgmr.msra.gmra.mrb[32].mxu0 %v7285_v56  ;;  %v5796_v61 = vpack.c.bf16 %v327_v54, %v318_v47  ;;  %v326_v63 = vld [vmem:[%s12515_s1 + $0x858] sm:$0xff]  ;;  %v103_v0 = vld [vmem:[%s12515_s1 + $0x160] sm:$0xff]  ;;  %v5812_v5 = vpack.c.bf16 %v256_v58, %v247_v55  ;;  %v112_v11 = vld [vmem:[%s12515_s1 + $0x1a8] sm:$0xff] }
  0x85   :  { %788 = vmatprep.mubr.f32.mxu0 %v7290_v57  ;;  %5807 = vmatpush3.bf16.msra.mxu0 %v5806_v39  ;;  %v336_v12 = vld [vmem:[%s12515_s1 + $0x8a8] sm:$0xff]  ;;  %v345_v14 = vld [vmem:[%s12515_s1 + $0x8f0] sm:$0xff]  ;;  %v274_v16 = vld [vmem:[%s12515_s1 + $0x6b8] sm:$0xff]  ;;  %v5798_v17 = vpack.c.bf16 %v326_v63, %v317_v62  ;;  %v5814_v20 = vpack.c.bf16 %v112_v11, %v103_v0 }
  0x86   :  { %5791 = vmatpush1.bf16.msra.mxu1 %v5790_v38  ;;  %5809 = vmatprep.subr.bf16.mxu0 %v5808_v43  ;;  %v265_v15 = vld [vmem:[%s12515_s1 + $0x670] sm:$0xff]  ;;  %v5800_v23 = vpack.c.bf16 %v345_v14, %v336_v12  ;;  %v335_v24 = vld [vmem:[%s12515_s1 + $0x8a0] sm:$0xff]  ;;  %v344_v25 = vld [vmem:[%s12515_s1 + $0x8e8] sm:$0xff] }
  0x87   :  { %5793 = vmatprep.subr.bf16.mxu1 %v5792_v40  ;;  %700 = vmatmul.mubr.f32.gmra.mrb[26].mxu1 %v7770_v26  ;;  %v121_v30 = vld [vmem:[%s12515_s1 + $0x1f0] sm:$0xff]  ;;  %v5816_v31 = vpack.c.bf16 %v274_v16, %v265_v15  ;;  %v130_v32 = vld [vmem:[%s12515_s1 + $0x238] sm:$0xff]  ;;  %v2050_v33 = vld [vmem:[%s12517_s3 + $0x8] sm:$0xff]  ;;  %v5802_v41 = vpack.c.bf16 %v344_v25, %v335_v24 }
  0x88   :  { %705 = vmatprep.mubr.f32.mxu1 %v7776_v29  ;;  %789 = vmatmul.mubr.f32.gmra.mrb[34].mxu0 %v7321_v6  ;;  %v2053_v38 = vld [vmem:[%s12517_s3 + $0x20] sm:$0xff]  ;;  %v292_v40 = vld [vmem:[%s12515_s1 + $0x748] sm:$0xff]  ;;  %v5818_v10 = vpack.c.bf16 %v130_v32, %v121_v30  ;;  %v301_v54 = vld [vmem:[%s12515_s1 + $0x790] sm:$0xff] }
  0x89   :  { %794 = vmatprep.mubr.f32.mxu0 %v7326_v7  ;;  %5811 = vmatpush3.bf16.msra.mxu0 %v5810_v60  ;;  %v283_v39 = vld [vmem:[%s12515_s1 + $0x700] sm:$0xff]  ;;  %v148_v43 = vld [vmem:[%s12515_s1 + $0x2c8] sm:$0xff]  ;;  %v5836_v44 = vpack.c.bf16 %v2053_v38, %v2050_v33  ;;  %v2052_v58 = vld [vmem:[%s12517_s3 + $0x18] sm:$0xff] }
  0x8a   :  { %5795 = vmatpush1.bf16.msra.mxu1 %v5794_v59  ;;  %5813 = vmatprep.subr.bf16.mxu0 %v5812_v5  ;;  %v139_v42 = vld [vmem:[%s12515_s1 + $0x280] sm:$0xff]  ;;  %v5820_v47 = vpack.c.bf16 %v292_v40, %v283_v39  ;;  %v7981_v59 = vld [vmem:[%s12514_s0 + $0x8] sm:$0xff]  ;;  %v310_v60 = vld [vmem:[%s12515_s1 + $0x7d8] sm:$0xff] }
  0x8b   :  { %5797 = vmatprep.subr.bf16.mxu1 %v5796_v61  ;;  %706 = vmatmul.mubr.f32.gmra.mrb[28].mxu1 %v7808_v48  ;;  %v2049_v55 = vld [vmem:[%s12517_s3] sm:$0xff]  ;;  %v2056_v61 = vld [vmem:[%s12517_s3 + $0x38] sm:$0xff]  ;;  %v2059_v62 = vld [vmem:[%s12517_s3 + $0x50] sm:$0xff]  ;;  %v5822_v63 = vpack.c.bf16 %v148_v43, %v139_v42  ;;  %v5824_v12 = vpack.c.bf16 %v310_v60, %v301_v54 }
  0x8c   :  { %711 = vmatprep.mubr.f32.mxu1 %v7814_v51  ;;  %795 = vmatmul.mubr.f32.gmra.mrb[36].mxu0 %v7357_v21  ;;  %v157_v0 = vld [vmem:[%s12515_s1 + $0x310] sm:$0xff]  ;;  %v166_v5 = vld [vmem:[%s12515_s1 + $0x358] sm:$0xff]  ;;  %v5838_v11 = vpack.c.bf16 %v2052_v58, %v2049_v55  ;;  %v319_v14 = vld [vmem:[%s12515_s1 + $0x820] sm:$0xff]  ;;  %v5840_v15 = vpack.c.bf16 %v2059_v62, %v2056_v61 }
  0x8d   :  { %800 = vmatprep.mubr.f32.mxu0 %v7362_v22  ;;  %5815 = vmatpush3.bf16.msra.mxu0 %v5814_v20  ;;  %v2055_v16 = vld [vmem:[%s12517_s3 + $0x30] sm:$0xff]  ;;  %v328_v20 = vld [vmem:[%s12515_s1 + $0x868] sm:$0xff]  ;;  %v2065_v24 = vld [vmem:[%s12517_s3 + $0x80] sm:$0xff]  ;;  %v5826_v25 = vpack.c.bf16 %v166_v5, %v157_v0 }
  0x8e   :  { %5799 = vmatpush1.bf16.msra.mxu1 %v5798_v17  ;;  %5817 = vmatprep.subr.bf16.mxu0 %v5816_v31  ;;  %v2058_v17 = vld [vmem:[%s12517_s3 + $0x48] sm:$0xff]  ;;  %v5828_v32 = vpack.c.bf16 %v328_v20, %v319_v14  ;;  %v337_v33 = vld [vmem:[%s12515_s1 + $0x8b0] sm:$0xff]  ;;  %v2061_v38 = vld [vmem:[%s12517_s3 + $0x60] sm:$0xff] }
  0x8f   :  { %5801 = vmatprep.subr.bf16.mxu1 %v5800_v23  ;;  %712 = vmatmul.mubr.f32.gmra.mrb[30].mxu1 %v7846_v13  ;;  %v2062_v23 = vld [vmem:[%s12517_s3 + $0x68] sm:$0xff]  ;;  %v5842_v31 = vpack.c.bf16 %v2058_v17, %v2055_v16  ;;  %v2064_v39 = vld [vmem:[%s12517_s3 + $0x78] sm:$0xff]  ;;  %v2077_v60 = vld [vmem:[%s12517_s3 + $0xe0] sm:$0xff] }
  0x90   :  { %801 = vmatmul.mubr.f32.gmra.mrb[38].mxu0 %v7393_v35  ;;  %943 = vmatprep.mubr.f32.mxu1 %v7981_v59  ;;  %v184_v30 = vld [vmem:[%s12515_s1 + $0x3e8] sm:$0xff]  ;;  %v346_v40 = vld [vmem:[%s12515_s1 + $0x8f8] sm:$0xff]  ;;  %v2099_v61 = vld [vmem:[%s12517_s3 + $0x190] sm:$0xff] }
  0x91   :  { %806 = vmatprep.mubr.f32.mxu0 %v7398_v37  ;;  %5819 = vmatpush3.bf16.msra.mxu0 %v5818_v10  ;;  %v2071_v10 = vld [vmem:[%s12517_s3 + $0xb0] sm:$0xff]  ;;  %v202_v43 = vld [vmem:[%s12515_s1 + $0x478] sm:$0xff]  ;;  %v2070_v55 = vld [vmem:[%s12517_s3 + $0xa8] sm:$0xff] }
  0x92   :  { %5803 = vmatpush1.bf16.msra.mxu1 %v5802_v41  ;;  %5821 = vmatprep.subr.bf16.mxu0 %v5820_v47  ;;  %v2068_v41 = vld [vmem:[%s12517_s3 + $0x98] sm:$0xff]  ;;  %v5832_v47 = vpack.c.bf16 %v346_v40, %v337_v33  ;;  %v2074_v58 = vld [vmem:[%s12517_s3 + $0xc8] sm:$0xff]  ;;  %v2073_v5 = vld [vmem:[%s12517_s3 + $0xc0] sm:$0xff] }
  0x93   :  { %5837 = vmatprep.subr.bf16.mxu1 %v5836_v44  ;;  %v5846_v44 = vpack.c.bf16 %v2064_v39, %v2061_v38  ;;  %v5848_v54 = vpack.c.bf16 %v2071_v10, %v2068_v41  ;;  %v2102_v62 = vld [vmem:[%s12517_s3 + $0x1a8] sm:$0xff]  ;;  %v5852_v0 = vpack.c.bf16 %v2077_v60, %v2074_v58  ;;  %v2083_v14 = vld [vmem:[%s12517_s3 + $0x110] sm:$0xff]  ;;  %v2089_v20 = vld [vmem:[%s12517_s3 + $0x140] sm:$0xff] }
  0x94   :  { %807 = vmatmul.mubr.f32.gmra.mrb[40].mxu0 %v7429_v49  ;;  %v2082_v17 = vld [vmem:[%s12517_s3 + $0x108] sm:$0xff]  ;;  %v2101_v33 = vld [vmem:[%s12517_s3 + $0x1a0] sm:$0xff]  ;;  %v2100_v39 = vld [vmem:[%s12517_s3 + $0x198] sm:$0xff] }
  0x95   :  { %944 = vmatmul.mubr.f32.vlgmr.msra.gmra.mrb[32].mxu1 %v7285_v56  ;;  %812 = vmatprep.mubr.f32.mxu0 %v7434_v50  ;;  %v175_v56 = vld [vmem:[%s12515_s1 + $0x3a0] sm:$0xff]  ;;  %v2107_v40 = vld [vmem:[%s12517_s3 + $0x1d0] sm:$0xff]  ;;  %v2118_v58 = vld [vmem:[%s12517_s3 + $0x228] sm:$0xff] }
  0x96   :  { %949 = vmatprep.mubr.f32.mxu1 %v7290_v57  ;;  %5823 = vmatpush3.bf16.msra.mxu0 %v5822_v63  ;;  %v5844_v57 = vpack.c.bf16 %v2065_v24, %v2062_v23  ;;  %v5830_v42 = vpack.c.bf16 %v184_v30, %v175_v56  ;;  %v2095_v56 = vld [vmem:[%s12517_s3 + $0x170] sm:$0xff]  ;;  %v2125_v60 = vld [vmem:[%s12517_s3 + $0x260] sm:$0xff] }
  0x97   :  { %5839 = vmatpush1.bf16.msra.mxu1 %v5838_v11  ;;  %5825 = vmatprep.subr.bf16.mxu0 %v5824_v12  ;;  %v2076_v11 = vld [vmem:[%s12517_s3 + $0xd8] sm:$0xff]  ;;  %v6096_v12 = vpack.c.bf16 %v2102_v62, %v2099_v61  ;;  %v2051_v61 = vld [vmem:[%s12517_s3 + $0x10] sm:$0xff]  ;;  %v2054_v62 = vld [vmem:[%s12517_s3 + $0x28] sm:$0xff] }
  0x98   :  { %5841 = vmatprep.subr.bf16.mxu1 %v5840_v15  ;;  %813 = vmatmul.mubr.f32.gmra.mrb[42].mxu0 %v7466_v1  ;;  %v5854_v15 = vpack.c.bf16 %v2076_v11, %v2073_v5  ;;  %v2121_v5 = vld [vmem:[%s12517_s3 + $0x240] sm:$0xff]  ;;  %v2124_v11 = vld [vmem:[%s12517_s3 + $0x258] sm:$0xff] }
  0x99   :  { %950 = vmatmul.mubr.f32.gmra.mrb[34].mxu1 %v7321_v6  ;;  %818 = vmatprep.mubr.f32.mxu0 %v7472_v2  ;;  %v193_v6 = vld [vmem:[%s12515_s1 + $0x430] sm:$0xff] }
  0x9a   :  { %955 = vmatprep.mubr.f32.mxu1 %v7326_v7  ;;  %5827 = vmatpush3.bf16.msra.mxu0 %v5826_v25  ;;  %v2067_v7 = vld [vmem:[%s12517_s3 + $0x90] sm:$0xff]  ;;  %v5834_v63 = vpack.c.bf16 %v202_v43, %v193_v6  ;;  %v2088_v25 = vld [vmem:[%s12517_s3 + $0x138] sm:$0xff]  ;;  %v2113_v6 = vld [vmem:[%s12517_s3 + $0x200] sm:$0xff] }
  0x9b   :  { %5843 = vmatpush1.bf16.msra.mxu1 %v5842_v31  ;;  %5829 = vmatprep.subr.bf16.mxu0 %v5828_v32  ;;  %v2094_v32 = vld [vmem:[%s12517_s3 + $0x168] sm:$0xff] }
  0x9c   :  { %5845 = vmatprep.subr.bf16.mxu1 %v5844_v57  ;;  %819 = vmatmul.mubr.f32.gmra.mrb[44].mxu0 %v7504_v18 }
  0x9d   :  { %956 = vmatmul.mubr.f32.gmra.mrb[36].mxu1 %v7357_v21  ;;  %824 = vmatprep.mubr.f32.mxu0 %v7510_v19  ;;  %v5850_v21 = vpack.c.bf16 %v2070_v55, %v2067_v7 }
  0x9e   :  { %961 = vmatprep.mubr.f32.mxu1 %v7362_v22  ;;  %5831 = vmatpush3.bf16.msra.mxu0 %v5830_v42  ;;  %v2080_v22 = vld [vmem:[%s12517_s3 + $0xf8] sm:$0xff]  ;;  %v2106_v42 = vld [vmem:[%s12517_s3 + $0x1c8] sm:$0xff] }
  0x9f   :  { %5847 = vmatpush1.bf16.msra.mxu1 %v5846_v44  ;;  %5833 = vmatprep.subr.bf16.mxu0 %v5832_v47  ;;  %v5856_v16 = vpack.c.bf16 %v2083_v14, %v2080_v22  ;;  %v2112_v47 = vld [vmem:[%s12517_s3 + $0x1f8] sm:$0xff]  ;;  %v2131_v14 = vld [vmem:[%s12517_s3 + $0x290] sm:$0xff] }
  0xa0   :  { %5849 = vmatprep.subr.bf16.mxu1 %v5848_v54  ;;  %825 = vmatmul.mubr.f32.gmra.mrb[46].mxu0 %v7542_v34  ;;  %v2119_v54 = vld [vmem:[%s12517_s3 + $0x230] sm:$0xff]  ;;  %v2128_v22 = vld [vmem:[%s12517_s3 + $0x278] sm:$0xff] }
  0xa1   :  { %962 = vmatmul.mubr.f32.gmra.mrb[38].mxu1 %v7393_v35  ;;  %830 = vmatprep.mubr.f32.mxu0 %v7548_v36  ;;  %v2079_v35 = vld [vmem:[%s12517_s3 + $0xf0] sm:$0xff] }
  0xa2   :  { %967 = vmatprep.mubr.f32.mxu1 %v7398_v37  ;;  %5835 = vmatpush3.bf16.msra.mxu0 %v5834_v63  ;;  %v2086_v37 = vld [vmem:[%s12517_s3 + $0x128] sm:$0xff]  ;;  %v5858_v23 = vpack.c.bf16 %v2082_v17, %v2079_v35  ;;  %v2060_v35 = vld [vmem:[%s12517_s3 + $0x58] sm:$0xff]  ;;  %v5886_v17 = vpack.c.bf16 %v2124_v11, %v2121_v5  ;;  %v6819_v5 = vld [vmem:[%s12514_s0 + $0x30] sm:$0xff] }
  0xa3   :  { %5851 = vmatpush1.bf16.msra.mxu1 %v5850_v21  ;;  %6097 = vmatprep.subr.bf16.mxu0 %v6096_v12  ;;  %v5860_v24 = vpack.c.bf16 %v2089_v20, %v2086_v37  ;;  %v2105_v21 = vld [vmem:[%s12517_s3 + $0x1c0] sm:$0xff]  ;;  %v2108_v12 = vld [vmem:[%s12517_s3 + $0x1d8] sm:$0xff]  ;;  %v2111_v20 = vld [vmem:[%s12517_s3 + $0x1f0] sm:$0xff] }
  0xa4   :  { %5853 = vmatprep.subr.bf16.mxu1 %v5852_v0  ;;  %831 = vmatmul.mubr.f32.gmra.mrb[48].mxu0 %v7580_v52  ;;  %v6100_v37 = vpack.c.bf16 %v2108_v12, %v2105_v21  ;;  %v2078_v21 = vld [vmem:[%s12517_s3 + $0xe8] sm:$0xff]  ;;  %v2129_v11 = vld [vmem:[%s12517_s3 + $0x280] sm:$0xff]  ;;  %v2132_v12 = vld [vmem:[%s12517_s3 + $0x298] sm:$0xff] }
  0xa5   :  { %968 = vmatmul.mubr.f32.gmra.mrb[40].mxu1 %v7429_v49  ;;  %836 = vmatprep.mubr.f32.mxu0 %v7586_v53  ;;  %v2085_v49 = vld [vmem:[%s12517_s3 + $0x120] sm:$0xff] }
  0xa6   :  { %973 = vmatprep.mubr.f32.mxu1 %v7434_v50  ;;  %v2092_v50 = vld [vmem:[%s12517_s3 + $0x158] sm:$0xff]  ;;  %v5862_v30 = vpack.c.bf16 %v2088_v25, %v2085_v49  ;;  %v6813_v49 = vld [vmem:[%s12514_s0] sm:$0xff]  ;;  %v2114_v25 = vld [vmem:[%s12517_s3 + $0x208] sm:$0xff] }
  0xa7   :  { %5855 = vmatpush1.bf16.msra.mxu1 %v5854_v15  ;;  %v5864_v31 = vpack.c.bf16 %v2095_v56, %v2092_v50  ;;  %v6098_v15 = vpack.c.bf16 %v2054_v62, %v2051_v61  ;;  %v2134_v50 = vld [vmem:[%s12517_s3 + $0x2a8] sm:$0xff]  ;;  %v2137_v56 = vld [vmem:[%s12517_s3 + $0x2c0] sm:$0xff] }
  0xa8   :  { %5857 = vmatprep.subr.bf16.mxu1 %v5856_v16  ;;  %837 = vmatmul.mubr.f32.gmra.mrb[50].mxu0 %v7618_v8  ;;  %v2057_v16 = vld [vmem:[%s12517_s3 + $0x40] sm:$0xff] }
  0xa9   :  { %974 = vmatmul.mubr.f32.gmra.mrb[42].mxu1 %v7466_v1  ;;  %842 = vmatprep.mubr.f32.mxu0 %v7624_v9  ;;  %v2091_v1 = vld [vmem:[%s12517_s3 + $0x150] sm:$0xff] }
  0xaa   :  { %979 = vmatprep.mubr.f32.mxu1 %v7472_v2  ;;  %v2098_v2 = vld [vmem:[%s12517_s3 + $0x188] sm:$0xff]  ;;  %v5866_v57 = vpack.c.bf16 %v2094_v32, %v2091_v1  ;;  %v2063_v1 = vld [vmem:[%s12517_s3 + $0x70] sm:$0xff] }
  0xab   :  { %5859 = vmatpush1.bf16.msra.mxu1 %v5858_v23  ;;  %v5868_v38 = vpack.c.bf16 %v2101_v33, %v2098_v2  ;;  %v2127_v23 = vld [vmem:[%s12517_s3 + $0x270] sm:$0xff]  ;;  %v2066_v32 = vld [vmem:[%s12517_s3 + $0x88] sm:$0xff]  ;;  %v6104_v33 = vpack.c.bf16 %v2114_v25, %v2111_v20 }
  0xac   :  { %5861 = vmatprep.subr.bf16.mxu1 %v5860_v24  ;;  %843 = vmatmul.mubr.f32.gmra.mrb[52].mxu0 %v7656_v27  ;;  %v2130_v24 = vld [vmem:[%s12517_s3 + $0x288] sm:$0xff] }
  0xad   :  { %980 = vmatmul.mubr.f32.gmra.mrb[44].mxu1 %v7504_v18  ;;  %848 = vmatprep.mubr.f32.mxu0 %v7662_v28  ;;  %v2097_v18 = vld [vmem:[%s12517_s3 + $0x180] sm:$0xff]  ;;  %v5890_v2 = vpack.c.bf16 %v2130_v24, %v2127_v23  ;;  %v2138_v20 = vld [vmem:[%s12517_s3 + $0x2c8] sm:$0xff] }
  0xae   :  { %985 = vmatprep.mubr.f32.mxu1 %v7510_v19  ;;  %v2104_v19 = vld [vmem:[%s12517_s3 + $0x1b8] sm:$0xff]  ;;  %v5870_v41 = vpack.c.bf16 %v2100_v39, %v2097_v18  ;;  %v2133_v18 = vld [vmem:[%s12517_s3 + $0x2a0] sm:$0xff]  ;;  %v2090_v25 = vld [vmem:[%s12517_s3 + $0x148] sm:$0xff] }
  0xaf   :  { %5863 = vmatpush1.bf16.msra.mxu1 %v5862_v30  ;;  %v5872_v10 = vpack.c.bf16 %v2107_v40, %v2104_v19  ;;  %v6814_v30 = vld [vmem:[%s12514_s0 + $0x18] sm:$0xff]  ;;  %v6815_v19 = vld [vmem:[%s12514_s0 + $0x10] sm:$0xff] }
  0xb0   :  { %5865 = vmatprep.subr.bf16.mxu1 %v5864_v31  ;;  %849 = vmatmul.mubr.f32.gmra.mrb[54].mxu0 %v7694_v45  ;;  %v6102_v31 = vpack.c.bf16 %v2060_v35, %v2057_v16  ;;  %v2136_v39 = vld [vmem:[%s12517_s3 + $0x2b8] sm:$0xff]  ;;  %v2081_v16 = vld [vmem:[%s12517_s3 + $0x100] sm:$0xff] }
  0xb1   :  { %986 = vmatmul.mubr.f32.gmra.mrb[46].mxu1 %v7542_v34  ;;  %854 = vmatprep.mubr.f32.mxu0 %v7700_v46  ;;  %v2103_v34 = vld [vmem:[%s12517_s3 + $0x1b0] sm:$0xff]  ;;  %v2120_v40 = vld [vmem:[%s12517_s3 + $0x238] sm:$0xff] }
  0xb2   :  { %991 = vmatprep.mubr.f32.mxu1 %v7548_v36  ;;  %v2110_v36 = vld [vmem:[%s12517_s3 + $0x1e8] sm:$0xff]  ;;  %v5874_v43 = vpack.c.bf16 %v2106_v42, %v2103_v34  ;;  %v6106_v42 = vpack.c.bf16 %v2066_v32, %v2063_v1  ;;  %v2084_v35 = vld [vmem:[%s12517_s3 + $0x118] sm:$0xff] }
  0xb3   :  { %5867 = vmatpush1.bf16.msra.mxu1 %v5866_v57  ;;  %v5876_v44 = vpack.c.bf16 %v2113_v6, %v2110_v36  ;;  %v2117_v57 = vld [vmem:[%s12517_s3 + $0x220] sm:$0xff]  ;;  %v6816_v34 = vld [vmem:[%s12514_s0 + $0x28] sm:$0xff]  ;;  %v2072_v6 = vld [vmem:[%s12517_s3 + $0xb8] sm:$0xff]  ;;  %v6118_v23 = vpack.c.bf16 %v2084_v35, %v2081_v16 }
  0xb4   :  { %5869 = vmatprep.subr.bf16.mxu1 %v5868_v38  ;;  %855 = vmatmul.mubr.f32.gmra.mrb[56].mxu0 %v7732_v3  ;;  %v5892_v38 = vpack.c.bf16 %v2137_v56, %v2134_v50  ;;  %v2069_v36 = vld [vmem:[%s12517_s3 + $0xa0] sm:$0xff]  ;;  %v6823_v50 = vld [vmem:[%s12514_s0 + $0x50] sm:$0xff]  ;;  %v8739_v35 = vld [vmem:[%s12517_s3 + $0x4f8] sm:$0xff] }
  0xb5   :  { %992 = vmatmul.mubr.f32.gmra.mrb[48].mxu1 %v7580_v52  ;;  %860 = vmatprep.mubr.f32.mxu0 %v7738_v4  ;;  %v2109_v52 = vld [vmem:[%s12517_s3 + $0x1e0] sm:$0xff]  ;;  %12633 = vst [vmem:[#allocation33_spill] sm:$0xff] %v8739_v35  ;;  %v8781_v16 = vld [vmem:[%s12517_s3 + $0x510] sm:$0xff] }
  0xb6   :  { %997 = vmatprep.mubr.f32.mxu1 %v7586_v53  ;;  %v2116_v53 = vld [vmem:[%s12517_s3 + $0x218] sm:$0xff]  ;;  %v5878_v7 = vpack.c.bf16 %v2112_v47, %v2109_v52  ;;  %v2123_v52 = vld [vmem:[%s12517_s3 + $0x250] sm:$0xff]  ;;  %v2141_v56 = vld [vmem:[%s12517_s3 + $0x2e0] sm:$0xff]  ;;  %12636 = vst [vmem:[#allocation36_spill] sm:$0xff] %v8781_v16 }
  0xb7   :  { %5871 = vmatpush1.bf16.msra.mxu1 %v5870_v41  ;;  %v5880_v55 = vpack.c.bf16 %v2119_v54, %v2116_v53  ;;  %v2140_v41 = vld [vmem:[%s12517_s3 + $0x2d8] sm:$0xff]  ;;  %v2139_v53 = vld [vmem:[%s12517_s3 + $0x2d0] sm:$0xff]  ;;  %v2142_v54 = vld [vmem:[%s12517_s3 + $0x2e8] sm:$0xff] }
  0xb8   :  { %5873 = vmatprep.subr.bf16.mxu1 %v5872_v10  ;;  %861 = vmatmul.mubr.f32.gmra.mrb[58].mxu0 %v7770_v26  ;;  %v2143_v10 = vld [vmem:[%s12517_s3 + $0x2f0] sm:$0xff]  ;;  %v5898_v61 = vpack.c.bf16 %v2142_v54, %v2139_v53  ;;  %v8494_v53 = vld [vmem:[%s12517_s3 + $0x378] sm:$0xff] }
  0xb9   :  { %998 = vmatmul.mubr.f32.gmra.mrb[50].mxu1 %v7618_v8  ;;  %866 = vmatprep.mubr.f32.mxu0 %v7776_v29  ;;  %v2115_v8 = vld [vmem:[%s12517_s3 + $0x210] sm:$0xff]  ;;  %v5896_v47 = vpack.c.bf16 %v2143_v10, %v2140_v41  ;;  %v6828_v10 = vld [vmem:[%s12514_s0 + $0x88] sm:$0xff] }
  0xba   :  { %1003 = vmatprep.mubr.f32.mxu1 %v7624_v9  ;;  %v2122_v9 = vld [vmem:[%s12517_s3 + $0x248] sm:$0xff]  ;;  %v5882_v63 = vpack.c.bf16 %v2118_v58, %v2115_v8  ;;  %v2149_v58 = vld [vmem:[%s12517_s3 + $0x320] sm:$0xff]  ;;  %v6827_v41 = vld [vmem:[%s12514_s0 + $0x70] sm:$0xff] }
  0xbb   :  { %5875 = vmatpush1.bf16.msra.mxu1 %v5874_v43  ;;  %v5884_v0 = vpack.c.bf16 %v2125_v60, %v2122_v9  ;;  %v5894_v43 = vpack.c.bf16 %v2136_v39, %v2133_v18  ;;  %v2146_v8 = vld [vmem:[%s12517_s3 + $0x308] sm:$0xff]  ;;  %v6818_v9 = vld [vmem:[%s12514_s0 + $0x38] sm:$0xff]  ;;  %v6110_v60 = vpack.c.bf16 %v2072_v6, %v2069_v36  ;;  %v6831_v36 = vld [vmem:[%s12514_s0 + $0x90] sm:$0xff] }
  0xbc   :  { %5877 = vmatprep.subr.bf16.mxu1 %v5876_v44  ;;  %867 = vmatmul.mubr.f32.gmra.mrb[60].mxu0 %v7808_v48  ;;  %v6108_v44 = vpack.c.bf16 %v2120_v40, %v2117_v57  ;;  %v6825_v57 = vld [vmem:[%s12514_s0 + $0x60] sm:$0xff]  ;;  %v2198_v18 = vld [vmem:[%s12517_s3 + $0x4a8] sm:$0xff]  ;;  %v6826_v39 = vld [vmem:[%s12514_s0 + $0x78] sm:$0xff] }
  0xbd   :  { %1004 = vmatmul.mubr.f32.gmra.mrb[52].mxu1 %v7656_v27  ;;  %872 = vmatprep.mubr.f32.mxu0 %v7814_v51  ;;  %v6832_v6 = vld [vmem:[%s12514_s0 + $0xa8] sm:$0xff] }
  0xbe   :  { %1009 = vmatprep.mubr.f32.mxu1 %v7662_v28 }
  0xbf   :  { %5879 = vmatpush1.bf16.msra.mxu1 %v5878_v7  ;;  %v6817_v7 = vld [vmem:[%s12514_s0 + $0x20] sm:$0xff] }
  0xc0   :  { %5881 = vmatprep.subr.bf16.mxu1 %v5880_v55  ;;  %873 = vmatmul.mubr.f32.gmra.mrb[62].mxu0 %v7846_v13  ;;  %v2126_v55 = vld [vmem:[%s12517_s3 + $0x268] sm:$0xff] }
  0xc1   :  { %1010 = vmatmul.mubr.f32.gmra.mrb[54].mxu1 %v7694_v45  ;;  %1104 = vmatprep.mubr.f32.mxu0 %v7981_v59  ;;  %v5888_v59 = vpack.c.bf16 %v2131_v14, %v2128_v22  ;;  %v6112_v62 = vpack.c.bf16 %v2126_v55, %v2123_v52  ;;  %v6820_v22 = vld [vmem:[%s12514_s0 + $0x48] sm:$0xff]  ;;  %v8484_v52 = vld [vmem:[%s12517_s3 + $0x380] sm:$0xff]  ;;  %v8509_v55 = vld [vmem:[%s12517_s3 + $0x3b0] sm:$0xff] }
  0xc2   :  { %1015 = vmatprep.mubr.f32.mxu1 %v7700_v46 }
  0xc3   :  { %5883 = vmatpush1.bf16.msra.mxu1 %v5882_v63  ;;  %v2075_v63 = vld [vmem:[%s12517_s3 + $0xd0] sm:$0xff] }
  0xc4   :  { %5885 = vmatprep.subr.bf16.mxu1 %v5884_v0  ;;  %1105 = vmatmul.mubr.f32.vlgmr.msra.gmra.mrb[64].mxu0 %v6813_v49  ;;  %v5900_v0 = vpack.c.bf16 %v2149_v58, %v2146_v8  ;;  %v6114_v14 = vpack.c.bf16 %v2078_v21, %v2075_v63  ;;  %v2087_v49 = vld [vmem:[%s12517_s3 + $0x130] sm:$0xff]  ;;  %v8519_v58 = vld [vmem:[%s12517_s3 + $0x3a8] sm:$0xff]  ;;  %v8544_v63 = vld [vmem:[%s12517_s3 + $0x3f8] sm:$0xff] }
  0xc5   :  { %1016 = vmatmul.mubr.f32.gmra.mrb[56].mxu1 %v7732_v3  ;;  %1109 = vmatprep.mubr.f32.mxu0 %v6814_v30  ;;  %v2144_v30 = vld [vmem:[%s12517_s3 + $0x2f8] sm:$0xff]  ;;  %v6122_v1 = vpack.c.bf16 %v2090_v25, %v2087_v49  ;;  %v8514_v8 = vld [vmem:[%s12517_s3 + $0x390] sm:$0xff]  ;;  %12608 = vst [vmem:[#allocation8_spill] sm:$0xff] %v8544_v63 }
  0xc6   :  { %1021 = vmatprep.mubr.f32.mxu1 %v7738_v4  ;;  %6099 = vmatpush3.bf16.msra.mxu0 %v6098_v15  ;;  %v6116_v15 = vpack.c.bf16 %v2132_v12, %v2129_v11  ;;  %v6124_v32 = vpack.c.bf16 %v2144_v30, %v2141_v56  ;;  %v8549_v21 = vld [vmem:[%s12517_s3 + $0x410] sm:$0xff]  ;;  %v8561_v12 = vld [vmem:[%s12517_s3 + $0x408] sm:$0xff] }
  0xc7   :  { %5887 = vmatpush1.bf16.msra.mxu1 %v5886_v17  ;;  %6101 = vmatprep.subr.bf16.mxu0 %v6100_v37  ;;  %v6821_v17 = vld [vmem:[%s12514_s0 + $0x40] sm:$0xff]  ;;  %v2135_v37 = vld [vmem:[%s12517_s3 + $0x2b0] sm:$0xff]  ;;  %12609 = vst [vmem:[#allocation9_spill] sm:$0xff] %v8549_v21  ;;  %12611 = vst [vmem:[#allocation11_spill] sm:$0xff] %v8561_v12 }
  0xc8   :  { %5889 = vmatprep.subr.bf16.mxu1 %v5888_v59  ;;  %1110 = vmatmul.mubr.f32.gmra.mrb[66].mxu0 %v6815_v19  ;;  %v6822_v59 = vld [vmem:[%s12514_s0 + $0x58] sm:$0xff]  ;;  %v6120_v24 = vpack.c.bf16 %v2138_v20, %v2135_v37  ;;  %v8556_v11 = vld [vmem:[%s12517_s3 + $0x3f0] sm:$0xff]  ;;  %v8579_v37 = vld [vmem:[%s12517_s3 + $0x440] sm:$0xff] }
  0xc9   :  { %1022 = vmatmul.mubr.f32.gmra.mrb[58].mxu1 %v7770_v26  ;;  %1114 = vmatprep.mubr.f32.mxu0 %v6816_v34  ;;  %v6829_v34 = vld [vmem:[%s12514_s0 + $0x80] sm:$0xff]  ;;  %12610 = vst [vmem:[#allocation10_spill] sm:$0xff] %v8556_v11  ;;  %12613 = vst [vmem:[#allocation13_spill] sm:$0xff] %v8579_v37  ;;  %v8607_v56 = vld [vmem:[%s12517_s3 + $0x470] sm:$0xff] }
  0xca   :  { %1027 = vmatprep.mubr.f32.mxu1 %v7776_v29  ;;  %6103 = vmatpush3.bf16.msra.mxu0 %v6102_v31  ;;  %v6824_v31 = vld [vmem:[%s12514_s0 + $0x68] sm:$0xff]  ;;  %v8584_v20 = vld [vmem:[%s12517_s3 + $0x420] sm:$0xff]  ;;  %12617 = vst [vmem:[#allocation17_spill] sm:$0xff] %v8607_v56  ;;  %v8612_v30 = vld [vmem:[%s12517_s3 + $0x450] sm:$0xff] }
  0xcb   :  { %5891 = vmatpush1.bf16.msra.mxu1 %v5890_v2  ;;  %6105 = vmatprep.subr.bf16.mxu0 %v6104_v33  ;;  %v2093_v2 = vld [vmem:[%s12517_s3 + $0x160] sm:$0xff]  ;;  %v2096_v33 = vld [vmem:[%s12517_s3 + $0x178] sm:$0xff]  ;;  %12614 = vst [vmem:[#allocation14_spill] sm:$0xff] %v8584_v20  ;;  %12618 = vst [vmem:[#allocation18_spill] sm:$0xff] %v8612_v30 }
  0xcc   :  { %5893 = vmatprep.subr.bf16.mxu1 %v5892_v38  ;;  %1115 = vmatmul.mubr.f32.gmra.mrb[68].mxu0 %v6817_v7  ;;  %v2195_v38 = vld [vmem:[%s12517_s3 + $0x490] sm:$0xff]  ;;  %v6126_v19 = vpack.c.bf16 %v2096_v33, %v2093_v2  ;;  %v8504_v7 = vld [vmem:[%s12517_s3 + $0x398] sm:$0xff]  ;;  %v8808_v20 = vld [vmem:[%s12517_s3 + $0x3a0] sm:$0xff] }
  0xcd   :  { %1028 = vmatmul.mubr.f32.gmra.mrb[60].mxu1 %v7808_v48  ;;  %1119 = vmatprep.mubr.f32.mxu0 %v6818_v9  ;;  %v6128_v40 = vpack.c.bf16 %v2198_v18, %v2195_v38  ;;  %v8524_v9 = vld [vmem:[%s12517_s3 + $0x3c8] sm:$0xff]  ;;  %v8639_v18 = vld [vmem:[%s12517_s3 + $0x480] sm:$0xff]  ;;  %v8896_v11 = vld [vmem:[%s12517_s3 + $0x570] sm:$0xff] }
  0xce   :  { %1033 = vmatprep.mubr.f32.mxu1 %v7814_v51  ;;  %6107 = vmatpush3.bf16.msra.mxu0 %v6106_v42  ;;  %v6830_v42 = vld [vmem:[%s12514_s0 + $0x98] sm:$0xff]  ;;  %12622 = vst [vmem:[#allocation22_spill] sm:$0xff] %v8639_v18  ;;  %v8830_v18 = vld [vmem:[%s12517_s3 + $0x560] sm:$0xff]  ;;  %12646 = vst [vmem:[#allocation46_spill] sm:$0xff] %v8896_v11 }
  0xcf   :  { %5895 = vmatpush1.bf16.msra.mxu1 %v5894_v43  ;;  %6109 = vmatprep.subr.bf16.mxu0 %v6108_v44  ;;  %v8479_v44 = vld [vmem:[%s12517_s3 + $0x368] sm:$0xff]  ;;  %12639 = vst [vmem:[#allocation39_spill] sm:$0xff] %v8830_v18  ;;  %v8945_v18 = vld [vmem:[%s12517_s3 + $0x5c0] sm:$0xff]  ;;  %v8967_v63 = vld [vmem:[%s12517_s3 + $0x5b0] sm:$0xff] }
  0xd0   :  { %5897 = vmatprep.subr.bf16.mxu1 %v5896_v47  ;;  %1120 = vmatmul.mubr.f32.gmra.mrb[70].mxu0 %v6819_v5  ;;  %v8489_v47 = vld [vmem:[%s12517_s3 + $0x360] sm:$0xff]  ;;  %v8786_v5 = vld [vmem:[%s12517_s3 + $0x528] sm:$0xff]  ;;  %12653 = vst [vmem:[#allocation53_spill] sm:$0xff] %v8945_v18  ;;  %12656 = vst [vmem:[#allocation56_spill] sm:$0xff] %v8967_v63 }
  0xd1   :  { %1034 = vmatmul.mubr.f32.gmra.mrb[62].mxu1 %v7846_v13  ;;  %1124 = vmatprep.mubr.f32.mxu0 %v6820_v22  ;;  %v8566_v22 = vld [vmem:[%s12517_s3 + $0x428] sm:$0xff]  ;;  %12637 = vst [vmem:[#allocation37_spill] sm:$0xff] %v8786_v5 }
  0xd2   :  { %6111 = vmatpush3.bf16.msra.mxu0 %v6110_v60  ;;  %v8529_v60 = vld [vmem:[%s12517_s3 + $0x3e0] sm:$0xff]  ;;  %12612 = vst [vmem:[#allocation12_spill] sm:$0xff] %v8566_v22  ;;  %v8879_v22 = vld [vmem:[%s12517_s3 + $0x578] sm:$0xff]  ;;  %v8901_v12 = vld [vmem:[%s12517_s3 + $0x588] sm:$0xff] }
  0xd3   :  { %5899 = vmatpush1.bf16.msra.mxu1 %v5898_v61  ;;  %6113 = vmatprep.subr.bf16.mxu0 %v6112_v62  ;;  %v8534_v61 = vld [vmem:[%s12517_s3 + $0x3c0] sm:$0xff]  ;;  %v8539_v62 = vld [vmem:[%s12517_s3 + $0x3d8] sm:$0xff]  ;;  %12644 = vst [vmem:[#allocation44_spill] sm:$0xff] %v8879_v22  ;;  %12647 = vst [vmem:[#allocation47_spill] sm:$0xff] %v8901_v12 }
  0xd4   :  { %5901 = vmatprep.subr.bf16.mxu1 %v5900_v0  ;;  %1125 = vmatmul.mubr.f32.gmra.mrb[72].mxu0 %v6821_v17  ;;  %12606 = vst [vmem:[#allocation6_spill] sm:$0xff] %v8534_v61  ;;  %12607 = vst [vmem:[#allocation7_spill] sm:$0xff] %v8539_v62  ;;  %v8996_v12 = vld [vmem:[%s12517_s3 + $0x448] sm:$0xff] }
  0xd5   :  { %1129 = vmatprep.mubr.f32.mxu0 %v6822_v59  ;;  %v8589_v59 = vld [vmem:[%s12517_s3 + $0x438] sm:$0xff] }
  0xd6   :  { %6115 = vmatpush3.bf16.msra.mxu0 %v6114_v14  ;;  %12615 = vst [vmem:[#allocation15_spill] sm:$0xff] %v8589_v59  ;;  %v8813_v59 = vld [vmem:[%s12517_s3 + $0x3b8] sm:$0xff] }
  0xd7   :  { %6117 = vmatprep.subr.bf16.mxu0 %v6116_v15 }
  0xd8   :  { %1130 = vmatmul.mubr.f32.gmra.mrb[74].mxu0 %v6823_v50  ;;  %v8602_v50 = vld [vmem:[%s12517_s3 + $0x458] sm:$0xff] }
  0xd9   :  { %1134 = vmatprep.mubr.f32.mxu0 %v6824_v31  ;;  %12616 = vst [vmem:[#allocation16_spill] sm:$0xff] %v8602_v50  ;;  %v8617_v31 = vld [vmem:[%s12517_s3 + $0x468] sm:$0xff] }
  0xda   :  { %6119 = vmatpush3.bf16.msra.mxu0 %v6118_v23  ;;  %12619 = vst [vmem:[#allocation19_spill] sm:$0xff] %v8617_v31  ;;  %v8818_v31 = vld [vmem:[%s12517_s3 + $0x548] sm:$0xff] }
  0xdb   :  { %6121 = vmatprep.subr.bf16.mxu0 %v6120_v24  ;;  %v8734_v24 = vld [vmem:[%s12517_s3 + $0x4e0] sm:$0xff]  ;;  %12638 = vst [vmem:[#allocation38_spill] sm:$0xff] %v8818_v31  ;;  %v8940_v31 = vld [vmem:[%s12517_s3 + $0x5a8] sm:$0xff] }
  0xdc   :  { %1135 = vmatmul.mubr.f32.gmra.mrb[76].mxu0 %v6825_v57  ;;  %v8706_v57 = vld [vmem:[%s12517_s3 + $0x340] sm:$0xff]  ;;  %12632 = vst [vmem:[#allocation32_spill] sm:$0xff] %v8734_v24  ;;  %12652 = vst [vmem:[#allocation52_spill] sm:$0xff] %v8940_v31 }
  0xdd   :  { %1139 = vmatprep.mubr.f32.mxu0 %v6826_v39  ;;  %v8644_v39 = vld [vmem:[%s12517_s3 + $0x498] sm:$0xff] }
  0xde   :  { %6123 = vmatpush3.bf16.msra.mxu0 %v6122_v1  ;;  %v8622_v1 = vld [vmem:[%s12517_s3 + $0x488] sm:$0xff]  ;;  %12623 = vst [vmem:[#allocation23_spill] sm:$0xff] %v8644_v39  ;;  %v8835_v39 = vld [vmem:[%s12517_s3 + $0x540] sm:$0xff] }
  0xdf   :  { %6125 = vmatprep.subr.bf16.mxu0 %v6124_v32  ;;  %12620 = vst [vmem:[#allocation20_spill] sm:$0xff] %v8622_v1  ;;  %v8627_v32 = vld [vmem:[%s12517_s3 + $0x4a0] sm:$0xff]  ;;  %v8796_v1 = vld [vmem:[%s12517_s3 + $0x538] sm:$0xff]  ;;  %12640 = vst [vmem:[#allocation40_spill] sm:$0xff] %v8835_v39 }
  0xe0   :  { %1140 = vmatmul.mubr.f32.gmra.mrb[78].mxu0 %v6827_v41  ;;  %12621 = vst [vmem:[#allocation21_spill] sm:$0xff] %v8627_v32  ;;  %v8659_v41 = vld [vmem:[%s12517_s3 + $0x4b8] sm:$0xff]  ;;  %v8957_v39 = vld [vmem:[%s12517_s3 + $0x5a0] sm:$0xff] }
  0xe1   :  { %1144 = vmatprep.mubr.f32.mxu0 %v6828_v10  ;;  %12624 = vst [vmem:[#allocation24_spill] sm:$0xff] %v8659_v41  ;;  %v8664_v10 = vld [vmem:[%s12517_s3 + $0x4d0] sm:$0xff]  ;;  %12654 = vst [vmem:[#allocation54_spill] sm:$0xff] %v8957_v39 }
  0xe2   :  { %6127 = vmatpush3.bf16.msra.mxu0 %v6126_v19  ;;  %v8649_v19 = vld [vmem:[%s12517_s3 + $0x310] sm:$0xff]  ;;  %12625 = vst [vmem:[#allocation25_spill] sm:$0xff] %v8664_v10 }
  0xe3   :  { %6129 = vmatprep.subr.bf16.mxu0 %v6128_v40  ;;  %v8654_v40 = vld [vmem:[%s12517_s3 + $0x328] sm:$0xff]  ;;  %v8884_v10 = vld [vmem:[%s12517_s3 + $0x590] sm:$0xff] }
  0xe4   :  { %1145 = vmatmul.mubr.f32.gmra.mrb[80].mxu0 %v6829_v34  ;;  %12645 = vst [vmem:[#allocation45_spill] sm:$0xff] %v8884_v10  ;;  %v8991_v10 = vld [vmem:[%s12517_s3 + $0x430] sm:$0xff] }
  0xe5   :  { %1149 = vmatprep.mubr.f32.mxu0 %v6830_v42 }
  0xe8   :  { %1150 = vmatmul.mubr.f32.gmra.mrb[82].mxu0 %v6831_v36 }
  0xe9   :  { %1154 = vmatprep.mubr.f32.mxu0 %v6832_v6 }
  0xec   :  { %1155 = vmatmul.mubr.f32.gmra.mrb[84].mxu0 %v7656_v27  ;;  %v351_v27 = vlaneseq }
  0xed   :  { %1159 = vmatprep.mubr.f32.mxu0 %v7662_v28 }
  0xee   :  { %v8432_v28 = vshrl.u32 %v351_v27, 7 }
  0xf0   :  { %1160 = vmatmul.mubr.f32.gmra.mrb[86].mxu0 %v7694_v45  ;;  %12605 = vst [vmem:[#allocation5_spill] sm:$0xff] %v8432_v28  ;;  %v12523_v45 = vsub.s32 0, %v8432_v28  ;;  %v12524_v17 = vsub.s32 2, %v8432_v28  ;;  %v365_v25 = vsub.s32 3, %v8432_v28 }
  0xf1   :  { %1164 = vmatprep.mubr.f32.mxu0 %v7700_v46  ;;  %v8438_v46 = vld [vmem:[%s12516_s2] sm:$0xff] }
  0xf2   :  { %v8474_v43 = vrot.slane %v8438_v46, %v12523_v45  ;;  %v8691_v45 = vld [vmem:[%s12517_s3 + $0x4d8] sm:$0xff]  ;;  %v8699_v36 = vrot.slane %v8438_v46, %v12524_v17  ;;  %v8721_v17 = vld [vmem:[%s12517_s3 + $0x500] sm:$0xff]  ;;  %v8727_v33 = vrot.slane %v8438_v46, %v365_v25  ;;  %v8754_v25 = vld [vmem:[%s12517_s3 + $0x370] sm:$0xff] }
  0xf3   :  { %12630 = vst [vmem:[#allocation30_spill] sm:$0xff] %v8721_v17  ;;  %v8874_v17 = vld [vmem:[%s12517_s3 + $0x3e8] sm:$0xff] }
  0xf4   :  { %1165 = vmatmul.mubr.f32.gmra.mrb[88].mxu0 %v7732_v3  ;;  %v12522_v3 = vsub.s32 1, %v8432_v28  ;;  %12628 = vst [vmem:[#allocation28_spill] sm:$0xff] %v8699_v36  ;;  %12631 = vst [vmem:[#allocation31_spill] sm:$0xff] %v8727_v33  ;;  %v8771_v36 = vld [vmem:[%s12517_s3 + $0x518] sm:$0xff]  ;;  %v8776_v28 = vld [vmem:[%s12517_s3 + $0x530] sm:$0xff] }
  0xf5   :  { %1169 = vmatprep.mubr.f32.mxu0 %v7738_v4  ;;  %v8444_v4 = vld [vmem:[%s12517_s3 + $0x300] sm:$0xff]  ;;  %12634 = vst [vmem:[#allocation34_spill] sm:$0xff] %v8771_v36  ;;  %12635 = vst [vmem:[#allocation35_spill] sm:$0xff] %v8776_v28  ;;  %v8918_v36 = vld [vmem:[%s12517_s3 + $0x598] sm:$0xff] }
  0xf6   :  { %v8499_v54 = vrot.slane %v8438_v46, %v12522_v3  ;;  %v8686_v3 = vld [vmem:[%s12517_s3 + $0x4c0] sm:$0xff]  ;;  %v8749_v46 = vld [vmem:[%s12517_s3 + $0x508] sm:$0xff]  ;;  %12643 = vst [vmem:[#allocation43_spill] sm:$0xff] %v8874_v17  ;;  %12649 = vst [vmem:[#allocation49_spill] sm:$0xff] %v8918_v36 }
  0xf7   :  { %v8791_v33 = vld [vmem:[%s12517_s3 + $0x520] sm:$0xff]  ;;  %v9032_v36 = vld [vmem:[%s12517_s3 + $0x5d0] sm:$0xff] }
  0xf8   :  { %1170 = vmatmul.mubr.f32.gmra.mrb[90].mxu0 %v7770_v26  ;;  %v8449_v26 = vld [vmem:[%s12517_s3 + $0x318] sm:$0xff]  ;;  %v8923_v28 = vld [vmem:[%s12517_s3 + $0x400] sm:$0xff] }
  0xf9   :  { %1174 = vmatprep.mubr.f32.mxu0 %v7776_v29  ;;  %v8454_v29 = vld [vmem:[%s12517_s3 + $0x338] sm:$0xff]  ;;  %12650 = vst [vmem:[#allocation50_spill] sm:$0xff] %v8923_v28 }
  0xfc   :  { %1175 = vmatmul.mubr.f32.gmra.mrb[92].mxu0 %v7808_v48  ;;  %v8459_v48 = vld [vmem:[%s12517_s3 + $0x350] sm:$0xff] }
  0xfd   :  { %1179 = vmatprep.mubr.f32.mxu0 %v7814_v51  ;;  %v8464_v51 = vld [vmem:[%s12517_s3 + $0x330] sm:$0xff] }
 0x100   :  { %1180 = vmatmul.mubr.f32.gmra.mrb[94].mxu0 %v7846_v13  ;;  %v8469_v13 = vld [vmem:[%s12517_s3 + $0x348] sm:$0xff] }
 0x117   :  { %v462_v0 = vpop.f32.mrb[0].mxu0 }
 0x118   :  { %v8569_v14 = vadd.f32 %v462_v0, %v8474_v43  ;;  %v464_v15 = vpop.f32.mrb[1].mxu0  ;;  %v8676_v0 = vld [vmem:[%s12517_s3 + $0x4b0] sm:$0xff] }
 0x119   :  { %v8592_v23 = vadd.f32 %v464_v15, %v8499_v54  ;;  %12626 = vst [vmem:[#allocation26_spill] sm:$0xff] %v8676_v0  ;;  %v8681_v15 = vld [vmem:[%s12517_s3 + $0x4c8] sm:$0xff]  ;;  %v8852_v0 = vld [vmem:[%s12517_s3 + $0x550] sm:$0xff] }
 0x11a   :  { %v1329_v2 = vmul.f32 1.442695, %v8569_v14  ;;  %12627 = vst [vmem:[#allocation27_spill] sm:$0xff] %v8681_v15  ;;  %v8857_v15 = vld [vmem:[%s12517_s3 + $0x568] sm:$0xff]  ;;  %vm1185_vm0 = vcmp.gt.f32.partialorder %v8569_v14, 0.0 }
 0x11b   :  { %v1331_v34 = vmul.f32 1.442695, %v8592_v23  ;;  %v468_v42 = vpop.f32.mrb[2].mxu0  ;;  %vm1186_vm1 = vcmp.gt.f32.partialorder %v8592_v23, 0.0 }
 0x11c   :  { %6428 = vpow2.f32 %v1329_v2  ;;  %v8694_v27 = vadd.f32 %v468_v42, %v8474_v43  ;;  %v470_v6 = vpop.f32.mrb[3].mxu0  ;;  %v8711_v2 = vld [vmem:[%s12517_s3 + $0x358] sm:$0xff]  ;;  %v8716_v42 = vld [vmem:[%s12517_s3 + $0x4e8] sm:$0xff] }
 0x11d   :  { %12629 = vst [vmem:[#allocation29_spill] sm:$0xff] %v8716_v42  ;;  %6430 = vpow2.f32 %v1331_v34  ;;  %v8724_v38 = vadd.f32 %v470_v6, %v8499_v54  ;;  %v8744_v34 = vld [vmem:[%s12517_s3 + $0x4f0] sm:$0xff]  ;;  %v8759_v6 = vld [vmem:[%s12517_s3 + $0x388] sm:$0xff]  ;;  %v8906_v42 = vld [vmem:[%s12517_s3 + $0x580] sm:$0xff] }
 0x11e   :  { %v1347_v49 = vmul.f32 1.442695, %v8694_v27  ;;  %12648 = vst [vmem:[#allocation48_spill] sm:$0xff] %v8906_v42  ;;  %vm1194_vm2 = vcmp.gt.f32.partialorder %v8694_v27, 0.0 }
 0x11f   :  { %v1349_v32 = vmul.f32 1.442695, %v8724_v38  ;;  %v474_v30 = vpop.f32.mrb[4].mxu0  ;;  %vm1195_vm3 = vcmp.gt.f32.partialorder %v8724_v38, 0.0 }
 0x120   :  { %6432 = vpow2.f32 %v1347_v49  ;;  %v8821_v50 = vadd.f32 %v474_v30, %v8474_v43  ;;  %v476_v56 = vpop.f32.mrb[5].mxu0  ;;  %v8840_v49 = vld [vmem:[%s12517_s3 + $0x558] sm:$0xff] }
 0x121   :  { %12641 = vst [vmem:[#allocation41_spill] sm:$0xff] %v8840_v49  ;;  %6434 = vpow2.f32 %v1349_v32  ;;  %v8843_v30 = vadd.f32 %v476_v56, %v8499_v54  ;;  %v8862_v56 = vld [vmem:[%s12517_s3 + $0x3d0] sm:$0xff]  ;;  %v8962_v49 = vld [vmem:[%s12517_s3 + $0x5b8] sm:$0xff]  ;;  %v8970_v11 = vpop.f32.mrb[0].mxu1 }
 0x122   :  { %12642 = vst [vmem:[#allocation42_spill] sm:$0xff] %v8862_v56  ;;  %v1365_v32 = vmul.f32 1.442695, %v8821_v50  ;;  %12655 = vst [vmem:[#allocation55_spill] sm:$0xff] %v8962_v49  ;;  %v8979_v56 = vld [vmem:[%s12517_s3 + $0x5c8] sm:$0xff]  ;;  %v8984_v62 = vpop.f32.mrb[1].mxu1 }
 0x123   :  { %v1367_v41 = vmul.f32 1.442695, %v8843_v30  ;;  %v480_v24 = vpop.f32.mrb[6].mxu0  ;;  %12657 = vst [vmem:[#allocation57_spill] sm:$0xff] %v8970_v11  ;;  %12658 = vst [vmem:[#allocation58_spill] sm:$0xff] %v8979_v56  ;;  %vm1203_vm4 = vcmp.gt.f32.partialorder %v8821_v50, 0.0 }
 0x124   :  { %6436 = vpow2.f32 %v1365_v32  ;;  %v8909_v35 = vadd.f32 %v480_v24, %v8474_v43  ;;  %v482_v37 = vpop.f32.mrb[7].mxu0  ;;  %v8928_v24 = vld [vmem:[%s12517_s3 + $0x418] sm:$0xff]  ;;  %12659 = vst [vmem:[#allocation59_spill] sm:$0xff] %v8984_v62  ;;  %vm1204_vm5 = vcmp.gt.f32.partialorder %v8843_v30, 0.0 }
 0x125   :  { %12651 = vst [vmem:[#allocation51_spill] sm:$0xff] %v8928_v24  ;;  %6438 = vpow2.f32 %v1367_v41  ;;  %v8931_v32 = vadd.f32 %v482_v37, %v8499_v54  ;;  %v9019_v49 = vpop.f32.mrb[2].mxu1 }
 0x126   :  { %v6429_v41 = vpop.eup %6428  ;;  %v1383_v37 = vmul.f32 1.442695, %v8909_v35  ;;  %12662 = vst [vmem:[#allocation62_spill] sm:$0xff] %v9019_v49  ;;  %v9027_v42 = vpop.f32.mrb[3].mxu1  ;;  %vm1212_vm6 = vcmp.gt.f32.partialorder %v8909_v35, 0.0 }
 0x127   :  { %v6431_v21 = vpop.eup %6430  ;;  %v4735_v5 = vadd.f32 -1.0, %v6429_v41  ;;  %v1385_v22 = vmul.f32 1.442695, %v8931_v32  ;;  %v486_v16 = vpop.f32.mrb[8].mxu0  ;;  %12663 = vst [vmem:[#allocation63_spill] sm:$0xff] %v9027_v42  ;;  %v12665_v42 = vpack.c.bf16 %v8654_v40, %v8649_v19  ;;  %v12667_v19 = vpack.c.bf16 %v8691_v45, %v8686_v3  ;;  %v9086_v40 = vld [vmem:[%s12517_s3 + $0x460] sm:$0xff] }
 0x128   :  { %6440 = vpow2.f32 %v1383_v37  ;;  %v8982_v17 = vadd.f32 %v486_v16, %v8474_v43  ;;  %v488_v41 = vpop.f32.mrb[9].mxu0  ;;  %v4736_v61 = vadd.f32 -1.0, %v6431_v21  ;;  %vm1213_vm7 = vcmp.gt.f32.partialorder %v8931_v32, 0.0 }
 0x129   :  { %v1761_v37 = vmul.f32 2.0, %v4735_v5  ;;  %6442 = vpow2.f32 %v1385_v22  ;;  %v8999_v16 = vadd.f32 %v488_v41, %v8499_v54  ;;  %v9010_v5 = vld [vmem:[%s12517_s3 + $0x5d8] sm:$0xff]  ;;  %v9015_v22 = vld [vmem:[%s12517_s3 + $0x5f0] sm:$0xff] }
 0x12a   :  { %v6433_v62 = vpop.eup %6432  ;;  %v1401_v11 = vmul.f32 1.442695, %v8982_v17  ;;  %v1762_v31 = vmul.f32 2.0, %v4736_v61  ;;  %12660 = vst [vmem:[#allocation60_spill] sm:$0xff] %v9010_v5  ;;  %12661 = vst [vmem:[#allocation61_spill] sm:$0xff] %v9015_v22  ;;  %vm1221_vm8 = vcmp.gt.f32.partialorder %v8982_v17, 0.0 }
 0x12b   :  { %v6435_v41 = vpop.eup %6434  ;;  %v1403_v21 = vmul.f32 1.442695, %v8999_v16  ;;  %v492_v39 = vpop.f32.mrb[10].mxu0  ;;  %v4744_v61 = vadd.f32 -1.0, %v6433_v62  ;;  %v9037_v62 = vld [vmem:[%s12517_s3 + $0x5e8] sm:$0xff]  ;;  %vm1222_vm9 = vcmp.gt.f32.partialorder %v8999_v16, 0.0 }
 0x12c   :  { %6444 = vpow2.f32 %v1401_v11  ;;  %v9024_v63 = vadd.f32 %v492_v39, %v8474_v43  ;;  %v494_v56 = vpop.f32.mrb[11].mxu0  ;;  %v1906_v28 = vsel %vm1186_vm1, %v8592_v23, %v1762_v31  ;;  %v4745_v24 = vadd.f32 -1.0, %v6435_v41 }
 0x12d   :  { %v1905_v11 = vsel %vm1185_vm0, %v8569_v14, %v1761_v37  ;;  %6446 = vpow2.f32 %v1403_v21  ;;  %v9043_v23 = vadd.f32 %v494_v56, %v8499_v54  ;;  %2569 = vmatprep.mubr.f32.mxu1 %v1906_v28  ;;  %3374 = vmatprep.mubr.f32.mxu0 %v1906_v28  ;;  %v1770_v31 = vmul.f32 2.0, %v4744_v61  ;;  %v9052_v14 = vld [vmem:[%s12517_s3 + $0x5e0] sm:$0xff]  ;;  %v9057_v28 = vld [vmem:[%s12517_s3 + $0x5f8] sm:$0xff] }
 0x12e   :  { %v6437_v39 = vpop.eup %6436  ;;  %v1419_v41 = vmul.f32 1.442695, %v9024_v63  ;;  %2570 = vmatmul.mubr.f32.vlgmr.msra.gmra.mrb[64].mxu1 %v1905_v11  ;;  %3375 = vmatmul.mubr.f32.vlgmr.msra.gmra.mrb[96].mxu0 %v1905_v11  ;;  %v1771_v18 = vmul.f32 2.0, %v4745_v24  ;;  %v12664_v24 = vpack.c.bf16 %v8449_v26, %v8444_v4  ;;  %v9064_v11 = vpop.f32.mrb[4].mxu1  ;;  %v12666_v26 = vpack.c.bf16 %v8459_v48, %v8454_v29 }
 0x12f   :  { %v6439_v56 = vpop.eup %6438  ;;  %v1421_v37 = vmul.f32 1.442695, %v9043_v23  ;;  %v498_v21 = vpop.f32.mrb[12].mxu0  ;;  %v4753_v61 = vadd.f32 -1.0, %v6437_v39  ;;  %6131 = vmatpush3.bf16.msra.mxu0 %v12665_v42  ;;  %v1914_v45 = vsel %vm1194_vm2, %v8694_v27, %v1770_v31  ;;  %v9111_v27 = vld [vmem:[%s12517_s3 + $0x620] sm:$0xff]  ;;  %vm1230_vm10 = vcmp.gt.f32.partialorder %v9024_v63, 0.0 }
 0x130   :  { %5903 = vmatpush1.bf16.msra.mxu1 %v12664_v24  ;;  %6448 = vpow2.f32 %v1419_v41  ;;  %v9072_v22 = vadd.f32 %v498_v21, %v8474_v43  ;;  %v500_v49 = vpop.f32.mrb[13].mxu0  ;;  %v1915_v4 = vsel %vm1195_vm3, %v8724_v38, %v1771_v18  ;;  %v4754_v39 = vadd.f32 -1.0, %v6439_v56  ;;  %v9078_v24 = vpop.f32.mrb[5].mxu1  ;;  %6133 = vmatprep.subr.bf16.mxu0 %v12667_v19  ;;  %v9091_v38 = vld [vmem:[%s12517_s3 + $0x478] sm:$0xff] }
 0x131   :  { %5905 = vmatprep.subr.bf16.mxu1 %v12666_v26  ;;  %6450 = vpow2.f32 %v1421_v37  ;;  %v9094_v29 = vadd.f32 %v500_v49, %v8499_v54  ;;  %2575 = vmatprep.mubr.f32.mxu1 %v1915_v4  ;;  %v1779_v3 = vmul.f32 2.0, %v4753_v61  ;;  %v9106_v49 = vld [vmem:[%s12517_s3 + $0x608] sm:$0xff]  ;;  %v12668_v37 = vpack.c.bf16 %v8469_v13, %v8464_v51 }
 0x132   :  { %3379 = vmatprep.mubr.f32.mxu0 %v1915_v4  ;;  %v6441_v48 = vpop.eup %6440  ;;  %v1437_v18 = vmul.f32 1.442695, %v9072_v22  ;;  %2576 = vmatmul.mubr.f32.gmra.mrb[66].mxu1 %v1914_v45  ;;  %v1780_v42 = vmul.f32 2.0, %v4754_v39  ;;  %v9118_v4 = vpop.f32.mrb[6].mxu1  ;;  %v12669_v26 = vpack.c.bf16 %v8711_v2, %v8706_v57  ;;  %v12670_v13 = vpack.c.bf16 %v8484_v52, %v8479_v44  ;;  %v9140_v2 = vld [vmem:[%s12517_s3 + $0x600] sm:$0xff] }
 0x133   :  { %3380 = vmatmul.mubr.f32.gmra.mrb[98].mxu0 %v1914_v45  ;;  %v6443_v31 = vpop.eup %6442  ;;  %v1439_v56 = vmul.f32 1.442695, %v9094_v29  ;;  %v504_v21 = vpop.f32.mrb[14].mxu0  ;;  %v4762_v61 = vadd.f32 -1.0, %v6441_v48  ;;  %v12671_v57 = vpack.c.bf16 %v8749_v46, %v8744_v34  ;;  %v1923_v52 = vsel %vm1203_vm4, %v8821_v50, %v1779_v3  ;;  %v9165_v50 = vld [vmem:[%s12517_s3 + $0x650] sm:$0xff] }
 0x134   :  { %5907 = vmatpush1.bf16.msra.mxu1 %v12668_v37  ;;  %6135 = vmatpush3.bf16.msra.mxu0 %v12669_v26  ;;  %6452 = vpow2.f32 %v1437_v18  ;;  %v9126_v19 = vadd.f32 %v504_v21, %v8474_v43  ;;  %v506_v45 = vpop.f32.mrb[15].mxu0  ;;  %v1924_v51 = vsel %vm1204_vm5, %v8843_v30, %v1780_v42  ;;  %v4763_v48 = vadd.f32 -1.0, %v6443_v31  ;;  %v9132_v37 = vpop.f32.mrb[7].mxu1  ;;  %v9145_v30 = vld [vmem:[%s12517_s3 + $0x618] sm:$0xff] }
 0x135   :  { %5909 = vmatprep.subr.bf16.mxu1 %v12670_v13  ;;  %6137 = vmatprep.subr.bf16.mxu0 %v12671_v57  ;;  %6454 = vpow2.f32 %v1439_v56  ;;  %v9148_v44 = vadd.f32 %v506_v45, %v8499_v54  ;;  %v1788_v34 = vmul.f32 2.0, %v4762_v61  ;;  %v9160_v56 = vld [vmem:[%s12517_s3 + $0x638] sm:$0xff]  ;;  %v12672_v61 = vpack.c.bf16 %v8494_v53, %v8489_v47 }
 0x136   :  { %2581 = vmatprep.mubr.f32.mxu1 %v1924_v51  ;;  %3384 = vmatprep.mubr.f32.mxu0 %v1924_v51  ;;  %v6445_v46 = vpop.eup %6444  ;;  %v1455_v18 = vmul.f32 1.442695, %v9126_v19  ;;  %v1789_v42 = vmul.f32 2.0, %v4763_v48  ;;  %v9172_v51 = vpop.f32.mrb[8].mxu1  ;;  %v12673_v13 = vpack.c.bf16 %v8759_v6, %v8754_v25  ;;  %v12674_v53 = vpack.c.bf16 %v8509_v55, %v8504_v7  ;;  %v9194_v6 = vld [vmem:[%s12517_s3 + $0x630] sm:$0xff] }
 0x137   :  { %2582 = vmatmul.mubr.f32.gmra.mrb[68].mxu1 %v1923_v52  ;;  %3385 = vmatmul.mubr.f32.gmra.mrb[100].mxu0 %v1923_v52  ;;  %v6447_v3 = vpop.eup %6446  ;;  %v1457_v21 = vmul.f32 1.442695, %v9148_v44  ;;  %v510_v26 = vpop.f32.mrb[16].mxu0  ;;  %v4771_v45 = vadd.f32 -1.0, %v6445_v46  ;;  %v12675_v25 = vpack.c.bf16 %v8796_v1, %v8791_v33  ;;  %12676 = vst [vmem:[#allocation64_spill] sm:$0xff] %v9194_v6  ;;  %v1932_v55 = vsel %vm1212_vm6, %v8909_v35, %v1788_v34  ;;  %v9219_v35 = vld [vmem:[%s12517_s3 + $0x680] sm:$0xff] }
 0x138   :  { %5911 = vmatpush1.bf16.msra.mxu1 %v12672_v61  ;;  %6139 = vmatpush3.bf16.msra.mxu0 %v12673_v13  ;;  %6456 = vpow2.f32 %v1455_v18  ;;  %v9180_v57 = vadd.f32 %v510_v26, %v8474_v43  ;;  %v512_v52 = vpop.f32.mrb[17].mxu0  ;;  %v1933_v47 = vsel %vm1213_vm7, %v8931_v32, %v1789_v42  ;;  %v4772_v46 = vadd.f32 -1.0, %v6447_v3  ;;  %v9186_v61 = vpop.f32.mrb[9].mxu1  ;;  %v9199_v32 = vld [vmem:[%s12517_s3 + $0x648] sm:$0xff]  ;;  %12679 = vst [vmem:[#allocation67_spill] sm:$0xff] %v9219_v35  ;;  %v12756_v35 = vld [vmem:[#allocation29_spill] sm:$0xff] }
 0x139   :  { %5913 = vmatprep.subr.bf16.mxu1 %v12674_v53  ;;  %6141 = vmatprep.subr.bf16.mxu0 %v12675_v25  ;;  %12677 = vst [vmem:[#allocation65_spill] sm:$0xff] %v9199_v32  ;;  %6458 = vpow2.f32 %v1457_v21  ;;  %v9202_v7 = vadd.f32 %v512_v52, %v8499_v54  ;;  %v1797_v1 = vmul.f32 2.0, %v4771_v45  ;;  %v9214_v21 = vld [vmem:[%s12517_s3 + $0x668] sm:$0xff]  ;;  %v12680_v45 = vpack.c.bf16 %v8519_v58, %v8514_v8 }
 0x13a   :  { %2587 = vmatprep.mubr.f32.mxu1 %v1933_v47  ;;  %3389 = vmatprep.mubr.f32.mxu0 %v1933_v47  ;;  %v6449_v33 = vpop.eup %6448  ;;  %v1473_v18 = vmul.f32 1.442695, %v9180_v57  ;;  %v1798_v42 = vmul.f32 2.0, %v4772_v46  ;;  %12678 = vst [vmem:[#allocation66_spill] sm:$0xff] %v9214_v21  ;;  %v9226_v47 = vpop.f32.mrb[10].mxu1  ;;  %v12681_v53 = vpack.c.bf16 %v8813_v59, %v8808_v20  ;;  %v12682_v58 = vpack.c.bf16 %v8529_v60, %v8524_v9  ;;  %v9248_v59 = vld [vmem:[%s12517_s3 + $0x660] sm:$0xff] }
 0x13b   :  { %2588 = vmatmul.mubr.f32.gmra.mrb[70].mxu1 %v1932_v55  ;;  %3390 = vmatmul.mubr.f32.gmra.mrb[102].mxu0 %v1932_v55  ;;  %v6451_v34 = vpop.eup %6450  ;;  %v1475_v26 = vmul.f32 1.442695, %v9202_v7  ;;  %v516_v13 = vpop.f32.mrb[18].mxu0  ;;  %v4780_v52 = vadd.f32 -1.0, %v6449_v33  ;;  %v12683_v20 = vpack.c.bf16 %v8857_v15, %v8852_v0  ;;  %12684 = vst [vmem:[#allocation68_spill] sm:$0xff] %v9248_v59  ;;  %v1941_v60 = vsel %vm1221_vm8, %v8982_v17, %v1797_v1  ;;  %v9264_v15 = vld [vmem:[%s12517_s3 + $0x698] sm:$0xff] }
 0x13c   :  { %5915 = vmatpush1.bf16.msra.mxu1 %v12680_v45  ;;  %6143 = vmatpush3.bf16.msra.mxu0 %v12681_v53  ;;  %6460 = vpow2.f32 %v1473_v18  ;;  %v9234_v25 = vadd.f32 %v516_v13, %v8474_v43  ;;  %v518_v55 = vpop.f32.mrb[19].mxu0  ;;  %v1942_v8 = vsel %vm1222_vm9, %v8999_v16, %v1798_v42  ;;  %v4781_v33 = vadd.f32 -1.0, %v6451_v34  ;;  %v9240_v45 = vpop.f32.mrb[11].mxu1  ;;  %v9253_v16 = vld [vmem:[%s12517_s3 + $0x678] sm:$0xff]  ;;  %12686 = vst [vmem:[#allocation70_spill] sm:$0xff] %v9264_v15  ;;  %v9269_v18 = vld [vmem:[%s12517_s3 + $0x6b0] sm:$0xff] }
 0x13d   :  { %5917 = vmatprep.subr.bf16.mxu1 %v12682_v58  ;;  %6145 = vmatprep.subr.bf16.mxu0 %v12683_v20  ;;  %12685 = vst [vmem:[#allocation69_spill] sm:$0xff] %v9253_v16  ;;  %6462 = vpow2.f32 %v1475_v26  ;;  %v9256_v9 = vadd.f32 %v518_v55, %v8499_v54  ;;  %v1806_v0 = vmul.f32 2.0, %v4780_v52  ;;  %12687 = vst [vmem:[#allocation71_spill] sm:$0xff] %v9269_v18  ;;  %v9278_v1 = vld [vmem:[%s12517_s3 + $0x690] sm:$0xff]  ;;  %v9283_v13 = vld [vmem:[%s12517_s3 + $0x6a8] sm:$0xff]  ;;  %vm1231_vm11 = vcmp.gt.f32.partialorder %v9043_v23, 0.0 }
 0x13e   :  { %2593 = vmatprep.mubr.f32.mxu1 %v1942_v8  ;;  %3394 = vmatprep.mubr.f32.mxu0 %v1942_v8  ;;  %v6453_v42 = vpop.eup %6452  ;;  %v1491_v34 = vmul.f32 1.442695, %v9234_v25  ;;  %v1807_v26 = vmul.f32 2.0, %v4781_v33  ;;  %12688 = vst [vmem:[#allocation72_spill] sm:$0xff] %v9278_v1  ;;  %12689 = vst [vmem:[#allocation73_spill] sm:$0xff] %v9283_v13  ;;  %v12690_v55 = vld [vmem:[#allocation7_spill] sm:$0xff] }
 0x13f   :  { %2594 = vmatmul.mubr.f32.gmra.mrb[72].mxu1 %v1941_v60  ;;  %3395 = vmatmul.mubr.f32.gmra.mrb[104].mxu0 %v1941_v60  ;;  %v6455_v52 = vpop.eup %6454  ;;  %v1493_v53 = vmul.f32 1.442695, %v9256_v9  ;;  %v12691_v8 = vld [vmem:[#allocation6_spill] sm:$0xff]  ;;  %v522_v33 = vpop.f32.mrb[20].mxu0  ;;  %v4789_v20 = vadd.f32 -1.0, %v6453_v42  ;;  %v12693_v17 = vld [vmem:[#allocation43_spill] sm:$0xff] }
 0x140   :  { %v12692_v58 = vpack.c.bf16 %v12690_v55, %v12691_v8  ;;  %v9290_v60 = vpop.f32.mrb[12].mxu1  ;;  %v12694_v46 = vld [vmem:[#allocation42_spill] sm:$0xff]  ;;  %6464 = vpow2.f32 %v1491_v34  ;;  %v9298_v31 = vadd.f32 %v522_v33, %v8474_v43  ;;  %v524_v5 = vpop.f32.mrb[21].mxu0  ;;  %v1951_v55 = vsel %vm1231_vm11, %v9043_v23, %v1807_v26  ;;  %v12696_v8 = vld [vmem:[#allocation9_spill] sm:$0xff] }
 0x141   :  { %v12695_v3 = vpack.c.bf16 %v12693_v17, %v12694_v46  ;;  %v4790_v42 = vadd.f32 -1.0, %v6455_v52  ;;  %v9304_v41 = vpop.f32.mrb[13].mxu1  ;;  %v12699_v21 = vld [vmem:[#allocation49_spill] sm:$0xff]  ;;  %v12700_v46 = vld [vmem:[#allocation48_spill] sm:$0xff]  ;;  %v9312_v34 = vld [vmem:[%s12517_s3 + $0x6c8] sm:$0xff]  ;;  %6466 = vpow2.f32 %v1493_v53  ;;  %2599 = vmatprep.mubr.f32.mxu1 %v1951_v55  ;;  %3399 = vmatprep.mubr.f32.mxu0 %v1951_v55  ;;  %v1815_v26 = vmul.f32 2.0, %v4789_v20 }
 0x142   :  { %5919 = vmatpush1.bf16.msra.mxu1 %v12692_v58  ;;  %v12697_v58 = vld [vmem:[#allocation8_spill] sm:$0xff]  ;;  %12702 = vst [vmem:[#allocation7_spill] sm:$0xff] %v9312_v34  ;;  %v9317_v23 = vld [vmem:[%s12517_s3 + $0x6e0] sm:$0xff]  ;;  %v6457_v17 = vpop.eup %6456  ;;  %v1509_v52 = vmul.f32 1.442695, %v9298_v31  ;;  %v12706_v55 = vld [vmem:[#allocation11_spill] sm:$0xff] }
 0x143   :  { %6147 = vmatpush3.bf16.msra.mxu0 %v12695_v3  ;;  %v12698_v39 = vpack.c.bf16 %v12696_v8, %v12697_v58  ;;  %v12701_v3 = vpack.c.bf16 %v12699_v21, %v12700_v46  ;;  %12703 = vst [vmem:[#allocation6_spill] sm:$0xff] %v9317_v23  ;;  %v1950_v21 = vsel %vm1230_vm10, %v9024_v63, %v1806_v0  ;;  %v1816_v33 = vmul.f32 2.0, %v4790_v42  ;;  %v9333_v53 = vld [vmem:[%s12517_s3 + $0x6c0] sm:$0xff]  ;;  %v9338_v63 = vld [vmem:[%s12517_s3 + $0x6d8] sm:$0xff]  ;;  %v6459_v0 = vpop.eup %6458  ;;  %v12707_v58 = vld [vmem:[#allocation10_spill] sm:$0xff]  ;;  %v528_v46 = vpop.f32.mrb[22].mxu0 }
 0x144   :  { %2600 = vmatmul.mubr.f32.gmra.mrb[74].mxu1 %v1950_v21  ;;  %3400 = vmatmul.mubr.f32.gmra.mrb[106].mxu0 %v1950_v21  ;;  %12704 = vst [vmem:[#allocation43_spill] sm:$0xff] %v9333_v53  ;;  %12705 = vst [vmem:[#allocation42_spill] sm:$0xff] %v9338_v63  ;;  %v12708_v42 = vpack.c.bf16 %v12706_v55, %v12707_v58  ;;  %vm1240_vm12 = vcmp.gt.f32.partialorder %v9094_v29, 0.0  ;;  %v9345_v21 = vpop.f32.mrb[14].mxu1  ;;  %v12710_v8 = vld [vmem:[#allocation50_spill] sm:$0xff]  ;;  %v9353_v13 = vadd.f32 %v528_v46, %v8474_v43  ;;  %v530_v15 = vpop.f32.mrb[23].mxu0 }
 0x145   :  { %5921 = vmatprep.subr.bf16.mxu1 %v12698_v39  ;;  %6149 = vmatprep.subr.bf16.mxu0 %v12701_v3  ;;  %v9320_v39 = vadd.f32 %v524_v5, %v8499_v54  ;;  %v4798_v3 = vadd.f32 -1.0, %v6457_v17  ;;  %v12709_v5 = vld [vmem:[#allocation51_spill] sm:$0xff]  ;;  %v1960_v55 = vsel %vm1240_vm12, %v9094_v29, %v1816_v33  ;;  %v12712_v58 = vld [vmem:[#allocation13_spill] sm:$0xff]  ;;  %vm1239_vm13 = vcmp.gt.f32.partialorder %v9072_v22, 0.0  ;;  %v9360_v59 = vpop.f32.mrb[15].mxu1  ;;  %v9373_v29 = vld [vmem:[%s12517_s3 + $0x7a8] sm:$0xff] }
 0x146   :  { %5923 = vmatpush1.bf16.msra.mxu1 %v12708_v42  ;;  %v12711_v48 = vpack.c.bf16 %v12709_v5, %v12710_v8  ;;  %v12713_v42 = vld [vmem:[#allocation12_spill] sm:$0xff]  ;;  %v4799_v17 = vadd.f32 -1.0, %v6459_v0  ;;  %v12715_v8 = vld [vmem:[#allocation58_spill] sm:$0xff]  ;;  %v9368_v46 = vld [vmem:[%s12517_s3 + $0x790] sm:$0xff]  ;;  %2605 = vmatprep.mubr.f32.mxu1 %v1960_v55  ;;  %v1959_v33 = vsel %vm1239_vm13, %v9072_v22, %v1815_v26  ;;  %vm1249_vm14 = vcmp.gt.f32.partialorder %v9148_v44, 0.0 }
 0x147   :  { %v1511_v20 = vmul.f32 1.442695, %v9320_v39  ;;  %v12714_v18 = vpack.c.bf16 %v12712_v58, %v12713_v42  ;;  %3404 = vmatprep.mubr.f32.mxu0 %v1960_v55  ;;  %v1824_v0 = vmul.f32 2.0, %v4798_v3  ;;  %v6461_v58 = vpop.eup %6460  ;;  %v1527_v42 = vmul.f32 1.442695, %v9353_v13  ;;  %v9390_v22 = vld [vmem:[%s12517_s3 + $0x710] sm:$0xff] }
 0x148   :  { %6151 = vmatpush3.bf16.msra.mxu0 %v12711_v48  ;;  %v12716_v48 = vld [vmem:[#allocation56_spill] sm:$0xff]  ;;  %2606 = vmatmul.mubr.f32.gmra.mrb[76].mxu1 %v1959_v33  ;;  %12719 = vst [vmem:[#allocation8_spill] sm:$0xff] %v9390_v22  ;;  %v6463_v26 = vpop.eup %6462  ;;  %v12721_v3 = vld [vmem:[#allocation14_spill] sm:$0xff]  ;;  %v6160_v1 = vpack.c.bf16 %v9373_v29, %v9368_v46  ;;  %vm1248_vm15 = vcmp.gt.f32.partialorder %v9126_v19, 0.0  ;;  %vm1258_vm0 = vcmp.gt.f32.partialorder %v9202_v7, 0.0  ;;  %vm1257_vm1 = vcmp.gt.f32.partialorder %v9180_v57, 0.0 }
 0x149   :  { %5925 = vmatprep.subr.bf16.mxu1 %v12714_v18  ;;  %v12717_v5 = vpack.c.bf16 %v12715_v8, %v12716_v48  ;;  %6468 = vpow2.f32 %v1511_v20  ;;  %v9376_v18 = vadd.f32 %v530_v15, %v8499_v54  ;;  %3405 = vmatmul.mubr.f32.gmra.mrb[108].mxu0 %v1959_v33  ;;  %v1825_v8 = vmul.f32 2.0, %v4799_v17  ;;  %v9385_v15 = vld [vmem:[%s12517_s3 + $0x6f8] sm:$0xff]  ;;  %v12720_v20 = vld [vmem:[#allocation15_spill] sm:$0xff]  ;;  %v534_v17 = vpop.f32.mrb[24].mxu0  ;;  %v9397_v33 = vpop.f32.mrb[16].mxu1 }
 0x14a   :  { %6470 = vpow2.f32 %v1509_v52  ;;  %12718 = vst [vmem:[#allocation9_spill] sm:$0xff] %v9385_v15  ;;  %v12722_v55 = vpack.c.bf16 %v12720_v20, %v12721_v3  ;;  %v12723_v48 = vpack.c.bf16 %v8996_v12, %v8991_v10  ;;  %v9405_v53 = vadd.f32 %v534_v17, %v8474_v43  ;;  %v536_v63 = vpop.f32.mrb[25].mxu0  ;;  %v12724_v3 = vld [vmem:[#allocation17_spill] sm:$0xff]  ;;  %v9412_v23 = vpop.f32.mrb[17].mxu1 }
 0x14b   :  { %6153 = vmatprep.subr.bf16.mxu0 %v12717_v5  ;;  %v1529_v52 = vmul.f32 1.442695, %v9376_v18  ;;  %v4807_v5 = vadd.f32 -1.0, %v6461_v58  ;;  %v1969_v20 = vsel %vm1249_vm14, %v9148_v44, %v1825_v8  ;;  %v4808_v58 = vadd.f32 -1.0, %v6463_v26  ;;  %v6465_v29 = vpop.eup %6464 }
 0x14c   :  { %5927 = vmatpush1.bf16.msra.mxu1 %v12722_v55  ;;  %6155 = vmatpush3.bf16.msra.mxu0 %v12723_v48  ;;  %v12725_v55 = vld [vmem:[#allocation16_spill] sm:$0xff]  ;;  %v12727_v12 = vpack.c.bf16 %v9057_v28, %v9052_v14  ;;  %v9418_v10 = vadd.f32 %v536_v63, %v8499_v54  ;;  %v1968_v44 = vsel %vm1248_vm15, %v9126_v19, %v1824_v0  ;;  %v12728_v14 = vld [vmem:[#allocation5_spill] sm:$0xff]  ;;  %v6467_v26 = vpop.eup %6466  ;;  %v12731_v0 = vld [vmem:[#allocation19_spill] sm:$0xff]  ;;  %vm1267_vm2 = vcmp.gt.f32.partialorder %v9256_v9, 0.0 }
 0x14d   :  { %v12726_v34 = vpack.c.bf16 %v12724_v3, %v12725_v55  ;;  %6472 = vpow2.f32 %v1529_v52  ;;  %2611 = vmatprep.mubr.f32.mxu1 %v1969_v20  ;;  %3409 = vmatprep.mubr.f32.mxu0 %v1969_v20  ;;  %v1833_v46 = vmul.f32 2.0, %v4807_v5  ;;  %v1834_v8 = vmul.f32 2.0, %v4808_v58  ;;  %v12729_v63 = vld [vmem:[#allocation28_spill] sm:$0xff]  ;;  %v12730_v52 = vld [vmem:[#allocation57_spill] sm:$0xff]  ;;  %v12732_v5 = vld [vmem:[#allocation18_spill] sm:$0xff]  ;;  %v540_v3 = vpop.f32.mrb[26].mxu0 }
 0x14e   :  { %6157 = vmatprep.subr.bf16.mxu0 %v12727_v12  ;;  %2612 = vmatmul.mubr.f32.gmra.mrb[78].mxu1 %v1968_v44  ;;  %6474 = vpow2.f32 %v1527_v42  ;;  %v9427_v17 = vadd.f32 %v12730_v52, %v12729_v63  ;;  %v1547_v19 = vmul.f32 1.442695, %v9418_v10  ;;  %v12733_v20 = vpack.c.bf16 %v12731_v0, %v12732_v5  ;;  %v9434_v55 = vpop.f32.mrb[18].mxu1  ;;  %v542_v12 = vpop.f32.mrb[27].mxu0  ;;  %v12735_v52 = vld [vmem:[#allocation21_spill] sm:$0xff]  ;;  %v12736_v48 = vld [vmem:[#allocation20_spill] sm:$0xff] }
 0x14f   :  { %5929 = vmatprep.subr.bf16.mxu1 %v12726_v34  ;;  %v1545_v34 = vmul.f32 1.442695, %v9405_v53  ;;  %3410 = vmatmul.mubr.f32.gmra.mrb[110].mxu0 %v1968_v44  ;;  %v12734_v58 = vpack.c.bf16 %v9091_v38, %v9086_v40  ;;  %v9440_v42 = vadd.f32 %v540_v3, %v8474_v43  ;;  %v1978_v44 = vsel %vm1258_vm0, %v9202_v7, %v1834_v8  ;;  %v9447_v5 = vpop.f32.mrb[19].mxu1  ;;  %v9452_v40 = vld [vmem:[%s12517_s3 + $0x6f0] sm:$0xff]  ;;  %v9457_v38 = vld [vmem:[%s12517_s3 + $0x708] sm:$0xff] }
 0x150   :  { %5931 = vmatpush1.bf16.msra.mxu1 %v12733_v20  ;;  %v12737_v28 = vpack.c.bf16 %v12735_v52, %v12736_v48  ;;  %v4817_v0 = vadd.f32 -1.0, %v6467_v26  ;;  %12738 = vst [vmem:[#allocation49_spill] sm:$0xff] %v9452_v40  ;;  %12739 = vst [vmem:[#allocation48_spill] sm:$0xff] %v9457_v38  ;;  %6476 = vpow2.f32 %v1547_v19  ;;  %v9460_v7 = vadd.f32 %v542_v12, %v8499_v54  ;;  %v12741_v26 = vld [vmem:[#allocation59_spill] sm:$0xff]  ;;  %v12743_v52 = vld [vmem:[#allocation22_spill] sm:$0xff] }
 0x151   :  { %6159 = vmatpush3.bf16.msra.mxu0 %v12734_v58  ;;  %2617 = vmatprep.mubr.f32.mxu1 %v1978_v44  ;;  %v1977_v8 = vsel %vm1257_vm1, %v9180_v57, %v1833_v46  ;;  %v4816_v48 = vadd.f32 -1.0, %v6465_v29  ;;  %6478 = vpow2.f32 %v1545_v34  ;;  %v1563_v3 = vmul.f32 1.442695, %v9440_v42  ;;  %v12742_v12 = vld [vmem:[#allocation23_spill] sm:$0xff]  ;;  %v9473_v46 = vpop.f32.mrb[20].mxu1 }
 0x152   :  { %5933 = vmatprep.subr.bf16.mxu1 %v12737_v28  ;;  %6161 = vmatprep.subr.bf16.mxu0 %v6160_v1  ;;  %v12740_v28 = vld [vmem:[#allocation31_spill] sm:$0xff]  ;;  %v1843_v58 = vmul.f32 2.0, %v4817_v0  ;;  %v1565_v19 = vmul.f32 1.442695, %v9460_v7  ;;  %v12744_v15 = vpack.c.bf16 %v12742_v12, %v12743_v52  ;;  %12745 = vst [vmem:[#allocation11_spill] sm:$0xff] %v9473_v46  ;;  %v12746_v12 = vld [vmem:[#allocation25_spill] sm:$0xff] }
 0x153   :  { %3414 = vmatprep.mubr.f32.mxu0 %v1978_v44  ;;  %v9465_v20 = vadd.f32 %v12741_v26, %v12740_v28  ;;  %2618 = vmatmul.mubr.f32.gmra.mrb[80].mxu1 %v1977_v8  ;;  %v6469_v1 = vpop.eup %6468  ;;  %v546_v44 = vpop.f32.mrb[28].mxu0  ;;  %v1842_v57 = vmul.f32 2.0, %v4816_v48  ;;  %vm1266_vm3 = vcmp.gt.f32.partialorder %v9234_v25, 0.0  ;;  %vm1276_vm4 = vcmp.gt.f32.partialorder %v9320_v39, 0.0 }
 0x154   :  { %3415 = vmatmul.mubr.f32.gmra.mrb[112].mxu0 %v1977_v8  ;;  %5935 = vmatpush1.bf16.msra.mxu1 %v12744_v15  ;;  %v6471_v34 = vpop.eup %6470  ;;  %v1333_v8 = vmul.f32 1.442695, %v9427_v17  ;;  %v9479_v0 = vadd.f32 %v546_v44, %v8474_v43  ;;  %v548_v26 = vpop.f32.mrb[29].mxu0  ;;  %v1987_v22 = vsel %vm1267_vm2, %v9256_v9, %v1843_v58  ;;  %v12747_v15 = vld [vmem:[#allocation24_spill] sm:$0xff]  ;;  %6480 = vpow2.f32 %v1565_v19  ;;  %v12750_v9 = vld [vmem:[#allocation62_spill] sm:$0xff] }
 0x155   :  { %v12748_v52 = vpack.c.bf16 %v12746_v12, %v12747_v15  ;;  %v9486_v48 = vpop.f32.mrb[21].mxu1  ;;  %v9489_v29 = vadd.f32 %v548_v26, %v8499_v54  ;;  %2623 = vmatprep.mubr.f32.mxu1 %v1987_v22  ;;  %3419 = vmatprep.mubr.f32.mxu0 %v1987_v22  ;;  %v1986_v44 = vsel %vm1266_vm3, %v9234_v25, %v1842_v57  ;;  %v4826_v40 = vadd.f32 -1.0, %v6469_v1  ;;  %v12751_v26 = vld [vmem:[#allocation63_spill] sm:$0xff]  ;;  %v12753_v1 = vld [vmem:[#allocation26_spill] sm:$0xff] }
 0x156   :  { %12749 = vst [vmem:[#allocation10_spill] sm:$0xff] %v9486_v48  ;;  %v1335_v38 = vmul.f32 1.442695, %v9465_v20  ;;  %v9495_v58 = vadd.f32 %v12750_v9, %v12729_v63  ;;  %6482 = vpow2.f32 %v1563_v3  ;;  %v1581_v12 = vmul.f32 1.442695, %v9479_v0  ;;  %v12752_v25 = vld [vmem:[#allocation27_spill] sm:$0xff] }
 0x157   :  { %5937 = vmatprep.subr.bf16.mxu1 %v12748_v52  ;;  %2624 = vmatmul.mubr.f32.gmra.mrb[82].mxu1 %v1986_v44  ;;  %v6473_v19 = vpop.eup %6472  ;;  %v9500_v15 = vadd.f32 %v12751_v26, %v12740_v28  ;;  %v1583_v22 = vmul.f32 1.442695, %v9489_v29  ;;  %v12754_v57 = vpack.c.bf16 %v12752_v25, %v12753_v1  ;;  %v552_v52 = vpop.f32.mrb[30].mxu0  ;;  %v1852_v16 = vmul.f32 2.0, %v4826_v40  ;;  %v12755_v26 = vld [vmem:[#allocation30_spill] sm:$0xff] }
 0x158   :  { %3420 = vmatmul.mubr.f32.gmra.mrb[114].mxu0 %v1986_v44  ;;  %v4825_v9 = vadd.f32 -1.0, %v6471_v34  ;;  %v9506_v46 = vpop.f32.mrb[22].mxu1  ;;  %6484 = vpow2.f32 %v1581_v12  ;;  %v9509_v3 = vadd.f32 %v552_v52, %v8474_v43  ;;  %v554_v44 = vpop.f32.mrb[31].mxu0  ;;  %v12757_v48 = vpack.c.bf16 %v12755_v26, %v12756_v35  ;;  %v12763_v26 = vld [vmem:[#allocation35_spill] sm:$0xff] }
 0x159   :  { %5939 = vmatpush1.bf16.msra.mxu1 %v12754_v57  ;;  %v4835_v6 = vadd.f32 -1.0, %v6473_v19  ;;  %v9515_v32 = vpop.f32.mrb[23].mxu1  ;;  %v6475_v25 = vpop.eup %6474  ;;  %6486 = vpow2.f32 %v1583_v22  ;;  %v9518_v40 = vadd.f32 %v554_v44, %v8499_v54  ;;  %v1996_v34 = vsel %vm1276_vm4, %v9320_v39, %v1852_v16  ;;  %v12758_v54 = vld [vmem:[#allocation33_spill] sm:$0xff]  ;;  %v12759_v57 = vld [vmem:[#allocation32_spill] sm:$0xff] }
 0x15a   :  { %5941 = vmatprep.subr.bf16.mxu1 %v12757_v48  ;;  %v1851_v12 = vmul.f32 2.0, %v4825_v9  ;;  %6488 = vpow2.f32 %v1333_v8  ;;  %v1599_v43 = vmul.f32 1.442695, %v9509_v3  ;;  %2629 = vmatprep.mubr.f32.mxu1 %v1996_v34  ;;  %vm1275_vm5 = vcmp.gt.f32.partialorder %v9298_v31, 0.0  ;;  %v6477_v48 = vpop.eup %6476  ;;  %v9530_v16 = vpop.f32.mrb[24].mxu1 }
 0x15b   :  { %3424 = vmatprep.mubr.f32.mxu0 %v1996_v34  ;;  %v1861_v35 = vmul.f32 2.0, %v4835_v6  ;;  %v1353_v19 = vmul.f32 1.442695, %v9500_v15  ;;  %v1601_v1 = vmul.f32 1.442695, %v9518_v40  ;;  %v12760_v52 = vpack.c.bf16 %v12758_v54, %v12759_v57  ;;  %12761 = vst [vmem:[#allocation51_spill] sm:$0xff] %v9530_v16  ;;  %v6479_v39 = vpop.eup %6478 }
 0x15c   :  { %v1995_v22 = vsel %vm1275_vm5, %v9298_v31, %v1851_v12  ;;  %vm1285_vm6 = vcmp.gt.f32.partialorder %v9376_v18, 0.0  ;;  %v9534_v8 = vadd.f32 %v9078_v24, %v12740_v28  ;;  %6490 = vpow2.f32 %v1599_v43  ;;  %v9537_v31 = vpop.f32.mrb[25].mxu1  ;;  %v9539_v44 = vpop.f32.mrb[32].mxu0  ;;  %v12764_v34 = vld [vmem:[#allocation34_spill] sm:$0xff]  ;;  %v9547_v24 = vld [vmem:[%s12516_s2] sm:$0xff] }
 0x15d   :  { %5943 = vmatpush1.bf16.msra.mxu1 %v12760_v52  ;;  %3425 = vmatmul.mubr.f32.gmra.mrb[116].mxu0 %v1995_v22  ;;  %v2005_v6 = vsel %vm1285_vm6, %v9376_v18, %v1861_v35  ;;  %v4834_v9 = vadd.f32 -1.0, %v6475_v25  ;;  %12762 = vst [vmem:[#allocation50_spill] sm:$0xff] %v9539_v44  ;;  %6492 = vpow2.f32 %v1601_v1  ;;  %v12765_v12 = vpack.c.bf16 %v12763_v26, %v12764_v34  ;;  %v9555_v35 = vpop.f32.mrb[33].mxu0  ;;  %v12769_v26 = vld [vmem:[#allocation37_spill] sm:$0xff]  ;;  %v12770_v34 = vld [vmem:[#allocation36_spill] sm:$0xff]  ;;  %v9570_v25 = vpop.f32.mrb[26].mxu1 }
 0x15e   :  { %2630 = vmatmul.mubr.f32.gmra.mrb[84].mxu1 %v1995_v22  ;;  %v4844_v54 = vadd.f32 -1.0, %v6477_v48  ;;  %v12766_v43 = vsub.s32 4, %v12728_v14  ;;  %12768 = vst [vmem:[#allocation12_spill] sm:$0xff] %v9555_v35  ;;  %6494 = vpow2.f32 %v1335_v38  ;;  %v1351_v1 = vmul.f32 1.442695, %v9495_v58  ;;  %3429 = vmatprep.mubr.f32.mxu0 %v2005_v6  ;;  %v6481_v57 = vpop.eup %6480  ;;  %12772 = vst [vmem:[#allocation58_spill] sm:$0xff] %v9570_v25 }
 0x15f   :  { %2635 = vmatprep.mubr.f32.mxu1 %v2005_v6  ;;  %5945 = vmatprep.subr.bf16.mxu1 %v12765_v12  ;;  %v9560_v48 = vadd.f32 %v9064_v11, %v12729_v63  ;;  %v1860_v22 = vmul.f32 2.0, %v4834_v9  ;;  %v9564_v52 = vadd.f32 %v9132_v37, %v12740_v28  ;;  %vm1284_vm7 = vcmp.gt.f32.partialorder %v9353_v13, 0.0  ;;  %v9575_v11 = vld [vmem:[%s12517_s3 + $0x728] sm:$0xff]  ;;  %v9580_v37 = vld [vmem:[%s12517_s3 + $0x740] sm:$0xff]  ;;  %v9590_v35 = vpop.f32.mrb[34].mxu0 }
 0x160   :  { %v9552_v18 = vrot.slane %v9547_v24, %v12766_v43  ;;  %v12771_v12 = vpack.c.bf16 %v12769_v26, %v12770_v34  ;;  %v1870_v38 = vmul.f32 2.0, %v4844_v54  ;;  %v4843_v43 = vadd.f32 -1.0, %v6479_v39  ;;  %12773 = vst [vmem:[#allocation56_spill] sm:$0xff] %v9575_v11  ;;  %12774 = vst [vmem:[#allocation15_spill] sm:$0xff] %v9580_v37  ;;  %v6483_v6 = vpop.eup %6482  ;;  %v12775_v39 = vld [vmem:[#allocation39_spill] sm:$0xff]  ;;  %v12776_v54 = vld [vmem:[#allocation38_spill] sm:$0xff] }
 0x161   :  { %6496 = vpow2.f32 %v1353_v19  ;;  %v1371_v9 = vmul.f32 1.442695, %v9534_v8  ;;  %v2004_v26 = vsel %vm1284_vm7, %v9353_v13, %v1860_v22  ;;  %vm1294_vm8 = vcmp.gt.f32.partialorder %v9418_v10, 0.0  ;;  %12779 = vst [vmem:[#allocation17_spill] sm:$0xff] %v9590_v35  ;;  %v9597_v22 = vpop.f32.mrb[35].mxu0  ;;  %v12785_v35 = vld [vmem:[#allocation44_spill] sm:$0xff] }
 0x162   :  { %12767 = vst [vmem:[#allocation13_spill] sm:$0xff] %v9552_v18  ;;  %5947 = vmatpush1.bf16.msra.mxu1 %v12771_v12  ;;  %v12777_v34 = vpack.c.bf16 %v12775_v39, %v12776_v54  ;;  %v9588_v12 = vpop.f32.mrb[27].mxu1  ;;  %v9594_v44 = vadd.f32 %v9118_v4, %v12729_v63  ;;  %3430 = vmatmul.mubr.f32.gmra.mrb[118].mxu0 %v2004_v26  ;;  %v1869_v18 = vmul.f32 2.0, %v4843_v43  ;;  %v4853_v13 = vadd.f32 -1.0, %v6481_v57  ;;  %v6485_v25 = vpop.eup %6484  ;;  %v12781_v57 = vld [vmem:[#allocation41_spill] sm:$0xff] }
 0x163   :  { %12778 = vst [vmem:[#allocation14_spill] sm:$0xff] %v9588_v12  ;;  %2636 = vmatmul.mubr.f32.gmra.mrb[86].mxu1 %v2004_v26  ;;  %v2014_v19 = vsel %vm1294_vm8, %v9418_v10, %v1870_v38  ;;  %12780 = vst [vmem:[#allocation16_spill] sm:$0xff] %v9597_v22  ;;  %6498 = vpow2.f32 %v1351_v1  ;;  %v1369_v39 = vmul.f32 1.442695, %v9560_v48  ;;  %v9602_v54 = vadd.f32 %v9186_v61, %v12740_v28  ;;  %v6487_v26 = vpop.eup %6486  ;;  %v12782_v38 = vld [vmem:[#allocation40_spill] sm:$0xff]  ;;  %v9611_v22 = vpop.f32.mrb[28].mxu1 }
 0x164   :  { %5949 = vmatprep.subr.bf16.mxu1 %v12777_v34  ;;  %2641 = vmatprep.mubr.f32.mxu1 %v2014_v19  ;;  %v1389_v10 = vmul.f32 1.442695, %v9564_v52  ;;  %vm1293_vm9 = vcmp.gt.f32.partialorder %v9405_v53, 0.0  ;;  %v12783_v43 = vpack.c.bf16 %v12781_v57, %v12782_v38  ;;  %v1879_v1 = vmul.f32 2.0, %v4853_v13  ;;  %v6489_v61 = vpop.eup %6488  ;;  %v12784_v4 = vld [vmem:[#allocation45_spill] sm:$0xff]  ;;  %v9618_v12 = vpop.f32.mrb[29].mxu1 }
 0x165   :  { %3434 = vmatprep.mubr.f32.mxu0 %v2014_v19  ;;  %v4852_v34 = vadd.f32 -1.0, %v6483_v6  ;;  %6500 = vpow2.f32 %v1371_v9  ;;  %v2013_v19 = vsel %vm1293_vm9, %v9405_v53, %v1869_v18  ;;  %vm1303_vm10 = vcmp.gt.f32.partialorder %v9460_v7, 0.0  ;;  %v9620_v16 = vpop.f32.mrb[36].mxu0  ;;  %v12790_v38 = vld [vmem:[#allocation46_spill] sm:$0xff] }
 0x166   :  { %5951 = vmatpush1.bf16.msra.mxu1 %v12783_v43  ;;  %v12786_v11 = vpack.c.bf16 %v12784_v4, %v12785_v35  ;;  %v4862_v37 = vadd.f32 -1.0, %v6487_v26  ;;  %12787 = vst [vmem:[#allocation28_spill] sm:$0xff] %v9620_v16  ;;  %v1387_v13 = vmul.f32 1.442695, %v9594_v44  ;;  %v9625_v6 = vadd.f32 %v9172_v51, %v12729_v63  ;;  %3435 = vmatmul.mubr.f32.gmra.mrb[120].mxu0 %v2013_v19  ;;  %v9628_v9 = vpop.f32.mrb[37].mxu0  ;;  %v6491_v35 = vpop.eup %6490 }
 0x167   :  { %2642 = vmatmul.mubr.f32.gmra.mrb[88].mxu1 %v2013_v19  ;;  %v2023_v53 = vsel %vm1303_vm10, %v9460_v7, %v1879_v1  ;;  %v1878_v18 = vmul.f32 2.0, %v4852_v34  ;;  %12788 = vst [vmem:[#allocation57_spill] sm:$0xff] %v9628_v9  ;;  %6502 = vpow2.f32 %v1369_v39  ;;  %v4861_v26 = vadd.f32 -1.0, %v6485_v25  ;;  %v6493_v57 = vpop.eup %6492  ;;  %v12789_v7 = vld [vmem:[#allocation47_spill] sm:$0xff]  ;;  %v9640_v39 = vpop.f32.mrb[30].mxu1  ;;  %v12794_v34 = vld [vmem:[#allocation52_spill] sm:$0xff] }
 0x168   :  { %5953 = vmatprep.subr.bf16.mxu1 %v12786_v11  ;;  %v1407_v11 = vmul.f32 1.442695, %v9602_v54  ;;  %2647 = vmatprep.mubr.f32.mxu1 %v2023_v53  ;;  %v1888_v4 = vmul.f32 2.0, %v4862_v37  ;;  %6504 = vpow2.f32 %v1389_v10  ;;  %v9633_v51 = vadd.f32 %v9240_v45, %v12740_v28  ;;  %12792 = vst [vmem:[#allocation19_spill] sm:$0xff] %v9640_v39  ;;  %v6495_v1 = vpop.eup %6494  ;;  %v12793_v10 = vld [vmem:[#allocation53_spill] sm:$0xff]  ;;  %v9647_v9 = vpop.f32.mrb[31].mxu1 }
 0x169   :  { %3439 = vmatprep.mubr.f32.mxu0 %v2023_v53  ;;  %vm1302_vm11 = vcmp.gt.f32.partialorder %v9440_v42, 0.0  ;;  %v12791_v43 = vpack.c.bf16 %v12789_v7, %v12790_v38  ;;  %vm1312_vm12 = vcmp.gt.f32.partialorder %v9489_v29, 0.0  ;;  %v12795_v19 = vpack.c.bf16 %v12793_v10, %v12794_v34  ;;  %12796 = vst [vmem:[#allocation18_spill] sm:$0xff] %v9647_v9  ;;  %v9649_v16 = vpop.f32.mrb[38].mxu0 }
 0x16a   :  { %v2022_v37 = vsel %vm1302_vm11, %v9440_v42, %v1878_v18  ;;  %v2032_v25 = vsel %vm1312_vm12, %v9489_v29, %v1888_v4  ;;  %v1887_v45 = vmul.f32 2.0, %v4861_v26  ;;  %v4871_v53 = vadd.f32 -1.0, %v6493_v57  ;;  %12797 = vst [vmem:[#allocation21_spill] sm:$0xff] %v9649_v16  ;;  %v9660_v18 = vld [vmem:[%s12517_s3 + $0x720] sm:$0xff]  ;;  %v9665_v4 = vld [vmem:[%s12517_s3 + $0x738] sm:$0xff] }
 0x16b   :  { %5955 = vmatpush1.bf16.msra.mxu1 %v12791_v43  ;;  %v4737_v7 = vadd.f32 -1.0, %v6489_v61  ;;  %6506 = vpow2.f32 %v1387_v13  ;;  %v1405_v38 = vmul.f32 1.442695, %v9625_v6  ;;  %3440 = vmatmul.mubr.f32.gmra.mrb[122].mxu0 %v2022_v37  ;;  %v12798_v42 = vsub.s32 5, %v12728_v14  ;;  %v9667_v61 = vpop.f32.mrb[39].mxu0  ;;  %v6497_v13 = vpop.eup %6496  ;;  %v9676_v43 = vld [vmem:[%s12517_s3 + $0x758] sm:$0xff] }
 0x16c   :  { %5957 = vmatprep.subr.bf16.mxu1 %v12795_v19  ;;  %2648 = vmatmul.mubr.f32.gmra.mrb[90].mxu1 %v2022_v37  ;;  %12800 = vst [vmem:[#allocation31_spill] sm:$0xff] %v9667_v61  ;;  %6508 = vpow2.f32 %v1407_v11  ;;  %v9671_v26 = vadd.f32 %v9226_v47, %v12729_v63  ;;  %v4870_v57 = vadd.f32 -1.0, %v6491_v35  ;;  %v9681_v37 = vld [vmem:[%s12517_s3 + $0x770] sm:$0xff]  ;;  %v1425_v47 = vmul.f32 1.442695, %v9633_v51  ;;  %v9697_v19 = vld [vmem:[%s12517_s3 + $0x768] sm:$0xff] }
 0x16d   :  { %v9655_v29 = vrot.slane %v9547_v24, %v12798_v42  ;;  %2653 = vmatprep.mubr.f32.mxu1 %v2032_v25  ;;  %3444 = vmatprep.mubr.f32.mxu0 %v2032_v25  ;;  %v1897_v24 = vmul.f32 2.0, %v4871_v53  ;;  %v9686_v11 = vld [vmem:[%s12517_s3 + $0x750] sm:$0xff]  ;;  %vm1311_vm13 = vcmp.gt.f32.partialorder %v9479_v0, 0.0  ;;  %v12802_v25 = vld [vmem:[#allocation54_spill] sm:$0xff]  ;;  %vm1321_vm14 = vcmp.gt.f32.partialorder %v9518_v40, 0.0  ;;  %v6499_v53 = vpop.eup %6498  ;;  %v12804_v61 = vld [vmem:[#allocation61_spill] sm:$0xff] }
 0x16e   :  { %v12801_v35 = vld [vmem:[#allocation55_spill] sm:$0xff]  ;;  %v4738_v34 = vadd.f32 -1.0, %v6495_v1  ;;  %v9701_v42 = vadd.f32 %v9304_v41, %v12740_v28  ;;  %v2031_v14 = vsel %vm1311_vm13, %v9479_v0, %v1887_v45  ;;  %v9708_v1 = vpop.f32.mrb[40].mxu0  ;;  %v4747_v9 = vadd.f32 -1.0, %v6497_v13 }
 0x16f   :  { %12799 = vst [vmem:[#allocation20_spill] sm:$0xff] %v9655_v29  ;;  %v12803_v10 = vpack.c.bf16 %v12801_v35, %v12802_v25  ;;  %v2041_v16 = vsel %vm1321_vm14, %v9518_v40, %v1897_v24  ;;  %v12805_v35 = vld [vmem:[#allocation60_spill] sm:$0xff]  ;;  %v9710_v29 = vpop.f32.mrb[32].mxu1  ;;  %3445 = vmatmul.mubr.f32.gmra.mrb[124].mxu0 %v2031_v14  ;;  %v9716_v40 = vpop.f32.mrb[41].mxu0  ;;  %v1763_v24 = vmul.f32 2.0, %v4737_v7  ;;  %vm1188_vm15 = vcmp.gt.f32.partialorder %v9465_v20, 0.0 }
 0x170   :  { %v12806_v25 = vpack.c.bf16 %v12804_v61, %v12805_v35  ;;  %12807 = vst [vmem:[#allocation59_spill] sm:$0xff] %v9710_v29  ;;  %2654 = vmatmul.mubr.f32.gmra.mrb[92].mxu1 %v2031_v14  ;;  %v1764_v39 = vmul.f32 2.0, %v4738_v34  ;;  %v9718_v45 = vpop.f32.mrb[33].mxu1  ;;  %v6501_v61 = vpop.eup %6500  ;;  %3449 = vmatprep.mubr.f32.mxu0 %v2041_v16  ;;  %6510 = vpow2.f32 %v1405_v38  ;;  %v1423_v13 = vmul.f32 1.442695, %v9671_v26  ;;  %v9744_v7 = vld [vmem:[%s12517_s3 + $0x7a0] sm:$0xff] }
 0x171   :  { %5959 = vmatpush1.bf16.msra.mxu1 %v12803_v10  ;;  %v1896_v10 = vmul.f32 2.0, %v4870_v57  ;;  %12808 = vst [vmem:[#allocation23_spill] sm:$0xff] %v9718_v45  ;;  %v9722_v57 = vadd.f32 %v9290_v60, %v12729_v63  ;;  %2659 = vmatprep.mubr.f32.mxu1 %v2041_v16  ;;  %v9730_v34 = vadd.f32 %v9360_v59, %v12740_v28  ;;  %vm1320_vm0 = vcmp.gt.f32.partialorder %v9509_v3, 0.0  ;;  %v9739_v16 = vld [vmem:[%s12517_s3 + $0x788] sm:$0xff]  ;;  %v6503_v38 = vpop.eup %6502  ;;  %v9757_v14 = vpop.f32.mrb[42].mxu0  ;;  %v9803_v45 = vld [vmem:[%s12517_s3 + $0x7d8] sm:$0xff] }
 0x172   :  { %5961 = vmatprep.subr.bf16.mxu1 %v12806_v25  ;;  %v12809_v60 = vpack.c.bf16 %v9037_v62, %v9032_v36  ;;  %6512 = vpow2.f32 %v1425_v47  ;;  %v1443_v59 = vmul.f32 1.442695, %v9701_v42  ;;  %v12810_v36 = vpack.c.bf16 %v9111_v27, %v9106_v49  ;;  %v2243_v25 = vld [vmem:[%s12517_s3 + $0x610] sm:$0xff]  ;;  %12811 = vst [vmem:[#allocation22_spill] sm:$0xff] %v9757_v14  ;;  %v6505_v47 = vpop.eup %6504 }
 0x173   :  { %v2040_v35 = vsel %vm1320_vm0, %v9509_v3, %v1896_v10  ;;  %v4746_v62 = vadd.f32 -1.0, %v6499_v53  ;;  %vm1187_vm1 = vcmp.gt.f32.partialorder %v9427_v17, 0.0  ;;  %v1908_v49 = vsel %vm1188_vm15, %v9465_v20, %v1764_v39  ;;  %v9763_v53 = vpop.f32.mrb[43].mxu0  ;;  %v9765_v10 = vpop.f32.mrb[34].mxu1 }
 0x174   :  { %2660 = vmatmul.mubr.f32.gmra.mrb[94].mxu1 %v2040_v35  ;;  %3450 = vmatmul.mubr.f32.gmra.mrb[126].mxu0 %v2040_v35  ;;  %v1773_v27 = vmul.f32 2.0, %v4747_v9  ;;  %v4756_v3 = vadd.f32 -1.0, %v6501_v61  ;;  %12812 = vst [vmem:[#allocation25_spill] sm:$0xff] %v9763_v53  ;;  %12813 = vst [vmem:[#allocation24_spill] sm:$0xff] %v9765_v10  ;;  %v9770_v0 = vadd.f32 %v9345_v21, %v12729_v63  ;;  %vm1197_vm2 = vcmp.gt.f32.partialorder %v9500_v15, 0.0  ;;  %v9775_v20 = vpop.f32.mrb[35].mxu1 }
 0x175   :  { %5963 = vmatpush1.bf16.msra.mxu1 %v12809_v60  ;;  %v2246_v60 = vld [vmem:[%s12517_s3 + $0x628] sm:$0xff]  ;;  %2730 = vmatprep.mubr.f32.mxu1 %v1908_v49  ;;  %12814 = vst [vmem:[#allocation62_spill] sm:$0xff] %v9775_v20  ;;  %v6507_v9 = vpop.eup %6506  ;;  %6514 = vpow2.f32 %v1423_v13  ;;  %v1461_v39 = vmul.f32 1.442695, %v9730_v34  ;;  %v9780_v61 = vadd.f32 %v9412_v23, %v12740_v28  ;;  %v9785_v21 = vld [vmem:[%s12517_s3 + $0x780] sm:$0xff]  ;;  %v1907_v13 = vsel %vm1187_vm1, %v9427_v17, %v1763_v24  ;;  %v9805_v29 = vpop.f32.mrb[44].mxu0 }
 0x176   :  { %5965 = vmatprep.subr.bf16.mxu1 %v12810_v36  ;;  %v1441_v36 = vmul.f32 1.442695, %v9722_v57  ;;  %3519 = vmatprep.mubr.f32.mxu0 %v1908_v49  ;;  %v9790_v49 = vld [vmem:[%s12517_s3 + $0x798] sm:$0xff]  ;;  %v6162_v35 = vpack.c.bf16 %v2246_v60, %v2243_v25  ;;  %v6509_v41 = vpop.eup %6508  ;;  %6516 = vpow2.f32 %v1443_v59  ;;  %v1772_v20 = vmul.f32 2.0, %v4746_v62  ;;  %v9798_v10 = vld [vmem:[%s12517_s3 + $0x7c0] sm:$0xff]  ;;  %12815 = vst [vmem:[#allocation63_spill] sm:$0xff] %v9805_v29 }
 0x177   :  { %v4755_v23 = vadd.f32 -1.0, %v6503_v38  ;;  %v9807_v25 = vpop.f32.mrb[36].mxu1  ;;  %v1917_v17 = vsel %vm1197_vm2, %v9500_v15, %v1773_v27  ;;  %vm1196_vm3 = vcmp.gt.f32.partialorder %v9495_v58, 0.0  ;;  %v1782_v24 = vmul.f32 2.0, %v4756_v3  ;;  %v9813_v59 = vpop.f32.mrb[45].mxu0  ;;  %v12825_v15 = vld [vmem:[#allocation65_spill] sm:$0xff] }
 0x178   :  { %12816 = vst [vmem:[#allocation27_spill] sm:$0xff] %v9807_v25  ;;  %2731 = vmatmul.mubr.f32.vlgmr.msra.gmra.mrb[64].mxu1 %v1907_v13  ;;  %3520 = vmatmul.mubr.f32.vlgmr.msra.gmra.mrb[128].mxu0 %v1907_v13  ;;  %v4765_v38 = vadd.f32 -1.0, %v6505_v47  ;;  %12817 = vst [vmem:[#allocation26_spill] sm:$0xff] %v9813_v59  ;;  %v9815_v62 = vpop.f32.mrb[37].mxu1  ;;  %6518 = vpow2.f32 %v1441_v36  ;;  %v1459_v60 = vmul.f32 1.442695, %v9770_v0  ;;  %v12819_v25 = vpack.c.bf16 %v9145_v30, %v9140_v2 }
 0x179   :  { %12818 = vst [vmem:[#allocation30_spill] sm:$0xff] %v9815_v62  ;;  %2736 = vmatprep.mubr.f32.mxu1 %v1917_v17  ;;  %vm1206_vm4 = vcmp.gt.f32.partialorder %v9534_v8, 0.0  ;;  %6520 = vpow2.f32 %v1461_v39  ;;  %v9826_v47 = vadd.f32 %v9397_v33, %v12729_v63  ;;  %v1479_v27 = vmul.f32 1.442695, %v9780_v61  ;;  %3524 = vmatprep.mubr.f32.mxu0 %v1917_v17  ;;  %v9835_v2 = vld [vmem:[%s12517_s3 + $0x7b8] sm:$0xff]  ;;  %v9840_v30 = vld [vmem:[%s12517_s3 + $0x7d0] sm:$0xff] }
 0x17a   :  { %5967 = vmatpush1.bf16.msra.mxu1 %v12819_v25  ;;  %v12820_v3 = vpack.c.bf16 %v9165_v50, %v9160_v56  ;;  %v6164_v33 = vpack.c.bf16 %v9803_v45, %v9798_v10  ;;  %v9846_v36 = vadd.f32 %v9447_v5, %v12740_v28  ;;  %v1916_v56 = vsel %vm1196_vm3, %v9495_v58, %v1772_v20  ;;  %v9854_v13 = vld [vmem:[%s12517_s3 + $0x640] sm:$0xff]  ;;  %v9859_v45 = vld [vmem:[%s12517_s3 + $0x658] sm:$0xff]  ;;  %v9861_v10 = vpop.f32.mrb[46].mxu0  ;;  %v9863_v5 = vpop.f32.mrb[38].mxu1 }
 0x17b   :  { %v1781_v50 = vmul.f32 2.0, %v4755_v23  ;;  %v4764_v39 = vadd.f32 -1.0, %v6507_v9  ;;  %6163 = vmatpush3.bf16.msra.mxu0 %v6162_v35  ;;  %12821 = vst [vmem:[#allocation29_spill] sm:$0xff] %v9861_v10  ;;  %12822 = vst [vmem:[#allocation33_spill] sm:$0xff] %v9863_v5  ;;  %v6511_v25 = vpop.eup %6510  ;;  %v1926_v58 = vsel %vm1206_vm4, %v9534_v8, %v1782_v24  ;;  %vm1205_vm5 = vcmp.gt.f32.partialorder %v9560_v48, 0.0  ;;  %v9869_v9 = vpop.f32.mrb[47].mxu0 }
 0x17c   :  { %5969 = vmatprep.subr.bf16.mxu1 %v12820_v3  ;;  %2737 = vmatmul.mubr.f32.gmra.mrb[66].mxu1 %v1916_v56  ;;  %v1791_v35 = vmul.f32 2.0, %v4765_v38  ;;  %v4774_v20 = vadd.f32 -1.0, %v6509_v41  ;;  %12823 = vst [vmem:[#allocation32_spill] sm:$0xff] %v9869_v9  ;;  %v9871_v23 = vpop.f32.mrb[39].mxu1  ;;  %v6513_v17 = vpop.eup %6512  ;;  %6522 = vpow2.f32 %v1459_v60  ;;  %v9875_v3 = vadd.f32 %v9434_v55, %v12729_v63  ;;  %v9886_v41 = vld [vmem:[%s12517_s3 + $0x7b0] sm:$0xff]  ;;  %v12828_v55 = vld [vmem:[#allocation10_spill] sm:$0xff] }
 0x17d   :  { %3525 = vmatmul.mubr.f32.gmra.mrb[130].mxu0 %v1916_v56  ;;  %12824 = vst [vmem:[#allocation35_spill] sm:$0xff] %v9871_v23  ;;  %v12826_v56 = vld [vmem:[#allocation64_spill] sm:$0xff]  ;;  %2742 = vmatprep.mubr.f32.mxu1 %v1926_v58  ;;  %vm1215_vm6 = vcmp.gt.f32.partialorder %v9564_v52, 0.0  ;;  %v1477_v24 = vmul.f32 1.442695, %v9826_v47  ;;  %6524 = vpow2.f32 %v1479_v27  ;;  %v9891_v38 = vadd.f32 %v12828_v55, %v12740_v28  ;;  %v12829_v60 = vld [vmem:[#allocation67_spill] sm:$0xff] }
 0x17e   :  { %v12827_v5 = vpack.c.bf16 %v12825_v15, %v12826_v56  ;;  %3529 = vmatprep.mubr.f32.mxu0 %v1926_v58  ;;  %v12830_v15 = vld [vmem:[#allocation66_spill] sm:$0xff]  ;;  %v6166_v8 = vpack.c.bf16 %v9859_v45, %v9854_v13  ;;  %v9906_v27 = vld [vmem:[%s12517_s3 + $0x7f0] sm:$0xff]  ;;  %v1497_v55 = vmul.f32 1.442695, %v9846_v36  ;;  %6165 = vmatprep.subr.bf16.mxu0 %v6164_v33  ;;  %v9917_v13 = vpop.f32.mrb[48].mxu0  ;;  %v9919_v45 = vpop.f32.mrb[40].mxu1  ;;  %v1935_v62 = vsel %vm1215_vm6, %v9564_v52, %v1791_v35 }
 0x17f   :  { %v9899_v56 = vld [vmem:[%s12517_s3 + $0x7c8] sm:$0xff]  ;;  %12832 = vst [vmem:[#allocation34_spill] sm:$0xff] %v9917_v13  ;;  %12833 = vst [vmem:[#allocation37_spill] sm:$0xff] %v9919_v45  ;;  %v6515_v23 = vpop.eup %6514  ;;  %vm1214_vm7 = vcmp.gt.f32.partialorder %v9594_v44, 0.0  ;;  %v1800_v9 = vmul.f32 2.0, %v4774_v20  ;;  %v4783_v10 = vadd.f32 -1.0, %v6513_v17  ;;  %6526 = vpow2.f32 %v1477_v24 }
 0x180   :  { %5971 = vmatpush1.bf16.msra.mxu1 %v12827_v5  ;;  %v12831_v5 = vpack.c.bf16 %v12829_v60, %v12830_v15  ;;  %v9911_v58 = vld [vmem:[%s12517_s3 + $0x808] sm:$0xff]  ;;  %v1925_v60 = vsel %vm1205_vm5, %v9560_v48, %v1781_v50  ;;  %v1790_v15 = vmul.f32 2.0, %v4764_v39  ;;  %v9925_v59 = vpop.f32.mrb[49].mxu0  ;;  %v9927_v48 = vpop.f32.mrb[41].mxu1  ;;  %v1495_v50 = vmul.f32 1.442695, %v9875_v3  ;;  %6167 = vmatpush3.bf16.msra.mxu0 %v6166_v8 }
 0x181   :  { %2743 = vmatmul.mubr.f32.gmra.mrb[68].mxu1 %v1925_v60  ;;  %3530 = vmatmul.mubr.f32.gmra.mrb[132].mxu0 %v1925_v60  ;;  %12834 = vst [vmem:[#allocation36_spill] sm:$0xff] %v9925_v59  ;;  %12835 = vst [vmem:[#allocation39_spill] sm:$0xff] %v9927_v48  ;;  %v6517_v33 = vpop.eup %6516  ;;  %v12836_v39 = vld [vmem:[#allocation11_spill] sm:$0xff]  ;;  %v12837_v60 = vld [vmem:[#allocation69_spill] sm:$0xff]  ;;  %vm1224_vm8 = vcmp.gt.f32.partialorder %v9602_v54, 0.0  ;;  %v9943_v20 = vadd.f32 %v9515_v32, %v12740_v28  ;;  %6528 = vpow2.f32 %v1497_v55  ;;  %vm1223_vm9 = vcmp.gt.f32.partialorder %v9625_v6, 0.0 }
 0x182   :  { %5973 = vmatprep.subr.bf16.mxu1 %v12831_v5  ;;  %v4773_v5 = vadd.f32 -1.0, %v6511_v25  ;;  %v9932_v25 = vadd.f32 %v12836_v39, %v12729_v63  ;;  %v12838_v45 = vld [vmem:[#allocation68_spill] sm:$0xff]  ;;  %2748 = vmatprep.mubr.f32.mxu1 %v1935_v62  ;;  %v1515_v35 = vmul.f32 1.442695, %v9891_v38  ;;  %v12840_v17 = vld [vmem:[#allocation71_spill] sm:$0xff]  ;;  %v12841_v39 = vld [vmem:[#allocation70_spill] sm:$0xff]  ;;  %v6519_v32 = vpop.eup %6518  ;;  %6530 = vpow2.f32 %v1495_v50 }
 0x183   :  { %v12839_v13 = vpack.c.bf16 %v12837_v60, %v12838_v45  ;;  %3534 = vmatprep.mubr.f32.mxu0 %v1935_v62  ;;  %v12842_v48 = vpack.c.bf16 %v12840_v17, %v12841_v39  ;;  %v9956_v24 = vld [vmem:[%s12517_s3 + $0x800] sm:$0xff]  ;;  %v6168_v45 = vpack.c.bf16 %v9911_v58, %v9906_v27  ;;  %v1934_v62 = vsel %vm1214_vm7, %v9594_v44, %v1790_v15  ;;  %v9966_v17 = vld [vmem:[%s12517_s3 + $0x670] sm:$0xff]  ;;  %v9971_v39 = vld [vmem:[%s12517_s3 + $0x688] sm:$0xff]  ;;  %v9973_v27 = vpop.f32.mrb[50].mxu0  ;;  %v9975_v58 = vpop.f32.mrb[42].mxu1 }
 0x184   :  { %v4782_v60 = vadd.f32 -1.0, %v6515_v23  ;;  %12843 = vst [vmem:[#allocation38_spill] sm:$0xff] %v9973_v27  ;;  %12844 = vst [vmem:[#allocation41_spill] sm:$0xff] %v9975_v58  ;;  %v6521_v55 = vpop.eup %6520  ;;  %v1944_v44 = vsel %vm1224_vm8, %v9602_v54, %v1800_v9  ;;  %v1809_v23 = vmul.f32 2.0, %v4783_v10  ;;  %v4792_v8 = vadd.f32 -1.0, %v6517_v33  ;;  %v9981_v15 = vpop.f32.mrb[51].mxu0 }
 0x185   :  { %5975 = vmatpush1.bf16.msra.mxu1 %v12839_v13  ;;  %v9951_v13 = vld [vmem:[%s12517_s3 + $0x7e8] sm:$0xff]  ;;  %3535 = vmatmul.mubr.f32.gmra.mrb[134].mxu0 %v1934_v62  ;;  %12845 = vst [vmem:[#allocation40_spill] sm:$0xff] %v9981_v15  ;;  %v1513_v52 = vmul.f32 1.442695, %v9932_v25  ;;  %v12847_v27 = vld [vmem:[#allocation73_spill] sm:$0xff]  ;;  %v12848_v58 = vld [vmem:[#allocation72_spill] sm:$0xff]  ;;  %6532 = vpow2.f32 %v1515_v35  ;;  %v9994_v10 = vadd.f32 %v9506_v46, %v12729_v63  ;;  %v6170_v46 = vpack.c.bf16 %v9971_v39, %v9966_v17 }
 0x186   :  { %5977 = vmatprep.subr.bf16.mxu1 %v12842_v48  ;;  %v1799_v48 = vmul.f32 2.0, %v4773_v5  ;;  %2749 = vmatmul.mubr.f32.gmra.mrb[70].mxu1 %v1934_v62  ;;  %v9983_v5 = vpop.f32.mrb[43].mxu1  ;;  %v12849_v59 = vpack.c.bf16 %v12847_v27, %v12848_v58  ;;  %vm1233_vm10 = vcmp.gt.f32.partialorder %v9633_v51, 0.0  ;;  %v1533_v9 = vmul.f32 1.442695, %v9943_v20  ;;  %v12850_v33 = vld [vmem:[#allocation6_spill] sm:$0xff]  ;;  %v6523_v27 = vpop.eup %6522 }
 0x187   :  { %12846 = vst [vmem:[#allocation45_spill] sm:$0xff] %v9983_v5  ;;  %2754 = vmatprep.mubr.f32.mxu1 %v1944_v44  ;;  %3539 = vmatprep.mubr.f32.mxu0 %v1944_v44  ;;  %v12851_v50 = vld [vmem:[#allocation7_spill] sm:$0xff]  ;;  %v10008_v35 = vld [vmem:[%s12517_s3 + $0x7f8] sm:$0xff]  ;;  %v10014_v58 = vadd.f32 %v9537_v31, %v12740_v28  ;;  %v10027_v39 = vpop.f32.mrb[52].mxu0  ;;  %v10029_v31 = vpop.f32.mrb[44].mxu1  ;;  %vm1232_vm11 = vcmp.gt.f32.partialorder %v9671_v26, 0.0  ;;  %6534 = vpow2.f32 %v1513_v52 }
 0x188   :  { %v12852_v62 = vpack.c.bf16 %v12850_v33, %v12851_v50  ;;  %v1943_v44 = vsel %vm1223_vm9, %v9625_v6, %v1799_v48  ;;  %v1808_v33 = vmul.f32 2.0, %v4782_v60  ;;  %v4791_v50 = vadd.f32 -1.0, %v6519_v32  ;;  %6169 = vmatprep.subr.bf16.mxu0 %v6168_v45  ;;  %v2312_v17 = vld [vmem:[%s12517_s3 + $0x838] sm:$0xff]  ;;  %12853 = vst [vmem:[#allocation44_spill] sm:$0xff] %v10027_v39  ;;  %12854 = vst [vmem:[#allocation47_spill] sm:$0xff] %v10029_v31  ;;  %v6525_v54 = vpop.eup %6524  ;;  %v10035_v48 = vpop.f32.mrb[53].mxu0 }
 0x189   :  { %5979 = vmatpush1.bf16.msra.mxu1 %v12849_v59  ;;  %v10003_v59 = vld [vmem:[%s12517_s3 + $0x7e0] sm:$0xff]  ;;  %3540 = vmatmul.mubr.f32.gmra.mrb[136].mxu0 %v1943_v44  ;;  %v1953_v6 = vsel %vm1233_vm10, %v9633_v51, %v1809_v23  ;;  %v1818_v45 = vmul.f32 2.0, %v4792_v8  ;;  %v4801_v32 = vadd.f32 -1.0, %v6521_v55  ;;  %12855 = vst [vmem:[#allocation46_spill] sm:$0xff] %v10035_v48  ;;  %v12856_v60 = vld [vmem:[#allocation51_spill] sm:$0xff]  ;;  %v12857_v39 = vld [vmem:[#allocation42_spill] sm:$0xff]  ;;  %6536 = vpow2.f32 %v1533_v9 }
 0x18a   :  { %5981 = vmatprep.subr.bf16.mxu1 %v12852_v62  ;;  %v10022_v62 = vld [vmem:[%s12517_s3 + $0x820] sm:$0xff]  ;;  %2755 = vmatmul.mubr.f32.gmra.mrb[72].mxu1 %v1943_v44  ;;  %v10039_v5 = vadd.f32 %v12856_v60, %v12729_v63  ;;  %v12858_v31 = vld [vmem:[#allocation43_spill] sm:$0xff]  ;;  %vm1242_vm12 = vcmp.gt.f32.partialorder %v9701_v42, 0.0  ;;  %v10050_v55 = vld [vmem:[%s12517_s3 + $0x818] sm:$0xff]  ;;  %v10052_v52 = vpop.f32.mrb[45].mxu1  ;;  %vm1241_vm13 = vcmp.gt.f32.partialorder %v9722_v57, 0.0 }
 0x18b   :  { %v12859_v15 = vpack.c.bf16 %v12857_v39, %v12858_v31  ;;  %2760 = vmatprep.mubr.f32.mxu1 %v1953_v6  ;;  %12860 = vst [vmem:[#allocation53_spill] sm:$0xff] %v10052_v52  ;;  %v1531_v23 = vmul.f32 1.442695, %v9994_v10  ;;  %v12861_v8 = vld [vmem:[#allocation14_spill] sm:$0xff]  ;;  %3544 = vmatprep.mubr.f32.mxu0 %v1953_v6  ;;  %v12863_v39 = vld [vmem:[#allocation9_spill] sm:$0xff]  ;;  %v10065_v60 = vld [vmem:[%s12517_s3 + $0x830] sm:$0xff]  ;;  %v6172_v51 = vpack.c.bf16 %v2312_v17, %v10022_v62  ;;  %v6527_v52 = vpop.eup %6526 }
 0x18c   :  { %v10057_v44 = vadd.f32 %v12861_v8, %v12740_v28  ;;  %v10071_v9 = vld [vmem:[%s12517_s3 + $0x6a0] sm:$0xff]  ;;  %v10076_v6 = vld [vmem:[%s12517_s3 + $0x6b8] sm:$0xff]  ;;  %v1551_v8 = vmul.f32 1.442695, %v10014_v58  ;;  %6171 = vmatpush3.bf16.msra.mxu0 %v6170_v46  ;;  %v10082_v62 = vpop.f32.mrb[54].mxu0  ;;  %v10084_v17 = vpop.f32.mrb[46].mxu1  ;;  %v1962_v48 = vsel %vm1242_vm12, %v9701_v42, %v1818_v45  ;;  %v10108_v45 = vadd.f32 %v9618_v12, %v12740_v28 }
 0x18d   :  { %5983 = vmatpush1.bf16.msra.mxu1 %v12859_v15  ;;  %v12862_v15 = vld [vmem:[#allocation8_spill] sm:$0xff]  ;;  %12865 = vst [vmem:[#allocation52_spill] sm:$0xff] %v10082_v62  ;;  %12866 = vst [vmem:[#allocation55_spill] sm:$0xff] %v10084_v17  ;;  %v1827_v29 = vmul.f32 2.0, %v4801_v32  ;;  %v4810_v53 = vadd.f32 -1.0, %v6525_v54  ;;  %v10090_v14 = vpop.f32.mrb[55].mxu0  ;;  %v6529_v46 = vpop.eup %6528  ;;  %6538 = vpow2.f32 %v1531_v23  ;;  %6173 = vmatprep.subr.bf16.mxu0 %v6172_v51 }
 0x18e   :  { %v12864_v31 = vpack.c.bf16 %v12862_v15, %v12863_v39  ;;  %v1952_v15 = vsel %vm1232_vm11, %v9671_v26, %v1808_v33  ;;  %v1817_v39 = vmul.f32 2.0, %v4791_v50  ;;  %v10092_v26 = vpop.f32.mrb[47].mxu1  ;;  %v12868_v33 = vld [vmem:[#allocation58_spill] sm:$0xff]  ;;  %v12870_v17 = vld [vmem:[#allocation49_spill] sm:$0xff]  ;;  %vm1251_vm14 = vcmp.gt.f32.partialorder %v9730_v34, 0.0  ;;  %v12872_v32 = vld [vmem:[#allocation15_spill] sm:$0xff] }
 0x18f   :  { %2761 = vmatmul.mubr.f32.gmra.mrb[74].mxu1 %v1952_v15  ;;  %3545 = vmatmul.mubr.f32.gmra.mrb[138].mxu0 %v1952_v15  ;;  %12867 = vst [vmem:[#allocation54_spill] sm:$0xff] %v10092_v26  ;;  %v10097_v50 = vadd.f32 %v12868_v33, %v12729_v63  ;;  %v12869_v15 = vld [vmem:[#allocation48_spill] sm:$0xff]  ;;  %v1569_v54 = vmul.f32 1.442695, %v10057_v44  ;;  %6540 = vpow2.f32 %v1551_v8  ;;  %v4809_v42 = vadd.f32 -1.0, %v6527_v52  ;;  %v2315_v12 = vld [vmem:[%s12517_s3 + $0x850] sm:$0xff] }
 0x190   :  { %5985 = vmatprep.subr.bf16.mxu1 %v12864_v31  ;;  %v4800_v31 = vadd.f32 -1.0, %v6523_v27  ;;  %v1549_v27 = vmul.f32 1.442695, %v10039_v5  ;;  %v12871_v62 = vpack.c.bf16 %v12869_v15, %v12870_v17  ;;  %2766 = vmatprep.mubr.f32.mxu1 %v1962_v48  ;;  %v12873_v33 = vld [vmem:[#allocation56_spill] sm:$0xff]  ;;  %v6531_v17 = vpop.eup %6530  ;;  %v1961_v23 = vsel %vm1241_vm13, %v9722_v57, %v1817_v39  ;;  %v10132_v8 = vpop.f32.mrb[48].mxu1 }
 0x191   :  { %3549 = vmatprep.mubr.f32.mxu0 %v1962_v48  ;;  %v12874_v26 = vpack.c.bf16 %v12872_v32, %v12873_v33  ;;  %v2318_v48 = vld [vmem:[%s12517_s3 + $0x868] sm:$0xff]  ;;  %v1971_v57 = vsel %vm1251_vm14, %v9730_v34, %v1827_v29  ;;  %vm1250_vm15 = vcmp.gt.f32.partialorder %v9770_v0, 0.0  ;;  %v1836_v51 = vmul.f32 2.0, %v4810_v53  ;;  %v10143_v29 = vpop.f32.mrb[49].mxu1 }
 0x192   :  { %5987 = vmatpush1.bf16.msra.mxu1 %v12871_v62  ;;  %v6174_v62 = vpack.c.bf16 %v10076_v6, %v10071_v9  ;;  %v1826_v15 = vmul.f32 2.0, %v4800_v31  ;;  %v6533_v9 = vpop.eup %6532  ;;  %v4819_v52 = vadd.f32 -1.0, %v6529_v46  ;;  %6542 = vpow2.f32 %v1549_v27  ;;  %12876 = vst [vmem:[#allocation61_spill] sm:$0xff] %v10143_v29  ;;  %v12877_v53 = vld [vmem:[#allocation18_spill] sm:$0xff] }
 0x193   :  { %5989 = vmatprep.subr.bf16.mxu1 %v12874_v26  ;;  %v10124_v26 = vpop.f32.mrb[56].mxu0  ;;  %2767 = vmatmul.mubr.f32.gmra.mrb[76].mxu1 %v1961_v23  ;;  %v1567_v39 = vmul.f32 1.442695, %v10097_v50  ;;  %v10137_v31 = vadd.f32 %v9611_v22, %v12729_v63  ;;  %v12875_v32 = vpack.c.bf16 %v9665_v4, %v9660_v18  ;;  %vm1260_vm0 = vcmp.gt.f32.partialorder %v9780_v61, 0.0  ;;  %v6535_v18 = vpop.eup %6534  ;;  %v12879_v4 = vld [vmem:[#allocation13_spill] sm:$0xff]  ;;  %v12880_v33 = vld [vmem:[#allocation50_spill] sm:$0xff] }
 0x194   :  { %3550 = vmatmul.mubr.f32.gmra.mrb[140].mxu0 %v1961_v23  ;;  %v10130_v6 = vpop.f32.mrb[57].mxu0  ;;  %2772 = vmatprep.mubr.f32.mxu1 %v1971_v57  ;;  %6544 = vpow2.f32 %v1569_v54  ;;  %v1587_v34 = vmul.f32 1.442695, %v10108_v45  ;;  %v10148_v46 = vadd.f32 %v12877_v53, %v12740_v28  ;;  %v12878_v22 = vpack.c.bf16 %v9681_v37, %v9676_v43  ;;  %v10163_v28 = vld [vmem:[%s12517_s3 + $0x6d0] sm:$0xff]  ;;  %v2270_v43 = vld [vmem:[%s12517_s3 + $0x6e8] sm:$0xff] }
 0x195   :  { %3554 = vmatprep.mubr.f32.mxu0 %v1971_v57  ;;  %v6176_v27 = vpack.c.bf16 %v2318_v48, %v2315_v12  ;;  %v10155_v23 = vadd.f32 %v12880_v33, %v12879_v4  ;;  %v1970_v54 = vsel %vm1250_vm15, %v9770_v0, %v1826_v15  ;;  %v4818_v29 = vadd.f32 -1.0, %v6531_v17  ;;  %6175 = vmatpush3.bf16.msra.mxu0 %v6174_v62  ;;  %v10168_v37 = vpop.f32.mrb[58].mxu0  ;;  %v10170_v12 = vpop.f32.mrb[50].mxu1  ;;  %v12883_v53 = vld [vmem:[#allocation19_spill] sm:$0xff] }
 0x196   :  { %5991 = vmatpush1.bf16.msra.mxu1 %v12875_v32  ;;  %v1835_v32 = vmul.f32 2.0, %v4809_v42  ;;  %12881 = vst [vmem:[#allocation60_spill] sm:$0xff] %v10170_v12  ;;  %v6537_v48 = vpop.eup %6536  ;;  %v1980_v0 = vsel %vm1260_vm0, %v9780_v61, %v1836_v51  ;;  %vm1259_vm1 = vcmp.gt.f32.partialorder %v9826_v47, 0.0  ;;  %v1845_v42 = vmul.f32 2.0, %v4819_v52  ;;  %v10176_v17 = vpop.f32.mrb[59].mxu0  ;;  %v12886_v51 = vld [vmem:[#allocation12_spill] sm:$0xff] }
 0x197   :  { %5993 = vmatprep.subr.bf16.mxu1 %v12878_v22  ;;  %2773 = vmatmul.mubr.f32.gmra.mrb[78].mxu1 %v1970_v54  ;;  %v4828_v62 = vadd.f32 -1.0, %v6533_v9  ;;  %v10178_v15 = vpop.f32.mrb[51].mxu1  ;;  %6546 = vpow2.f32 %v1567_v39  ;;  %v1585_v57 = vmul.f32 1.442695, %v10137_v31  ;;  %v10183_v22 = vadd.f32 %v12883_v53, %v12729_v63  ;;  %v12885_v9 = vld [vmem:[#allocation20_spill] sm:$0xff] }
 0x198   :  { %3555 = vmatmul.mubr.f32.gmra.mrb[142].mxu0 %v1970_v54  ;;  %12882 = vst [vmem:[#allocation65_spill] sm:$0xff] %v10178_v15  ;;  %v12884_v33 = vpack.c.bf16 %v9697_v19, %v9686_v11  ;;  %2778 = vmatprep.mubr.f32.mxu1 %v1980_v0  ;;  %vm1269_vm2 = vcmp.gt.f32.partialorder %v9846_v36, 0.0  ;;  %6548 = vpow2.f32 %v1587_v34  ;;  %v1605_v61 = vmul.f32 1.442695, %v10148_v46  ;;  %v10201_v11 = vld [vmem:[%s12517_s3 + $0x880] sm:$0xff]  ;;  %v10206_v19 = vld [vmem:[%s12517_s3 + $0x898] sm:$0xff] }
 0x199   :  { %v10192_v52 = vadd.f32 %v12886_v51, %v12885_v9  ;;  %3559 = vmatprep.mubr.f32.mxu0 %v1980_v0  ;;  %v12887_v39 = vpack.c.bf16 %v9744_v7, %v9739_v16  ;;  %v6178_v63 = vpack.c.bf16 %v2270_v43, %v10163_v28  ;;  %v1337_v34 = vmul.f32 1.442695, %v10155_v23  ;;  %6177 = vmatprep.subr.bf16.mxu0 %v6176_v27  ;;  %v10212_v28 = vpop.f32.mrb[60].mxu0  ;;  %v10214_v43 = vpop.f32.mrb[52].mxu1 }
 0x19a   :  { %5995 = vmatpush1.bf16.msra.mxu1 %v12884_v33  ;;  %v1979_v54 = vsel %vm1259_vm1, %v9826_v47, %v1835_v32  ;;  %v1844_v16 = vmul.f32 2.0, %v4818_v29  ;;  %v4827_v7 = vadd.f32 -1.0, %v6535_v18  ;;  %12888 = vst [vmem:[#allocation64_spill] sm:$0xff] %v10214_v43  ;;  %v6539_v0 = vpop.eup %6538  ;;  %v1989_v53 = vsel %vm1269_vm2, %v9846_v36, %v1845_v42  ;;  %v10222_v47 = vpop.f32.mrb[53].mxu1  ;;  %v12890_v18 = vld [vmem:[#allocation17_spill] sm:$0xff] }
 0x19b   :  { %5997 = vmatprep.subr.bf16.mxu1 %v12887_v39  ;;  %2779 = vmatmul.mubr.f32.gmra.mrb[80].mxu1 %v1979_v54  ;;  %vm1268_vm3 = vcmp.gt.f32.partialorder %v9875_v3, 0.0  ;;  %v1854_v33 = vmul.f32 2.0, %v4828_v62  ;;  %v4837_v51 = vadd.f32 -1.0, %v6537_v48  ;;  %v10220_v39 = vpop.f32.mrb[61].mxu0  ;;  %12889 = vst [vmem:[#allocation10_spill] sm:$0xff] %v10222_v47  ;;  %v6541_v29 = vpop.eup %6540  ;;  %6550 = vpow2.f32 %v1585_v57  ;;  %v12892_v48 = vld [vmem:[#allocation16_spill] sm:$0xff] }
 0x19c   :  { %3560 = vmatmul.mubr.f32.gmra.mrb[144].mxu0 %v1979_v54  ;;  %v1603_v27 = vmul.f32 1.442695, %v10183_v22  ;;  %v10227_v32 = vadd.f32 %v12890_v18, %v12879_v4  ;;  %v12891_v54 = vpack.c.bf16 %v9790_v49, %v9785_v21  ;;  %2784 = vmatprep.mubr.f32.mxu1 %v1989_v53  ;;  %vm1278_vm4 = vcmp.gt.f32.partialorder %v9891_v38, 0.0  ;;  %v6543_v21 = vpop.eup %6542 }
 0x19d   :  { %6552 = vpow2.f32 %v1605_v61  ;;  %v1339_v36 = vmul.f32 1.442695, %v10192_v52  ;;  %v10236_v42 = vadd.f32 %v12892_v48, %v12885_v9  ;;  %3564 = vmatprep.mubr.f32.mxu0 %v1989_v53  ;;  %v12893_v62 = vpack.c.bf16 %v9840_v30, %v9835_v2  ;;  %v10254_v2 = vld [vmem:[%s12517_s3 + $0x828] sm:$0xff]  ;;  %6179 = vmatpush3.bf16.msra.mxu0 %v6178_v63  ;;  %v10259_v30 = vld [vmem:[%s12517_s3 + $0x700] sm:$0xff]  ;;  %v2276_v63 = vld [vmem:[%s12517_s3 + $0x718] sm:$0xff] }
 0x19e   :  { %5999 = vmatpush1.bf16.msra.mxu1 %v12891_v54  ;;  %v6180_v57 = vpack.c.bf16 %v10206_v19, %v10201_v11  ;;  %6554 = vpow2.f32 %v1337_v34  ;;  %v1988_v49 = vsel %vm1268_vm3, %v9875_v3, %v1844_v16  ;;  %v1853_v61 = vmul.f32 2.0, %v4827_v7  ;;  %v10249_v54 = vld [vmem:[%s12517_s3 + $0x810] sm:$0xff]  ;;  %v10261_v11 = vpop.f32.mrb[62].mxu0  ;;  %v6545_v3 = vpop.eup %6544  ;;  %v12895_v48 = vld [vmem:[#allocation28_spill] sm:$0xff] }
 0x19f   :  { %6001 = vmatprep.subr.bf16.mxu1 %v12893_v62  ;;  %v4836_v18 = vadd.f32 -1.0, %v6539_v0  ;;  %2785 = vmatmul.mubr.f32.gmra.mrb[82].mxu1 %v1988_v49  ;;  %v1998_v19 = vsel %vm1278_vm4, %v9891_v38, %v1854_v33  ;;  %vm1277_vm5 = vcmp.gt.f32.partialorder %v9932_v25, 0.0  ;;  %v1863_v34 = vmul.f32 2.0, %v4837_v51  ;;  %v10270_v7 = vpop.f32.mrb[63].mxu0  ;;  %v10272_v0 = vpop.f32.mrb[54].mxu1 }
 0x1a0   :  { %3565 = vmatmul.mubr.f32.gmra.mrb[146].mxu0 %v1988_v49  ;;  %v4846_v16 = vadd.f32 -1.0, %v6541_v29  ;;  %12894 = vst [vmem:[#allocation67_spill] sm:$0xff] %v10272_v0  ;;  %6556 = vpow2.f32 %v1603_v27  ;;  %v1355_v53 = vmul.f32 1.442695, %v10227_v32  ;;  %v10277_v62 = vadd.f32 %v12895_v48, %v12879_v4  ;;  %2790 = vmatprep.mubr.f32.mxu1 %v1998_v19  ;;  %v10283_v33 = vpop.f32.mrb[55].mxu1  ;;  %v12898_v29 = vld [vmem:[#allocation57_spill] sm:$0xff] }
 0x1a1   :  { %v12896_v38 = vpack.c.bf16 %v9899_v56, %v9886_v41  ;;  %vm1287_vm6 = vcmp.gt.f32.partialorder %v9943_v20, 0.0  ;;  %12897 = vst [vmem:[#allocation66_spill] sm:$0xff] %v10283_v33  ;;  %6558 = vpow2.f32 %v1339_v36  ;;  %v1357_v51 = vmul.f32 1.442695, %v10236_v42  ;;  %3569 = vmatprep.mubr.f32.mxu0 %v1998_v19  ;;  %v10298_v56 = vld [vmem:[%s12517_s3 + $0x848] sm:$0xff]  ;;  %v10303_v36 = vld [vmem:[%s12517_s3 + $0x860] sm:$0xff]  ;;  %6181 = vmatprep.subr.bf16.mxu0 %v6180_v57 }
 0x1a2   :  { %v10288_v27 = vadd.f32 %v12898_v29, %v12885_v9  ;;  %v12899_v49 = vpack.c.bf16 %v9956_v24, %v9951_v13  ;;  %v6010_v41 = vpack.c.bf16 %v10254_v2, %v10249_v54  ;;  %v10308_v19 = vld [vmem:[%s12517_s3 + $0x840] sm:$0xff]  ;;  %v6547_v13 = vpop.eup %6546  ;;  %v1997_v24 = vsel %vm1277_vm5, %v9932_v25, %v1853_v61  ;;  %v10316_v48 = vld [vmem:[%s12517_s3 + $0x858] sm:$0xff]  ;;  %v10322_v29 = vld [vmem:[%s12517_s3 + $0x8b0] sm:$0xff]  ;;  %v10326_v33 = vpop.f32.mrb[56].mxu1 }
 0x1a3   :  { %6003 = vmatpush1.bf16.msra.mxu1 %v12896_v38  ;;  %v1862_v54 = vmul.f32 2.0, %v4836_v18  ;;  %v4845_v2 = vadd.f32 -1.0, %v6543_v21  ;;  %v6182_v38 = vpack.c.bf16 %v2276_v63, %v10259_v30  ;;  %12900 = vst [vmem:[#allocation11_spill] sm:$0xff] %v10326_v33  ;;  %v6549_v25 = vpop.eup %6548  ;;  %v2007_v21 = vsel %vm1287_vm6, %v9943_v20, %v1863_v34  ;;  %v2330_v18 = vld [vmem:[%s12517_s3 + $0x8c8] sm:$0xff]  ;;  %v10337_v63 = vpop.f32.mrb[57].mxu1  ;;  %v12903_v34 = vld [vmem:[#allocation31_spill] sm:$0xff] }
 0x1a4   :  { %6005 = vmatprep.subr.bf16.mxu1 %v12899_v49  ;;  %v10324_v49 = vpop.f32.mrb[64].mxu0  ;;  %2791 = vmatmul.mubr.f32.gmra.mrb[84].mxu1 %v1997_v24  ;;  %vm1286_vm7 = vcmp.gt.f32.partialorder %v9994_v10, 0.0  ;;  %v1872_v57 = vmul.f32 2.0, %v4846_v16  ;;  %v4855_v61 = vadd.f32 -1.0, %v6545_v3  ;;  %12901 = vst [vmem:[#allocation69_spill] sm:$0xff] %v10337_v63  ;;  %6560 = vpow2.f32 %v1355_v53 }
 0x1a5   :  { %3570 = vmatmul.mubr.f32.gmra.mrb[148].mxu0 %v1997_v24  ;;  %v10335_v30 = vpop.f32.mrb[65].mxu0  ;;  %v1373_v33 = vmul.f32 1.442695, %v10277_v62  ;;  %v12902_v24 = vpack.c.bf16 %v10008_v35, %v10003_v59  ;;  %2796 = vmatprep.mubr.f32.mxu1 %v2007_v21  ;;  %vm1296_vm8 = vcmp.gt.f32.partialorder %v10014_v58, 0.0  ;;  %v6012_v20 = vpack.c.bf16 %v10303_v36, %v10298_v56  ;;  %v10359_v35 = vld [vmem:[%s12517_s3 + $0x878] sm:$0xff]  ;;  %v10369_v56 = vld [vmem:[%s12517_s3 + $0x870] sm:$0xff] }
 0x1a6   :  { %6562 = vpow2.f32 %v1357_v51  ;;  %v1375_v3 = vmul.f32 1.442695, %v10288_v27  ;;  %v10349_v16 = vadd.f32 %v12903_v34, %v12885_v9  ;;  %3574 = vmatprep.mubr.f32.mxu0 %v2007_v21  ;;  %v12904_v53 = vpack.c.bf16 %v10065_v60, %v10050_v55  ;;  %v10364_v51 = vld [vmem:[%s12517_s3 + $0x890] sm:$0xff]  ;;  %v6551_v55 = vpop.eup %6550  ;;  %6183 = vmatpush3.bf16.msra.mxu0 %v6182_v38  ;;  %v10385_v34 = vpop.f32.mrb[66].mxu0  ;;  %v2282_v38 = vld [vmem:[%s12517_s3 + $0x748] sm:$0xff] }
 0x1a7   :  { %6007 = vmatpush1.bf16.msra.mxu1 %v12902_v24  ;;  %v6014_v59 = vpack.c.bf16 %v10316_v48, %v10308_v19  ;;  %v2006_v60 = vsel %vm1286_vm7, %v9994_v10, %v1862_v54  ;;  %v1871_v36 = vmul.f32 2.0, %v4845_v2  ;;  %v4854_v19 = vadd.f32 -1.0, %v6547_v13  ;;  %v10377_v48 = vld [vmem:[%s12517_s3 + $0x888] sm:$0xff]  ;;  %v10383_v24 = vld [vmem:[%s12517_s3 + $0x730] sm:$0xff]  ;;  %v6553_v10 = vpop.eup %6552 }
 0x1a8   :  { %6009 = vmatprep.subr.bf16.mxu1 %v12904_v53  ;;  %v6184_v21 = vpack.c.bf16 %v2330_v18, %v10322_v29  ;;  %v10387_v53 = vpop.f32.mrb[58].mxu1  ;;  %2797 = vmatmul.mubr.f32.gmra.mrb[86].mxu1 %v2006_v60  ;;  %v2016_v13 = vsel %vm1296_vm8, %v10014_v58, %v1872_v57  ;;  %vm1295_vm9 = vcmp.gt.f32.partialorder %v10039_v5, 0.0  ;;  %v1881_v54 = vmul.f32 2.0, %v4855_v61  ;;  %v10396_v29 = vpop.f32.mrb[67].mxu0 }
 0x1a9   :  { %12905 = vst [vmem:[#allocation68_spill] sm:$0xff] %v10387_v53  ;;  %3575 = vmatmul.mubr.f32.gmra.mrb[150].mxu0 %v2006_v60  ;;  %v4864_v2 = vadd.f32 -1.0, %v6549_v25  ;;  %v10398_v18 = vpop.f32.mrb[59].mxu1  ;;  %v6555_v53 = vpop.eup %6554  ;;  %6564 = vpow2.f32 %v1373_v33  ;;  %v12907_v60 = vld [vmem:[#allocation21_spill] sm:$0xff]  ;;  %2802 = vmatprep.mubr.f32.mxu1 %v2016_v13  ;;  %vm1305_vm10 = vcmp.gt.f32.partialorder %v10057_v44, 0.0  ;;  %v6016_v58 = vpack.c.bf16 %v10364_v51, %v10359_v35 }
 0x1aa   :  { %12906 = vst [vmem:[#allocation71_spill] sm:$0xff] %v10398_v18  ;;  %v10402_v63 = vadd.f32 %v12907_v60, %v12879_v4  ;;  %6566 = vpow2.f32 %v1375_v3  ;;  %v1393_v25 = vmul.f32 1.442695, %v10349_v16  ;;  %v10410_v57 = vadd.f32 %v9716_v40, %v12885_v9  ;;  %3579 = vmatprep.mubr.f32.mxu0 %v2016_v13  ;;  %v6557_v61 = vpop.eup %6556  ;;  %v10425_v40 = vld [vmem:[%s12517_s3 + $0x8c0] sm:$0xff]  ;;  %6185 = vmatprep.subr.bf16.mxu0 %v6184_v21  ;;  %v10435_v13 = vpop.f32.mrb[60].mxu1  ;;  %v2336_v21 = vld [vmem:[%s12517_s3 + $0x8f8] sm:$0xff] }
 0x1ab   :  { %6011 = vmatpush1.bf16.msra.mxu1 %v6010_v41  ;;  %v6018_v33 = vpack.c.bf16 %v10377_v48, %v10369_v56  ;;  %v10417_v41 = vld [vmem:[%s12517_s3 + $0x8a8] sm:$0xff]  ;;  %v2015_v3 = vsel %vm1295_vm9, %v10039_v5, %v1871_v36  ;;  %v1880_v35 = vmul.f32 2.0, %v4854_v19  ;;  %v6186_v51 = vpack.c.bf16 %v2282_v38, %v10383_v24  ;;  %v10431_v56 = vld [vmem:[%s12517_s3 + $0x8e0] sm:$0xff]  ;;  %v10433_v48 = vpop.f32.mrb[68].mxu0  ;;  %12908 = vst [vmem:[#allocation70_spill] sm:$0xff] %v10435_v13  ;;  %v6559_v5 = vpop.eup %6558 }
 0x1ac   :  { %6013 = vmatprep.subr.bf16.mxu1 %v6012_v20  ;;  %v4863_v20 = vadd.f32 -1.0, %v6551_v55  ;;  %vm1189_vm11 = vcmp.gt.f32.partialorder %v10155_v23, 0.0  ;;  %2803 = vmatmul.mubr.f32.gmra.mrb[88].mxu1 %v2015_v3  ;;  %v2025_v55 = vsel %vm1305_vm10, %v10057_v44, %v1881_v54  ;;  %vm1304_vm12 = vcmp.gt.f32.partialorder %v10097_v50, 0.0  ;;  %v10445_v24 = vpop.f32.mrb[69].mxu0  ;;  %v10447_v38 = vpop.f32.mrb[61].mxu1 }
 0x1ad   :  { %3580 = vmatmul.mubr.f32.gmra.mrb[152].mxu0 %v2015_v3  ;;  %v1890_v36 = vmul.f32 2.0, %v4864_v2  ;;  %v4873_v19 = vadd.f32 -1.0, %v6553_v10  ;;  %12909 = vst [vmem:[#allocation73_spill] sm:$0xff] %v10447_v38  ;;  %v4739_v60 = vadd.f32 -1.0, %v6555_v53  ;;  %v1391_v13 = vmul.f32 1.442695, %v10402_v63  ;;  %2808 = vmatprep.mubr.f32.mxu1 %v2025_v55 }
 0x1ae   :  { %v10452_v3 = vadd.f32 %v9708_v1, %v12879_v4  ;;  %vm1314_vm13 = vcmp.gt.f32.partialorder %v10108_v45, 0.0  ;;  %6568 = vpow2.f32 %v1393_v25  ;;  %v1411_v44 = vmul.f32 1.442695, %v10410_v57  ;;  %v12910_v10 = vld [vmem:[#allocation22_spill] sm:$0xff]  ;;  %3584 = vmatprep.mubr.f32.mxu0 %v2025_v55  ;;  %v2325_v1 = vld [vmem:[%s12517_s3 + $0x8a0] sm:$0xff]  ;;  %v2332_v2 = vld [vmem:[%s12517_s3 + $0x8d8] sm:$0xff]  ;;  %v10471_v25 = vpop.eup %6560  ;;  %6187 = vmatpush3.bf16.msra.mxu0 %v6186_v51 }
 0x1af   :  { %6015 = vmatpush1.bf16.msra.mxu1 %v6014_v59  ;;  %v10458_v54 = vadd.f32 %v12910_v10, %v12879_v4  ;;  %v6020_v53 = vpack.c.bf16 %v10425_v40, %v10417_v41  ;;  %v2328_v59 = vld [vmem:[%s12517_s3 + $0x8b8] sm:$0xff]  ;;  %v1889_v55 = vmul.f32 2.0, %v4863_v20  ;;  %v2335_v41 = vld [vmem:[%s12517_s3 + $0x8f0] sm:$0xff]  ;;  %v4872_v40 = vadd.f32 -1.0, %v6557_v61  ;;  %v2285_v38 = vld [vmem:[%s12517_s3 + $0x760] sm:$0xff]  ;;  %v10483_v18 = vpop.f32.mrb[70].mxu0 }
 0x1b0   :  { %6017 = vmatprep.subr.bf16.mxu1 %v6016_v58  ;;  %v2024_v58 = vsel %vm1304_vm12, %v10097_v50, %v1880_v35  ;;  %v6188_v10 = vpack.c.bf16 %v2336_v21, %v10431_v56  ;;  %v10485_v0 = vpop.f32.mrb[62].mxu1  ;;  %v6563_v47 = vpop.eup %6562  ;;  %v2034_v50 = vsel %vm1314_vm13, %v10108_v45, %v1890_v36  ;;  %vm1313_vm14 = vcmp.gt.f32.partialorder %v10137_v31, 0.0  ;;  %v2288_v20 = vld [vmem:[%s12517_s3 + $0x778] sm:$0xff] }
 0x1b1   :  { %12911 = vst [vmem:[#allocation72_spill] sm:$0xff] %v10485_v0  ;;  %2809 = vmatmul.mubr.f32.gmra.mrb[90].mxu1 %v2024_v58  ;;  %3585 = vmatmul.mubr.f32.gmra.mrb[154].mxu0 %v2024_v58  ;;  %v1899_v61 = vmul.f32 2.0, %v4873_v19  ;;  %v4740_v35 = vadd.f32 -1.0, %v6559_v5  ;;  %v10494_v51 = vpop.f32.mrb[71].mxu0  ;;  %v10496_v56 = vpop.f32.mrb[63].mxu1  ;;  %6570 = vpow2.f32 %v1391_v13  ;;  %v6022_v58 = vpack.c.bf16 %v2328_v59, %v2325_v1  ;;  %v12913_v5 = vld [vmem:[#allocation25_spill] sm:$0xff] }
 0x1b2   :  { %12912 = vst [vmem:[#allocation6_spill] sm:$0xff] %v10496_v56  ;;  %v1409_v21 = vmul.f32 1.442695, %v10452_v3  ;;  %2814 = vmatprep.mubr.f32.mxu1 %v2034_v50  ;;  %vm1323_vm15 = vcmp.gt.f32.partialorder %v10148_v46, 0.0  ;;  %v1765_v45 = vmul.f32 2.0, %v4739_v60  ;;  %6572 = vpow2.f32 %v1411_v44  ;;  %3589 = vmatprep.mubr.f32.mxu0 %v2034_v50  ;;  %v2331_v13 = vld [vmem:[%s12517_s3 + $0x8d0] sm:$0xff] }
 0x1b3   :  { %6019 = vmatpush1.bf16.msra.mxu1 %v6018_v33  ;;  %v10502_v36 = vadd.f32 %v12913_v5, %v12885_v9  ;;  %v6024_v19 = vpack.c.bf16 %v2335_v41, %v2332_v2  ;;  %v2334_v33 = vld [vmem:[%s12517_s3 + $0x8e8] sm:$0xff]  ;;  %v10510_v1 = vpop.eup %6564  ;;  %v1427_v60 = vmul.f32 1.442695, %v10458_v54  ;;  %v2033_v44 = vsel %vm1313_vm14, %v10137_v31, %v1889_v55  ;;  %6189 = vmatprep.subr.bf16.mxu0 %v6188_v10  ;;  %v2341_v41 = vld [vmem:[%s12517_s3 + $0x920] sm:$0xff]  ;;  %v10522_v50 = vpop.f32.mrb[72].mxu0  ;;  %v12914_v10 = vld [vmem:[#allocation63_spill] sm:$0xff] }
 0x1b4   :  { %6021 = vmatprep.subr.bf16.mxu1 %v6020_v53  ;;  %v1898_v59 = vmul.f32 2.0, %v4872_v40  ;;  %v6190_v53 = vpack.c.bf16 %v2288_v20, %v2285_v38  ;;  %v2338_v2 = vld [vmem:[%s12517_s3 + $0x908] sm:$0xff]  ;;  %v6567_v5 = vpop.eup %6566  ;;  %v2043_v31 = vsel %vm1323_vm15, %v10148_v46, %v1899_v61  ;;  %vm1322_vm0 = vcmp.gt.f32.partialorder %v10183_v22, 0.0  ;;  %v10528_v40 = vpop.f32.mrb[73].mxu0 }
 0x1b5   :  { %2815 = vmatmul.mubr.f32.gmra.mrb[92].mxu1 %v2033_v44  ;;  %3590 = vmatmul.mubr.f32.gmra.mrb[156].mxu0 %v2033_v44  ;;  %v1766_v38 = vmul.f32 2.0, %v4740_v35  ;;  %v4749_v55 = vadd.f32 -1.0, %v6563_v47  ;;  %v10532_v20 = vadd.f32 %v12914_v10, %v12879_v4  ;;  %v6026_v0 = vpack.c.bf16 %v2334_v33, %v2331_v13  ;;  %v12915_v46 = vld [vmem:[#allocation26_spill] sm:$0xff]  ;;  %v2337_v35 = vld [vmem:[%s12517_s3 + $0x900] sm:$0xff] }
 0x1b6   :  { %2820 = vmatprep.mubr.f32.mxu1 %v2043_v31  ;;  %vm1190_vm1 = vcmp.gt.f32.partialorder %v10192_v52, 0.0  ;;  %6574 = vpow2.f32 %v1409_v21  ;;  %v1429_v44 = vmul.f32 1.442695, %v10502_v36  ;;  %v10538_v61 = vadd.f32 %v12915_v46, %v12885_v9  ;;  %3594 = vmatprep.mubr.f32.mxu0 %v2043_v31  ;;  %v12916_v13 = vld [vmem:[#allocation29_spill] sm:$0xff] }
 0x1b7   :  { %6023 = vmatpush1.bf16.msra.mxu1 %v6022_v58  ;;  %v6028_v47 = vpack.c.bf16 %v2341_v41, %v2338_v2  ;;  %v2340_v58 = vld [vmem:[%s12517_s3 + $0x918] sm:$0xff]  ;;  %v1909_v21 = vsel %vm1189_vm11, %v10155_v23, %v1765_v45  ;;  %v10551_v33 = vadd.f32 %v12916_v13, %v12879_v4  ;;  %6191 = vmatpush3.bf16.msra.mxu0 %v6190_v53  ;;  %v2347_v41 = vld [vmem:[%s12517_s3 + $0x950] sm:$0xff]  ;;  %v4748_v31 = vadd.f32 -1.0, %v10471_v25  ;;  %v10563_v23 = vpop.f32.mrb[74].mxu0 }
 0x1b8   :  { %6025 = vmatprep.subr.bf16.mxu1 %v6024_v19  ;;  %v2042_v19 = vsel %vm1322_vm0, %v10183_v22, %v1898_v59  ;;  %v2344_v2 = vld [vmem:[%s12517_s3 + $0x938] sm:$0xff]  ;;  %v6569_v45 = vpop.eup %6568  ;;  %6576 = vpow2.f32 %v1427_v60  ;;  %v1910_v22 = vsel %vm1190_vm1, %v10192_v52, %v1766_v38  ;;  %v1775_v59 = vmul.f32 2.0, %v4749_v55  ;;  %v10568_v10 = vpop.f32.mrb[75].mxu0  ;;  %v12919_v52 = vld [vmem:[#allocation34_spill] sm:$0xff]  ;;  %v2343_v55 = vld [vmem:[%s12517_s3 + $0x930] sm:$0xff] }
 0x1b9   :  { %2821 = vmatmul.mubr.f32.gmra.mrb[94].mxu1 %v2042_v19  ;;  %3595 = vmatmul.mubr.f32.gmra.mrb[158].mxu0 %v2042_v19  ;;  %v4758_v53 = vadd.f32 -1.0, %v6567_v5  ;;  %12917 = vst [vmem:[#allocation7_spill] sm:$0xff] %v10568_v10  ;;  %v1445_v46 = vmul.f32 1.442695, %v10532_v20  ;;  %v12918_v13 = vld [vmem:[#allocation32_spill] sm:$0xff]  ;;  %v6030_v25 = vpack.c.bf16 %v2340_v58, %v2337_v35  ;;  %vm1199_vm2 = vcmp.gt.f32.partialorder %v10236_v42, 0.0 }
 0x1ba   :  { %v10573_v56 = vadd.f32 %v12918_v13, %v12885_v9  ;;  %2891 = vmatprep.mubr.f32.mxu1 %v1910_v22  ;;  %6578 = vpow2.f32 %v1429_v44  ;;  %v1447_v60 = vmul.f32 1.442695, %v10538_v61  ;;  %v10579_v38 = vadd.f32 %v12919_v52, %v12879_v4  ;;  %3664 = vmatprep.mubr.f32.mxu0 %v1910_v22  ;;  %v2350_v44 = vld [vmem:[%s12517_s3 + $0x968] sm:$0xff]  ;;  %v12920_v19 = vld [vmem:[#allocation36_spill] sm:$0xff]  ;;  %v10599_v13 = vpop.f32.mrb[76].mxu0 }
 0x1bb   :  { %6027 = vmatpush1.bf16.msra.mxu1 %v6026_v0  ;;  %v6032_v5 = vpack.c.bf16 %v2347_v41, %v2344_v2  ;;  %v2346_v0 = vld [vmem:[%s12517_s3 + $0x948] sm:$0xff]  ;;  %v6571_v35 = vpop.eup %6570  ;;  %v1463_v58 = vmul.f32 1.442695, %v10551_v33  ;;  %v10593_v22 = vadd.f32 %v12920_v19, %v12885_v9  ;;  %v2353_v2 = vld [vmem:[%s12517_s3 + $0x980] sm:$0xff]  ;;  %v4757_v41 = vadd.f32 -1.0, %v10510_v1  ;;  %12921 = vst [vmem:[#allocation51_spill] sm:$0xff] %v10599_v13 }
 0x1bc   :  { %6029 = vmatprep.subr.bf16.mxu1 %v6028_v47  ;;  %v1774_v47 = vmul.f32 2.0, %v4748_v31  ;;  %v6573_v52 = vpop.eup %6572  ;;  %v1919_v43 = vsel %vm1199_vm2, %v10236_v42, %v1775_v59  ;;  %vm1198_vm3 = vcmp.gt.f32.partialorder %v10227_v32, 0.0  ;;  %v1784_v19 = vmul.f32 2.0, %v4758_v53  ;;  %v10605_v31 = vpop.f32.mrb[77].mxu0  ;;  %v2352_v59 = vld [vmem:[%s12517_s3 + $0x978] sm:$0xff] }
 0x1bd   :  { %3665 = vmatmul.mubr.f32.vlgmr.msra.gmra.mrb[160].mxu0 %v1909_v21  ;;  %v4767_v15 = vadd.f32 -1.0, %v6569_v45  ;;  %12922 = vst [vmem:[#allocation42_spill] sm:$0xff] %v10605_v31  ;;  %6580 = vpow2.f32 %v1445_v46  ;;  %v1465_v12 = vmul.f32 1.442695, %v10573_v56  ;;  %v6034_v1 = vpack.c.bf16 %v2346_v0, %v2343_v55  ;;  %v2349_v45 = vld [vmem:[%s12517_s3 + $0x960] sm:$0xff] }
 0x1be   :  { %2892 = vmatmul.mubr.f32.vlgmr.msra.gmra.mrb[64].mxu1 %v1909_v21  ;;  %vm1208_vm4 = vcmp.gt.f32.partialorder %v10288_v27, 0.0  ;;  %6582 = vpow2.f32 %v1447_v60  ;;  %v1481_v21 = vmul.f32 1.442695, %v10579_v38  ;;  %3669 = vmatprep.mubr.f32.mxu0 %v1919_v43  ;;  %v6036_v42 = vpack.c.bf16 %v2353_v2, %v2350_v44  ;;  %v2359_v60 = vld [vmem:[%s12517_s3 + $0x9b0] sm:$0xff] }
 0x1bf   :  { %6031 = vmatpush1.bf16.msra.mxu1 %v6030_v25  ;;  %2897 = vmatprep.mubr.f32.mxu1 %v1919_v43  ;;  %6584 = vpow2.f32 %v1463_v58  ;;  %v1483_v53 = vmul.f32 1.442695, %v10593_v22  ;;  %v1918_v46 = vsel %vm1198_vm3, %v10227_v32, %v1774_v47  ;;  %v1783_v25 = vmul.f32 2.0, %v4757_v41  ;;  %v2356_v43 = vld [vmem:[%s12517_s3 + $0x998] sm:$0xff] }
 0x1c0   :  { %6033 = vmatprep.subr.bf16.mxu1 %v6032_v5  ;;  %v10626_v5 = vpop.f32.mrb[78].mxu0  ;;  %v6575_v55 = vpop.eup %6574  ;;  %v1928_v0 = vsel %vm1208_vm4, %v10288_v27, %v1784_v19  ;;  %vm1207_vm5 = vcmp.gt.f32.partialorder %v10277_v62, 0.0  ;;  %v1793_v32 = vmul.f32 2.0, %v4767_v15  ;;  %v4766_v44 = vadd.f32 -1.0, %v6571_v35  ;;  %v2358_v27 = vld [vmem:[%s12517_s3 + $0x9a8] sm:$0xff]  ;;  %v12926_v35 = vld [vmem:[#allocation40_spill] sm:$0xff] }
 0x1c1   :  { %12923 = vst [vmem:[#allocation43_spill] sm:$0xff] %v10626_v5  ;;  %3670 = vmatmul.mubr.f32.gmra.mrb[162].mxu0 %v1918_v46  ;;  %v10632_v58 = vpop.f32.mrb[79].mxu0  ;;  %6586 = vpow2.f32 %v1465_v12  ;;  %v6038_v47 = vpack.c.bf16 %v2352_v59, %v2349_v45  ;;  %vm1217_vm6 = vcmp.gt.f32.partialorder %v10349_v16, 0.0  ;;  %v4776_v2 = vadd.f32 -1.0, %v6573_v52  ;;  %v2355_v12 = vld [vmem:[%s12517_s3 + $0x990] sm:$0xff]  ;;  %v12927_v19 = vld [vmem:[#allocation5_spill] sm:$0xff] }
 0x1c2   :  { %2898 = vmatmul.mubr.f32.gmra.mrb[66].mxu1 %v1918_v46  ;;  %12924 = vst [vmem:[#allocation14_spill] sm:$0xff] %v10632_v58  ;;  %v10635_v41 = vpop.eup %6576  ;;  %6588 = vpow2.f32 %v1481_v21  ;;  %v12925_v46 = vld [vmem:[#allocation38_spill] sm:$0xff]  ;;  %3674 = vmatprep.mubr.f32.mxu0 %v1928_v0  ;;  %v6040_v15 = vpack.c.bf16 %v2359_v60, %v2356_v43  ;;  %v10649_v52 = vadd.f32 %v12926_v35, %v12885_v9  ;;  %v2365_v59 = vld [vmem:[%s12517_s3 + $0x9e0] sm:$0xff]  ;;  %v10661_v43 = vpop.f32.mrb[80].mxu0  ;;  %vm1216_vm7 = vcmp.gt.f32.partialorder %v10402_v63, 0.0 }
 0x1c3   :  { %6035 = vmatpush1.bf16.msra.mxu1 %v6034_v1  ;;  %2903 = vmatprep.mubr.f32.mxu1 %v1928_v0  ;;  %v10639_v5 = vadd.f32 %v12925_v46, %v12879_v4  ;;  %v377_v1 = vsub.s32 6, %v12927_v19  ;;  %v1927_v21 = vsel %vm1207_vm5, %v10277_v62, %v1783_v25  ;;  %v2362_v45 = vld [vmem:[%s12517_s3 + $0x9c8] sm:$0xff]  ;;  %12928 = vst [vmem:[#allocation8_spill] sm:$0xff] %v10661_v43  ;;  %6590 = vpow2.f32 %v1483_v53  ;;  %v10667_v25 = vpop.f32.mrb[81].mxu0 }
 0x1c4   :  { %6037 = vmatprep.subr.bf16.mxu1 %v6036_v42  ;;  %v1792_v42 = vmul.f32 2.0, %v4766_v44  ;;  %v6579_v60 = vpop.eup %6578  ;;  %v1937_v0 = vsel %vm1217_vm6, %v10349_v16, %v1793_v32  ;;  %v1802_v62 = vmul.f32 2.0, %v4776_v2  ;;  %12929 = vst [vmem:[#allocation9_spill] sm:$0xff] %v10667_v25  ;;  %v12930_v44 = vld [vmem:[#allocation44_spill] sm:$0xff]  ;;  %v381_v35 = vsub.s32 7, %v12927_v19  ;;  %v12931_v16 = vld [vmem:[#allocation46_spill] sm:$0xff] }
 0x1c5   :  { %3675 = vmatmul.mubr.f32.gmra.mrb[164].mxu0 %v1927_v21  ;;  %v10671_v46 = vadd.f32 %v12930_v44, %v12879_v4  ;;  %v6042_v53 = vpack.c.bf16 %v2358_v27, %v2355_v12  ;;  %vm1226_vm8 = vcmp.gt.f32.partialorder %v10410_v57, 0.0  ;;  %v10678_v32 = vadd.f32 %v12931_v16, %v12885_v9  ;;  %v2361_v44 = vld [vmem:[%s12517_s3 + $0x9c0] sm:$0xff]  ;;  %v2371_v19 = vld [vmem:[%s12517_s3 + $0xa10] sm:$0xff]  ;;  %v10707_v43 = vpop.f32.mrb[82].mxu0 }
 0x1c6   :  { %2904 = vmatmul.mubr.f32.gmra.mrb[68].mxu1 %v1927_v21  ;;  %v1499_v21 = vmul.f32 1.442695, %v10639_v5  ;;  %3679 = vmatprep.mubr.f32.mxu0 %v1937_v0  ;;  %v6044_v2 = vpack.c.bf16 %v2365_v59, %v2362_v45  ;;  %v4775_v25 = vadd.f32 -1.0, %v6575_v55  ;;  %v1501_v27 = vmul.f32 1.442695, %v10649_v52  ;;  %v6834_v16 = vld [vmem:[%s12516_s2] sm:$0xff] }
 0x1c7   :  { %6039 = vmatpush1.bf16.msra.mxu1 %v6038_v47  ;;  %2909 = vmatprep.mubr.f32.mxu1 %v1937_v0  ;;  %v2364_v47 = vld [vmem:[%s12517_s3 + $0x9d8] sm:$0xff]  ;;  %v10686_v12 = vpop.eup %6580  ;;  %v10692_v0 = vrot.slane %v6834_v16, %v377_v1  ;;  %v1936_v45 = vsel %vm1216_vm7, %v10402_v63, %v1792_v42  ;;  %12933 = vst [vmem:[#allocation58_spill] sm:$0xff] %v10707_v43  ;;  %vm1225_vm9 = vcmp.gt.f32.partialorder %v10452_v3, 0.0  ;;  %v4785_v42 = vadd.f32 -1.0, %v6579_v60  ;;  %v10713_v58 = vpop.f32.mrb[83].mxu0 }
 0x1c8   :  { %6041 = vmatprep.subr.bf16.mxu1 %v6040_v15  ;;  %v12932_v55 = vld [vmem:[#allocation52_spill] sm:$0xff]  ;;  %v6583_v1 = vpop.eup %6582  ;;  %v1801_v63 = vmul.f32 2.0, %v4775_v25  ;;  %v1517_v13 = vmul.f32 1.442695, %v10671_v46  ;;  %v10718_v10 = vrot.slane %v6834_v16, %v381_v35  ;;  %v6046_v43 = vpack.c.bf16 %v2364_v47, %v2361_v44  ;;  %v2367_v25 = vld [vmem:[%s12517_s3 + $0x9f0] sm:$0xff]  ;;  %v2370_v35 = vld [vmem:[%s12517_s3 + $0xa08] sm:$0xff] }
 0x1c9   :  { %v10696_v15 = vadd.f32 %v12932_v55, %v12879_v4  ;;  %v2368_v59 = vld [vmem:[%s12517_s3 + $0x9f8] sm:$0xff]  ;;  %3680 = vmatmul.mubr.f32.gmra.mrb[166].mxu0 %v1936_v45  ;;  %v1946_v55 = vsel %vm1226_vm8, %v10410_v57, %v1802_v62  ;;  %v10715_v31 = vpop.eup %6584  ;;  %vm1235_vm10 = vcmp.gt.f32.partialorder %v10502_v36, 0.0  ;;  %v10724_v57 = vadd.f32 %v10090_v14, %v12885_v9  ;;  %v12934_v44 = vld [vmem:[#allocation59_spill] sm:$0xff]  ;;  %v2377_v16 = vld [vmem:[%s12517_s3 + $0xa40] sm:$0xff] }
 0x1ca   :  { %2910 = vmatmul.mubr.f32.gmra.mrb[70].mxu1 %v1936_v45  ;;  %v1519_v45 = vmul.f32 1.442695, %v10678_v32  ;;  %3684 = vmatprep.mubr.f32.mxu0 %v1946_v55  ;;  %v1811_v60 = vmul.f32 2.0, %v4785_v42  ;;  %v6048_v62 = vpack.c.bf16 %v2371_v19, %v2368_v59  ;;  %6592 = vpow2.f32 %v1499_v21  ;;  %v10746_v59 = vpop.f32.mrb[84].mxu0 }
 0x1cb   :  { %6043 = vmatpush1.bf16.msra.mxu1 %v6042_v53  ;;  %2915 = vmatprep.mubr.f32.mxu1 %v1946_v55  ;;  %v6587_v53 = vpop.eup %6586  ;;  %v10734_v47 = vadd.f32 %v12934_v44, %v10692_v0  ;;  %v1945_v14 = vsel %vm1225_vm9, %v10452_v3, %v1801_v63  ;;  %v4784_v19 = vadd.f32 -1.0, %v10635_v41  ;;  %12935 = vst [vmem:[#allocation48_spill] sm:$0xff] %v10746_v59  ;;  %6594 = vpow2.f32 %v1501_v27  ;;  %v10755_v41 = vpop.f32.mrb[85].mxu0  ;;  %v12937_v63 = vld [vmem:[#allocation23_spill] sm:$0xff] }
 0x1cc   :  { %6045 = vmatprep.subr.bf16.mxu1 %v6044_v2  ;;  %v2374_v2 = vld [vmem:[%s12517_s3 + $0xa28] sm:$0xff]  ;;  %v10748_v21 = vpop.eup %6588  ;;  %v1535_v55 = vmul.f32 1.442695, %v10696_v15  ;;  %v1955_v3 = vsel %vm1235_vm10, %v10502_v36, %v1811_v60  ;;  %vm1234_vm11 = vcmp.gt.f32.partialorder %v10458_v54, 0.0  ;;  %12936 = vst [vmem:[#allocation49_spill] sm:$0xff] %v10755_v41  ;;  %6596 = vpow2.f32 %v1517_v13  ;;  %v2373_v13 = vld [vmem:[%s12517_s3 + $0xa20] sm:$0xff] }
 0x1cd   :  { %3685 = vmatmul.mubr.f32.gmra.mrb[168].mxu0 %v1945_v14  ;;  %v10759_v42 = vadd.f32 %v12937_v63, %v10718_v10  ;;  %v1810_v27 = vmul.f32 2.0, %v4784_v19  ;;  %v6050_v44 = vpack.c.bf16 %v2370_v35, %v2367_v25  ;;  %v6591_v59 = vpop.eup %6590  ;;  %6598 = vpow2.f32 %v1519_v45  ;;  %v2376_v63 = vld [vmem:[%s12517_s3 + $0xa38] sm:$0xff] }
 0x1ce   :  { %2916 = vmatmul.mubr.f32.gmra.mrb[72].mxu1 %v1945_v14  ;;  %v1537_v14 = vmul.f32 1.442695, %v10724_v57  ;;  %3689 = vmatprep.mubr.f32.mxu0 %v1955_v3  ;;  %v4794_v36 = vadd.f32 -1.0, %v6583_v1  ;;  %v6052_v60 = vpack.c.bf16 %v2377_v16, %v2374_v2  ;;  %vm1244_vm12 = vcmp.gt.f32.partialorder %v10538_v61, 0.0  ;;  %v10774_v1 = vpop.f32.mrb[86].mxu0  ;;  %v12939_v25 = vld [vmem:[#allocation24_spill] sm:$0xff] }
 0x1cf   :  { %6047 = vmatpush1.bf16.msra.mxu1 %v6046_v43  ;;  %2921 = vmatprep.mubr.f32.mxu1 %v1955_v3  ;;  %v1341_v43 = vmul.f32 1.442695, %v10734_v47  ;;  %v1954_v45 = vsel %vm1234_vm11, %v10458_v54, %v1810_v27  ;;  %12938 = vst [vmem:[#allocation15_spill] sm:$0xff] %v10774_v1  ;;  %6600 = vpow2.f32 %v1535_v55  ;;  %v10778_v35 = vadd.f32 %v12939_v25, %v10692_v0  ;;  %v2380_v54 = vld [vmem:[%s12517_s3 + $0xa58] sm:$0xff]  ;;  %v10787_v2 = vpop.f32.mrb[87].mxu0 }
 0x1d0   :  { %6049 = vmatprep.subr.bf16.mxu1 %v6048_v62  ;;  %v4793_v62 = vadd.f32 -1.0, %v10686_v12  ;;  %v1820_v19 = vmul.f32 2.0, %v4794_v36  ;;  %vm1243_vm13 = vcmp.gt.f32.partialorder %v10532_v20, 0.0  ;;  %v2383_v12 = vld [vmem:[%s12517_s3 + $0xa70] sm:$0xff]  ;;  %12940 = vst [vmem:[#allocation56_spill] sm:$0xff] %v10787_v2  ;;  %v6054_v3 = vpack.c.bf16 %v2376_v63, %v2373_v13  ;;  %v12942_v13 = vld [vmem:[#allocation62_spill] sm:$0xff] }
 0x1d1   :  { %3690 = vmatmul.mubr.f32.gmra.mrb[170].mxu0 %v1954_v45  ;;  %v1343_v16 = vmul.f32 1.442695, %v10759_v42  ;;  %v4803_v27 = vadd.f32 -1.0, %v6587_v53  ;;  %6602 = vpow2.f32 %v1537_v14  ;;  %v10792_v36 = vadd.f32 %v10124_v26, %v12879_v4  ;;  %v2379_v14 = vld [vmem:[%s12517_s3 + $0xa50] sm:$0xff] }
 0x1d2   :  { %2922 = vmatmul.mubr.f32.gmra.mrb[74].mxu1 %v1954_v45  ;;  %v1819_v55 = vmul.f32 2.0, %v4793_v62  ;;  %v1964_v45 = vsel %vm1244_vm12, %v10538_v61, %v1820_v19  ;;  %vm1253_vm14 = vcmp.gt.f32.partialorder %v10573_v56, 0.0  ;;  %v10800_v25 = vadd.f32 %v10130_v6, %v12885_v9  ;;  %v2382_v61 = vld [vmem:[%s12517_s3 + $0xa68] sm:$0xff]  ;;  %v2389_v19 = vld [vmem:[%s12517_s3 + $0xaa0] sm:$0xff] }
 0x1d3   :  { %6051 = vmatpush1.bf16.msra.mxu1 %v6050_v44  ;;  %2927 = vmatprep.mubr.f32.mxu1 %v1964_v45  ;;  %v1829_v44 = vmul.f32 2.0, %v4803_v27  ;;  %v6056_v26 = vpack.c.bf16 %v2383_v12, %v2380_v54  ;;  %6604 = vpow2.f32 %v1341_v43  ;;  %v1359_v6 = vmul.f32 1.442695, %v10778_v35  ;;  %v2386_v62 = vld [vmem:[%s12517_s3 + $0xa88] sm:$0xff]  ;;  %v2387_v27 = vld [vmem:[%s12517_s3 + $0xa90] sm:$0xff] }
 0x1d4   :  { %6053 = vmatprep.subr.bf16.mxu1 %v6052_v60  ;;  %3694 = vmatprep.mubr.f32.mxu0 %v1964_v45  ;;  %v1963_v53 = vsel %vm1243_vm13, %v10532_v20, %v1819_v55  ;;  %v10811_v60 = vpop.f32.mrb[88].mxu0  ;;  %v10816_v63 = vadd.f32 %v12942_v13, %v10718_v10  ;;  %v4802_v20 = vadd.f32 -1.0, %v10715_v31  ;;  %v10827_v43 = vpop.eup %6592  ;;  %6606 = vpow2.f32 %v1343_v16  ;;  %v10836_v55 = vld [vmem:[%s12517_s3 + $0xa80] sm:$0xff]  ;;  %v2390_v16 = vld [vmem:[%s12517_s3 + $0xaa8] sm:$0xff] }
 0x1d5   :  { %12941 = vst [vmem:[#allocation18_spill] sm:$0xff] %v10811_v60  ;;  %3695 = vmatmul.mubr.f32.gmra.mrb[172].mxu0 %v1963_v53  ;;  %v10825_v54 = vpop.f32.mrb[89].mxu0  ;;  %v1973_v12 = vsel %vm1253_vm14, %v10573_v56, %v1829_v44  ;;  %vm1252_vm15 = vcmp.gt.f32.partialorder %v10551_v33, 0.0  ;;  %v4812_v31 = vadd.f32 -1.0, %v6591_v59  ;;  %v1553_v45 = vmul.f32 1.442695, %v10792_v36 }
 0x1d6   :  { %2928 = vmatmul.mubr.f32.gmra.mrb[76].mxu1 %v1963_v53  ;;  %12943 = vst [vmem:[#allocation13_spill] sm:$0xff] %v10825_v54  ;;  %3699 = vmatprep.mubr.f32.mxu0 %v1973_v12  ;;  %v1828_v56 = vmul.f32 2.0, %v4802_v20  ;;  %v6058_v59 = vpack.c.bf16 %v2382_v61, %v2379_v14  ;;  %vm1262_vm0 = vcmp.gt.f32.partialorder %v10593_v22, 0.0  ;;  %v2388_v53 = vld [vmem:[%s12517_s3 + $0xa98] sm:$0xff]  ;;  %v2339_v44 = vld [vmem:[%s12517_s3 + $0x910] sm:$0xff]  ;;  %v6060_v2 = vpack.c.bf16 %v2389_v19, %v2386_v62  ;;  %v2342_v14 = vld [vmem:[%s12517_s3 + $0x928] sm:$0xff] }
 0x1d7   :  { %6055 = vmatpush1.bf16.msra.mxu1 %v6054_v3  ;;  %v6595_v3 = vpop.eup %6594  ;;  %2933 = vmatprep.mubr.f32.mxu1 %v1973_v12  ;;  %v1555_v54 = vmul.f32 1.442695, %v10800_v25  ;;  %v1838_v60 = vmul.f32 2.0, %v4812_v31  ;;  %v4811_v20 = vadd.f32 -1.0, %v10748_v21  ;;  %v10859_v61 = vpop.f32.mrb[90].mxu0  ;;  %6608 = vpow2.f32 %v1359_v6  ;;  %v2395_v19 = vld [vmem:[%s12517_s3 + $0xad0] sm:$0xff] }
 0x1d8   :  { %v10852_v13 = vpop.eup %6596  ;;  %6057 = vmatprep.subr.bf16.mxu1 %v6056_v26  ;;  %12944 = vst [vmem:[#allocation50_spill] sm:$0xff] %v10859_v61  ;;  %v10863_v1 = vadd.f32 %v10168_v37, %v12879_v4  ;;  %v1972_v26 = vsel %vm1252_vm15, %v10551_v33, %v1828_v56  ;;  %v6192_v31 = vpack.c.bf16 %v2390_v16, %v2387_v27  ;;  %v10868_v62 = vpop.f32.mrb[91].mxu0  ;;  %vm1261_vm1 = vcmp.gt.f32.partialorder %v10579_v38, 0.0  ;;  %v2392_v33 = vld [vmem:[%s12517_s3 + $0xab8] sm:$0xff] }
 0x1d9   :  { %v6599_v12 = vpop.eup %6598  ;;  %12945 = vst [vmem:[#allocation19_spill] sm:$0xff] %v10868_v62  ;;  %v10872_v21 = vadd.f32 %v10176_v17, %v12885_v9  ;;  %3700 = vmatmul.mubr.f32.gmra.mrb[174].mxu0 %v1972_v26  ;;  %v1982_v6 = vsel %vm1262_vm0, %v10593_v22, %v1838_v60  ;;  %v1837_v37 = vmul.f32 2.0, %v4811_v20  ;;  %6610 = vpow2.f32 %v1553_v45  ;;  %v2393_v60 = vld [vmem:[%s12517_s3 + $0xac0] sm:$0xff]  ;;  %v2396_v56 = vld [vmem:[%s12517_s3 + $0xad8] sm:$0xff] }
 0x1da   :  { %2934 = vmatmul.mubr.f32.gmra.mrb[78].mxu1 %v1972_v26  ;;  %v10884_v27 = vpop.eup %6600  ;;  %v6062_v17 = vpack.c.bf16 %v2388_v53, %v10836_v55  ;;  %v4821_v16 = vadd.f32 -1.0, %v6595_v3  ;;  %v6194_v22 = vpack.c.bf16 %v2342_v14, %v2339_v44  ;;  %v1361_v20 = vmul.f32 1.442695, %v10816_v63  ;;  %v12946_v26 = vld [vmem:[#allocation27_spill] sm:$0xff]  ;;  %3704 = vmatprep.mubr.f32.mxu0 %v1982_v6  ;;  %v2394_v3 = vld [vmem:[%s12517_s3 + $0xac8] sm:$0xff] }
 0x1db   :  { %6059 = vmatpush1.bf16.msra.mxu1 %v6058_v59  ;;  %2939 = vmatprep.mubr.f32.mxu1 %v1982_v6  ;;  %6612 = vpow2.f32 %v1555_v54  ;;  %v10896_v45 = vadd.f32 %v12946_v26, %v10692_v0  ;;  %vm1271_vm2 = vcmp.gt.f32.partialorder %v10649_v52, 0.0  ;;  %v2391_v55 = vld [vmem:[%s12517_s3 + $0xab0] sm:$0xff]  ;;  %v10905_v59 = vpop.f32.mrb[92].mxu0  ;;  %v10907_v53 = vpop.eup %6602  ;;  %v1981_v54 = vsel %vm1261_vm1, %v10579_v38, %v1837_v37  ;;  %v2345_v6 = vld [vmem:[%s12517_s3 + $0x940] sm:$0xff]  ;;  %v2348_v26 = vld [vmem:[%s12517_s3 + $0x958] sm:$0xff] }
 0x1dc   :  { %6061 = vmatprep.subr.bf16.mxu1 %v6060_v2  ;;  %12947 = vst [vmem:[#allocation20_spill] sm:$0xff] %v10905_v59  ;;  %6193 = vmatprep.subr.bf16.mxu0 %v6192_v31  ;;  %v1847_v2 = vmul.f32 2.0, %v4821_v16  ;;  %v6064_v44 = vpack.c.bf16 %v2395_v19, %v2392_v33  ;;  %v4820_v14 = vadd.f32 -1.0, %v10827_v43  ;;  %v2398_v59 = vld [vmem:[%s12517_s3 + $0xae8] sm:$0xff]  ;;  %v10922_v62 = vpop.f32.mrb[93].mxu0  ;;  %vm1270_vm3 = vcmp.gt.f32.partialorder %v10639_v5, 0.0 }
 0x1dd   :  { %12948 = vst [vmem:[#allocation12_spill] sm:$0xff] %v10922_v62  ;;  %v1571_v38 = vmul.f32 1.442695, %v10863_v1  ;;  %v1573_v31 = vmul.f32 1.442695, %v10872_v21  ;;  %3705 = vmatmul.mubr.f32.gmra.mrb[176].mxu0 %v1981_v54  ;;  %v6196_v43 = vpack.c.bf16 %v2396_v56, %v2393_v60  ;;  %v2401_v37 = vld [vmem:[%s12517_s3 + $0xb00] sm:$0xff]  ;;  %v10930_v33 = vpop.eup %6604  ;;  %v6066_v62 = vpack.c.bf16 %v2394_v3, %v2391_v55 }
 0x1de   :  { %2940 = vmatmul.mubr.f32.gmra.mrb[80].mxu1 %v1981_v54  ;;  %v1991_v19 = vsel %vm1271_vm2, %v10649_v52, %v1847_v2  ;;  %6195 = vmatpush3.bf16.msra.mxu0 %v6194_v22  ;;  %v1846_v16 = vmul.f32 2.0, %v4820_v14  ;;  %v4830_v61 = vadd.f32 -1.0, %v6599_v12  ;;  %v10935_v41 = vpop.eup %6606  ;;  %v10939_v60 = vadd.f32 %v10212_v28, %v12879_v4  ;;  %v2397_v52 = vld [vmem:[%s12517_s3 + $0xae0] sm:$0xff]  ;;  %v10949_v12 = vpop.f32.mrb[94].mxu0  ;;  %v2400_v3 = vld [vmem:[%s12517_s3 + $0xaf8] sm:$0xff]  ;;  %v2399_v54 = vld [vmem:[%s12517_s3 + $0xaf0] sm:$0xff] }
 0x1df   :  { %6063 = vmatpush1.bf16.msra.mxu1 %v6062_v17  ;;  %v10943_v56 = vadd.f32 %v10220_v39, %v12885_v9  ;;  %2945 = vmatprep.mubr.f32.mxu1 %v1991_v19  ;;  %vm1280_vm4 = vcmp.gt.f32.partialorder %v10678_v32, 0.0  ;;  %v6198_v17 = vpack.c.bf16 %v2348_v26, %v2345_v6  ;;  %v10956_v39 = vadd.f32 %v10335_v30, %v10324_v49  ;;  %v2402_v2 = vld [vmem:[%s12517_s3 + $0xb08] sm:$0xff]  ;;  %v2351_v30 = vld [vmem:[%s12517_s3 + $0x970] sm:$0xff] }
 0x1e0   :  { %3709 = vmatprep.mubr.f32.mxu0 %v1991_v19  ;;  %6065 = vmatprep.subr.bf16.mxu1 %v6064_v44  ;;  %v1990_v28 = vsel %vm1270_vm3, %v10639_v5, %v1846_v16  ;;  %v1856_v22 = vmul.f32 2.0, %v4830_v61  ;;  %v6068_v55 = vpack.c.bf16 %v2401_v37, %v2398_v59  ;;  %v10967_v5 = vpop.f32.mrb[95].mxu0  ;;  %6614 = vpow2.f32 %v1361_v20  ;;  %v2354_v59 = vld [vmem:[%s12517_s3 + $0x988] sm:$0xff]  ;;  %v2404_v20 = vld [vmem:[%s12517_s3 + $0xb18] sm:$0xff]  ;;  %v2407_v26 = vld [vmem:[%s12517_s3 + $0xb30] sm:$0xff] }
 0x1e1   :  { %6197 = vmatprep.subr.bf16.mxu0 %v6196_v43  ;;  %v1377_v61 = vmul.f32 1.442695, %v10896_v45  ;;  %3710 = vmatmul.mubr.f32.gmra.mrb[178].mxu0 %v1990_v28  ;;  %v4829_v49 = vadd.f32 -1.0, %v10852_v13  ;;  %v10977_v44 = vpop.eup %6608  ;;  %v12949_v14 = vld [vmem:[#allocation30_spill] sm:$0xff]  ;;  %6616 = vpow2.f32 %v1573_v31  ;;  %vm1279_vm5 = vcmp.gt.f32.partialorder %v10671_v46, 0.0 }
 0x1e2   :  { %2946 = vmatmul.mubr.f32.gmra.mrb[82].mxu1 %v1990_v28  ;;  %v10981_v6 = vadd.f32 %v12949_v14, %v10718_v10  ;;  %v2000_v13 = vsel %vm1280_vm4, %v10678_v32, %v1856_v22  ;;  %6199 = vmatpush3.bf16.msra.mxu0 %v6198_v17  ;;  %6618 = vpow2.f32 %v1571_v38  ;;  %v6200_v43 = vpack.c.bf16 %v2402_v2, %v2399_v54  ;;  %v2403_v32 = vld [vmem:[%s12517_s3 + $0xb10] sm:$0xff]  ;;  %v2406_v38 = vld [vmem:[%s12517_s3 + $0xb28] sm:$0xff]  ;;  %v2408_v54 = vld [vmem:[%s12517_s3 + $0xb38] sm:$0xff] }
 0x1e3   :  { %6067 = vmatpush1.bf16.msra.mxu1 %v6066_v62  ;;  %2951 = vmatprep.mubr.f32.mxu1 %v2000_v13  ;;  %v1855_v31 = vmul.f32 2.0, %v4829_v49  ;;  %v6070_v62 = vpack.c.bf16 %v2400_v3, %v2397_v52  ;;  %v10996_v37 = vpop.eup %6610  ;;  %v1589_v19 = vmul.f32 1.442695, %v10939_v60  ;;  %v1591_v16 = vmul.f32 1.442695, %v10943_v56 }
 0x1e4   :  { %3714 = vmatprep.mubr.f32.mxu0 %v2000_v13  ;;  %6069 = vmatprep.subr.bf16.mxu1 %v6068_v55  ;;  %v4839_v17 = vadd.f32 -1.0, %v10907_v53  ;;  %v6202_v28 = vpack.c.bf16 %v2354_v59, %v2351_v30  ;;  %vm1289_vm6 = vcmp.gt.f32.partialorder %v10724_v57, 0.0  ;;  %v11010_v3 = vadd.f32 %v10396_v29, %v10385_v34  ;;  %v2405_v53 = vld [vmem:[%s12517_s3 + $0xb20] sm:$0xff]  ;;  %v12951_v30 = vld [vmem:[#allocation35_spill] sm:$0xff] }
 0x1e5   :  { %v6613_v52 = vpop.eup %6612  ;;  %v1999_v22 = vsel %vm1279_vm5, %v10671_v46, %v1855_v31  ;;  %6201 = vmatprep.subr.bf16.mxu0 %v6200_v43  ;;  %v6072_v55 = vpack.c.bf16 %v2407_v26, %v2404_v20  ;;  %6620 = vpow2.f32 %v1377_v61  ;;  %v1379_v2 = vmul.f32 1.442695, %v10981_v6  ;;  %v12950_v29 = vld [vmem:[#allocation33_spill] sm:$0xff] }
 0x1e6   :  { %v11021_v46 = vadd.f32 %v10270_v7, %v12885_v9  ;;  %2952 = vmatmul.mubr.f32.gmra.mrb[84].mxu1 %v1999_v22  ;;  %3715 = vmatmul.mubr.f32.gmra.mrb[180].mxu0 %v1999_v22  ;;  %v1865_v34 = vmul.f32 2.0, %v4839_v17  ;;  %v11025_v49 = vadd.f32 %v12950_v29, %v10692_v0  ;;  %v11029_v59 = vadd.f32 %v12951_v30, %v10718_v10  ;;  %v2357_v9 = vld [vmem:[%s12517_s3 + $0x9a0] sm:$0xff]  ;;  %v2360_v7 = vld [vmem:[%s12517_s3 + $0x9b8] sm:$0xff]  ;;  %v2366_v30 = vld [vmem:[%s12517_s3 + $0x9e8] sm:$0xff] }
 0x1e7   :  { %6071 = vmatpush1.bf16.msra.mxu1 %v6070_v62  ;;  %6203 = vmatpush3.bf16.msra.mxu0 %v6202_v28  ;;  %v4838_v61 = vadd.f32 -1.0, %v10884_v27  ;;  %v6074_v14 = vpack.c.bf16 %v2406_v38, %v2403_v32  ;;  %6622 = vpow2.f32 %v1591_v16  ;;  %vm1288_vm7 = vcmp.gt.f32.partialorder %v10696_v15, 0.0  ;;  %v2410_v27 = vld [vmem:[%s12517_s3 + $0xb48] sm:$0xff]  ;;  %v2413_v26 = vld [vmem:[%s12517_s3 + $0xb60] sm:$0xff] }
 0x1e8   :  { %v2009_v13 = vsel %vm1289_vm6, %v10724_v57, %v1865_v34  ;;  %6073 = vmatprep.subr.bf16.mxu1 %v6072_v55  ;;  %v6204_v20 = vpack.c.bf16 %v2408_v54, %v2405_v53  ;;  %6624 = vpow2.f32 %v1589_v19  ;;  %v11050_v31 = vadd.f32 %v10261_v11, %v12879_v4  ;;  %v2409_v62 = vld [vmem:[%s12517_s3 + $0xb40] sm:$0xff]  ;;  %v2412_v4 = vld [vmem:[%s12517_s3 + $0xb58] sm:$0xff]  ;;  %v2411_v11 = vld [vmem:[%s12517_s3 + $0xb50] sm:$0xff] }
 0x1e9   :  { %2957 = vmatprep.mubr.f32.mxu1 %v2009_v13  ;;  %3719 = vmatprep.mubr.f32.mxu0 %v2009_v13  ;;  %v1864_v57 = vmul.f32 2.0, %v4838_v61  ;;  %v12952_v43 = vld [vmem:[#allocation37_spill] sm:$0xff]  ;;  %v1609_v16 = vmul.f32 1.442695, %v11021_v46  ;;  %v4848_v17 = vadd.f32 -1.0, %v6613_v52  ;;  %v6206_v19 = vpack.c.bf16 %v2360_v7, %v2357_v9  ;;  %v2414_v28 = vld [vmem:[%s12517_s3 + $0xb68] sm:$0xff] }
 0x1ea   :  { %v11057_v32 = vadd.f32 %v12952_v43, %v10692_v0  ;;  %6205 = vmatprep.subr.bf16.mxu0 %v6204_v20  ;;  %v11069_v38 = vpop.eup %6614  ;;  %vm1298_vm8 = vcmp.gt.f32.partialorder %v10800_v25, 0.0  ;;  %v11077_v52 = vadd.f32 %v10445_v24, %v10433_v48  ;;  %v6076_v55 = vpack.c.bf16 %v2413_v26, %v2410_v27  ;;  %v2363_v53 = vld [vmem:[%s12517_s3 + $0x9d0] sm:$0xff]  ;;  %v2416_v9 = vld [vmem:[%s12517_s3 + $0xb78] sm:$0xff] }
 0x1eb   :  { %v2008_v22 = vsel %vm1288_vm7, %v10696_v15, %v1864_v57  ;;  %6075 = vmatpush1.bf16.msra.mxu1 %v6074_v14  ;;  %v6617_v54 = vpop.eup %6616  ;;  %6626 = vpow2.f32 %v1379_v2  ;;  %v1395_v34 = vmul.f32 1.442695, %v11025_v49  ;;  %v1397_v29 = vmul.f32 1.442695, %v11029_v59  ;;  %6207 = vmatpush3.bf16.msra.mxu0 %v6206_v19  ;;  %v2419_v7 = vld [vmem:[%s12517_s3 + $0xb90] sm:$0xff] }
 0x1ec   :  { %2958 = vmatmul.mubr.f32.gmra.mrb[86].mxu1 %v2008_v22  ;;  %3720 = vmatmul.mubr.f32.gmra.mrb[182].mxu0 %v2008_v22  ;;  %v1874_v15 = vmul.f32 2.0, %v4848_v17  ;;  %v6619_v48 = vpop.eup %6618  ;;  %v1607_v24 = vmul.f32 1.442695, %v11050_v31  ;;  %v4847_v61 = vadd.f32 -1.0, %v10996_v37  ;;  %v6078_v14 = vpack.c.bf16 %v2412_v4, %v2409_v62  ;;  %v12953_v13 = vld [vmem:[#allocation39_spill] sm:$0xff]  ;;  %v2420_v22 = vld [vmem:[%s12517_s3 + $0xb98] sm:$0xff] }
 0x1ed   :  { %6077 = vmatprep.subr.bf16.mxu1 %v6076_v55  ;;  %v6208_v2 = vpack.c.bf16 %v2414_v28, %v2411_v11  ;;  %v11097_v20 = vadd.f32 %v12953_v13, %v10718_v10  ;;  %6628 = vpow2.f32 %v1609_v16  ;;  %vm1297_vm9 = vcmp.gt.f32.partialorder %v10792_v36, 0.0  ;;  %v2415_v43 = vld [vmem:[%s12517_s3 + $0xb70] sm:$0xff]  ;;  %v12954_v16 = vld [vmem:[#allocation41_spill] sm:$0xff]  ;;  %v2418_v11 = vld [vmem:[%s12517_s3 + $0xb88] sm:$0xff] }
 0x1ee   :  { %v2018_v27 = vsel %vm1298_vm8, %v10800_v25, %v1874_v15  ;;  %v1413_v37 = vmul.f32 1.442695, %v11057_v32  ;;  %v1873_v26 = vmul.f32 2.0, %v4847_v61  ;;  %v4857_v57 = vadd.f32 -1.0, %v6617_v54  ;;  %v2417_v28 = vld [vmem:[%s12517_s3 + $0xb80] sm:$0xff]  ;;  %v2372_v61 = vld [vmem:[%s12517_s3 + $0xa18] sm:$0xff] }
 0x1ef   :  { %2963 = vmatprep.mubr.f32.mxu1 %v2018_v27  ;;  %3724 = vmatprep.mubr.f32.mxu0 %v2018_v27  ;;  %v6210_v62 = vpack.c.bf16 %v2366_v30, %v2363_v53  ;;  %v11107_v17 = vpop.eup %6620  ;;  %v11111_v19 = vadd.f32 %v12954_v16, %v10692_v0  ;;  %vm1307_vm10 = vcmp.gt.f32.partialorder %v10872_v21, 0.0  ;;  %v11116_v25 = vadd.f32 %v10494_v51, %v10483_v18  ;;  %v12955_v55 = vld [vmem:[#allocation45_spill] sm:$0xff]  ;;  %v2422_v27 = vld [vmem:[%s12517_s3 + $0xba8] sm:$0xff] }
 0x1f0   :  { %6079 = vmatpush1.bf16.msra.mxu1 %v6078_v14  ;;  %6209 = vmatprep.subr.bf16.mxu0 %v6208_v2  ;;  %v6080_v4 = vpack.c.bf16 %v2419_v7, %v2416_v9  ;;  %6630 = vpow2.f32 %v1607_v24  ;;  %v11129_v53 = vadd.f32 %v12955_v55, %v10718_v10  ;;  %v2017_v18 = vsel %vm1297_vm9, %v10792_v36, %v1873_v26  ;;  %v2369_v24 = vld [vmem:[%s12517_s3 + $0xa00] sm:$0xff]  ;;  %v12956_v9 = vld [vmem:[#allocation47_spill] sm:$0xff]  ;;  %v2426_v55 = vld [vmem:[%s12517_s3 + $0xbc8] sm:$0xff] }
 0x1f1   :  { %v1883_v51 = vmul.f32 2.0, %v4857_v57  ;;  %6211 = vmatpush3.bf16.msra.mxu0 %v6210_v62  ;;  %v6623_v54 = vpop.eup %6622  ;;  %6632 = vpow2.f32 %v1395_v34  ;;  %v1415_v15 = vmul.f32 1.442695, %v11097_v20  ;;  %2964 = vmatmul.mubr.f32.gmra.mrb[88].mxu1 %v2017_v18  ;;  %v4856_v30 = vadd.f32 -1.0, %v6619_v48  ;;  %v2421_v62 = vld [vmem:[%s12517_s3 + $0xba0] sm:$0xff] }
 0x1f2   :  { %3725 = vmatmul.mubr.f32.gmra.mrb[184].mxu0 %v2017_v18  ;;  %v6625_v14 = vpop.eup %6624  ;;  %6081 = vmatprep.subr.bf16.mxu1 %v6080_v4  ;;  %vm1306_vm11 = vcmp.gt.f32.partialorder %v10863_v1, 0.0  ;;  %v6082_v34 = vpack.c.bf16 %v2418_v11, %v2415_v43  ;;  %v6212_v2 = vpack.c.bf16 %v2420_v22, %v2417_v28  ;;  %6634 = vpow2.f32 %v1397_v29  ;;  %v12957_v16 = vld [vmem:[#allocation53_spill] sm:$0xff]  ;;  %v2424_v28 = vld [vmem:[%s12517_s3 + $0xbb8] sm:$0xff]  ;;  %v2423_v22 = vld [vmem:[%s12517_s3 + $0xbb0] sm:$0xff] }
 0x1f3   :  { %v2027_v36 = vsel %vm1307_vm10, %v10872_v21, %v1883_v51  ;;  %v1431_v48 = vmul.f32 1.442695, %v11111_v19  ;;  %v11148_v7 = vadd.f32 %v12956_v9, %v10692_v0  ;;  %v1882_v13 = vmul.f32 2.0, %v4856_v30  ;;  %v2425_v21 = vld [vmem:[%s12517_s3 + $0xbc0] sm:$0xff]  ;;  %v2428_v9 = vld [vmem:[%s12517_s3 + $0xbd8] sm:$0xff] }
 0x1f4   :  { %2969 = vmatprep.mubr.f32.mxu1 %v2027_v36  ;;  %3729 = vmatprep.mubr.f32.mxu0 %v2027_v36  ;;  %6636 = vpow2.f32 %v1413_v37  ;;  %v1433_v29 = vmul.f32 1.442695, %v11129_v53  ;;  %v4866_v26 = vadd.f32 -1.0, %v6623_v54  ;;  %v6214_v57 = vpack.c.bf16 %v2372_v61, %v2369_v24  ;;  %v2375_v24 = vld [vmem:[%s12517_s3 + $0xa30] sm:$0xff] }
 0x1f5   :  { %6083 = vmatpush1.bf16.msra.mxu1 %v6082_v34  ;;  %6213 = vmatprep.subr.bf16.mxu0 %v6212_v2  ;;  %v11160_v43 = vpop.eup %6626  ;;  %v11164_v4 = vadd.f32 %v12957_v16, %v10718_v10  ;;  %v2026_v37 = vsel %vm1306_vm11, %v10863_v1, %v1882_v13  ;;  %vm1316_vm12 = vcmp.gt.f32.partialorder %v10943_v56, 0.0  ;;  %v11172_v11 = vadd.f32 %v10528_v40, %v10522_v50  ;;  %v12958_v1 = vld [vmem:[#allocation55_spill] sm:$0xff] }
 0x1f6   :  { %6638 = vpow2.f32 %v1415_v15  ;;  %v11185_v18 = vadd.f32 %v12958_v1, %v10692_v0  ;;  %2970 = vmatmul.mubr.f32.gmra.mrb[90].mxu1 %v2026_v37  ;;  %3730 = vmatmul.mubr.f32.gmra.mrb[186].mxu0 %v2026_v37  ;;  %v1892_v50 = vmul.f32 2.0, %v4866_v26  ;;  %v6084_v40 = vpack.c.bf16 %v2425_v21, %v2422_v27  ;;  %v2378_v15 = vld [vmem:[%s12517_s3 + $0xa48] sm:$0xff]  ;;  %v2429_v1 = vld [vmem:[%s12517_s3 + $0xbe0] sm:$0xff] }
 0x1f7   :  { %v6629_v51 = vpop.eup %6628  ;;  %6640 = vpow2.f32 %v1431_v48  ;;  %v1449_v54 = vmul.f32 1.442695, %v11148_v7  ;;  %6215 = vmatpush3.bf16.msra.mxu0 %v6214_v57  ;;  %v4865_v30 = vadd.f32 -1.0, %v6625_v14  ;;  %vm1315_vm13 = vcmp.gt.f32.partialorder %v10939_v60, 0.0  ;;  %v12959_v21 = vld [vmem:[#allocation54_spill] sm:$0xff]  ;;  %v2427_v57 = vld [vmem:[%s12517_s3 + $0xbd0] sm:$0xff] }
 0x1f8   :  { %v2036_v61 = vsel %vm1316_vm12, %v10943_v56, %v1892_v50  ;;  %6085 = vmatprep.subr.bf16.mxu1 %v6084_v40  ;;  %v6086_v36 = vpack.c.bf16 %v2424_v28, %v2421_v62  ;;  %v6216_v34 = vpack.c.bf16 %v2426_v55, %v2423_v22  ;;  %v4741_v2 = vadd.f32 -1.0, %v10930_v33  ;;  %v2431_v56 = vld [vmem:[%s12517_s3 + $0xbf0] sm:$0xff]  ;;  %v2430_v62 = vld [vmem:[%s12517_s3 + $0xbe8] sm:$0xff]  ;;  %v2432_v50 = vld [vmem:[%s12517_s3 + $0xbf8] sm:$0xff] }
 0x1f9   :  { %6642 = vpow2.f32 %v1433_v29  ;;  %v1451_v14 = vmul.f32 1.442695, %v11164_v4  ;;  %2975 = vmatprep.mubr.f32.mxu1 %v2036_v61  ;;  %3734 = vmatprep.mubr.f32.mxu0 %v2036_v61  ;;  %v1891_v48 = vmul.f32 2.0, %v4865_v30  ;;  %v1467_v27 = vmul.f32 1.442695, %v11185_v18  ;;  %v12960_v22 = vld [vmem:[#allocation7_spill] sm:$0xff] }
 0x1fa   :  { %v6631_v13 = vpop.eup %6630  ;;  %v11209_v33 = vadd.f32 %v12959_v21, %v10718_v10  ;;  %6087 = vmatpush1.bf16.msra.mxu1 %v6086_v36  ;;  %6217 = vmatprep.subr.bf16.mxu0 %v6216_v34  ;;  %v4875_v29 = vadd.f32 -1.0, %v6629_v51  ;;  %v6218_v26 = vpack.c.bf16 %v2378_v15, %v2375_v24  ;;  %v11221_v37 = vadd.f32 %v10132_v8, %v10692_v0  ;;  %v2381_v24 = vld [vmem:[%s12517_s3 + $0xa60] sm:$0xff]  ;;  %v2384_v15 = vld [vmem:[%s12517_s3 + $0xa78] sm:$0xff] }
 0x1fb   :  { %v11217_v16 = vpop.eup %6632  ;;  %v2035_v28 = vsel %vm1315_vm13, %v10939_v60, %v1891_v48  ;;  %vm1325_vm14 = vcmp.gt.f32.partialorder %v11021_v46, 0.0  ;;  %v11229_v55 = vadd.f32 %v12960_v22, %v10563_v23  ;;  %vm1191_vm15 = vcmp.gt.f32.partialorder %v10734_v47, 0.0  ;;  %v12964_v22 = vld [vmem:[#allocation60_spill] sm:$0xff] }
 0x1fc   :  { %6644 = vpow2.f32 %v1449_v54  ;;  %2976 = vmatmul.mubr.f32.gmra.mrb[92].mxu1 %v2035_v28  ;;  %3735 = vmatmul.mubr.f32.gmra.mrb[188].mxu0 %v2035_v28  ;;  %v1901_v8 = vmul.f32 2.0, %v4875_v29  ;;  %v6088_v60 = vpack.c.bf16 %v2431_v56, %v2428_v9  ;;  %v11238_v40 = vpop.eup %6634  ;;  %v1767_v51 = vmul.f32 2.0, %v4741_v2  ;;  %v2434_v2 = vld [vmem:[%s12517_s3 + $0xc08] sm:$0xff] }
 0x1fd   :  { %6646 = vpow2.f32 %v1451_v14  ;;  %6219 = vmatpush3.bf16.msra.mxu0 %v6218_v26  ;;  %v4874_v23 = vadd.f32 -1.0, %v6631_v13  ;;  %v6090_v30 = vpack.c.bf16 %v2430_v62, %v2427_v57  ;;  %v1469_v61 = vmul.f32 1.442695, %v11209_v33  ;;  %v2437_v14 = vld [vmem:[%s12517_s3 + $0xc20] sm:$0xff]  ;;  %v12962_v26 = vld [vmem:[#allocation51_spill] sm:$0xff] }
 0x1fe   :  { %v11246_v54 = vpop.eup %6636  ;;  %v2045_v36 = vsel %vm1325_vm14, %v11021_v46, %v1901_v8  ;;  %6089 = vmatprep.subr.bf16.mxu1 %v6088_v60  ;;  %vm1324_vm0 = vcmp.gt.f32.partialorder %v11050_v31, 0.0  ;;  %v6220_v34 = vpack.c.bf16 %v2432_v50, %v2429_v1  ;;  %6648 = vpow2.f32 %v1467_v27  ;;  %v12961_v13 = vld [vmem:[#allocation61_spill] sm:$0xff]  ;;  %v12963_v27 = vld [vmem:[#allocation42_spill] sm:$0xff] }
 0x1ff   :  { %v1485_v48 = vmul.f32 1.442695, %v11221_v37  ;;  %2981 = vmatprep.mubr.f32.mxu1 %v2045_v36  ;;  %3739 = vmatprep.mubr.f32.mxu0 %v2045_v36  ;;  %v1900_v9 = vmul.f32 2.0, %v4874_v23  ;;  %v4742_v46 = vadd.f32 -1.0, %v10935_v41  ;;  %v11265_v21 = vadd.f32 %v12961_v13, %v10718_v10  ;;  %v2433_v62 = vld [vmem:[%s12517_s3 + $0xc00] sm:$0xff]  ;;  %v2436_v41 = vld [vmem:[%s12517_s3 + $0xc18] sm:$0xff] }
 0x200   :  { %v11261_v56 = vpop.eup %6638  ;;  %6091 = vmatpush1.bf16.msra.mxu1 %v6090_v30  ;;  %6221 = vmatprep.subr.bf16.mxu0 %v6220_v34  ;;  %vm1192_vm1 = vcmp.gt.f32.partialorder %v10759_v42, 0.0  ;;  %v6222_v29 = vpack.c.bf16 %v2384_v15, %v2381_v24  ;;  %v11270_v57 = vadd.f32 %v12963_v27, %v12962_v26  ;;  %v11282_v1 = vadd.f32 %v12964_v22, %v10692_v0  ;;  %v11295_v24 = vld [vmem:[%s12516_s2 + $0x8] ss:$0 sm:$0xff] }
 0x201   :  { %v11278_v28 = vpop.eup %6640  ;;  %v2044_v50 = vsel %vm1324_vm0, %v11050_v31, %v1900_v9  ;;  %v1768_v8 = vmul.f32 2.0, %v4742_v46  ;;  %v6092_v60 = vpack.c.bf16 %v2437_v14, %v2434_v2  ;;  %v1911_v23 = vsel %vm1191_vm15, %v10734_v47, %v1767_v51  ;;  %v12965_v47 = vld [vmem:[#allocation43_spill] sm:$0xff]  ;;  %v12966_v51 = vld [vmem:[#allocation14_spill] sm:$0xff]  ;;  %v12967_v2 = vld [vmem:[#allocation8_spill] sm:$0xff] }
 0x202   :  { %6650 = vpow2.f32 %v1469_v61  ;;  %2982 = vmatmul.mubr.f32.gmra.mrb[94].mxu1 %v2044_v50  ;;  %3740 = vmatmul.mubr.f32.gmra.mrb[190].mxu0 %v2044_v50  ;;  %v6094_v15 = vpack.c.bf16 %v2436_v41, %v2433_v62  ;;  %v4751_v36 = vadd.f32 -1.0, %v11069_v38  ;;  %v11303_v61 = vadd.f32 %v12966_v51, %v12965_v47  ;;  %v12968_v14 = vld [vmem:[#allocation9_spill] sm:$0xff]  ;;  %v12970_v62 = vld [vmem:[#allocation58_spill] sm:$0xff] }
 0x203   :  { %v11290_v30 = vpop.eup %6642  ;;  %v1912_v31 = vsel %vm1192_vm1, %v10759_v42, %v1768_v8  ;;  %6223 = vmatpush3.bf16.msra.mxu0 %v6222_v29  ;;  %6093 = vmatprep.subr.bf16.mxu1 %v6092_v60  ;;  %6652 = vpow2.f32 %v1485_v48  ;;  %v1487_v34 = vmul.f32 1.442695, %v11265_v21  ;;  %vm1201_vm2 = vcmp.gt.f32.partialorder %v10816_v63, 0.0  ;;  %v12969_v46 = vld [vmem:[#allocation65_spill] sm:$0xff] }
 0x204   :  { %3052 = vmatprep.mubr.f32.mxu1 %v1912_v31  ;;  %3809 = vmatprep.mubr.f32.mxu0 %v1912_v31  ;;  %v11309_v9 = vadd.f32 %v12968_v14, %v12967_v2  ;;  %v1503_v42 = vmul.f32 1.442695, %v11282_v1  ;;  %v11314_v38 = vadd.f32 %v12969_v46, %v10718_v10  ;;  %v1777_v13 = vmul.f32 2.0, %v4751_v36  ;;  %v12972_v8 = vld [vmem:[#allocation49_spill] sm:$0xff]  ;;  %v12975_v2 = vld [vmem:[#allocation56_spill] sm:$0xff] }
 0x205   :  { %v4750_v29 = vadd.f32 -1.0, %v10977_v44  ;;  %v11321_v26 = vadd.f32 %v10956_v39, %v11295_v24  ;;  %vm1200_vm3 = vcmp.gt.f32.partialorder %v10778_v35, 0.0  ;;  %v4760_v27 = vadd.f32 -1.0, %v11160_v43  ;;  %v12971_v39 = vld [vmem:[#allocation48_spill] sm:$0xff] }
 0x206   :  { %v11317_v48 = vpop.eup %6644  ;;  %3053 = vmatmul.mubr.f32.vlgmr.msra.gmra.mrb[64].mxu1 %v1911_v23  ;;  %3810 = vmatmul.mubr.f32.vlgmr.msra.gmra.mrb[192].mxu0 %v1911_v23  ;;  %v11327_v41 = vadd.f32 %v10713_v58, %v12970_v62  ;;  %v1921_v44 = vsel %vm1201_vm2, %v10816_v63, %v1777_v13  ;;  %vm1210_vm4 = vcmp.gt.f32.partialorder %v10981_v6, 0.0  ;;  %v11335_v60 = vadd.f32 %v12972_v8, %v12971_v39  ;;  %v12976_v13 = vld [vmem:[#allocation10_spill] sm:$0xff] }
 0x207   :  { %v11329_v22 = vpop.eup %6646  ;;  %6095 = vmatpush1.bf16.msra.mxu1 %v6094_v15  ;;  %v1776_v50 = vmul.f32 2.0, %v4750_v29  ;;  %6654 = vpow2.f32 %v1487_v34  ;;  %3058 = vmatprep.mubr.f32.mxu1 %v1921_v44  ;;  %v1786_v43 = vmul.f32 2.0, %v4760_v27  ;;  %v4759_v31 = vadd.f32 -1.0, %v11107_v17  ;;  %v12973_v15 = vld [vmem:[#allocation64_spill] sm:$0xff]  ;;  %v12974_v17 = vld [vmem:[#allocation15_spill] sm:$0xff]  ;;  %v12978_v27 = vld [vmem:[#allocation13_spill] sm:$0xff] }
 0x208   :  { %3814 = vmatprep.mubr.f32.mxu0 %v1921_v44  ;;  %v11337_v23 = vpop.eup %6648  ;;  %6656 = vpow2.f32 %v1503_v42  ;;  %v1505_v63 = vmul.f32 1.442695, %v11314_v38  ;;  %v11344_v36 = vadd.f32 %v12973_v15, %v10692_v0  ;;  %vm1209_vm5 = vcmp.gt.f32.partialorder %v10896_v45, 0.0  ;;  %v5088_v42 = vpop.f32.mrb[96].mxu0  ;;  %v12980_v8 = vld [vmem:[#allocation66_spill] sm:$0xff] }
 0x209   :  { %v1920_v58 = vsel %vm1200_vm3, %v10778_v35, %v1776_v50  ;;  %v1930_v47 = vsel %vm1210_vm4, %v10981_v6, %v1786_v43  ;;  %v1345_v51 = vmul.f32 1.442695, %v11321_v26  ;;  %v1785_v34 = vmul.f32 2.0, %v4759_v31  ;;  %v12977_v6 = vld [vmem:[#allocation18_spill] sm:$0xff]  ;;  %v12979_v50 = vld [vmem:[#allocation67_spill] sm:$0xff] }
 0x20a   :  { %3059 = vmatmul.mubr.f32.gmra.mrb[66].mxu1 %v1920_v58  ;;  %3815 = vmatmul.mubr.f32.gmra.mrb[194].mxu0 %v1920_v58  ;;  %v4769_v35 = vadd.f32 -1.0, %v11238_v40  ;;  %v11352_v14 = vadd.f32 %v12975_v2, %v12974_v17  ;;  %v11358_v29 = vadd.f32 %v12976_v13, %v10718_v10  ;;  %vm1219_vm6 = vcmp.gt.f32.partialorder %v11029_v59, 0.0  ;;  %v5089_v40 = vpop.f32.mrb[97].mxu0  ;;  %v12981_v2 = vld [vmem:[#allocation50_spill] sm:$0xff]  ;;  %v12982_v13 = vld [vmem:[#allocation19_spill] sm:$0xff] }
 0x20b   :  { %3064 = vmatprep.mubr.f32.mxu1 %v1930_v47  ;;  %3819 = vmatprep.mubr.f32.mxu0 %v1930_v47  ;;  %v11363_v62 = vadd.f32 %v12978_v27, %v12977_v6  ;;  %v4768_v44 = vadd.f32 -1.0, %v11217_v16  ;;  %v11368_v39 = vadd.f32 %v12979_v50, %v10692_v0  ;;  %v11372_v43 = vadd.f32 %v12980_v8, %v10718_v10 }
 0x20c   :  { %v11354_v46 = vpop.eup %6650  ;;  %v1929_v58 = vsel %vm1209_vm5, %v10896_v45, %v1785_v34  ;;  %v1795_v31 = vmul.f32 2.0, %v4769_v35  ;;  %6658 = vpow2.f32 %v1505_v63  ;;  %vm1218_vm7 = vcmp.gt.f32.partialorder %v11025_v49, 0.0  ;;  %v12983_v45 = vld [vmem:[#allocation20_spill] sm:$0xff]  ;;  %v5091_v63 = vpop.f32.mrb[98].mxu0 }
 0x20d   :  { %v11377_v15 = vpop.eup %6652  ;;  %v1794_v16 = vmul.f32 2.0, %v4768_v44  ;;  %v4778_v47 = vadd.f32 -1.0, %v11261_v56  ;;  %vm1228_vm8 = vcmp.gt.f32.partialorder %v11097_v20, 0.0  ;;  %v11385_v6 = vadd.f32 %v12982_v13, %v12981_v2  ;;  %v12984_v34 = vld [vmem:[#allocation12_spill] sm:$0xff] }
 0x20e   :  { %3065 = vmatmul.mubr.f32.gmra.mrb[68].mxu1 %v1929_v58  ;;  %3820 = vmatmul.mubr.f32.gmra.mrb[196].mxu0 %v1929_v58  ;;  %v1939_v17 = vsel %vm1219_vm6, %v11029_v59, %v1795_v31  ;;  %v11389_v35 = vadd.f32 %v12984_v34, %v12983_v45  ;;  %6660 = vpow2.f32 %v1345_v51  ;;  %v1521_v27 = vmul.f32 1.442695, %v11344_v36  ;;  %v5092_v59 = vpop.f32.mrb[99].mxu0  ;;  %v12985_v51 = vld [vmem:[#allocation11_spill] sm:$0xff] }
 0x20f   :  { %v1523_v44 = vmul.f32 1.442695, %v11358_v29  ;;  %3070 = vmatprep.mubr.f32.mxu1 %v1939_v17  ;;  %3824 = vmatprep.mubr.f32.mxu0 %v1939_v17  ;;  %v1804_v56 = vmul.f32 2.0, %v4778_v47  ;;  %v1539_v50 = vmul.f32 1.442695, %v11368_v39  ;;  %v1938_v58 = vsel %vm1218_vm7, %v11025_v49, %v1794_v16  ;;  %v12986_v49 = vld [vmem:[#allocation69_spill] sm:$0xff] }
 0x210   :  { %v1541_v8 = vmul.f32 1.442695, %v11372_v43  ;;  %v4777_v31 = vadd.f32 -1.0, %v11246_v54  ;;  %v11401_v13 = vadd.f32 %v12985_v51, %v10692_v0  ;;  %vm1227_vm9 = vcmp.gt.f32.partialorder %v11057_v32, 0.0 }
 0x211   :  { %v6655_v2 = vpop.eup %6654  ;;  %v1948_v47 = vsel %vm1228_vm8, %v11097_v20, %v1804_v56  ;;  %v4787_v17 = vadd.f32 -1.0, %v11290_v30  ;;  %v11412_v54 = vadd.f32 %v12986_v49, %v10718_v10  ;;  %vm1237_vm10 = vcmp.gt.f32.partialorder %v11129_v53, 0.0  ;;  %v5094_v20 = vpop.f32.mrb[100].mxu0 }
 0x212   :  { %3071 = vmatmul.mubr.f32.gmra.mrb[70].mxu1 %v1938_v58  ;;  %3825 = vmatmul.mubr.f32.gmra.mrb[198].mxu0 %v1938_v58  ;;  %v11408_v45 = vpop.eup %6656  ;;  %v1803_v16 = vmul.f32 2.0, %v4777_v31  ;;  %v11417_v34 = vadd.f32 %v10967_v5, %v10949_v12  ;;  %6662 = vpow2.f32 %v1521_v27  ;;  %v4786_v30 = vadd.f32 -1.0, %v11278_v28  ;;  %v5095_v58 = vpop.f32.mrb[101].mxu0 }
 0x213   :  { %3076 = vmatprep.mubr.f32.mxu1 %v1948_v47  ;;  %3829 = vmatprep.mubr.f32.mxu0 %v1948_v47  ;;  %v1813_v56 = vmul.f32 2.0, %v4787_v17  ;;  %6664 = vpow2.f32 %v1523_v44  ;;  %v11421_v49 = vadd.f32 %v5089_v40, %v5088_v42  ;;  %vm1236_vm11 = vcmp.gt.f32.partialorder %v11111_v19, 0.0  ;;  %v12987_v40 = vld [vmem:[#allocation71_spill] sm:$0xff]  ;;  %v12988_v47 = vld [vmem:[#allocation68_spill] sm:$0xff] }
 0x214   :  { %v1947_v51 = vsel %vm1227_vm9, %v11057_v32, %v1803_v16  ;;  %6666 = vpow2.f32 %v1539_v50  ;;  %v1812_v12 = vmul.f32 2.0, %v4786_v30  ;;  %v1557_v5 = vmul.f32 1.442695, %v11401_v13  ;;  %v5097_v32 = vpop.f32.mrb[102].mxu0 }
 0x215   :  { %v1957_v31 = vsel %vm1237_vm10, %v11129_v53, %v1813_v56  ;;  %6668 = vpow2.f32 %v1541_v8  ;;  %v1559_v27 = vmul.f32 1.442695, %v11412_v54  ;;  %v4796_v28 = vadd.f32 -1.0, %v11329_v22  ;;  %v5098_v8 = vpop.f32.mrb[103].mxu0 }
 0x216   :  { %3077 = vmatmul.mubr.f32.gmra.mrb[72].mxu1 %v1947_v51  ;;  %3830 = vmatmul.mubr.f32.gmra.mrb[200].mxu0 %v1947_v51  ;;  %v6659_v42 = vpop.eup %6658  ;;  %v11430_v44 = vadd.f32 %v12987_v40, %v10718_v10  ;;  %vm1246_vm12 = vcmp.gt.f32.partialorder %v11164_v4, 0.0  ;;  %v4795_v53 = vadd.f32 -1.0, %v11317_v48  ;;  %v11434_v50 = vadd.f32 %v5092_v59, %v5091_v63 }
 0x217   :  { %3082 = vmatprep.mubr.f32.mxu1 %v1957_v31  ;;  %3834 = vmatprep.mubr.f32.mxu0 %v1957_v31  ;;  %v11438_v17 = vadd.f32 %v12988_v47, %v10692_v0  ;;  %v1956_v22 = vsel %vm1236_vm11, %v11111_v19, %v1812_v12  ;;  %v1822_v16 = vmul.f32 2.0, %v4796_v28  ;;  %v4805_v56 = vadd.f32 -1.0, %v11354_v46  ;;  %v5100_v12 = vpop.f32.mrb[104].mxu0  ;;  %v2435_v46 = vld [vmem:[%s12517_s3 + $0xc10] sm:$0xff]  ;;  %v2438_v28 = vld [vmem:[%s12517_s3 + $0xc28] sm:$0xff] }
 0x218   :  { %v11444_v30 = vpop.eup %6660  ;;  %vm1245_vm13 = vcmp.gt.f32.partialorder %v11148_v7, 0.0  ;;  %v1821_v48 = vmul.f32 2.0, %v4795_v53  ;;  %v4804_v63 = vadd.f32 -1.0, %v11337_v23  ;;  %v11448_v59 = vadd.f32 %v5095_v58, %v5094_v20  ;;  %v12990_v20 = vld [vmem:[#allocation73_spill] sm:$0xff] }
 0x219   :  { %v1966_v51 = vsel %vm1246_vm12, %v11164_v4, %v1822_v16  ;;  %vm1255_vm14 = vcmp.gt.f32.partialorder %v11209_v33, 0.0  ;;  %v1831_v31 = vmul.f32 2.0, %v4805_v56  ;;  %v4814_v19 = vadd.f32 -1.0, %v6655_v2  ;;  %v5101_v4 = vpop.f32.mrb[105].mxu0 }
 0x21a   :  { %3083 = vmatmul.mubr.f32.gmra.mrb[74].mxu1 %v1956_v22  ;;  %3835 = vmatmul.mubr.f32.gmra.mrb[202].mxu0 %v1956_v22  ;;  %12989 = vst [vmem:[#allocation17_spill] sm:$0xff] %v11448_v59  ;;  %6670 = vpow2.f32 %v1559_v27  ;;  %v1577_v23 = vmul.f32 1.442695, %v11430_v44  ;;  %v11461_v58 = vadd.f32 %v12990_v20, %v10718_v10  ;;  %vm1254_vm15 = vcmp.gt.f32.partialorder %v11185_v18, 0.0 }
 0x21b   :  { %3088 = vmatprep.mubr.f32.mxu1 %v1966_v51  ;;  %3839 = vmatprep.mubr.f32.mxu0 %v1966_v51  ;;  %v1965_v2 = vsel %vm1245_vm13, %v11148_v7, %v1821_v48  ;;  %v1830_v40 = vmul.f32 2.0, %v4804_v63  ;;  %v4813_v53 = vadd.f32 -1.0, %v11377_v15  ;;  %v11468_v47 = vadd.f32 %v5098_v8, %v5097_v32  ;;  %v12991_v7 = vld [vmem:[#allocation70_spill] sm:$0xff]  ;;  %v5103_v15 = vpop.f32.mrb[106].mxu0 }
 0x21c   :  { %v6663_v27 = vpop.eup %6662  ;;  %v1975_v22 = vsel %vm1255_vm14, %v11209_v33, %v1831_v31  ;;  %v1840_v16 = vmul.f32 2.0, %v4814_v19  ;;  %v4823_v56 = vadd.f32 -1.0, %v6659_v42  ;;  %v6224_v51 = vpack.c.bf16 %v2438_v28, %v2435_v46  ;;  %v12992_v42 = vld [vmem:[#allocation6_spill] sm:$0xff]  ;;  %v5104_v63 = vpop.f32.mrb[107].mxu0 }
 0x21d   :  { %v6665_v20 = vpop.eup %6664  ;;  %6672 = vpow2.f32 %v1557_v5  ;;  %v1575_v59 = vmul.f32 1.442695, %v11438_v17  ;;  %v11476_v48 = vadd.f32 %v12991_v7, %v10692_v0  ;;  %vm1264_vm0 = vcmp.gt.f32.partialorder %v11265_v21, 0.0 }
 0x21e   :  { %3089 = vmatmul.mubr.f32.gmra.mrb[76].mxu1 %v1965_v2  ;;  %3840 = vmatmul.mubr.f32.gmra.mrb[204].mxu0 %v1965_v2  ;;  %v6667_v32 = vpop.eup %6666  ;;  %6674 = vpow2.f32 %v1577_v23  ;;  %v1595_v33 = vmul.f32 1.442695, %v11461_v58  ;;  %v11482_v8 = vadd.f32 %v12992_v42, %v10718_v10  ;;  %v11484_v5 = vadd.f32 %v5101_v4, %v5100_v12 }
 0x21f   :  { %3094 = vmatprep.mubr.f32.mxu1 %v1975_v22  ;;  %3844 = vmatprep.mubr.f32.mxu0 %v1975_v22  ;;  %v6669_v31 = vpop.eup %6668  ;;  %v1974_v19 = vsel %vm1254_vm15, %v11185_v18, %v1830_v40  ;;  %vm1263_vm1 = vcmp.gt.f32.partialorder %v11221_v37, 0.0  ;;  %v1839_v46 = vmul.f32 2.0, %v4813_v53  ;;  %v4822_v28 = vadd.f32 -1.0, %v11408_v45  ;;  %v5106_v45 = vpop.f32.mrb[108].mxu0  ;;  %v12993_v40 = vld [vmem:[#allocation72_spill] sm:$0xff] }
 0x220   :  { %6225 = vmatprep.subr.bf16.mxu0 %v6224_v51  ;;  %v1984_v10 = vsel %vm1264_vm0, %v11265_v21, %v1840_v16  ;;  %v1849_v12 = vmul.f32 2.0, %v4823_v56  ;;  %v4832_v23 = vadd.f32 -1.0, %v6665_v20  ;;  %v11494_v4 = vadd.f32 %v5104_v63, %v5103_v15  ;;  %v5107_v22 = vpop.f32.mrb[109].mxu0 }
 0x221   :  { %6227 = vmatpush3.bf16.msra.mxu0 %v6224_v51  ;;  %v11498_v2 = vadd.f32 %v11010_v3, %v11295_v24  ;;  %6676 = vpow2.f32 %v1575_v59  ;;  %v1593_v18 = vmul.f32 1.442695, %v11476_v48  ;;  %vm1273_vm2 = vcmp.gt.f32.partialorder %v11314_v38, 0.0 }
 0x222   :  { %3095 = vmatmul.mubr.f32.gmra.mrb[78].mxu1 %v1974_v19  ;;  %3845 = vmatmul.mubr.f32.gmra.mrb[206].mxu0 %v1974_v19  ;;  %6678 = vpow2.f32 %v1595_v33  ;;  %v11504_v21 = vadd.f32 %v12993_v40, %v10692_v0  ;;  %v1613_v53 = vmul.f32 1.442695, %v11482_v8  ;;  %v1983_v3 = vsel %vm1263_vm1, %v11221_v37, %v1839_v46  ;;  %v5109_v37 = vpop.f32.mrb[110].mxu0 }
 0x223   :  { %3100 = vmatprep.mubr.f32.mxu1 %v1984_v10  ;;  %3849 = vmatprep.mubr.f32.mxu0 %v1984_v10  ;;  %v1848_v59 = vmul.f32 2.0, %v4822_v28  ;;  %v4831_v16 = vadd.f32 -1.0, %v6663_v27  ;;  %v11510_v56 = vadd.f32 %v5107_v22, %v5106_v45  ;;  %v1993_v20 = vsel %vm1273_vm2, %v11314_v38, %v1849_v12  ;;  %v5110_v42 = vpop.f32.mrb[111].mxu0 }
 0x224   :  { %v6671_v51 = vpop.eup %6670  ;;  %vm1272_vm3 = vcmp.gt.f32.partialorder %v11282_v1, 0.0  ;;  %v1858_v0 = vmul.f32 2.0, %v4832_v23  ;;  %v4841_v7 = vadd.f32 -1.0, %v6669_v31  ;;  %v1363_v15 = vmul.f32 1.442695, %v11498_v2 }
 0x225   :  { %v11517_v33 = vadd.f32 %v11077_v52, %v11295_v24  ;;  %6680 = vpow2.f32 %v1593_v18  ;;  %vm1282_vm4 = vcmp.gt.f32.partialorder %v11358_v29, 0.0  ;;  %v11522_v27 = vadd.f32 %v11116_v25, %v11295_v24 }
 0x226   :  { %3101 = vmatmul.mubr.f32.gmra.mrb[80].mxu1 %v1983_v3  ;;  %3850 = vmatmul.mubr.f32.gmra.mrb[208].mxu0 %v1983_v3  ;;  %v1611_v38 = vmul.f32 1.442695, %v11504_v21  ;;  %6682 = vpow2.f32 %v1613_v53  ;;  %v1992_v31 = vsel %vm1272_vm3, %v11282_v1, %v1848_v59  ;;  %v1857_v19 = vmul.f32 2.0, %v4831_v16 }
 0x227   :  { %3106 = vmatprep.mubr.f32.mxu1 %v1993_v20  ;;  %3854 = vmatprep.mubr.f32.mxu0 %v1993_v20  ;;  %v6673_v63 = vpop.eup %6672  ;;  %v4840_v52 = vadd.f32 -1.0, %v6667_v32  ;;  %v11526_v46 = vadd.f32 %v5110_v42, %v5109_v37  ;;  %v2002_v10 = vsel %vm1282_vm4, %v11358_v29, %v1858_v0  ;;  %vm1281_vm5 = vcmp.gt.f32.partialorder %v11344_v36, 0.0  ;;  %v5112_v1 = vpop.f32.mrb[112].mxu0 }
 0x228   :  { %v6675_v28 = vpop.eup %6674  ;;  %v1867_v25 = vmul.f32 2.0, %v4841_v7  ;;  %v4850_v12 = vadd.f32 -1.0, %v6671_v51  ;;  %6684 = vpow2.f32 %v1363_v15  ;;  %v1381_v23 = vmul.f32 1.442695, %v11517_v33  ;;  %v5113_v45 = vpop.f32.mrb[113].mxu0 }
 0x229   :  { %v11533_v18 = vadd.f32 %v11172_v11, %v11295_v24  ;;  %vm1291_vm6 = vcmp.gt.f32.partialorder %v11372_v43, 0.0  ;;  %v1399_v32 = vmul.f32 1.442695, %v11522_v27  ;;  %v11539_v29 = vadd.f32 %v11229_v55, %v11295_v24 }
 0x22a   :  { %3107 = vmatmul.mubr.f32.gmra.mrb[82].mxu1 %v1992_v31  ;;  %3855 = vmatmul.mubr.f32.gmra.mrb[210].mxu0 %v1992_v31  ;;  %6686 = vpow2.f32 %v1611_v38  ;;  %v2001_v53 = vsel %vm1281_vm5, %v11344_v36, %v1857_v19  ;;  %v1866_v22 = vmul.f32 2.0, %v4840_v52  ;;  %v4849_v3 = vadd.f32 -1.0, %v6673_v63 }
 0x22b   :  { %3112 = vmatprep.mubr.f32.mxu1 %v2002_v10  ;;  %3859 = vmatprep.mubr.f32.mxu0 %v2002_v10  ;;  %v6677_v40 = vpop.eup %6676  ;;  %v11542_v11 = vadd.f32 %v5113_v45, %v5112_v1  ;;  %v2011_v16 = vsel %vm1291_vm6, %v11372_v43, %v1867_v25  ;;  %vm1290_vm7 = vcmp.gt.f32.partialorder %v11368_v39, 0.0  ;;  %v1876_v51 = vmul.f32 2.0, %v4850_v12  ;;  %v5115_v36 = vpop.f32.mrb[114].mxu0 }
 0x22c   :  { %v6679_v59 = vpop.eup %6678  ;;  %v4859_v20 = vadd.f32 -1.0, %v6675_v28  ;;  %6688 = vpow2.f32 %v1381_v23  ;;  %v1417_v55 = vmul.f32 1.442695, %v11533_v18  ;;  %vm1300_vm8 = vcmp.gt.f32.partialorder %v11412_v54, 0.0  ;;  %v5116_v43 = vpop.f32.mrb[115].mxu0 }
 0x22d   :  { %6690 = vpow2.f32 %v1399_v32  ;;  %v1435_v0 = vmul.f32 1.442695, %v11539_v29  ;;  %v11551_v7 = vadd.f32 %v11270_v57, %v11295_v24  ;;  %v2010_v37 = vsel %vm1290_vm7, %v11368_v39, %v1866_v22 }
 0x22e   :  { %3113 = vmatmul.mubr.f32.gmra.mrb[84].mxu1 %v2001_v53  ;;  %3860 = vmatmul.mubr.f32.gmra.mrb[212].mxu0 %v2001_v53  ;;  %v1875_v38 = vmul.f32 2.0, %v4849_v3  ;;  %v4858_v42 = vadd.f32 -1.0, %v6677_v40  ;;  %v11554_v63 = vadd.f32 %v5116_v43, %v5115_v36  ;;  %v2020_v19 = vsel %vm1300_vm8, %v11412_v54, %v1876_v51 }
 0x22f   :  { %3118 = vmatprep.mubr.f32.mxu1 %v2011_v16  ;;  %3864 = vmatprep.mubr.f32.mxu0 %v2011_v16  ;;  %v6681_v15 = vpop.eup %6680  ;;  %vm1299_vm9 = vcmp.gt.f32.partialorder %v11401_v13, 0.0  ;;  %v1885_v52 = vmul.f32 2.0, %v4859_v20  ;;  %v4868_v28 = vadd.f32 -1.0, %v6679_v59  ;;  %6692 = vpow2.f32 %v1417_v55 }
 0x230   :  { %v6683_v31 = vpop.eup %6682  ;;  %v11560_v57 = vadd.f32 %v11303_v61, %v11295_v24  ;;  %vm1309_vm10 = vcmp.gt.f32.partialorder %v11430_v44, 0.0  ;;  %6694 = vpow2.f32 %v1435_v0  ;;  %v1453_v39 = vmul.f32 1.442695, %v11551_v7  ;;  %v5118_v1 = vpop.f32.mrb[116].mxu0 }
 0x231   :  { %v11566_v10 = vadd.f32 %v11309_v9, %v11295_v24  ;;  %v11570_v25 = vadd.f32 %v11327_v41, %v11295_v24  ;;  %v2019_v12 = vsel %vm1299_vm9, %v11401_v13, %v1875_v38  ;;  %v1884_v61 = vmul.f32 2.0, %v4858_v42  ;;  %v5119_v53 = vpop.f32.mrb[117].mxu0 }
 0x232   :  { %3119 = vmatmul.mubr.f32.gmra.mrb[86].mxu1 %v2010_v37  ;;  %3865 = vmatmul.mubr.f32.gmra.mrb[214].mxu0 %v2010_v37  ;;  %v6685_v54 = vpop.eup %6684  ;;  %v4867_v23 = vadd.f32 -1.0, %v6681_v15  ;;  %v2029_v45 = vsel %vm1309_vm10, %v11430_v44, %v1885_v52  ;;  %vm1308_vm11 = vcmp.gt.f32.partialorder %v11438_v17, 0.0  ;;  %v1894_v40 = vmul.f32 2.0, %v4868_v28 }
 0x233   :  { %3124 = vmatprep.mubr.f32.mxu1 %v2020_v19  ;;  %3869 = vmatprep.mubr.f32.mxu0 %v2020_v19  ;;  %v4877_v9 = vadd.f32 -1.0, %v6683_v31  ;;  %v1471_v22 = vmul.f32 1.442695, %v11560_v57  ;;  %v11578_v41 = vadd.f32 %v11335_v60, %v11295_v24  ;;  %vm1318_vm12 = vcmp.gt.f32.partialorder %v11461_v58, 0.0 }
 0x234   :  { %v6687_v32 = vpop.eup %6686  ;;  %v11581_v13 = vadd.f32 %v5119_v53, %v5118_v1  ;;  %v4752_v3 = vadd.f32 -1.0, %v6685_v54  ;;  %6696 = vpow2.f32 %v1453_v39  ;;  %v1489_v44 = vmul.f32 1.442695, %v11566_v10 }
 0x235   :  { %v1507_v16 = vmul.f32 1.442695, %v11570_v25  ;;  %v2028_v51 = vsel %vm1308_vm11, %v11438_v17, %v1884_v61  ;;  %v1893_v20 = vmul.f32 2.0, %v4867_v23  ;;  %v4876_v55 = vadd.f32 -1.0, %v6687_v32  ;;  %v5121_v15 = vpop.f32.mrb[118].mxu0 }
 0x236   :  { %3125 = vmatmul.mubr.f32.gmra.mrb[88].mxu1 %v2019_v12  ;;  %3870 = vmatmul.mubr.f32.gmra.mrb[216].mxu0 %v2019_v12  ;;  %v6689_v59 = vpop.eup %6688  ;;  %v2038_v60 = vsel %vm1318_vm12, %v11461_v58, %v1894_v40  ;;  %vm1317_vm13 = vcmp.gt.f32.partialorder %v11476_v48, 0.0  ;;  %v1903_v0 = vmul.f32 2.0, %v4877_v9  ;;  %v4743_v43 = vadd.f32 -1.0, %v11444_v30  ;;  %v5122_v17 = vpop.f32.mrb[119].mxu0 }
 0x237   :  { %3130 = vmatprep.mubr.f32.mxu1 %v2029_v45  ;;  %3874 = vmatprep.mubr.f32.mxu0 %v2029_v45  ;;  %v6691_v36 = vpop.eup %6690  ;;  %6698 = vpow2.f32 %v1471_v22  ;;  %v1525_v37 = vmul.f32 1.442695, %v11578_v41  ;;  %v11592_v38 = vadd.f32 %v11352_v14, %v11295_v24  ;;  %vm1327_vm14 = vcmp.gt.f32.partialorder %v11482_v8, 0.0 }
 0x238   :  { %vm1202_vm15 = vcmp.gt.f32.partialorder %v11498_v2, 0.0  ;;  %6700 = vpow2.f32 %v1489_v44  ;;  %v11596_v58 = vadd.f32 %v5122_v17, %v5121_v15  ;;  %v11600_v30 = vadd.f32 %v11363_v62, %v11295_v24 }
 0x239   :  { %v6693_v42 = vpop.eup %6692  ;;  %6702 = vpow2.f32 %v1507_v16  ;;  %v2037_v14 = vsel %vm1317_vm13, %v11476_v48, %v1893_v20  ;;  %v1902_v31 = vmul.f32 2.0, %v4876_v55  ;;  %v2047_v52 = vsel %vm1327_vm14, %v11482_v8, %v1903_v0  ;;  %v5124_v54 = vpop.f32.mrb[120].mxu0 }
 0x23a   :  { %3131 = vmatmul.mubr.f32.gmra.mrb[90].mxu1 %v2028_v51  ;;  %3875 = vmatmul.mubr.f32.gmra.mrb[218].mxu0 %v2028_v51  ;;  %v6695_v19 = vpop.eup %6694  ;;  %vm1326_vm0 = vcmp.gt.f32.partialorder %v11504_v21, 0.0  ;;  %v1769_v28 = vmul.f32 2.0, %v4743_v43  ;;  %v4761_v39 = vadd.f32 -1.0, %v6689_v59  ;;  %v1778_v12 = vmul.f32 2.0, %v4752_v3  ;;  %v5125_v48 = vpop.f32.mrb[121].mxu0 }
 0x23b   :  { %3136 = vmatprep.mubr.f32.mxu1 %v2038_v60  ;;  %3879 = vmatprep.mubr.f32.mxu0 %v2038_v60  ;;  %6704 = vpow2.f32 %v1525_v37  ;;  %v1543_v62 = vmul.f32 1.442695, %v11592_v38  ;;  %vm1193_vm1 = vcmp.gt.f32.partialorder %v11321_v26, 0.0  ;;  %v11611_v61 = vadd.f32 %v11385_v6, %v11295_v24 }
 0x23c   :  { %vm2456_vm2 = vcmask 130048   ;;  %v11613_v8 = vadd.f32 %v5125_v48, %v5124_v54  ;;  %v1561_v23 = vmul.f32 1.442695, %v11600_v30  ;;  %v11618_v1 = vadd.f32 %v11389_v35, %v11295_v24  ;;  %v12994_v54 = vld [vmem:[#allocation5_spill] sm:$0xff] }
 0x23d   :  { %v2046_v32 = vsel %vm1326_vm0, %v11504_v21, %v1902_v31  ;;  %v4770_v45 = vadd.f32 -1.0, %v6691_v36  ;;  %v1913_v6 = vsel %vm1193_vm1, %v11321_v26, %v1769_v28  ;;  %v1787_v9 = vmul.f32 2.0, %v4761_v39 }
 0x23e   :  { %3137 = vmatmul.mubr.f32.gmra.mrb[92].mxu1 %v2037_v14  ;;  %3880 = vmatmul.mubr.f32.gmra.mrb[220].mxu0 %v2037_v14  ;;  %v6697_v40 = vpop.eup %6696  ;;  %v4779_v53 = vadd.f32 -1.0, %v6693_v42  ;;  %v5127_v22 = vpop.f32.mrb[122].mxu0  ;;  %v1922_v3 = vsel %vm1202_vm15, %v11498_v2, %v1778_v12  ;;  %v6859_v35 = vmov 0.0   ;;  %vm1211_vm3 = vcmp.gt.f32.partialorder %v11517_v33, 0.0 }
 0x23f   :  { %3142 = vmatprep.mubr.f32.mxu1 %v2047_v52  ;;  %3884 = vmatprep.mubr.f32.mxu0 %v2047_v52  ;;  %v5128_v21 = vpop.f32.mrb[123].mxu0  ;;  %6706 = vpow2.f32 %v1543_v62  ;;  %v1579_v44 = vmul.f32 1.442695, %v11611_v61  ;;  %v11633_v26 = vadd.f32 %v11417_v34, %v11295_v24  ;;  %v1597_v2 = vmul.f32 1.442695, %v11618_v1 }
 0x240   :  { %v11635_v59 = vadd.f32 %v5128_v21, %v5127_v22  ;;  %6708 = vpow2.f32 %v1561_v23  ;;  %v1796_v51 = vmul.f32 2.0, %v4770_v45  ;;  %v4788_v20 = vadd.f32 -1.0, %v6695_v19 }
 0x241   :  { %v6699_v16 = vpop.eup %6698  ;;  %v1931_v36 = vsel %vm1211_vm3, %v11517_v33, %v1787_v9  ;;  %vm1220_vm4 = vcmp.gt.f32.partialorder %v11522_v27, 0.0  ;;  %v1805_v60 = vmul.f32 2.0, %v4779_v53  ;;  %v4797_v24 = vadd.f32 -1.0, %v6697_v40  ;;  %v11651_v33 = vld [vmem:[%s12518_s4] sm:$0x7] }
 0x242   :  { %3143 = vmatmul.mubr.f32.gmra.mrb[94].mxu1 %v2046_v32  ;;  %3885 = vmatmul.mubr.f32.gmra.mrb[222].mxu0 %v2046_v32  ;;  %v6701_v55 = vpop.eup %6700  ;;  %v5130_v34 = vpop.f32.mrb[124].mxu0  ;;  %vm1229_vm5 = vcmp.gt.f32.partialorder %v11533_v18, 0.0  ;;  %6710 = vpow2.f32 %v1579_v44  ;;  %v1615_v15 = vmul.f32 1.442695, %v11633_v26  ;;  %v1940_v42 = vsel %vm1220_vm4, %v11522_v27, %v1796_v51 }
 0x243   :  { %5496 = vmatprep.mubr.msk.f32.mxu0 %vm2456_vm2, %v1913_v6  ;;  %3213 = vmatprep.mubr.f32.mxu1 %v6859_v35  ;;  %v6703_v0 = vpop.eup %6702  ;;  %v5131_v43 = vpop.f32.mrb[125].mxu0  ;;  %6712 = vpow2.f32 %v1597_v2  ;;  %v1814_v14 = vmul.f32 2.0, %v4788_v20  ;;  %v4806_v31 = vadd.f32 -1.0, %v6699_v16  ;;  %v1949_v19 = vsel %vm1229_vm5, %v11533_v18, %v1805_v60 }
 0x244   :  { %v11646_v37 = vadd.f32 %v5131_v43, %v5130_v34  ;;  %vm1238_vm6 = vcmp.gt.f32.partialorder %v11539_v29, 0.0  ;;  %v1823_v52 = vmul.f32 2.0, %v4797_v24  ;;  %v4815_v28 = vadd.f32 -1.0, %v6701_v55 }
 0x245   :  { %v6705_v17 = vpop.eup %6704  ;;  %vm1247_vm7 = vcmp.gt.f32.partialorder %v11551_v7, 0.0  ;;  %6714 = vpow2.f32 %v1615_v15  ;;  %v12995_v12 = vsub.s32 2, %v12994_v54  ;;  %v1958_v18 = vsel %vm1238_vm6, %v11539_v29, %v1814_v14 }
 0x246   :  { %4879 = vmatmul.mubr.msk.f32.vlgmr.msra.gmra.mrb[64].mxu1 %vm2456_vm2, %v1913_v6  ;;  %5497 = vmatmul.mubr.msk.f32.vlgmr.msra.gmra.mrb[224].mxu0 %vm2456_vm2, %v1922_v3  ;;  %v1832_v23 = vmul.f32 2.0, %v4806_v31  ;;  %v4824_v32 = vadd.f32 -1.0, %v6703_v0  ;;  %v11672_v40 = vsel %vm1247_vm7, %v11551_v7, %v1823_v52  ;;  %vm1256_vm8 = vcmp.gt.f32.partialorder %v11560_v57, 0.0 }
 0x247   :  { %5499 = vmatprep.mubr.msk.f32.mxu0 %vm2456_vm2, %v1931_v36  ;;  %3219 = vmatprep.mubr.f32.mxu1 %v6859_v35  ;;  %v5133_v39 = vpop.f32.mrb[126].mxu0  ;;  %v11664_v62 = vrot.slane %v11651_v33, %v12995_v12  ;;  %v1841_v6 = vmul.f32 2.0, %v4815_v28  ;;  %v4833_v9 = vadd.f32 -1.0, %v6705_v17  ;;  %vm1265_vm9 = vcmp.gt.f32.partialorder %v11566_v10, 0.0 }
 0x248   :  { %v5134_v27 = vpop.f32.mrb[127].mxu0  ;;  %v11682_v7 = vsel %vm1256_vm8, %v11560_v57, %v1832_v23  ;;  %vm1274_vm10 = vcmp.gt.f32.partialorder %v11570_v25, 0.0  ;;  %v1850_v44 = vmul.f32 2.0, %v4824_v32  ;;  %vm1283_vm11 = vcmp.gt.f32.partialorder %v11578_v41, 0.0 }
 0x249   :  { %v11666_v48 = vadd.f32 %v5134_v27, %v5133_v39  ;;  %v6707_v45 = vpop.eup %6706  ;;  %v11689_v51 = vsel %vm1265_vm9, %v11566_v10, %v1841_v6  ;;  %v1859_v20 = vmul.f32 2.0, %v4833_v9  ;;  %v3382_v24 = vadd.f32 %v11434_v50, %v11664_v62 }
 0x24a   :  { %4880 = vmatmul.mubr.msk.f32.gmra.mrb[66].mxu1 %vm2456_vm2, %v1922_v3  ;;  %5500 = vmatmul.mubr.msk.f32.gmra.mrb[226].mxu0 %vm2456_vm2, %v1940_v42  ;;  %v6709_v22 = vpop.eup %6708  ;;  %v3377_v3 = vadd.f32 %v11421_v49, %v11664_v62  ;;  %v4842_v16 = vadd.f32 -1.0, %v6707_v45  ;;  %v11702_v10 = vsel %vm1274_vm10, %v11570_v25, %v1850_v44  ;;  %vm1292_vm12 = vcmp.gt.f32.partialorder %v11592_v38, 0.0 }
 0x24b   :  { %5502 = vmatprep.mubr.msk.f32.mxu0 %vm2456_vm2, %v1949_v19  ;;  %3225 = vmatprep.mubr.f32.mxu1 %v6859_v35  ;;  %v5168_v53 = vpop.f32.mrb[128].mxu0  ;;  %v4851_v49 = vadd.f32 -1.0, %v6709_v22  ;;  %v11709_v17 = vsel %vm1283_vm11, %v11578_v41, %v1859_v20  ;;  %vm1301_vm13 = vcmp.gt.f32.partialorder %v11600_v30, 0.0  ;;  %vm1310_vm14 = vcmp.gt.f32.partialorder %v11611_v61, 0.0 }
 0x24c   :  { %v5169_v29 = vpop.f32.mrb[129].mxu0  ;;  %v6711_v2 = vpop.eup %6710  ;;  %v1868_v0 = vmul.f32 2.0, %v4842_v16  ;;  %vm1319_vm15 = vcmp.gt.f32.partialorder %v11618_v1, 0.0  ;;  %vm1328_vm0 = vcmp.gt.f32.partialorder %v11633_v26, 0.0  ;;  %v3402_v16 = vadd.f32 %v11494_v4, %v11664_v62 }
 0x24d   :  { %v5170_v21 = vadd.f32 %v5169_v29, %v5168_v53  ;;  %v6713_v57 = vpop.eup %6712  ;;  %v4860_v43 = vadd.f32 -1.0, %v6711_v2  ;;  %v1877_v50 = vmul.f32 2.0, %v4851_v49  ;;  %v3407_v20 = vadd.f32 %v11510_v56, %v11664_v62 }
 0x24e   :  { %4881 = vmatmul.mubr.msk.f32.gmra.mrb[68].mxu1 %vm2456_vm2, %v1931_v36  ;;  %5503 = vmatmul.mubr.msk.f32.gmra.mrb[228].mxu0 %vm2456_vm2, %v1958_v18  ;;  %v4869_v14 = vadd.f32 -1.0, %v6713_v57  ;;  %v11722_v41 = vsel %vm1292_vm12, %v11592_v38, %v1868_v0  ;;  %v4340_v0 = vld [vmem:[%s12519_s5 + $0x88] sm:$0xff] }
 0x24f   :  { %5505 = vmatprep.mubr.msk.f32.mxu0 %vm2456_vm2, %v11672_v40  ;;  %3231 = vmatprep.mubr.f32.mxu1 %v6859_v35  ;;  %v11691_v55 = vadd.f32 %v5170_v21, %v3377_v3  ;;  %v6715_v15 = vpop.eup %6714  ;;  %v1886_v39 = vmul.f32 2.0, %v4860_v43  ;;  %v11728_v12 = vsel %vm1301_vm13, %v11600_v30, %v1877_v50  ;;  %v3417_v43 = vadd.f32 %v11542_v11, %v11664_v62  ;;  %v4324_v50 = vld [vmem:[%s12519_s5 + $0x8] sm:$0xff] }
 0x250   :  { %v5171_v36 = vpop.f32.mrb[130].mxu0  ;;  %v4878_v27 = vadd.f32 -1.0, %v6715_v15  ;;  %v1895_v23 = vmul.f32 2.0, %v4869_v14  ;;  %v3422_v11 = vadd.f32 %v11554_v63, %v11664_v62  ;;  %v4325_v63 = vld [vmem:[%s12519_s5 + $0x10] sm:$0xff] }
 0x251   :  { %v5172_v60 = vpop.f32.mrb[131].mxu0  ;;  %v11740_v30 = vsel %vm1310_vm14, %v11611_v61, %v1886_v39  ;;  %v3397_v61 = vadd.f32 %v11484_v5, %v11664_v62 }
 0x252   :  { %4882 = vmatmul.mubr.msk.f32.gmra.mrb[70].mxu1 %vm2456_vm2, %v1940_v42  ;;  %5506 = vmatmul.mubr.msk.f32.gmra.mrb[230].mxu0 %vm2456_vm2, %v11682_v7  ;;  %v5173_v34 = vadd.f32 %v5172_v60, %v5171_v36  ;;  %v1904_v9 = vmul.f32 2.0, %v4878_v27  ;;  %v11747_v53 = vsel %vm1319_vm15, %v11618_v1, %v1895_v23  ;;  %v4341_v27 = vld [vmem:[%s12519_s5 + $0x90] sm:$0xff]  ;;  %v4342_v23 = vld [vmem:[%s12519_s5 + $0x98] sm:$0xff] }
 0x253   :  { %5508 = vmatprep.mubr.msk.f32.mxu0 %vm2456_vm2, %v11689_v51  ;;  %3237 = vmatprep.mubr.f32.mxu1 %v6859_v35 }
 0x254   :  { %v11711_v42 = vadd.f32 %v5173_v34, %v3382_v24  ;;  %v5174_v31 = vpop.f32.mrb[132].mxu0  ;;  %v11758_v3 = vsel %vm1328_vm0, %v11633_v26, %v1904_v9 }
 0x255   :  { %v5175_v25 = vpop.f32.mrb[133].mxu0 }
 0x256   :  { %4883 = vmatmul.mubr.msk.f32.gmra.mrb[72].mxu1 %vm2456_vm2, %v1949_v19  ;;  %5509 = vmatmul.mubr.msk.f32.gmra.mrb[232].mxu0 %vm2456_vm2, %v11702_v10  ;;  %v12996_v19 = vld [vmem:[#allocation17_spill] sm:$0xff]  ;;  %v5176_v28 = vadd.f32 %v5175_v25, %v5174_v31 }
 0x257   :  { %5511 = vmatprep.mubr.msk.f32.mxu0 %vm2456_vm2, %v11709_v17  ;;  %3243 = vmatprep.mubr.f32.mxu1 %v6859_v35  ;;  %v3387_v52 = vadd.f32 %v12996_v19, %v11664_v62 }
 0x258   :  { %v5177_v45 = vpop.f32.mrb[134].mxu0 }
 0x259   :  { %v11731_v32 = vadd.f32 %v5176_v28, %v3387_v52  ;;  %v5178_v38 = vpop.f32.mrb[135].mxu0 }
 0x25a   :  { %4884 = vmatmul.mubr.msk.f32.gmra.mrb[74].mxu1 %vm2456_vm2, %v1958_v18  ;;  %5512 = vmatmul.mubr.msk.f32.gmra.mrb[234].mxu0 %vm2456_vm2, %v11722_v41  ;;  %v3392_v18 = vadd.f32 %v11468_v47, %v11664_v62  ;;  %v5179_v6 = vadd.f32 %v5178_v38, %v5177_v45  ;;  %v6232_v38 = vpack.c.bf16 %v4342_v23, %v4341_v27  ;;  %v4331_v27 = vld [vmem:[%s12519_s5 + $0x40] sm:$0xff] }
 0x25b   :  { %5514 = vmatprep.mubr.msk.f32.mxu0 %vm2456_vm2, %v11728_v12  ;;  %3249 = vmatprep.mubr.f32.mxu1 %v6859_v35 }
 0x25c   :  { %v11750_v22 = vadd.f32 %v5179_v6, %v3392_v18  ;;  %v5180_v29 = vpop.f32.mrb[136].mxu0  ;;  %v4326_v18 = vld [vmem:[%s12519_s5 + $0x18] sm:$0xff] }
 0x25d   :  { %v5181_v47 = vpop.f32.mrb[137].mxu0  ;;  %v6234_v6 = vpack.c.bf16 %v4326_v18, %v4325_v63 }
 0x25e   :  { %4885 = vmatmul.mubr.msk.f32.gmra.mrb[76].mxu1 %vm2456_vm2, %v11672_v40  ;;  %5515 = vmatmul.mubr.msk.f32.gmra.mrb[236].mxu0 %vm2456_vm2, %v11740_v30  ;;  %v5182_v40 = vadd.f32 %v5181_v47, %v5180_v29 }
 0x25f   :  { %5517 = vmatprep.mubr.msk.f32.mxu0 %vm2456_vm2, %v11747_v53  ;;  %3255 = vmatprep.mubr.f32.mxu1 %v6859_v35 }
 0x260   :  { %v11764_v1 = vadd.f32 %v5182_v40, %v3397_v61 }
 0x262   :  { %4886 = vmatmul.mubr.msk.f32.gmra.mrb[78].mxu1 %vm2456_vm2, %v11682_v7  ;;  %5518 = vmatmul.mubr.msk.f32.gmra.mrb[238].mxu0 %vm2456_vm2, %v11758_v3  ;;  %v5183_v21 = vpop.f32.mrb[138].mxu0 }
 0x263   :  { %3261 = vmatprep.mubr.f32.mxu1 %v6859_v35  ;;  %v5184_v44 = vpop.f32.mrb[139].mxu0 }
 0x264   :  { %v5185_v5 = vadd.f32 %v5184_v44, %v5183_v21  ;;  %v4343_v44 = vld [vmem:[%s12519_s5 + $0xa0] sm:$0xff] }
 0x266   :  { %4887 = vmatmul.mubr.msk.f32.gmra.mrb[80].mxu1 %vm2456_vm2, %v11689_v51  ;;  %v11771_v26 = vadd.f32 %v5185_v5, %v3402_v16  ;;  %v3412_v51 = vadd.f32 %v11526_v46, %v11664_v62  ;;  %v4323_v46 = vld [vmem:[%s12519_s5] sm:$0xff]  ;;  %v4344_v16 = vld [vmem:[%s12519_s5 + $0xa8] sm:$0xff] }
 0x267   :  { %v5186_v2 = vpop.f32.mrb[140].mxu0  ;;  %3267 = vmatprep.mubr.f32.mxu1 %v6859_v35  ;;  %v6230_v14 = vpack.c.bf16 %v4324_v50, %v4323_v46 }
 0x268   :  { %v5187_v7 = vpop.f32.mrb[141].mxu0 }
 0x269   :  { %v5188_v49 = vadd.f32 %v5187_v7, %v5186_v2  ;;  %v6236_v2 = vpack.c.bf16 %v4344_v16, %v4343_v44 }
 0x26a   :  { %4888 = vmatmul.mubr.msk.f32.gmra.mrb[82].mxu1 %vm2456_vm2, %v11702_v10  ;;  %v4339_v10 = vld [vmem:[%s12519_s5 + $0x80] sm:$0xff] }
 0x26b   :  { %v11778_v36 = vadd.f32 %v5188_v49, %v3407_v20  ;;  %v5189_v4 = vpop.f32.mrb[142].mxu0  ;;  %3273 = vmatprep.mubr.f32.mxu1 %v6859_v35 }
 0x26c   :  { %v5190_v57 = vpop.f32.mrb[143].mxu0 }
 0x26d   :  { %v5191_v60 = vadd.f32 %v5190_v57, %v5189_v4  ;;  %v3442_v57 = vadd.f32 %v11635_v59, %v11664_v62  ;;  %v3447_v59 = vadd.f32 %v11646_v37, %v11664_v62 }
 0x26e   :  { %4889 = vmatmul.mubr.msk.f32.gmra.mrb[84].mxu1 %vm2456_vm2, %v11709_v17  ;;  %v6228_v17 = vpack.c.bf16 %v4340_v0, %v4339_v10  ;;  %v4329_v10 = vld [vmem:[%s12519_s5 + $0x30] sm:$0xff] }
 0x26f   :  { %v11785_v24 = vadd.f32 %v5191_v60, %v3412_v51  ;;  %v5192_v56 = vpop.f32.mrb[144].mxu0  ;;  %3279 = vmatprep.mubr.f32.mxu1 %v6859_v35 }
 0x270   :  { %v5193_v34 = vpop.f32.mrb[145].mxu0  ;;  %6229 = vmatprep.subr.bf16.mxu1 %v6228_v17 }
 0x271   :  { %v5194_v15 = vadd.f32 %v5193_v34, %v5192_v56  ;;  %6231 = vmatpush3.bf16.msra.mxu1 %v6230_v14  ;;  %v4345_v34 = vld [vmem:[%s12519_s5 + $0xb0] sm:$0xff] }
 0x272   :  { %4890 = vmatmul.mubr.msk.f32.gmra.mrb[86].mxu1 %vm2456_vm2, %v11722_v41  ;;  %6233 = vmatprep.subr.bf16.mxu1 %v6232_v38 }
 0x273   :  { %v11804_v31 = vadd.f32 %v5194_v15, %v3417_v43  ;;  %v5195_v25 = vpop.f32.mrb[146].mxu0  ;;  %3285 = vmatprep.mubr.f32.mxu1 %v6859_v35  ;;  %v4330_v43 = vld [vmem:[%s12519_s5 + $0x38] sm:$0xff] }
 0x274   :  { %v5196_v19 = vpop.f32.mrb[147].mxu0  ;;  %v6242_v15 = vpack.c.bf16 %v4330_v43, %v4329_v10 }
 0x275   :  { %v5197_v52 = vadd.f32 %v5196_v19, %v5195_v25  ;;  %6235 = vmatpush3.bf16.msra.mxu1 %v6234_v6  ;;  %v3452_v25 = vadd.f32 %v11666_v48, %v11664_v62 }
 0x276   :  { %4891 = vmatmul.mubr.msk.f32.gmra.mrb[88].mxu1 %vm2456_vm2, %v11728_v12  ;;  %v3427_v12 = vadd.f32 %v11581_v13, %v11664_v62  ;;  %v3432_v13 = vadd.f32 %v11596_v58, %v11664_v62  ;;  %v4327_v58 = vld [vmem:[%s12519_s5 + $0x20] sm:$0xff]  ;;  %6237 = vmatprep.subr.bf16.mxu1 %v6236_v2 }
 0x277   :  { %v11811_v28 = vadd.f32 %v5197_v52, %v3422_v11  ;;  %3291 = vmatprep.mubr.f32.mxu1 %v6859_v35 }
 0x278   :  { %v5198_v39 = vpop.f32.mrb[148].mxu0 }
 0x279   :  { %v5199_v41 = vpop.f32.mrb[149].mxu0 }
 0x27a   :  { %v5200_v45 = vadd.f32 %v5199_v41, %v5198_v39  ;;  %4892 = vmatmul.mubr.msk.f32.gmra.mrb[90].mxu1 %vm2456_vm2, %v11740_v30  ;;  %v4347_v39 = vld [vmem:[%s12519_s5 + $0xc0] sm:$0xff]  ;;  %v4348_v41 = vld [vmem:[%s12519_s5 + $0xc8] sm:$0xff] }
 0x27b   :  { %3297 = vmatprep.mubr.f32.mxu1 %v6859_v35  ;;  %v6244_v63 = vpack.c.bf16 %v4348_v41, %v4347_v39 }
 0x27c   :  { %v11830_v9 = vadd.f32 %v5200_v45, %v3427_v12  ;;  %v5201_v29 = vpop.f32.mrb[150].mxu0 }
 0x27d   :  { %v5202_v47 = vpop.f32.mrb[151].mxu0 }
 0x27e   :  { %v5203_v61 = vadd.f32 %v5202_v47, %v5201_v29  ;;  %4893 = vmatmul.mubr.msk.f32.gmra.mrb[92].mxu1 %vm2456_vm2, %v11747_v53  ;;  %v3437_v53 = vadd.f32 %v11613_v8, %v11664_v62  ;;  %v4332_v62 = vld [vmem:[%s12519_s5 + $0x48] sm:$0xff] }
 0x27f   :  { %3303 = vmatprep.mubr.f32.mxu1 %v6859_v35  ;;  %v4328_v35 = vld [vmem:[%s12519_s5 + $0x28] sm:$0xff]  ;;  %v6246_v48 = vpack.c.bf16 %v4332_v62, %v4331_v27 }
 0x280   :  { %v11837_v40 = vadd.f32 %v5203_v61, %v3432_v13  ;;  %v5204_v21 = vpop.f32.mrb[152].mxu0  ;;  %v6238_v7 = vpack.c.bf16 %v4328_v35, %v4327_v58  ;;  %v4349_v13 = vld [vmem:[%s12519_s5 + $0xd0] sm:$0xff]  ;;  %v4350_v61 = vld [vmem:[%s12519_s5 + $0xd8] sm:$0xff] }
 0x281   :  { %v5205_v30 = vpop.f32.mrb[153].mxu0 }
 0x282   :  { %v5206_v5 = vadd.f32 %v5205_v30, %v5204_v21  ;;  %4894 = vmatmul.mubr.msk.f32.gmra.mrb[94].mxu1 %vm2456_vm2, %v11758_v3  ;;  %v4346_v3 = vld [vmem:[%s12519_s5 + $0xb8] sm:$0xff]  ;;  %v6248_v30 = vpack.c.bf16 %v4350_v61, %v4349_v13  ;;  %v4356_v13 = vld [vmem:[%s12519_s5 + $0x108] sm:$0xff] }
 0x283   :  { %6239 = vmatpush3.bf16.msra.mxu1 %v6238_v7  ;;  %v6240_v46 = vpack.c.bf16 %v4346_v3, %v4345_v34 }
 0x284   :  { %v11856_v20 = vadd.f32 %v5206_v5, %v3437_v53  ;;  %v5207_v49 = vpop.f32.mrb[154].mxu0 }
 0x285   :  { %v5208_v4 = vpop.f32.mrb[155].mxu0  ;;  %6241 = vmatprep.subr.bf16.mxu1 %v6240_v46 }
 0x286   :  { %v5209_v8 = vadd.f32 %v5208_v4, %v5207_v49 }
 0x287   :  { %6243 = vmatpush3.bf16.msra.mxu1 %v6242_v15  ;;  %v4351_v15 = vld [vmem:[%s12519_s5 + $0xe0] sm:$0xff] }
 0x288   :  { %v11860_v51 = vadd.f32 %v5209_v8, %v3442_v57  ;;  %v5210_v60 = vpop.f32.mrb[156].mxu0  ;;  %6245 = vmatprep.subr.bf16.mxu1 %v6244_v63  ;;  %v4354_v63 = vld [vmem:[%s12519_s5 + $0xf8] sm:$0xff] }
 0x289   :  { %v5211_v56 = vpop.f32.mrb[157].mxu0 }
 0x28a   :  { %v5212_v0 = vadd.f32 %v5211_v56, %v5210_v60 }
 0x28b   :  { %6247 = vmatpush3.bf16.msra.mxu1 %v6246_v48 }
 0x28c   :  { %v11876_v17 = vadd.f32 %v5212_v0, %v3447_v59  ;;  %v5213_v50 = vpop.f32.mrb[158].mxu0  ;;  %6249 = vmatprep.subr.bf16.mxu1 %v6248_v30 }
 0x28d   :  { %v5214_v14 = vpop.f32.mrb[159].mxu0 }
 0x28e   :  { %v5215_v19 = vadd.f32 %v5214_v14, %v5213_v50 }
 0x290   :  { %v11880_v11 = vadd.f32 %v5215_v19, %v3452_v25  ;;  %v5248_v37 = vpop.f32.mrb[160].mxu0 }
 0x291   :  { %v5249_v52 = vpop.f32.mrb[161].mxu0 }
 0x292   :  { %v5250_v23 = vadd.f32 %v5249_v52, %v5248_v37 }
 0x294   :  { %v11895_v12 = vadd.f32 %v5250_v23, %v11691_v55  ;;  %v5251_v45 = vpop.f32.mrb[162].mxu0  ;;  %v4333_v55 = vld [vmem:[%s12519_s5 + $0x50] sm:$0xff] }
 0x295   :  { %v5252_v38 = vpop.f32.mrb[163].mxu0  ;;  %v4353_v23 = vld [vmem:[%s12519_s5 + $0xf0] sm:$0xff] }
 0x296   :  { %v5253_v18 = vadd.f32 %v5252_v38, %v5251_v45  ;;  %v6256_v48 = vpack.c.bf16 %v4354_v63, %v4353_v23 }
 0x298   :  { %v11898_v6 = vadd.f32 %v5253_v18, %v11711_v42  ;;  %v5254_v29 = vpop.f32.mrb[164].mxu0  ;;  %v4334_v42 = vld [vmem:[%s12519_s5 + $0x58] sm:$0xff] }
 0x299   :  { %v5255_v47 = vpop.f32.mrb[165].mxu0  ;;  %v6250_v44 = vpack.c.bf16 %v4334_v42, %v4333_v55 }
 0x29a   :  { %v5256_v21 = vadd.f32 %v5255_v47, %v5254_v29  ;;  %v4355_v47 = vld [vmem:[%s12519_s5 + $0x100] sm:$0xff] }
 0x29b   :  { %6251 = vmatpush3.bf16.msra.mxu1 %v6250_v44  ;;  %v6260_v55 = vpack.c.bf16 %v4356_v13, %v4355_v47 }
 0x29c   :  { %v11913_v16 = vadd.f32 %v5256_v21, %v11731_v32  ;;  %v5257_v58 = vpop.f32.mrb[166].mxu0 }
 0x29d   :  { %v5258_v53 = vpop.f32.mrb[167].mxu0  ;;  %6261 = vmatprep.subr.bf16.mxu0 %v6260_v55 }
 0x29e   :  { %v5259_v5 = vadd.f32 %v5258_v53, %v5257_v58  ;;  %6263 = vmatpush3.bf16.msra.mxu0 %v6260_v55 }
 0x2a0   :  { %v11916_v2 = vadd.f32 %v5259_v5, %v11750_v22  ;;  %v5260_v35 = vpop.f32.mrb[168].mxu0 }
 0x2a1   :  { %v5261_v7 = vpop.f32.mrb[169].mxu0 }
 0x2a2   :  { %v5262_v49 = vadd.f32 %v5261_v7, %v5260_v35 }
 0x2a4   :  { %v11919_v4 = vadd.f32 %v5262_v49, %v11764_v1  ;;  %v5263_v57 = vpop.f32.mrb[170].mxu0 }
 0x2a5   :  { %v5264_v8 = vpop.f32.mrb[171].mxu0 }
 0x2a6   :  { %v5265_v60 = vadd.f32 %v5264_v8, %v5263_v57 }
 0x2a8   :  { %v11922_v32 = vadd.f32 %v5265_v60, %v11771_v26  ;;  %v5266_v56 = vpop.f32.mrb[172].mxu0  ;;  %v4352_v26 = vld [vmem:[%s12519_s5 + $0xe8] sm:$0xff] }
 0x2a9   :  { %v5267_v34 = vpop.f32.mrb[173].mxu0  ;;  %v6252_v14 = vpack.c.bf16 %v4352_v26, %v4351_v15 }
 0x2aa   :  { %v5268_v3 = vadd.f32 %v5267_v34, %v5266_v56 }
 0x2ab   :  { %6253 = vmatprep.subr.bf16.mxu1 %v6252_v14 }
 0x2ac   :  { %v11925_v10 = vadd.f32 %v5268_v3, %v11778_v36  ;;  %v5269_v22 = vpop.f32.mrb[174].mxu0  ;;  %v4335_v36 = vld [vmem:[%s12519_s5 + $0x60] sm:$0xff] }
 0x2ad   :  { %v5270_v59 = vpop.f32.mrb[175].mxu0 }
 0x2ae   :  { %v5271_v0 = vadd.f32 %v5270_v59, %v5269_v22 }
 0x2b0   :  { %v11928_v46 = vadd.f32 %v5271_v0, %v11785_v24  ;;  %v5272_v1 = vpop.f32.mrb[176].mxu0  ;;  %v4336_v24 = vld [vmem:[%s12519_s5 + $0x68] sm:$0xff] }
 0x2b1   :  { %v5273_v43 = vpop.f32.mrb[177].mxu0  ;;  %v6254_v25 = vpack.c.bf16 %v4336_v24, %v4335_v36 }
 0x2b2   :  { %v5274_v50 = vadd.f32 %v5273_v43, %v5272_v1 }
 0x2b3   :  { %6255 = vmatpush3.bf16.msra.mxu1 %v6254_v25 }
 0x2b4   :  { %v11943_v19 = vadd.f32 %v5274_v50, %v11804_v31  ;;  %v5275_v37 = vpop.f32.mrb[178].mxu0  ;;  %v4337_v31 = vld [vmem:[%s12519_s5 + $0x70] sm:$0xff]  ;;  %6257 = vmatprep.subr.bf16.mxu1 %v6256_v48 }
 0x2b5   :  { %v5276_v52 = vpop.f32.mrb[179].mxu0 }
 0x2b6   :  { %v5277_v39 = vadd.f32 %v5276_v52, %v5275_v37 }
 0x2b8   :  { %v11946_v41 = vadd.f32 %v5277_v39, %v11811_v28  ;;  %v4338_v28 = vld [vmem:[%s12519_s5 + $0x78] sm:$0xff] }
 0x2b9   :  { %v5278_v27 = vpop.f32.mrb[180].mxu0  ;;  %v6258_v38 = vpack.c.bf16 %v4338_v28, %v4337_v31 }
 0x2ba   :  { %v5279_v62 = vpop.f32.mrb[181].mxu0 }
 0x2bb   :  { %v5280_v45 = vadd.f32 %v5279_v62, %v5278_v27  ;;  %6259 = vmatpush3.bf16.msra.mxu1 %v6258_v38 }
 0x2bd   :  { %v11961_v18 = vadd.f32 %v5280_v45, %v11830_v9 }
 0x2bf   :  { %v5281_v29 = vpop.f32.mrb[182].mxu0 }
 0x2c0   :  { %v5282_v61 = vpop.f32.mrb[183].mxu0 }
 0x2c1   :  { %v5283_v21 = vadd.f32 %v5282_v61, %v5281_v29 }
 0x2c3   :  { %v11970_v30 = vadd.f32 %v5283_v21, %v11837_v40 }
 0x2c5   :  { %v5284_v9 = vpop.f32.mrb[184].mxu0 }
 0x2c6   :  { %v5285_v42 = vpop.f32.mrb[185].mxu0 }
 0x2c7   :  { %v5286_v44 = vadd.f32 %v5285_v42, %v5284_v9 }
 0x2c9   :  { %v11973_v58 = vadd.f32 %v5286_v44, %v11856_v20  ;;  %v5287_v53 = vpop.f32.mrb[186].mxu0 }
 0x2ca   :  { %v5288_v5 = vpop.f32.mrb[187].mxu0 }
 0x2cb   :  { %v5289_v35 = vadd.f32 %v5288_v5, %v5287_v53 }
 0x2cd   :  { %v11976_v7 = vadd.f32 %v5289_v35, %v11860_v51 }
 0x2cf   :  { %v5290_v49 = vpop.f32.mrb[188].mxu0 }
 0x2d0   :  { %v5291_v57 = vpop.f32.mrb[189].mxu0 }
 0x2d1   :  { %v5292_v8 = vadd.f32 %v5291_v57, %v5290_v49 }
 0x2d3   :  { %v11979_v60 = vadd.f32 %v5292_v8, %v11876_v17 }
 0x2d5   :  { %v5293_v40 = vpop.f32.mrb[190].mxu0 }
 0x2d6   :  { %v5294_v56 = vpop.f32.mrb[191].mxu0 }
 0x2d7   :  { %v5295_v34 = vadd.f32 %v5294_v56, %v5293_v40 }
 0x2d9   :  { %v11982_v3 = vadd.f32 %v5295_v34, %v11880_v11  ;;  %v5328_v20 = vpop.f32.mrb[192].mxu0 }
 0x2da   :  { %v5329_v22 = vpop.f32.mrb[193].mxu0 }
 0x2db   :  { %v5330_v59 = vadd.f32 %v5329_v22, %v5328_v20 }
 0x2dd   :  { %v5331_v0 = vpop.f32.mrb[194].mxu0  ;;  %v11985_v1 = vadd.f32 %v5330_v59, %v11895_v12 }
 0x2de   :  { %v5332_v51 = vpop.f32.mrb[195].mxu0 }
 0x2df   :  { %v5333_v43 = vadd.f32 %v5332_v51, %v5331_v0  ;;  %v12997_v51 = vsub.s32 0, %v12994_v54 }
 0x2e1   :  { %v5334_v15 = vpop.f32.mrb[196].mxu0  ;;  %v3817_v26 = vadd.f32 %v5333_v43, %v11898_v6  ;;  %v12030_v43 = vrot.slane %v11651_v33, %v12997_v51 }
 0x2e2   :  { %v5335_v17 = vpop.f32.mrb[197].mxu0 }
 0x2e3   :  { %v5336_v36 = vadd.f32 %v5335_v17, %v5334_v15  ;;  %v12998_v15 = vsub.s32 1, %v12994_v54 }
 0x2e5   :  { %v5337_v50 = vpop.f32.mrb[198].mxu0  ;;  %v11989_v14 = vadd.f32 %v5336_v36, %v11913_v16  ;;  %v12035_v17 = vrot.slane %v11651_v33, %v12998_v15 }
 0x2e6   :  { %v5338_v11 = vpop.f32.mrb[199].mxu0 }
 0x2e7   :  { %v5339_v24 = vadd.f32 %v5338_v11, %v5337_v50 }
 0x2e9   :  { %v5340_v25 = vpop.f32.mrb[200].mxu0  ;;  %v11992_v37 = vadd.f32 %v5339_v24, %v11916_v2 }
 0x2ea   :  { %v5341_v52 = vpop.f32.mrb[201].mxu0 }
 0x2eb   :  { %v5342_v12 = vadd.f32 %v5341_v52, %v5340_v25 }
 0x2ed   :  { %v5343_v39 = vpop.f32.mrb[202].mxu0  ;;  %v11995_v27 = vadd.f32 %v5342_v12, %v11919_v4 }
 0x2ee   :  { %v5344_v23 = vpop.f32.mrb[203].mxu0 }
 0x2ef   :  { %v5345_v6 = vadd.f32 %v5344_v23, %v5343_v39 }
 0x2f1   :  { %v5346_v63 = vpop.f32.mrb[204].mxu0  ;;  %v11998_v31 = vadd.f32 %v5345_v6, %v11922_v32 }
 0x2f2   :  { %v5347_v16 = vpop.f32.mrb[205].mxu0 }
 0x2f3   :  { %v5348_v62 = vadd.f32 %v5347_v16, %v5346_v63 }
 0x2f5   :  { %v5349_v48 = vpop.f32.mrb[206].mxu0  ;;  %v12001_v28 = vadd.f32 %v5348_v62, %v11925_v10 }
 0x2f6   :  { %v5350_v2 = vpop.f32.mrb[207].mxu0 }
 0x2f7   :  { %v5351_v45 = vadd.f32 %v5350_v2, %v5349_v48 }
 0x2f9   :  { %v5352_v38 = vpop.f32.mrb[208].mxu0  ;;  %v12004_v29 = vadd.f32 %v5351_v45, %v11928_v46 }
 0x2fa   :  { %v5353_v4 = vpop.f32.mrb[209].mxu0 }
 0x2fb   :  { %v5354_v47 = vadd.f32 %v5353_v4, %v5352_v38 }
 0x2fd   :  { %v5355_v13 = vpop.f32.mrb[210].mxu0  ;;  %v12007_v61 = vadd.f32 %v5354_v47, %v11943_v19 }
 0x2fe   :  { %v5356_v32 = vpop.f32.mrb[211].mxu0 }
 0x2ff   :  { %v5357_v55 = vadd.f32 %v5356_v32, %v5355_v13 }
 0x301   :  { %v5358_v21 = vpop.f32.mrb[212].mxu0  ;;  %v12010_v9 = vadd.f32 %v5357_v55, %v11946_v41 }
 0x302   :  { %v5359_v10 = vpop.f32.mrb[213].mxu0 }
 0x303   :  { %v5360_v42 = vadd.f32 %v5359_v10, %v5358_v21 }
 0x305   :  { %v5361_v44 = vpop.f32.mrb[214].mxu0  ;;  %v12013_v53 = vadd.f32 %v5360_v42, %v11961_v18 }
 0x306   :  { %v5362_v46 = vpop.f32.mrb[215].mxu0 }
 0x307   :  { %v5363_v5 = vadd.f32 %v5362_v46, %v5361_v44 }
 0x309   :  { %v5364_v35 = vpop.f32.mrb[216].mxu0  ;;  %v12016_v49 = vadd.f32 %v5363_v5, %v11970_v30 }
 0x30a   :  { %v5365_v19 = vpop.f32.mrb[217].mxu0 }
 0x30b   :  { %v5366_v57 = vadd.f32 %v5365_v19, %v5364_v35 }
 0x30d   :  { %v5367_v8 = vpop.f32.mrb[218].mxu0  ;;  %v12019_v40 = vadd.f32 %v5366_v57, %v11973_v58 }
 0x30e   :  { %v5368_v41 = vpop.f32.mrb[219].mxu0 }
 0x30f   :  { %v5369_v56 = vadd.f32 %v5368_v41, %v5367_v8 }
 0x311   :  { %v5370_v34 = vpop.f32.mrb[220].mxu0  ;;  %v12022_v20 = vadd.f32 %v5369_v56, %v11976_v7 }
 0x312   :  { %v5371_v18 = vpop.f32.mrb[221].mxu0 }
 0x313   :  { %v5372_v22 = vadd.f32 %v5371_v18, %v5370_v34 }
 0x315   :  { %v5373_v59 = vpop.f32.mrb[222].mxu0  ;;  %v12025_v0 = vadd.f32 %v5372_v22, %v11979_v60 }
 0x316   :  { %v5374_v30 = vpop.f32.mrb[223].mxu0 }
 0x317   :  { %v5375_v58 = vadd.f32 %v5374_v30, %v5373_v59 }
 0x319   :  { %v3215_v7 = vpop.f32.mrb[64].mxu1  ;;  %v5498_v36 = vpop.f32.mrb[224].mxu0  ;;  %v12038_v50 = vadd.f32 %v5375_v58, %v11982_v3 }
 0x31a   :  { %v12041_v60 = vadd.f32 %v3215_v7, %v12030_v43  ;;  %v12043_v11 = vadd.f32 %v5498_v36, %v3817_v26  ;;  %v3217_v24 = vpop.f32.mrb[65].mxu1  ;;  %v3956_v25 = vpop.f32.mrb[225].mxu0 }
 0x31b   :  { %v12046_v52 = vadd.f32 %v3956_v25, %v11985_v1  ;;  %v12051_v12 = vadd.f32 %v3217_v24, %v12035_v17 }
 0x31c   :  { %v4083_v54 = vmul.f32 1.442695, %v12041_v60  ;;  %v4093_v33 = vmul.f32 1.442695, %v12043_v11  ;;  %vm4035_vm1 = vcmp.gt.f32.partialorder %v12041_v60, 0.0  ;;  %vm4040_vm3 = vcmp.gt.f32.partialorder %v12043_v11, 0.0 }
 0x31d   :  { %v3221_v39 = vpop.f32.mrb[66].mxu1  ;;  %v4087_v3 = vmul.f32 1.442695, %v12046_v52  ;;  %v5501_v26 = vpop.f32.mrb[226].mxu0  ;;  %v4085_v62 = vmul.f32 1.442695, %v12051_v12 }
 0x31e   :  { %6716 = vpow2.f32 %v4083_v54  ;;  %v12055_v23 = vadd.f32 %v3221_v39, %v12030_v43  ;;  %v3223_v6 = vpop.f32.mrb[67].mxu1  ;;  %v12058_v1 = vadd.f32 %v5501_v26, %v11992_v37  ;;  %v3966_v16 = vpop.f32.mrb[227].mxu0  ;;  %vm4037_vm4 = vcmp.gt.f32.partialorder %v12046_v52, 0.0 }
 0x31f   :  { %6718 = vpow2.f32 %v4093_v33  ;;  %v12061_v63 = vadd.f32 %v3223_v6, %v12035_v17  ;;  %v12065_v48 = vadd.f32 %v3966_v16, %v11989_v14  ;;  %vm4036_vm5 = vcmp.gt.f32.partialorder %v12051_v12, 0.0 }
 0x320   :  { %v4089_v2 = vmul.f32 1.442695, %v12055_v23  ;;  %6720 = vpow2.f32 %v4087_v3  ;;  %v4105_v38 = vmul.f32 1.442695, %v12058_v1  ;;  %vm4046_vm7 = vcmp.gt.f32.partialorder %v12058_v1, 0.0 }
 0x321   :  { %v3227_v45 = vpop.f32.mrb[68].mxu1  ;;  %v5504_v37 = vpop.f32.mrb[228].mxu0  ;;  %v4091_v13 = vmul.f32 1.442695, %v12061_v63  ;;  %6722 = vpow2.f32 %v4085_v62  ;;  %v4099_v14 = vmul.f32 1.442695, %v12065_v48 }
 0x322   :  { %v12070_v4 = vadd.f32 %v3227_v45, %v12030_v43  ;;  %v3229_v47 = vpop.f32.mrb[69].mxu1  ;;  %v12074_v32 = vadd.f32 %v5504_v37, %v11998_v31  ;;  %v3976_v55 = vpop.f32.mrb[229].mxu0  ;;  %6724 = vpow2.f32 %v4089_v2  ;;  %vm4043_vm6 = vcmp.gt.f32.partialorder %v12065_v48, 0.0 }
 0x323   :  { %v12078_v21 = vadd.f32 %v3229_v47, %v12035_v17  ;;  %v12081_v10 = vadd.f32 %v3976_v55, %v11995_v27  ;;  %6726 = vpow2.f32 %v4105_v38  ;;  %vm4039_vm8 = vcmp.gt.f32.partialorder %v12061_v63, 0.0 }
 0x324   :  { %v4117_v42 = vmul.f32 1.442695, %v12074_v32  ;;  %v4095_v46 = vmul.f32 1.442695, %v12070_v4  ;;  %6728 = vpow2.f32 %v4091_v13  ;;  %vm4038_vm9 = vcmp.gt.f32.partialorder %v12055_v23, 0.0 }
 0x325   :  { %v3233_v44 = vpop.f32.mrb[70].mxu1  ;;  %v5507_v5 = vpop.f32.mrb[230].mxu0  ;;  %v4111_v19 = vmul.f32 1.442695, %v12081_v10  ;;  %6730 = vpow2.f32 %v4099_v14  ;;  %v4097_v56 = vmul.f32 1.442695, %v12078_v21 }
 0x326   :  { %v12086_v31 = vadd.f32 %v3233_v44, %v12030_v43  ;;  %v3235_v35 = vpop.f32.mrb[71].mxu1  ;;  %v12090_v57 = vadd.f32 %v5507_v5, %v12004_v29  ;;  %v3986_v8 = vpop.f32.mrb[231].mxu0  ;;  %6732 = vpow2.f32 %v4117_v42  ;;  %vm4049_vm10 = vcmp.gt.f32.partialorder %v12081_v10, 0.0 }
 0x327   :  { %v12093_v27 = vadd.f32 %v3235_v35, %v12035_v17  ;;  %v12097_v34 = vadd.f32 %v3986_v8, %v12001_v28  ;;  %6734 = vpow2.f32 %v4095_v46  ;;  %vm4052_vm11 = vcmp.gt.f32.partialorder %v12074_v32, 0.0 }
 0x328   :  { %v6717_v41 = vpop.eup %6716  ;;  %v4129_v59 = vmul.f32 1.442695, %v12090_v57  ;;  %v4101_v58 = vmul.f32 1.442695, %v12086_v31  ;;  %6736 = vpow2.f32 %v4111_v19  ;;  %vm4042_vm12 = vcmp.gt.f32.partialorder %v12078_v21, 0.0 }
 0x329   :  { %v6719_v18 = vpop.eup %6718  ;;  %v4911_v22 = vadd.f32 -1.0, %v6717_v41  ;;  %v3239_v30 = vpop.f32.mrb[72].mxu1  ;;  %v4103_v36 = vmul.f32 1.442695, %v12093_v27  ;;  %v4123_v25 = vmul.f32 1.442695, %v12097_v34 }
 0x32a   :  { %v5510_v51 = vpop.f32.mrb[232].mxu0  ;;  %v4916_v29 = vadd.f32 -1.0, %v6719_v18  ;;  %v3241_v15 = vpop.f32.mrb[73].mxu1  ;;  %v12103_v24 = vadd.f32 %v3239_v30, %v12030_v43  ;;  %6738 = vpow2.f32 %v4129_v59  ;;  %vm4041_vm13 = vcmp.gt.f32.partialorder %v12070_v4, 0.0 }
 0x32b   :  { %v3996_v7 = vpop.f32.mrb[233].mxu0  ;;  %v6721_v28 = vpop.eup %6720  ;;  %v12107_v54 = vadd.f32 %v5510_v51, %v12010_v9  ;;  %v4227_v33 = vmul.f32 2.0, %v4911_v22  ;;  %6740 = vpow2.f32 %v4097_v56  ;;  %v12113_v2 = vadd.f32 %v3241_v15, %v12035_v17 }
 0x32c   :  { %v4107_v39 = vmul.f32 1.442695, %v12103_v24  ;;  %v6723_v6 = vpop.eup %6722  ;;  %v4232_v16 = vmul.f32 2.0, %v4916_v29  ;;  %6742 = vpow2.f32 %v4101_v58  ;;  %v4913_v37 = vadd.f32 -1.0, %v6721_v28 }
 0x32d   :  { %v3245_v3 = vpop.f32.mrb[74].mxu1  ;;  %v5513_v26 = vpop.f32.mrb[234].mxu0  ;;  %v4141_v62 = vmul.f32 1.442695, %v12107_v54  ;;  %6744 = vpow2.f32 %v4103_v36  ;;  %v12119_v47 = vadd.f32 %v3996_v7, %v12007_v61  ;;  %v4275_v44 = vsel %vm4035_vm1, %v12041_v60, %v4227_v33 }
 0x32e   :  { %v3247_v45 = vpop.f32.mrb[75].mxu1  ;;  %v4006_v38 = vpop.f32.mrb[235].mxu0  ;;  %6746 = vpow2.f32 %v4123_v25  ;;  %v12123_v55 = vadd.f32 %v3245_v3, %v12030_v43  ;;  %v12126_v14 = vadd.f32 %v5513_v26, %v12016_v49  ;;  %v4280_v35 = vsel %vm4040_vm3, %v12043_v11, %v4232_v16 }
 0x32f   :  { %v12115_v9 = vpop.eup %6724  ;;  %6748 = vpow2.f32 %v4107_v39  ;;  %v4135_v46 = vmul.f32 1.442695, %v12119_v47  ;;  %v4109_v49 = vmul.f32 1.442695, %v12113_v2  ;;  %v12141_v60 = vadd.f32 %v3247_v45, %v12035_v17 }
 0x330   :  { %v6727_v13 = vpop.eup %6726  ;;  %6750 = vpow2.f32 %v4141_v62  ;;  %v4153_v19 = vmul.f32 1.442695, %v12126_v14  ;;  %v12144_v41 = vadd.f32 %v4006_v38, %v12013_v53  ;;  %v4912_v56 = vadd.f32 -1.0, %v6723_v6 }
 0x331   :  { %v6729_v42 = vpop.eup %6728  ;;  %v3251_v61 = vpop.f32.mrb[76].mxu1  ;;  %v4229_v18 = vmul.f32 2.0, %v4913_v37  ;;  %v4922_v30 = vadd.f32 -1.0, %v6727_v13  ;;  %6752 = vpow2.f32 %v4135_v46  ;;  %v4113_v51 = vmul.f32 1.442695, %v12123_v55 }
 0x332   :  { %v6731_v5 = vpop.eup %6730  ;;  %v5516_v22 = vpop.f32.mrb[236].mxu0  ;;  %6754 = vpow2.f32 %v4153_v19  ;;  %v4147_v53 = vmul.f32 1.442695, %v12144_v41  ;;  %v4228_v36 = vmul.f32 2.0, %v4912_v56  ;;  %v12161_v3 = vadd.f32 %v3251_v61, %v12030_v43 }
 0x333   :  { %v6733_v8 = vpop.eup %6732  ;;  %v3253_v11 = vpop.f32.mrb[77].mxu1  ;;  %v12150_v29 = vadd.f32 %v5516_v22, %v12022_v20  ;;  %v4919_v7 = vadd.f32 -1.0, %v6731_v5  ;;  %6756 = vpow2.f32 %v4109_v49  ;;  %v4277_v20 = vsel %vm4037_vm4, %v12046_v52, %v4229_v18 }
 0x334   :  { %v12146_v59 = vpop.eup %6734  ;;  %v4016_v58 = vpop.f32.mrb[237].mxu0  ;;  %v12155_v39 = vadd.f32 -1.0, %v6733_v8  ;;  %v4115_v62 = vmul.f32 1.442695, %v12141_v60  ;;  %6758 = vpow2.f32 %v4147_v53  ;;  %v4276_v45 = vsel %vm4036_vm5, %v12051_v12, %v4228_v36  ;;  %5524 = vmatprep.mubr.msk.f32.mxu0 %vm2456_vm2, %v4277_v20 }
 0x335   :  { %v6737_v15 = vpop.eup %6736  ;;  %v3257_v28 = vpop.f32.mrb[78].mxu1  ;;  %v4165_v38 = vmul.f32 1.442695, %v12150_v29  ;;  %6760 = vpow2.f32 %v4113_v51  ;;  %4476 = vmatprep.mubr.f32.mxu1 %v4276_v45  ;;  %5525 = vmatmul.mubr.msk.f32.vlgmr.msra.gmra.mrb[240].mxu0 %vm2456_vm2, %v4280_v35  ;;  %v12173_v13 = vadd.f32 %v3253_v11, %v12035_v17  ;;  %v12176_v46 = vadd.f32 %v4016_v58, %v12019_v40 }
 0x336   :  { %v5519_v25 = vpop.f32.mrb[238].mxu0  ;;  %v6739_v33 = vpop.eup %6738  ;;  %v4925_v52 = vadd.f32 -1.0, %v6737_v15  ;;  %4477 = vmatmul.mubr.f32.vlgmr.msra.gmra.mrb[96].mxu1 %v4275_v44  ;;  %v4915_v5 = vadd.f32 -1.0, %v6729_v42  ;;  %v4235_v49 = vmul.f32 2.0, %v4919_v7  ;;  %v4914_v19 = vadd.f32 -1.0, %v12115_v9 }
 0x337   :  { %v3259_v26 = vpop.f32.mrb[79].mxu1  ;;  %v4026_v6 = vpop.f32.mrb[239].mxu0  ;;  %v12181_v12 = vadd.f32 -1.0, %v6739_v33  ;;  %v4119_v56 = vmul.f32 1.442695, %v12161_v3  ;;  %6762 = vpow2.f32 %v4165_v38  ;;  %v4238_v18 = vmul.f32 2.0, %v4922_v30 }
 0x338   :  { %v6741_v16 = vpop.eup %6740  ;;  %v4159_v40 = vmul.f32 1.442695, %v12176_v46  ;;  %6764 = vpow2.f32 %v4115_v62  ;;  %v4231_v42 = vmul.f32 2.0, %v4915_v5  ;;  %v4283_v9 = vsel %vm4043_vm6, %v12065_v48, %v4235_v49 }
 0x339   :  { %v12169_v37 = vpop.eup %6742  ;;  %v12184_v8 = vpop.f32.mrb[80].mxu1  ;;  %v4230_v44 = vmul.f32 2.0, %v4914_v19  ;;  %v4121_v58 = vmul.f32 1.442695, %v12173_v13  ;;  %5527 = vmatprep.mubr.msk.f32.mxu0 %vm2456_vm2, %v4283_v9  ;;  %v4286_v30 = vsel %vm4046_vm7, %v12058_v1, %v4238_v18  ;;  %v12202_v15 = vadd.f32 %v3257_v28, %v12030_v43 }
 0x33a   :  { %v12178_v61 = vpop.eup %6744  ;;  %v3265_v11 = vpop.f32.mrb[81].mxu1  ;;  %v12205_v7 = vadd.f32 %v5519_v25, %v12038_v50  ;;  %6766 = vpow2.f32 %v4159_v40  ;;  %v4279_v53 = vsel %vm4039_vm8, %v12061_v63, %v4231_v42  ;;  %5528 = vmatmul.mubr.msk.f32.gmra.mrb[242].mxu0 %vm2456_vm2, %v4286_v30  ;;  %v12212_v36 = vadd.f32 %v3259_v26, %v12035_v17 }
 0x33b   :  { %v6747_v35 = vpop.eup %6746  ;;  %vm4055_vm14 = vcmp.gt.f32.partialorder %v12097_v34, 0.0  ;;  %6768 = vpow2.f32 %v4119_v56  ;;  %4481 = vmatprep.mubr.f32.mxu1 %v4279_v53  ;;  %v4278_v50 = vsel %vm4038_vm9, %v12055_v23, %v4230_v44  ;;  %v4125_v1 = vmul.f32 1.442695, %v12202_v15 }
 0x33c   :  { %v12190_v22 = vpop.eup %6748  ;;  %v4931_v48 = vadd.f32 -1.0, %v6747_v35  ;;  %v4177_v28 = vmul.f32 1.442695, %v12205_v7  ;;  %vm4058_vm15 = vcmp.gt.f32.partialorder %v12090_v57, 0.0  ;;  %4482 = vmatmul.mubr.f32.gmra.mrb[98].mxu1 %v4278_v50  ;;  %v12224_v26 = vadd.f32 %v4026_v6, %v12025_v0 }
 0x33d   :  { %v6751_v51 = vpop.eup %6750  ;;  %v3269_v33 = vpop.f32.mrb[82].mxu1  ;;  %v4918_v62 = vadd.f32 -1.0, %v6741_v16  ;;  %v4241_v45 = vmul.f32 2.0, %v4925_v52  ;;  %6770 = vpow2.f32 %v4121_v58  ;;  %v4127_v23 = vmul.f32 1.442695, %v12212_v36 }
 0x33e   :  { %v6753_v20 = vpop.eup %6752  ;;  %v12221_v25 = vadd.f32 -1.0, %v6751_v51  ;;  %v3271_v38 = vpop.f32.mrb[83].mxu1  ;;  %v4917_v49 = vadd.f32 -1.0, %v12146_v59  ;;  %v4244_v19 = vmul.f32 2.0, %v12155_v39  ;;  %6772 = vpow2.f32 %v4177_v28 }
 0x33f   :  { %v6755_v63 = vpop.eup %6754  ;;  %v4937_v56 = vadd.f32 -1.0, %v6753_v20  ;;  %v4171_v40 = vmul.f32 1.442695, %v12224_v26  ;;  %v4234_v18 = vmul.f32 2.0, %v4918_v62  ;;  %vm4044_vm0 = vcmp.gt.f32.partialorder %v12086_v31, 0.0 }
 0x340   :  { %v12226_v5 = vpop.eup %6756  ;;  %v12237_v16 = vadd.f32 -1.0, %v6755_v63  ;;  %6774 = vpow2.f32 %v4125_v1  ;;  %v4289_v59 = vsel %vm4049_vm10, %v12081_v10, %v4241_v45  ;;  %v4233_v39 = vmul.f32 2.0, %v4917_v49 }
 0x341   :  { %v6759_v35 = vpop.eup %6758  ;;  %v12233_v0 = vpop.f32.mrb[84].mxu1  ;;  %vm4061_vm1 = vcmp.gt.f32.partialorder %v12119_v47, 0.0  ;;  %6776 = vpow2.f32 %v4171_v40  ;;  %v4282_v42 = vsel %vm4042_vm12, %v12078_v21, %v4234_v18  ;;  %5530 = vmatprep.mubr.msk.f32.mxu0 %vm2456_vm2, %v4289_v59  ;;  %v4292_v9 = vsel %vm4052_vm11, %v12074_v32, %v4244_v19 }
 0x342   :  { %v12235_v6 = vpop.eup %6760  ;;  %v12242_v52 = vpop.f32.mrb[85].mxu1  ;;  %v12254_v44 = vadd.f32 %v12184_v8, %v12030_v43  ;;  %vm4064_vm3 = vcmp.gt.f32.partialorder %v12107_v54, 0.0  ;;  %v12257_v51 = vadd.f32 -1.0, %v6759_v35  ;;  %6778 = vpow2.f32 %v4127_v23  ;;  %4486 = vmatprep.mubr.f32.mxu1 %v4282_v42  ;;  %5531 = vmatmul.mubr.msk.f32.gmra.mrb[244].mxu0 %vm2456_vm2, %v4292_v9 }
 0x343   :  { %v6763_v10 = vpop.eup %6762  ;;  %v4281_v21 = vsel %vm4041_vm13, %v12070_v4, %v4233_v39  ;;  %v12264_v58 = vadd.f32 %v3265_v11, %v12035_v17  ;;  %v4921_v30 = vadd.f32 -1.0, %v12178_v61  ;;  %v4247_v53 = vmul.f32 2.0, %v4931_v48 }
 0x344   :  { %v6765_v32 = vpop.eup %6764  ;;  %4487 = vmatmul.mubr.f32.gmra.mrb[100].mxu1 %v4281_v21  ;;  %v4131_v8 = vmul.f32 1.442695, %v12254_v44  ;;  %v4920_v20 = vadd.f32 -1.0, %v12169_v37  ;;  %v4250_v4 = vmul.f32 2.0, %v12181_v12  ;;  %v12274_v28 = vadd.f32 %v3269_v33, %v12030_v43 }
 0x345   :  { %v12269_v50 = vpop.f32.mrb[86].mxu1  ;;  %v4133_v1 = vmul.f32 1.442695, %v12264_v58  ;;  %v12277_v11 = vadd.f32 %v3271_v38, %v12035_v17  ;;  %v6767_v62 = vpop.eup %6766  ;;  %v12281_v45 = vadd.f32 -1.0, %v6763_v10  ;;  %v4237_v61 = vmul.f32 2.0, %v4921_v30 }
 0x346   :  { %v12279_v63 = vpop.f32.mrb[87].mxu1  ;;  %v4295_v37 = vsel %vm4055_vm14, %v12097_v34, %v4247_v53  ;;  %v4236_v48 = vmul.f32 2.0, %v4920_v20  ;;  %v12286_v23 = vpop.eup %6768  ;;  %vm4067_vm4 = vcmp.gt.f32.partialorder %v12144_v41, 0.0  ;;  %6780 = vpow2.f32 %v4131_v8 }
 0x347   :  { %vm4045_vm5 = vcmp.gt.f32.partialorder %v12093_v27, 0.0  ;;  %5533 = vmatprep.mubr.msk.f32.mxu0 %vm2456_vm2, %v4295_v37  ;;  %v4298_v12 = vsel %vm4058_vm15, %v12090_v57, %v4250_v4  ;;  %v4137_v33 = vmul.f32 1.442695, %v12274_v28  ;;  %vm4070_vm6 = vcmp.gt.f32.partialorder %v12126_v14, 0.0  ;;  %v6771_v35 = vpop.eup %6770 }
 0x348   :  { %v12296_v38 = vadd.f32 -1.0, %v6767_v62  ;;  %6782 = vpow2.f32 %v4133_v1  ;;  %v4285_v34 = vsel %vm4045_vm5, %v12093_v27, %v4237_v61  ;;  %5534 = vmatmul.mubr.msk.f32.gmra.mrb[246].mxu0 %vm2456_vm2, %v4298_v12  ;;  %v4139_v49 = vmul.f32 1.442695, %v12277_v11  ;;  %v6773_v27 = vpop.eup %6772 }
 0x349   :  { %v12301_v19 = vpop.f32.mrb[88].mxu1  ;;  %4491 = vmatprep.mubr.f32.mxu1 %v4285_v34  ;;  %v4284_v57 = vsel %vm4044_vm0, %v12086_v31, %v4236_v48  ;;  %vm4048_vm7 = vcmp.gt.f32.partialorder %v12113_v2, 0.0  ;;  %v4924_v40 = vadd.f32 -1.0, %v12226_v5  ;;  %v4253_v18 = vmul.f32 2.0, %v4937_v56 }
 0x34a   :  { %v12308_v59 = vpop.f32.mrb[89].mxu1  ;;  %4492 = vmatmul.mubr.f32.gmra.mrb[102].mxu1 %v4284_v57  ;;  %6784 = vpow2.f32 %v4137_v33  ;;  %v4923_v39 = vadd.f32 -1.0, %v12190_v22  ;;  %v4256_v42 = vmul.f32 2.0, %v12221_v25  ;;  %v12314_v9 = vadd.f32 %v12233_v0, %v12030_v43  ;;  %v12316_v10 = vpop.eup %6774 }
 0x34b   :  { %vm4073_vm8 = vcmp.gt.f32.partialorder %v12176_v46, 0.0  ;;  %v4240_v31 = vmul.f32 2.0, %v4924_v40  ;;  %v4301_v5 = vsel %vm4061_vm1, %v12119_v47, %v4253_v18  ;;  %vm4047_vm9 = vcmp.gt.f32.partialorder %v12103_v24, 0.0  ;;  %v6777_v25 = vpop.eup %6776 }
 0x34c   :  { %v12325_v22 = vadd.f32 %v12242_v52, %v12035_v17  ;;  %vm4076_vm10 = vcmp.gt.f32.partialorder %v12150_v29, 0.0  ;;  %6786 = vpow2.f32 %v4139_v49  ;;  %5536 = vmatprep.mubr.msk.f32.mxu0 %vm2456_vm2, %v4301_v5  ;;  %v4239_v56 = vmul.f32 2.0, %v4923_v39  ;;  %v6779_v8 = vpop.eup %6778 }
 0x34d   :  { %v4304_v0 = vsel %vm4064_vm3, %v12107_v54, %v4256_v42  ;;  %v4143_v21 = vmul.f32 1.442695, %v12314_v9  ;;  %v12333_v47 = vpop.f32.mrb[90].mxu1  ;;  %v12335_v30 = vadd.f32 -1.0, %v6773_v27  ;;  %v4288_v52 = vsel %vm4048_vm7, %v12113_v2, %v4240_v31 }
 0x34e   :  { %5537 = vmatmul.mubr.msk.f32.gmra.mrb[248].mxu0 %vm2456_vm2, %v4304_v0  ;;  %vm4051_vm11 = vcmp.gt.f32.partialorder %v12141_v60, 0.0  ;;  %v4927_v53 = vadd.f32 -1.0, %v6765_v32  ;;  %v12342_v20 = vpop.f32.mrb[91].mxu1  ;;  %v4955_v1 = vadd.f32 -1.0, %v6777_v25  ;;  %4496 = vmatprep.mubr.f32.mxu1 %v4288_v52  ;;  %v4287_v54 = vsel %vm4047_vm9, %v12103_v24, %v4239_v56 }
 0x34f   :  { %v4145_v4 = vmul.f32 1.442695, %v12325_v22  ;;  %v4259_v62 = vmul.f32 2.0, %v12257_v51  ;;  %4497 = vmatmul.mubr.f32.gmra.mrb[104].mxu1 %v4287_v54  ;;  %6788 = vpow2.f32 %v4143_v21  ;;  %v4926_v61 = vadd.f32 -1.0, %v12235_v6 }
 0x350   :  { %v4243_v2 = vmul.f32 2.0, %v4927_v53  ;;  %v4262_v37 = vmul.f32 2.0, %v12237_v16  ;;  %vm4079_vm12 = vcmp.gt.f32.partialorder %v12224_v26, 0.0  ;;  %vm4050_vm13 = vcmp.gt.f32.partialorder %v12123_v55, 0.0  ;;  %v12366_v6 = vpop.eup %6780 }
 0x351   :  { %v4307_v32 = vsel %vm4067_vm4, %v12144_v41, %v4259_v62  ;;  %v12358_v24 = vadd.f32 %v12269_v50, %v12030_v43  ;;  %v12362_v51 = vadd.f32 %v12279_v63, %v12035_v17  ;;  %v12364_v48 = vpop.f32.mrb[92].mxu1  ;;  %vm4082_vm14 = vcmp.gt.f32.partialorder %v12205_v7, 0.0 }
 0x352   :  { %v4291_v41 = vsel %vm4051_vm11, %v12141_v60, %v4243_v2  ;;  %5539 = vmatprep.mubr.msk.f32.mxu0 %vm2456_vm2, %v4307_v32  ;;  %v4242_v16 = vmul.f32 2.0, %v4926_v61  ;;  %v4310_v50 = vsel %vm4070_vm6, %v12126_v14, %v4262_v37  ;;  %v4930_v12 = vadd.f32 -1.0, %v6771_v35  ;;  %v3301_v63 = vpop.f32.mrb[93].mxu1  ;;  %v6783_v33 = vpop.eup %6782 }
 0x353   :  { %6790 = vpow2.f32 %v4145_v4  ;;  %4501 = vmatprep.mubr.f32.mxu1 %v4291_v41  ;;  %5540 = vmatmul.mubr.msk.f32.gmra.mrb[250].mxu0 %vm2456_vm2, %v4310_v50  ;;  %v4149_v34 = vmul.f32 1.442695, %v12358_v24  ;;  %v4151_v49 = vmul.f32 1.442695, %v12362_v51  ;;  %v4265_v60 = vmul.f32 2.0, %v12296_v38 }
 0x354   :  { %v4290_v57 = vsel %vm4050_vm13, %v12123_v55, %v4242_v16  ;;  %v4246_v40 = vmul.f32 2.0, %v4930_v12  ;;  %v4929_v14 = vadd.f32 -1.0, %v12286_v23  ;;  %v4268_v35 = vmul.f32 2.0, %v12281_v45  ;;  %v6785_v18 = vpop.eup %6784 }
 0x355   :  { %4502 = vmatmul.mubr.f32.gmra.mrb[106].mxu1 %v4290_v57  ;;  %vm4054_vm15 = vcmp.gt.f32.partialorder %v12173_v13, 0.0  ;;  %v4313_v27 = vsel %vm4073_vm8, %v12176_v46, %v4265_v60  ;;  %v12391_v38 = vadd.f32 %v12301_v19, %v12030_v43  ;;  %v12395_v55 = vadd.f32 %v12308_v59, %v12035_v17  ;;  %v3305_v39 = vpop.f32.mrb[94].mxu1 }
 0x356   :  { %6792 = vpow2.f32 %v4149_v34  ;;  %v4294_v45 = vsel %vm4054_vm15, %v12173_v13, %v4246_v40  ;;  %5542 = vmatprep.mubr.msk.f32.mxu0 %vm2456_vm2, %v4313_v27  ;;  %v4245_v23 = vmul.f32 2.0, %v4929_v14  ;;  %v4316_v42 = vsel %vm4076_vm10, %v12150_v29, %v4268_v35  ;;  %v3307_v46 = vpop.f32.mrb[95].mxu1  ;;  %v6787_v31 = vpop.eup %6786 }
 0x357   :  { %6794 = vpow2.f32 %v4151_v49  ;;  %4506 = vmatprep.mubr.f32.mxu1 %v4294_v45  ;;  %vm4053_vm0 = vcmp.gt.f32.partialorder %v12161_v3, 0.0  ;;  %5543 = vmatmul.mubr.msk.f32.gmra.mrb[252].mxu0 %vm2456_vm2, %v4316_v42  ;;  %v4157_v19 = vmul.f32 1.442695, %v12395_v55  ;;  %v4933_v59 = vadd.f32 -1.0, %v6779_v8 }
 0x358   :  { %v4293_v13 = vsel %vm4053_vm0, %v12161_v3, %v4245_v23  ;;  %v4155_v5 = vmul.f32 1.442695, %v12391_v38  ;;  %v4271_v25 = vmul.f32 2.0, %v4955_v1  ;;  %v4932_v56 = vadd.f32 -1.0, %v12316_v10 }
 0x359   :  { %4507 = vmatmul.mubr.f32.gmra.mrb[108].mxu1 %v4293_v13  ;;  %vm4057_vm1 = vcmp.gt.f32.partialorder %v12212_v36, 0.0  ;;  %v4249_v29 = vmul.f32 2.0, %v4933_v59  ;;  %v4274_v0 = vmul.f32 2.0, %v12335_v30  ;;  %v12412_v21 = vadd.f32 %v12333_v47, %v12030_v43  ;;  %v6789_v52 = vpop.eup %6788 }
 0x35a   :  { %6796 = vpow2.f32 %v4157_v19  ;;  %v4319_v3 = vsel %vm4079_vm12, %v12224_v26, %v4271_v25  ;;  %v4248_v8 = vmul.f32 2.0, %v4932_v56  ;;  %v12419_v10 = vadd.f32 %v12342_v20, %v12035_v17 }
 0x35b   :  { %v4297_v53 = vsel %vm4057_vm1, %v12212_v36, %v4249_v29  ;;  %5545 = vmatprep.mubr.msk.f32.mxu0 %vm2456_vm2, %v4319_v3  ;;  %vm4056_vm3 = vcmp.gt.f32.partialorder %v12202_v15, 0.0  ;;  %v4322_v47 = vsel %vm4082_vm14, %v12205_v7, %v4274_v0  ;;  %v4161_v30 = vmul.f32 1.442695, %v12412_v21 }
 0x35c   :  { %6798 = vpow2.f32 %v4155_v5  ;;  %4511 = vmatprep.mubr.f32.mxu1 %v4297_v53  ;;  %v4296_v26 = vsel %vm4056_vm3, %v12202_v15, %v4248_v8  ;;  %5546 = vmatmul.mubr.msk.f32.gmra.mrb[254].mxu0 %vm2456_vm2, %v4322_v47  ;;  %v4163_v20 = vmul.f32 1.442695, %v12419_v10  ;;  %v4936_v1 = vadd.f32 -1.0, %v6783_v33 }
 0x35d   :  { %v6791_v36 = vpop.eup %6790  ;;  %4512 = vmatmul.mubr.f32.gmra.mrb[110].mxu1 %v4296_v26  ;;  %vm4060_vm4 = vcmp.gt.f32.partialorder %v12264_v58, 0.0  ;;  %v4935_v54 = vadd.f32 -1.0, %v12366_v6  ;;  %v12435_v7 = vadd.f32 %v12364_v48, %v12030_v43  ;;  %v12438_v4 = vadd.f32 %v3301_v63, %v12035_v17 }
 0x35e   :  { %6800 = vpow2.f32 %v4163_v20  ;;  %v4252_v15 = vmul.f32 2.0, %v4936_v1  ;;  %vm4059_vm2 = vcmp.gt.f32.partialorder %v12254_v44, 0.0  ;;  %v4939_v62 = vadd.f32 -1.0, %v6787_v31 }
 0x35f   :  { %6802 = vpow2.f32 %v4161_v30  ;;  %v4251_v2 = vmul.f32 2.0, %v4935_v54  ;;  %v4167_v61 = vmul.f32 1.442695, %v12435_v7  ;;  %v4169_v37 = vmul.f32 1.442695, %v12438_v4 }
 0x360   :  { %v6793_v32 = vpop.eup %6792  ;;  %v4300_v6 = vsel %vm4060_vm4, %v12264_v58, %v4252_v15  ;;  %v4255_v41 = vmul.f32 2.0, %v4939_v62  ;;  %v4938_v48 = vadd.f32 -1.0, %v6785_v18  ;;  %v12445_v16 = vadd.f32 %v3305_v39, %v12030_v43 }
 0x361   :  { %v6795_v50 = vpop.eup %6794  ;;  %4516 = vmatprep.mubr.f32.mxu1 %v4300_v6  ;;  %v4299_v12 = vsel %vm4059_vm2, %v12254_v44, %v4251_v2  ;;  %vm4063_vm5 = vcmp.gt.f32.partialorder %v12277_v11, 0.0  ;;  %v12450_v63 = vadd.f32 %v3307_v46, %v12035_v17  ;;  %6804 = vpow2.f32 %v4169_v37 }
 0x362   :  { %4517 = vmatmul.mubr.f32.gmra.mrb[112].mxu1 %v4299_v12  ;;  %v4303_v33 = vsel %vm4063_vm5, %v12277_v11, %v4255_v41  ;;  %v4254_v34 = vmul.f32 2.0, %v4938_v48  ;;  %v4942_v49 = vadd.f32 -1.0, %v6791_v36  ;;  %v4941_v43 = vadd.f32 -1.0, %v6789_v52 }
 0x363   :  { %4521 = vmatprep.mubr.f32.mxu1 %v4303_v33  ;;  %v4175_v58 = vmul.f32 1.442695, %v12450_v63  ;;  %6806 = vpow2.f32 %v4167_v61  ;;  %vm4062_vm6 = vcmp.gt.f32.partialorder %v12274_v28, 0.0  ;;  %v4173_v44 = vmul.f32 1.442695, %v12445_v16 }
 0x364   :  { %v6797_v60 = vpop.eup %6796  ;;  %v4945_v57 = vadd.f32 -1.0, %v6795_v50  ;;  %v4302_v17 = vsel %vm4062_vm6, %v12274_v28, %v4254_v34  ;;  %v4258_v40 = vmul.f32 2.0, %v4942_v49  ;;  %v4257_v14 = vmul.f32 2.0, %v4941_v43  ;;  %v12484_v61 = vld [vmem:[%s12520_s6] ss:$0 sm:$0xff]  ;;  %s6860_s6 = smov [#allocation2]  }
 0x365   :  { %6808 = vpow2.f32 %v4175_v58  ;;  %vm4066_vm7 = vcmp.gt.f32.partialorder %v12325_v22, 0.0  ;;  %v4944_v18 = vadd.f32 -1.0, %v6793_v32  ;;  %v4948_v27 = vadd.f32 -1.0, %v6797_v60  ;;  %s4723_s0 = sshll.u32 %s6860_s6, 4  ;;  %s4724_s0 = int_to_ptr.vmem [resolvable:$true] %s4723_s0 }
 0x366   :  { %v6799_v35 = vpop.eup %6798  ;;  %4522 = vmatmul.mubr.f32.gmra.mrb[114].mxu1 %v4302_v17  ;;  %v4261_v11 = vmul.f32 2.0, %v4945_v57  ;;  %v4306_v39 = vsel %vm4066_vm7, %v12325_v22, %v4258_v40  ;;  %vm4069_vm8 = vcmp.gt.f32.partialorder %v12362_v51, 0.0  ;;  %6810 = vpow2.f32 %v4173_v44  ;;  %s6835_s23 = scalar_lea.vmem %s4724_s0, 2048  ;;  %p6840_p1 = scmp.lt.s32.totalorder %s4724_s0, %s4724_s0 }
 0x367   :  { %4526 = vmatprep.mubr.f32.mxu1 %v4306_v39  ;;  %vm4065_vm9 = vcmp.gt.f32.partialorder %v12314_v9, 0.0  ;;  %v4264_v23 = vmul.f32 2.0, %v4948_v27  ;;  %v4260_v31 = vmul.f32 2.0, %v4944_v18  ;;  %v4947_v19 = vadd.f32 -1.0, %v6799_v35  ;;  %p6836_p0 = scmp.ne.s32.totalorder %s4724_s0, %s6835_s23  ;;  %p6841_p2 = scmp.lt.s32.totalorder %s6835_s23, %s6835_s23 }
 0x368   :  { %v6801_v45 = vpop.eup %6800  ;;  %v4309_v28 = vsel %vm4069_vm8, %v12362_v51, %v4261_v11  ;;  %v4305_v46 = vsel %vm4065_vm9, %v12314_v9, %v4257_v14  ;;  %vm4072_vm10 = vcmp.gt.f32.partialorder %v12395_v55, 0.0  ;;  %vm4068_vm11 = vcmp.gt.f32.partialorder %v12358_v24, 0.0 }
 0x369   :  { %v6803_v42 = vpop.eup %6802  ;;  %v4951_v59 = vadd.f32 -1.0, %v6801_v45  ;;  %v4312_v13 = vsel %vm4072_vm10, %v12395_v55, %v4264_v23  ;;  %v4308_v25 = vsel %vm4068_vm11, %v12358_v24, %v4260_v31  ;;  %v4263_v51 = vmul.f32 2.0, %v4947_v19  ;;  %p6842_p3 = por %p6841_p2, %p6840_p1 }
 0x36a   :  { %4527 = vmatmul.mubr.f32.gmra.mrb[116].mxu1 %v4305_v46  ;;  %v4950_v56 = vadd.f32 -1.0, %v6803_v42  ;;  %vm4075_vm12 = vcmp.gt.f32.partialorder %v12419_v10, 0.0  ;;  %vm4071_vm13 = vcmp.gt.f32.partialorder %v12391_v38, 0.0  ;;  %vm4078_vm14 = vcmp.gt.f32.partialorder %v12438_v4, 0.0 }
 0x36b   :  { %4531 = vmatprep.mubr.f32.mxu1 %v4309_v28  ;;  %v6805_v22 = vpop.eup %6804  ;;  %v4267_v5 = vmul.f32 2.0, %v4951_v59  ;;  %v4311_v55 = vsel %vm4071_vm13, %v12391_v38, %v4263_v51  ;;  %vm4074_vm15 = vcmp.gt.f32.partialorder %v12412_v21, 0.0  ;;  %vm4081_vm0 = vcmp.gt.f32.partialorder %v12450_v63, 0.0  ;;  %p6843_p4 = pnand %p6842_p3, %p6836_p0 }
 0x36c   :  { %v4954_v29 = vadd.f32 -1.0, %v6805_v22  ;;  %v4266_v53 = vmul.f32 2.0, %v4950_v56  ;;  %vm4077_vm1 = vcmp.gt.f32.partialorder %v12435_v7, 0.0  ;;  %vm4080_vm3 = vcmp.gt.f32.partialorder %v12445_v16, 0.0 }
 0x36d   :  { %v6807_v0 = vpop.eup %6806  ;;  %v4315_v52 = vsel %vm4075_vm12, %v12419_v10, %v4267_v5 }
 0x36e   :  { %4532 = vmatmul.mubr.f32.gmra.mrb[118].mxu1 %v4308_v25  ;;  %v4270_v3 = vmul.f32 2.0, %v4954_v29  ;;  %v4953_v47 = vadd.f32 -1.0, %v6807_v0  ;;  %v4314_v20 = vsel %vm4074_vm15, %v12412_v21, %v4266_v53 }
 0x36f   :  { %v6809_v9 = vpop.eup %6808  ;;  %4536 = vmatprep.mubr.f32.mxu1 %v4312_v13 }
 0x370   :  { %v4957_v8 = vadd.f32 -1.0, %v6809_v9  ;;  %v6811_v24 = vpop.eup %6810  ;;  %v4318_v30 = vsel %vm4078_vm14, %v12438_v4, %v4270_v3  ;;  %v4269_v1 = vmul.f32 2.0, %v4953_v47 }
 0x371   :  { %v4956_v10 = vadd.f32 -1.0, %v6811_v24 }
 0x372   :  { %4537 = vmatmul.mubr.f32.gmra.mrb[120].mxu1 %v4311_v55  ;;  %v4273_v26 = vmul.f32 2.0, %v4957_v8  ;;  %v4317_v36 = vsel %vm4077_vm1, %v12435_v7, %v4269_v1 }
 0x373   :  { %4541 = vmatprep.mubr.f32.mxu1 %v4315_v52  ;;  %v4272_v54 = vmul.f32 2.0, %v4956_v10 }
 0x374   :  { %v4321_v38 = vsel %vm4081_vm0, %v12450_v63, %v4273_v26 }
 0x375   :  { %v4320_v4 = vsel %vm4080_vm3, %v12445_v16, %v4272_v54 }
 0x376   :  { %4542 = vmatmul.mubr.f32.gmra.mrb[122].mxu1 %v4314_v20 }
 0x377   :  { %4546 = vmatprep.mubr.f32.mxu1 %v4318_v30 }
 0x37a   :  { %4547 = vmatmul.mubr.f32.gmra.mrb[124].mxu1 %v4317_v36 }
 0x37b   :  { %4551 = vmatprep.mubr.f32.mxu1 %v4321_v38 }
 0x37e   :  { %4552 = vmatmul.mubr.f32.gmra.mrb[126].mxu1 %v4320_v4 }
 0x408   :  { %v5526_v21 = vpop.f32.mrb[240].mxu0 }
 0x409   :  { %v5426_v15 = vpop.f32.mrb[96].mxu1  ;;  %v4623_v62 = vpop.f32.mrb[241].mxu0 }
 0x40a   :  { %v5427_v2 = vpop.f32.mrb[97].mxu1 }
 0x40b   :  { %v5428_v37 = vadd.f32 %v5427_v2, %v5426_v15 }
 0x40d   :  { %v4479_v7 = vadd.f32 %v5428_v37, %v12484_v61  ;;  %v5529_v32 = vpop.f32.mrb[242].mxu0 }
 0x40e   :  { %v4633_v6 = vpop.f32.mrb[243].mxu0 }
 0x40f   :  { %v4624_v41 = vadd.f32 %v4623_v62, %v4479_v7  ;;  %v5429_v48 = vpop.f32.mrb[98].mxu1 }
 0x410   :  { %v5430_v50 = vpop.f32.mrb[99].mxu1 }
 0x411   :  { %4702 = vst [vmem:[#allocation2] sm:$0xff] %v4624_v41  ;;  %v5431_v16 = vadd.f32 %v5430_v50, %v5429_v48 }
 0x413   :  { %v4484_v12 = vadd.f32 %v5431_v16, %v12484_v61 }
 0x415   :  { %v5532_v63 = vpop.f32.mrb[244].mxu0  ;;  %v4629_v33 = vadd.f32 %v5526_v21, %v4484_v12 }
 0x416   :  { %v4643_v58 = vpop.f32.mrb[245].mxu0 }
 0x417   :  { %v5432_v34 = vpop.f32.mrb[100].mxu1  ;;  %4703 = vst [vmem:[#allocation2 + $0x8] sm:$0xff] %v4629_v33 }
 0x418   :  { %v5433_v49 = vpop.f32.mrb[101].mxu1 }
 0x419   :  { %v5434_v43 = vadd.f32 %v5433_v49, %v5432_v34 }
 0x41b   :  { %v4489_v60 = vadd.f32 %v5434_v43, %v12484_v61  ;;  %v5535_v44 = vpop.f32.mrb[246].mxu0 }
 0x41c   :  { %v4653_v57 = vpop.f32.mrb[247].mxu0 }
 0x41d   :  { %v4634_v17 = vadd.f32 %v4633_v6, %v4489_v60  ;;  %v5435_v40 = vpop.f32.mrb[102].mxu1 }
 0x41e   :  { %v5436_v14 = vpop.f32.mrb[103].mxu1 }
 0x41f   :  { %4704 = vst [vmem:[#allocation2 + $0x10] sm:$0xff] %v4634_v17  ;;  %v5437_v35 = vadd.f32 %v5436_v14, %v5435_v40 }
 0x421   :  { %v5538_v11 = vpop.f32.mrb[248].mxu0  ;;  %v4494_v18 = vadd.f32 %v5437_v35, %v12484_v61 }
 0x422   :  { %v4663_v27 = vpop.f32.mrb[249].mxu0  ;;  %v5438_v39 = vpop.f32.mrb[104].mxu1 }
 0x423   :  { %v4639_v45 = vadd.f32 %v5529_v32, %v4494_v18  ;;  %v5439_v28 = vpop.f32.mrb[105].mxu1 }
 0x424   :  { %v5440_v23 = vadd.f32 %v5439_v28, %v5438_v39 }
 0x425   :  { %4705 = vst [vmem:[#allocation2 + $0x18] sm:$0xff] %v4639_v45 }
 0x426   :  { %v5541_v42 = vpop.f32.mrb[250].mxu0  ;;  %v4499_v46 = vadd.f32 %v5440_v23, %v12484_v61 }
 0x427   :  { %v4673_v31 = vpop.f32.mrb[251].mxu0 }
 0x428   :  { %v5441_v19 = vpop.f32.mrb[106].mxu1  ;;  %v4644_v59 = vadd.f32 %v4643_v58, %v4499_v46 }
 0x429   :  { %v5442_v22 = vpop.f32.mrb[107].mxu1 }
 0x42a   :  { %v5443_v13 = vadd.f32 %v5442_v22, %v5441_v19  ;;  %v5544_v5 = vpop.f32.mrb[252].mxu0  ;;  %4706 = vst [vmem:[#allocation2 + $0x20] sm:$0xff] %v4644_v59 }
 0x42b   :  { %v4683_v25 = vpop.f32.mrb[253].mxu0 }
 0x42c   :  { %v4504_v51 = vadd.f32 %v5443_v13, %v12484_v61  ;;  %v5444_v56 = vpop.f32.mrb[108].mxu1 }
 0x42d   :  { %v5445_v29 = vpop.f32.mrb[109].mxu1 }
 0x42e   :  { %v4649_v0 = vadd.f32 %v5532_v63, %v4504_v51  ;;  %v5446_v9 = vadd.f32 %v5445_v29, %v5444_v56 }
 0x42f   :  { %v5547_v52 = vpop.f32.mrb[254].mxu0 }
 0x430   :  { %4707 = vst [vmem:[#allocation2 + $0x28] sm:$0xff] %v4649_v0  ;;  %v4509_v3 = vadd.f32 %v5446_v9, %v12484_v61  ;;  %v5447_v8 = vpop.f32.mrb[110].mxu1  ;;  %v4693_v55 = vpop.f32.mrb[255].mxu0 }
 0x431   :  { %v5448_v53 = vpop.f32.mrb[111].mxu1 }
 0x432   :  { %v4654_v47 = vadd.f32 %v4653_v57, %v4509_v3  ;;  %v5449_v24 = vadd.f32 %v5448_v53, %v5447_v8 }
 0x434   :  { %4708 = vst [vmem:[#allocation2 + $0x30] sm:$0xff] %v4654_v47  ;;  %v4514_v30 = vadd.f32 %v5449_v24, %v12484_v61 }
 0x435   :  { %v5450_v26 = vpop.f32.mrb[112].mxu1 }
 0x436   :  { %v4659_v20 = vadd.f32 %v5535_v44, %v4514_v30  ;;  %v5451_v1 = vpop.f32.mrb[113].mxu1 }
 0x437   :  { %v5452_v10 = vadd.f32 %v5451_v1, %v5450_v26 }
 0x438   :  { %4709 = vst [vmem:[#allocation2 + $0x38] sm:$0xff] %v4659_v20 }
 0x439   :  { %v4519_v38 = vadd.f32 %v5452_v10, %v12484_v61  ;;  %v5453_v36 = vpop.f32.mrb[114].mxu1 }
 0x43a   :  { %v5454_v54 = vpop.f32.mrb[115].mxu1 }
 0x43b   :  { %v4664_v4 = vadd.f32 %v4663_v27, %v4519_v38  ;;  %v5455_v21 = vadd.f32 %v5454_v54, %v5453_v36 }
 0x43d   :  { %4710 = vst [vmem:[#allocation2 + $0x40] sm:$0xff] %v4664_v4  ;;  %v4524_v15 = vadd.f32 %v5455_v21, %v12484_v61  ;;  %v5456_v62 = vpop.f32.mrb[116].mxu1 }
 0x43e   :  { %v5457_v2 = vpop.f32.mrb[117].mxu1 }
 0x43f   :  { %v4669_v37 = vadd.f32 %v5538_v11, %v4524_v15  ;;  %v5458_v7 = vadd.f32 %v5457_v2, %v5456_v62 }
 0x441   :  { %4711 = vst [vmem:[#allocation2 + $0x48] sm:$0xff] %v4669_v37  ;;  %v4529_v32 = vadd.f32 %v5458_v7, %v12484_v61  ;;  %v5459_v6 = vpop.f32.mrb[118].mxu1 }
 0x442   :  { %v5460_v41 = vpop.f32.mrb[119].mxu1 }
 0x443   :  { %v4674_v48 = vadd.f32 %v4673_v31, %v4529_v32  ;;  %v5461_v50 = vadd.f32 %v5460_v41, %v5459_v6 }
 0x445   :  { %4712 = vst [vmem:[#allocation2 + $0x50] sm:$0xff] %v4674_v48  ;;  %v4534_v16 = vadd.f32 %v5461_v50, %v12484_v61  ;;  %v5462_v12 = vpop.f32.mrb[120].mxu1 }
 0x446   :  { %v5463_v63 = vpop.f32.mrb[121].mxu1 }
 0x447   :  { %v4679_v33 = vadd.f32 %v5541_v42, %v4534_v16  ;;  %v5464_v34 = vadd.f32 %v5463_v63, %v5462_v12 }
 0x449   :  { %4713 = vst [vmem:[#allocation2 + $0x58] sm:$0xff] %v4679_v33  ;;  %v4539_v58 = vadd.f32 %v5464_v34, %v12484_v61  ;;  %v5465_v49 = vpop.f32.mrb[122].mxu1 }
 0x44a   :  { %v5466_v43 = vpop.f32.mrb[123].mxu1 }
 0x44b   :  { %v4684_v60 = vadd.f32 %v4683_v25, %v4539_v58  ;;  %v5467_v44 = vadd.f32 %v5466_v43, %v5465_v49 }
 0x44d   :  { %4714 = vst [vmem:[#allocation2 + $0x60] sm:$0xff] %v4684_v60  ;;  %v4544_v57 = vadd.f32 %v5467_v44, %v12484_v61  ;;  %v5468_v17 = vpop.f32.mrb[124].mxu1 }
 0x44e   :  { %v5469_v40 = vpop.f32.mrb[125].mxu1 }
 0x44f   :  { %v4689_v14 = vadd.f32 %v5544_v5, %v4544_v57  ;;  %v5470_v35 = vadd.f32 %v5469_v40, %v5468_v17 }
 0x451   :  { %4715 = vst [vmem:[#allocation2 + $0x68] sm:$0xff] %v4689_v14  ;;  %v4549_v11 = vadd.f32 %v5470_v35, %v12484_v61  ;;  %v5471_v18 = vpop.f32.mrb[126].mxu1 }
 0x452   :  { %v5472_v27 = vpop.f32.mrb[127].mxu1 }
 0x453   :  { %v4694_v39 = vadd.f32 %v4693_v55, %v4549_v11  ;;  %v5473_v45 = vadd.f32 %v5472_v27, %v5471_v18 }
 0x455   :  { %4716 = vst [vmem:[#allocation2 + $0x70] sm:$0xff] %v4694_v39  ;;  %v4554_v28 = vadd.f32 %v5473_v45, %v12484_v61 }
 0x457   :  { %v4699_v23 = vadd.f32 %v5547_v52, %v4554_v28 }
 0x459   :  { %4717 = vst [vmem:[#allocation2 + $0x78] sm:$0xff] %v4699_v23 }
 0x45a   :  { %6846 = shalt.err (!%p6843_p4)
}
 0x45b   :  { %s6847_s26 = scalar_lea.hbm %s12521_s7, 2048 }
 0x45c   :  { %p6848_p5 = scmp.ne.s32.totalorder %s12521_s7, %s6847_s26  ;;  %p6851_p6 = scmp.lt.u32.totalorder %s6847_s26, %s12521_s7 }
 0x45e   :  { %p6853_p7 = pnand %p6851_p6, %p6848_p5 }
 0x460   :  { %6856 = shalt.err (!%p6853_p7)
}
 0x461   :  { %s6861_s2 = smov 128   ;;  %s6862_s8 = smov 8  }
 0x462   :  { %4729 = dma.vmem_to_hbm [thread:$0]  %s4724_s0, 2048, %s12521_s7, [#allocation3], %s6861_s2, %s6861_s2, %s6862_s8  }
 0x463   :  { %6857 = dma.done.wait [#allocation3], 2048  }
 0x464   :  { %6858 = vsyncadd [#allocation3], 4294965248 }
 0x465   :  { %4733 = vsyncpa [#allocation3], 1 }

</bundles_post_ra>
